<compile_context>
chip_gen: v7x
topology: tpu7x:2x2x1
jax: 0.10.0
libtpu: 0.0.40
codegen_flags: <defaults>
</compile_context>

<pallas_src>
import jax
import jax.numpy as jnp
import numpy as np
from jax import lax
from jax.experimental import pallas as pl
from jax.experimental.pallas import tpu as pltpu


def _cdiv(a, b):
    return -(-a // b)


def _mac(xs, ys):
    """sum_k xs[k] * ys[k]  (scalars and/or (8, Lb) lane/sublane tiles)."""
    acc = xs[0] * ys[0]
    for x, y in zip(xs[1:], ys[1:]):
        acc = acc + x * y
    return acc


# --------------------------------- kernel ------------------------------------

def _ldm_chunk_kernel(inp_ref, A_sm, C_sm, mu0_sm, L0_sm, wd_sm, rd_sm,
                      muf_out, lp_out, lt_out, mu_s, lam_s):
    f32 = jnp.float32
    tt = inp_ref.shape[0]                 # timesteps per chunk
    da = inp_ref.shape[1] - 1             # last channel is the mask
    SUB, LB = inp_ref.shape[2], inp_ref.shape[3]
    dx = mu_s.shape[0]
    ntri = lam_s.shape[0]
    ci = pl.program_id(1)                 # time-chunk index ("arbitrary" axis)

    def tri(i, j):                        # upper-triangle flat index (i<=j)
        if i > j:
            i, j = j, i
        return i * dx - (i * (i - 1)) // 2 + (j - i)

    # initialize the carried state x_{0|-1}, P_{0|-1} at the first time chunk
    @pl.when(ci == 0)
    def _():
        for i in range(dx):
            mu_s[i] = jnp.full((SUB, LB), mu0_sm[i], f32)
        for i in range(dx):
            for j in range(i, dx):
                lam_s[tri(i, j)] = jnp.full((SUB, LB), L0_sm[i, j], f32)

    # scalar parameters, read once per chunk from SMEM and reused for all
    # `tt` timesteps (hoisted out of the recursion).
    A = [[A_sm[i, j] for j in range(dx)] for i in range(dx)]
    Cm = [[C_sm[i, j] for j in range(dx)] for i in range(da)]
    Wd = [wd_sm[i] for i in range(dx)]    # exp(W_log_diag), from wrapper
    Rd = [rd_sm[i] for i in range(da)]    # exp(R_log_diag), from wrapper

    ones = jnp.ones((SUB, LB), f32)
    zeros = jnp.zeros((SUB, LB), f32)

    def step(s, carry):
        mu, Pt = carry                                     # tuples of (8, LB)
        P = lambda i, j: Pt[tri(i, j)]                     # symmetric access

        slab = inp_ref[s]                                  # (da+1, 8, LB)
        m_t = slab[da]                                     # mask
        am = [slab[i] * m_t for i in range(da)]            # masked obs

        # innovation r = a_masked - C mu_pred
        r = [am[i] - _mac(Cm[i], mu) for i in range(da)]

        # PCt[i][k] = (P C^T)[i, k]
        PCt = [[_mac(Cm[k], [P(i, j) for j in range(dx)]) for k in range(da)]
               for i in range(dx)]

        # S = C P C^T + R (symmetric): upper triangle only, mirror references
        S = [[None] * da for _ in range(da)]
        for i in range(da):
            for k in range(i, da):
                v = _mac(Cm[i], [PCt[j][k] for j in range(dx)])
                if i == k:
                    v = v + Rd[i]
                S[i][k] = v
                S[k][i] = v

        # S^{-1}: fully unrolled Gauss-Jordan (S is SPD -> no pivoting);
        # pivot reciprocals on the EUP + two Newton refinements.
        M = [list(row) for row in S]
        Inv = [[ones if i == j else zeros for j in range(da)]
               for i in range(da)]
        for i in range(da):
            piv = M[i][i]
            ip = pl.reciprocal(piv, approx=True)
            ip = ip * (2.0 - piv * ip)
            ip = ip * (2.0 - piv * ip)
            Mrow = [M[i][j] * ip for j in range(da)]
            Irow = [Inv[i][j] * ip for j in range(da)]
            for rr in range(da):
                if rr == i:
                    continue
                f = M[rr][i]
                M[rr] = [M[rr][j] - f * Mrow[j] for j in range(da)]
                Inv[rr] = [Inv[rr][j] - f * Irow[j] for j in range(da)]
            M[i] = Mrow
            Inv[i] = Irow

        # K = P C^T S^{-1}, zero gain for missing observations
        K = [[_mac(PCt[i], [Inv[j][k] for j in range(da)]) * m_t
              for k in range(da)] for i in range(dx)]

        # filtered estimates; Lt = P - K (C P), (C P)[k][j] = PCt[j][k]
        mu_t = [mu[i] + _mac(K[i], r) for i in range(dx)]
        Lt_t = []
        for i in range(dx):
            for j in range(i, dx):
                Lt_t.append(P(i, j) - _mac(K[i], PCt[j]))
        Lt = lambda i, j: Lt_t[tri(i, j)]

        # one-step-ahead predictions
        mu_p = [_mac(A[i], mu_t) for i in range(dx)]
        AP = [[_mac(A[i], [Lt(k, j) for k in range(dx)]) for j in range(dx)]
              for i in range(dx)]
        Lp_t = []
        for i in range(dx):
            for j in range(i, dx):
                v = _mac(AP[i], A[j])                      # (A Lt A^T)[i,j]
                if i == j:
                    v = v + Wd[i]                          # + diag(W)
                Lp_t.append(v)
        Lp = lambda i, j: Lp_t[tri(i, j)]

        # lane/sublane-dense stores: one (8, LB) tile per row, no concatenate
        for i in range(dx):
            muf_out[s, i] = mu_t[i]
            muf_out[s, dx + i] = mu_p[i]
        for i in range(dx):
            for j in range(dx):
                lt_out[s, i * dx + j] = Lt(i, j)
                lp_out[s, i * dx + j] = Lp(i, j)

        return (tuple(mu_p), tuple(Lp_t))

    carry0 = (tuple(mu_s[i] for i in range(dx)),
              tuple(lam_s[k] for k in range(ntri)))

    # manual unroll-by-2 (tt is always a multiple of 8) for cross-iteration
    # scheduling visibility
    def step2(h, carry):
        return step(h * 2 + 1, step(h * 2, carry))

    mu_f, Pt_f = lax.fori_loop(0, tt // 2, step2, carry0)
    for i in range(dx):
        mu_s[i] = mu_f[i]
    for k in range(ntri):
        lam_s[k] = Pt_f[k]


# --------------------------------- wrapper -----------------------------------

def ldm_forward_pallas(a, A, C, mu_0, Lambda_0, W_log_diag, R_log_diag,
                       mask=None, do_smoothing=False,
                       time_block=64, lane_block=128):
    """Equivalent of LDM.forward(a, mask, do_smoothing=False)."""
    # TODO(synk): do_smoothing=True (RTS backward pass) not implemented; the
    # PyTorch default path (do_smoothing=False) is what this kernel reproduces.
    assert not do_smoothing
    f32 = jnp.float32
    a = jnp.asarray(a, f32)
    num_seq, num_steps, dim_a = a.shape
    A = jnp.asarray(A, f32)
    C = jnp.asarray(C, f32)
    dim_x = A.shape[0]
    mu_0 = jnp.asarray(mu_0, f32).reshape(dim_x)
    Lambda_0 = jnp.asarray(Lambda_0, f32)
    # hoisted: diagonal covariances computed once, outside the recursion
    W_diag = jnp.exp(jnp.asarray(W_log_diag, f32).reshape(dim_x))
    R_diag = jnp.exp(jnp.asarray(R_log_diag, f32).reshape(dim_a))

    if mask is None:
        mask = jnp.ones((num_seq, num_steps), f32)
    mask = jnp.asarray(mask, f32).reshape(num_seq, num_steps)

    # ---- batch folded onto 8 sublanes x Lb lanes; grid tiles sublane groups --
    per_block = 8 * lane_block
    if num_seq > per_block:
        n_bblk, Lb = _cdiv(num_seq, per_block), lane_block
    elif num_seq >= 256:
        n_bblk, Lb = 2, _cdiv(num_seq, 16)   # >=2 blocks engage both v7x TCs
    else:
        n_bblk, Lb = 1, max(1, _cdiv(num_seq, 8))
    b_pad = n_bblk * 8 * Lb

    # ---- time chunk sized to a conservative VMEM budget (v7x-safe) ----------
    rows = (dim_a + 1) + 2 * dim_x + 2 * dim_x * dim_x    # block rows per step
    bytes_per_t = rows * 8 * Lb * 4 * 2                   # double-buffered
    budget = 28 << 20
    tt = max(8, (int(time_block) // 8) * 8)
    tt = min(tt, max(8, (budget // bytes_per_t) // 8 * 8))
    tt = min(tt, _cdiv(num_steps, 8) * 8)
    n_chunks = _cdiv(num_steps, tt)
    t_pad = n_chunks * tt

    ntri = dim_x * (dim_x + 1) // 2
    vmem_need = bytes_per_t * tt + (dim_x + ntri) * 8 * Lb * 4
    vmem_limit = int(min(max(2 * vmem_need, 32 << 20), 48 << 20))

    # time-major input with the mask packed as an extra channel; padded time /
    # batch has mask = 0 so it never affects the real outputs.
    a_t = jnp.transpose(a, (1, 2, 0))                      # (T, da, b)
    m_t = jnp.transpose(mask, (1, 0))[:, None, :]          # (T, 1, b)
    inp = jnp.concatenate([a_t, m_t], axis=1)              # (T, da+1, b)
    inp = jnp.pad(inp, ((0, t_pad - num_steps), (0, 0), (0, b_pad - num_seq)))
    inp = inp.reshape(t_pad, dim_a + 1, n_bblk * 8, Lb)

    def io_map(bi, ci):
        return (ci, 0, bi, 0)

    smem = pl.BlockSpec(memory_space=pltpu.MemorySpace.SMEM)
    grid_spec = pltpu.PrefetchScalarGridSpec(
        num_scalar_prefetch=0,
        grid=(n_bblk, n_chunks),
        in_specs=[
            pl.BlockSpec((tt, dim_a + 1, 8, Lb), io_map),   # obs + mask
            smem, smem, smem, smem, smem, smem,             # A,C,mu0,L0,Wd,Rd
        ],
        out_specs=(
            pl.BlockSpec((tt, 2 * dim_x, 8, Lb), io_map),        # mu_t | mu_pred
            pl.BlockSpec((tt, dim_x * dim_x, 8, Lb), io_map),    # Lambda_pred
            pl.BlockSpec((tt, dim_x * dim_x, 8, Lb), io_map),    # Lambda_t
        ),
        scratch_shapes=[
            pltpu.VMEM((dim_x, 8, Lb), f32),                     # mu_pred carry
            pltpu.VMEM((ntri, 8, Lb), f32),                      # P_pred carry (triu)
        ])

    out_shapes = (
        jax.ShapeDtypeStruct((t_pad, 2 * dim_x, n_bblk * 8, Lb), f32),
        jax.ShapeDtypeStruct((t_pad, dim_x * dim_x, n_bblk * 8, Lb), f32),
        jax.ShapeDtypeStruct((t_pad, dim_x * dim_x, n_bblk * 8, Lb), f32),
    )

    muf, lp, lt = pl.pallas_call(
        _ldm_chunk_kernel,
        out_shape=out_shapes,
        grid_spec=grid_spec,
        compiler_params=pltpu.CompilerParams(
            dimension_semantics=("parallel", "arbitrary"),
            vmem_limit_bytes=vmem_limit),
    )(inp, A, C, mu_0, Lambda_0, W_diag, R_diag)

    # back to the module's (num_seq, num_steps, ...) layout (required by the
    # forward() return contract).
    def unfold(o, d):
        o = o[:num_steps].reshape(num_steps, d, b_pad)
        return jnp.transpose(o, (2, 0, 1))[:num_seq]

    mu_t_all = unfold(muf[:, :dim_x], dim_x)
    mu_pred_all = unfold(muf[:, dim_x:], dim_x)
    Lambda_pred_all = unfold(lp, dim_x * dim_x).reshape(
        num_seq, num_steps, dim_x, dim_x)
    Lambda_t_all = unfold(lt, dim_x * dim_x).reshape(
        num_seq, num_steps, dim_x, dim_x)
    mu_back_all = jnp.ones_like(mu_t_all)
    Lambda_back_all = jnp.ones_like(Lambda_t_all)
    return (mu_pred_all, mu_t_all, mu_back_all,
            Lambda_pred_all, Lambda_t_all, Lambda_back_all)


# ------------------------------ numpy reference -------------------------------

def ldm_forward_ref(a, A, C, mu_0, Lambda_0, W_log, R_log, mask):
    a = np.asarray(a, np.float32)
    mask = np.asarray(mask, np.float32)
    num_seq, num_steps, _ = a.shape
    dim_x = A.shape[0]
    W = np.diag(np.exp(W_log)).astype(np.float32)
    R = np.diag(np.exp(R_log)).astype(np.float32)
    a_masked = a * mask
    mu_pred = np.tile(mu_0[None], (num_seq, 1)).astype(np.float32)
    Lambda_pred = np.tile(Lambda_0[None], (num_seq, 1, 1)).astype(np.float32)
    mu_pred_all = np.zeros((num_steps, num_seq, dim_x), np.float32)
    mu_t_all = np.zeros((num_steps, num_seq, dim_x), np.float32)
    Lp_all = np.zeros((num_steps, num_seq, dim_x, dim_x), np.float32)
    Lt_all = np.zeros((num_steps, num_seq, dim_x, dim_x), np.float32)
    I = np.eye(dim_x, dtype=np.float32)
    for t in range(num_steps):
        a_pred = mu_pred @ C.T
        r = a_masked[:, t, :] - a_pred
        S = C[None] @ Lambda_pred @ C.T[None] + R[None]
        S_inv = np.linalg.inv(S)
        K = Lambda_pred @ C.T[None] @ S_inv
        K = K * mask[:, t, :][:, None, :]
        mu_t = mu_pred + np.einsum('bxa,ba->bx', K, r)
        I_KC = I[None] - K @ C[None]
        Lambda_t = I_KC @ Lambda_pred
        mu_pred = np.einsum('xy,by->bx', A, mu_t)
        Lambda_pred = A[None] @ Lambda_t @ A.T[None] + W[None]
        mu_pred_all[t] = mu_pred
        mu_t_all[t] = mu_t
        Lp_all[t] = Lambda_pred
        Lt_all[t] = Lambda_t
    mu_pred_all = mu_pred_all.transpose(1, 0, 2)
    mu_t_all = mu_t_all.transpose(1, 0, 2)
    Lp_all = Lp_all.transpose(1, 0, 2, 3)
    Lt_all = Lt_all.transpose(1, 0, 2, 3)
    return (mu_pred_all, mu_t_all, np.ones_like(mu_t_all),
            Lp_all, Lt_all, np.ones_like(Lt_all))


# ----------------------------------- main -------------------------------------

if __name__ == "__main__":
    num_seq, num_steps, dim_a, dim_x = 3, 20, 3, 4

    key = jax.random.PRNGKey(0)
    k1, k2 = jax.random.split(key)
    a = jax.random.normal(k1, (num_seq, num_steps, dim_a), dtype=jnp.float32)
    mask = jnp.ones((num_seq, num_steps, 1), jnp.float32)
    mask = mask.at[1, 3, 0].set(0.0)    # missing observations
    mask = mask.at[2, 10, 0].set(0.0)

    # deterministic parameters (module defaults where the ctor defines them;
    # A and C must be supplied per LDM._check_matrix_shapes)
    eye_x = jnp.eye(dim_x, dtype=jnp.float32)
    A_param = 0.9 * eye_x + 0.05 * jnp.roll(eye_x, 1, axis=1)
    C_param = 0.5 * jnp.eye(dim_a, dim_x, dtype=jnp.float32) + 0.1
    mu_0 = jnp.zeros((dim_x,), jnp.float32)
    Lambda_0 = jnp.eye(dim_x, dtype=jnp.float32)
    W_log_diag = jnp.ones((dim_x,), jnp.float32)
    R_log_diag = jnp.ones((dim_a,), jnp.float32)

    # config 1: tiny batch, num_steps not a multiple of the time chunk,
    # multiple time chunks (exercises the carried VMEM scratch state).
    outs = ldm_forward_pallas(a, A_param, C_param, mu_0, Lambda_0,
                              W_log_diag, R_log_diag, mask=mask, time_block=8)
    outs = jax.block_until_ready(outs)
    refs = ldm_forward_ref(np.asarray(a), np.asarray(A_param), np.asarray(C_param),
                           np.asarray(mu_0), np.asarray(Lambda_0),
                           np.asarray(W_log_diag), np.asarray(R_log_diag),
                           np.asarray(mask))
    for got, want in zip(outs, refs):
        np.testing.assert_allclose(np.asarray(got), want, rtol=1e-4, atol=1e-4)

    # config 2: mid-size batch -> two batch blocks along the "parallel" grid
    # axis (megacore path on v7x), single time chunk, batch padding.
    ns2, nt2 = 260, 12
    a2 = jax.random.normal(k2, (ns2, nt2, dim_a), dtype=jnp.float32)
    mask2 = jnp.ones((ns2, nt2, 1), jnp.float32).at[0, 5, 0].set(0.0)
    outs2 = jax.block_until_ready(
        ldm_forward_pallas(a2, A_param, C_param, mu_0, Lambda_0,
                           W_log_diag, R_log_diag, mask=mask2))
    refs2 = ldm_forward_ref(np.asarray(a2), np.asarray(A_param),
                            np.asarray(C_param), np.asarray(mu_0),
                            np.asarray(Lambda_0), np.asarray(W_log_diag),
                            np.asarray(R_log_diag), np.asarray(mask2))
    for got, want in zip(outs2, refs2):
        np.testing.assert_allclose(np.asarray(got), want, rtol=1e-4, atol=1e-4)

    print("KERNEL_OK")
</pallas_src>

<mosaic_0001>
module attributes {stable_mosaic.version = 11 : i64} {
  func.func @_ldm_chunk_kernel(%arg0: i32, %arg1: i32, %arg2: memref<8x4x8x1xf32, #tpu.memory_space<vmem>>, %arg3: memref<4x4xf32, #tpu.memory_space<smem>>, %arg4: memref<3x4xf32, #tpu.memory_space<smem>>, %arg5: memref<4xf32, #tpu.memory_space<smem>>, %arg6: memref<4x4xf32, #tpu.memory_space<smem>>, %arg7: memref<4xf32, #tpu.memory_space<smem>>, %arg8: memref<3xf32, #tpu.memory_space<smem>>, %arg9: memref<8x8x8x1xf32, #tpu.memory_space<vmem>>, %arg10: memref<8x16x8x1xf32, #tpu.memory_space<vmem>>, %arg11: memref<8x16x8x1xf32, #tpu.memory_space<vmem>>, %arg12: memref<4x8x1xf32, #tpu.memory_space<vmem>>, %arg13: memref<10x8x1xf32, #tpu.memory_space<vmem>>) attributes {dimension_semantics = [#tpu.dimension_semantics<parallel>, #tpu.dimension_semantics<arbitrary>], iteration_bounds = array<i64: 1, 3>, scalar_prefetch = 0 : i64, scratch_operands = 2 : i64, tpu.core_type = #tpu.core_type<tc>, window_params = [{transform_indices = @transform_0, window_bounds = array<i64: 8, 4, 8, 1>}, {transform_indices = @transform_1, window_bounds = array<i64: 4, 4>}, {transform_indices = @transform_2, window_bounds = array<i64: 3, 4>}, {transform_indices = @transform_3, window_bounds = array<i64: 4>}, {transform_indices = @transform_4, window_bounds = array<i64: 4, 4>}, {transform_indices = @transform_5, window_bounds = array<i64: 4>}, {transform_indices = @transform_6, window_bounds = array<i64: 3>}, {transform_indices = @transform_7, window_bounds = array<i64: 8, 8, 8, 1>}, {transform_indices = @transform_8, window_bounds = array<i64: 8, 16, 8, 1>}, {transform_indices = @transform_9, window_bounds = array<i64: 8, 16, 8, 1>}]} {
    %c0_i32 = arith.constant 0 : i32
    %0 = arith.cmpi eq, %arg1, %c0_i32 : i32
    %1 = arith.extui %0 : i1 to i32
    %c0_i32_0 = arith.constant 0 : i32
    %2 = arith.cmpi ne, %1, %c0_i32_0 : i32
    scf.if %2 {
      %c0_141 = arith.constant 0 : index
      %112 = memref.load %arg5[%c0_141] : memref<4xf32, #tpu.memory_space<smem>>
      %113 = vector.broadcast %112 : f32 to vector<8x1xf32>
      %c0_142 = arith.constant 0 : index
      %c0_143 = arith.constant 0 : index
      %c0_144 = arith.constant 0 : index
      %114 = vector.load %arg12[%c0_142, %c0_143, %c0_144] : memref<4x8x1xf32, #tpu.memory_space<vmem>>, vector<1x8x1xf32>
      %115 = vector.shape_cast %114 : vector<1x8x1xf32> to vector<8x1xf32>
      %116 = vector.shape_cast %113 : vector<8x1xf32> to vector<1x8x1xf32>
      tpu.vector_store %arg12[%c0_142, %c0_143, %c0_144], %116 {strides = array<i32>} : memref<4x8x1xf32, #tpu.memory_space<vmem>>, vector<1x8x1xf32>,
      %c1_145 = arith.constant 1 : index
      %117 = memref.load %arg5[%c1_145] : memref<4xf32, #tpu.memory_space<smem>>
      %118 = vector.broadcast %117 : f32 to vector<8x1xf32>
      %c1_146 = arith.constant 1 : index
      %c0_147 = arith.constant 0 : index
      %c0_148 = arith.constant 0 : index
      %119 = vector.load %arg12[%c1_146, %c0_147, %c0_148] : memref<4x8x1xf32, #tpu.memory_space<vmem>>, vector<1x8x1xf32>
      %120 = vector.shape_cast %119 : vector<1x8x1xf32> to vector<8x1xf32>
      %121 = vector.shape_cast %118 : vector<8x1xf32> to vector<1x8x1xf32>
      tpu.vector_store %arg12[%c1_146, %c0_147, %c0_148], %121 {strides = array<i32>} : memref<4x8x1xf32, #tpu.memory_space<vmem>>, vector<1x8x1xf32>,
      %c2_149 = arith.constant 2 : index
      %122 = memref.load %arg5[%c2_149] : memref<4xf32, #tpu.memory_space<smem>>
      %123 = vector.broadcast %122 : f32 to vector<8x1xf32>
      %c2_150 = arith.constant 2 : index
      %c0_151 = arith.constant 0 : index
      %c0_152 = arith.constant 0 : index
      %124 = vector.load %arg12[%c2_150, %c0_151, %c0_152] : memref<4x8x1xf32, #tpu.memory_space<vmem>>, vector<1x8x1xf32>
      %125 = vector.shape_cast %124 : vector<1x8x1xf32> to vector<8x1xf32>
      %126 = vector.shape_cast %123 : vector<8x1xf32> to vector<1x8x1xf32>
      tpu.vector_store %arg12[%c2_150, %c0_151, %c0_152], %126 {strides = array<i32>} : memref<4x8x1xf32, #tpu.memory_space<vmem>>, vector<1x8x1xf32>,
      %c3_153 = arith.constant 3 : index
      %127 = memref.load %arg5[%c3_153] : memref<4xf32, #tpu.memory_space<smem>>
      %128 = vector.broadcast %127 : f32 to vector<8x1xf32>
      %c3_154 = arith.constant 3 : index
      %c0_155 = arith.constant 0 : index
      %c0_156 = arith.constant 0 : index
      %129 = vector.load %arg12[%c3_154, %c0_155, %c0_156] : memref<4x8x1xf32, #tpu.memory_space<vmem>>, vector<1x8x1xf32>
      %130 = vector.shape_cast %129 : vector<1x8x1xf32> to vector<8x1xf32>
      %131 = vector.shape_cast %128 : vector<8x1xf32> to vector<1x8x1xf32>
      tpu.vector_store %arg12[%c3_154, %c0_155, %c0_156], %131 {strides = array<i32>} : memref<4x8x1xf32, #tpu.memory_space<vmem>>, vector<1x8x1xf32>,
      %c0_157 = arith.constant 0 : index
      %c0_158 = arith.constant 0 : index
      %132 = memref.load %arg6[%c0_157, %c0_158] : memref<4x4xf32, #tpu.memory_space<smem>>
      %133 = vector.broadcast %132 : f32 to vector<8x1xf32>
      %c0_159 = arith.constant 0 : index
      %c0_160 = arith.constant 0 : index
      %c0_161 = arith.constant 0 : index
      %134 = vector.load %arg13[%c0_159, %c0_160, %c0_161] : memref<10x8x1xf32, #tpu.memory_space<vmem>>, vector<1x8x1xf32>
      %135 = vector.shape_cast %134 : vector<1x8x1xf32> to vector<8x1xf32>
      %136 = vector.shape_cast %133 : vector<8x1xf32> to vector<1x8x1xf32>
      tpu.vector_store %arg13[%c0_159, %c0_160, %c0_161], %136 {strides = array<i32>} : memref<10x8x1xf32, #tpu.memory_space<vmem>>, vector<1x8x1xf32>,
      %c0_162 = arith.constant 0 : index
      %c1_163 = arith.constant 1 : index
      %137 = memref.load %arg6[%c0_162, %c1_163] : memref<4x4xf32, #tpu.memory_space<smem>>
      %138 = vector.broadcast %137 : f32 to vector<8x1xf32>
      %c1_164 = arith.constant 1 : index
      %c0_165 = arith.constant 0 : index
      %c0_166 = arith.constant 0 : index
      %139 = vector.load %arg13[%c1_164, %c0_165, %c0_166] : memref<10x8x1xf32, #tpu.memory_space<vmem>>, vector<1x8x1xf32>
      %140 = vector.shape_cast %139 : vector<1x8x1xf32> to vector<8x1xf32>
      %141 = vector.shape_cast %138 : vector<8x1xf32> to vector<1x8x1xf32>
      tpu.vector_store %arg13[%c1_164, %c0_165, %c0_166], %141 {strides = array<i32>} : memref<10x8x1xf32, #tpu.memory_space<vmem>>, vector<1x8x1xf32>,
      %c0_167 = arith.constant 0 : index
      %c2_168 = arith.constant 2 : index
      %142 = memref.load %arg6[%c0_167, %c2_168] : memref<4x4xf32, #tpu.memory_space<smem>>
      %143 = vector.broadcast %142 : f32 to vector<8x1xf32>
      %c2_169 = arith.constant 2 : index
      %c0_170 = arith.constant 0 : index
      %c0_171 = arith.constant 0 : index
      %144 = vector.load %arg13[%c2_169, %c0_170, %c0_171] : memref<10x8x1xf32, #tpu.memory_space<vmem>>, vector<1x8x1xf32>
      %145 = vector.shape_cast %144 : vector<1x8x1xf32> to vector<8x1xf32>
      %146 = vector.shape_cast %143 : vector<8x1xf32> to vector<1x8x1xf32>
      tpu.vector_store %arg13[%c2_169, %c0_170, %c0_171], %146 {strides = array<i32>} : memref<10x8x1xf32, #tpu.memory_space<vmem>>, vector<1x8x1xf32>,
      %c0_172 = arith.constant 0 : index
      %c3_173 = arith.constant 3 : index
      %147 = memref.load %arg6[%c0_172, %c3_173] : memref<4x4xf32, #tpu.memory_space<smem>>
      %148 = vector.broadcast %147 : f32 to vector<8x1xf32>
      %c3_174 = arith.constant 3 : index
      %c0_175 = arith.constant 0 : index
      %c0_176 = arith.constant 0 : index
      %149 = vector.load %arg13[%c3_174, %c0_175, %c0_176] : memref<10x8x1xf32, #tpu.memory_space<vmem>>, vector<1x8x1xf32>
      %150 = vector.shape_cast %149 : vector<1x8x1xf32> to vector<8x1xf32>
      %151 = vector.shape_cast %148 : vector<8x1xf32> to vector<1x8x1xf32>
      tpu.vector_store %arg13[%c3_174, %c0_175, %c0_176], %151 {strides = array<i32>} : memref<10x8x1xf32, #tpu.memory_space<vmem>>, vector<1x8x1xf32>,
      %c1_177 = arith.constant 1 : index
      %c1_178 = arith.constant 1 : index
      %152 = memref.load %arg6[%c1_177, %c1_178] : memref<4x4xf32, #tpu.memory_space<smem>>
      %153 = vector.broadcast %152 : f32 to vector<8x1xf32>
      %c4_179 = arith.constant 4 : index
      %c0_180 = arith.constant 0 : index
      %c0_181 = arith.constant 0 : index
      %154 = vector.load %arg13[%c4_179, %c0_180, %c0_181] : memref<10x8x1xf32, #tpu.memory_space<vmem>>, vector<1x8x1xf32>
      %155 = vector.shape_cast %154 : vector<1x8x1xf32> to vector<8x1xf32>
      %156 = vector.shape_cast %153 : vector<8x1xf32> to vector<1x8x1xf32>
      tpu.vector_store %arg13[%c4_179, %c0_180, %c0_181], %156 {strides = array<i32>} : memref<10x8x1xf32, #tpu.memory_space<vmem>>, vector<1x8x1xf32>,
      %c1_182 = arith.constant 1 : index
      %c2_183 = arith.constant 2 : index
      %157 = memref.load %arg6[%c1_182, %c2_183] : memref<4x4xf32, #tpu.memory_space<smem>>
      %158 = vector.broadcast %157 : f32 to vector<8x1xf32>
      %c5_184 = arith.constant 5 : index
      %c0_185 = arith.constant 0 : index
      %c0_186 = arith.constant 0 : index
      %159 = vector.load %arg13[%c5_184, %c0_185, %c0_186] : memref<10x8x1xf32, #tpu.memory_space<vmem>>, vector<1x8x1xf32>
      %160 = vector.shape_cast %159 : vector<1x8x1xf32> to vector<8x1xf32>
      %161 = vector.shape_cast %158 : vector<8x1xf32> to vector<1x8x1xf32>
      tpu.vector_store %arg13[%c5_184, %c0_185, %c0_186], %161 {strides = array<i32>} : memref<10x8x1xf32, #tpu.memory_space<vmem>>, vector<1x8x1xf32>,
      %c1_187 = arith.constant 1 : index
      %c3_188 = arith.constant 3 : index
      %162 = memref.load %arg6[%c1_187, %c3_188] : memref<4x4xf32, #tpu.memory_space<smem>>
      %163 = vector.broadcast %162 : f32 to vector<8x1xf32>
      %c6_189 = arith.constant 6 : index
      %c0_190 = arith.constant 0 : index
      %c0_191 = arith.constant 0 : index
      %164 = vector.load %arg13[%c6_189, %c0_190, %c0_191] : memref<10x8x1xf32, #tpu.memory_space<vmem>>, vector<1x8x1xf32>
      %165 = vector.shape_cast %164 : vector<1x8x1xf32> to vector<8x1xf32>
      %166 = vector.shape_cast %163 : vector<8x1xf32> to vector<1x8x1xf32>
      tpu.vector_store %arg13[%c6_189, %c0_190, %c0_191], %166 {strides = array<i32>} : memref<10x8x1xf32, #tpu.memory_space<vmem>>, vector<1x8x1xf32>,
      %c2_192 = arith.constant 2 : index
      %c2_193 = arith.constant 2 : index
      %167 = memref.load %arg6[%c2_192, %c2_193] : memref<4x4xf32, #tpu.memory_space<smem>>
      %168 = vector.broadcast %167 : f32 to vector<8x1xf32>
      %c7_194 = arith.constant 7 : index
      %c0_195 = arith.constant 0 : index
      %c0_196 = arith.constant 0 : index
      %169 = vector.load %arg13[%c7_194, %c0_195, %c0_196] : memref<10x8x1xf32, #tpu.memory_space<vmem>>, vector<1x8x1xf32>
      %170 = vector.shape_cast %169 : vector<1x8x1xf32> to vector<8x1xf32>
      %171 = vector.shape_cast %168 : vector<8x1xf32> to vector<1x8x1xf32>
      tpu.vector_store %arg13[%c7_194, %c0_195, %c0_196], %171 {strides = array<i32>} : memref<10x8x1xf32, #tpu.memory_space<vmem>>, vector<1x8x1xf32>,
      %c2_197 = arith.constant 2 : index
      %c3_198 = arith.constant 3 : index
      %172 = memref.load %arg6[%c2_197, %c3_198] : memref<4x4xf32, #tpu.memory_space<smem>>
      %173 = vector.broadcast %172 : f32 to vector<8x1xf32>
      %c8_199 = arith.constant 8 : index
      %c0_200 = arith.constant 0 : index
      %c0_201 = arith.constant 0 : index
      %174 = vector.load %arg13[%c8_199, %c0_200, %c0_201] : memref<10x8x1xf32, #tpu.memory_space<vmem>>, vector<1x8x1xf32>
      %175 = vector.shape_cast %174 : vector<1x8x1xf32> to vector<8x1xf32>
      %176 = vector.shape_cast %173 : vector<8x1xf32> to vector<1x8x1xf32>
      tpu.vector_store %arg13[%c8_199, %c0_200, %c0_201], %176 {strides = array<i32>} : memref<10x8x1xf32, #tpu.memory_space<vmem>>, vector<1x8x1xf32>,
      %c3_202 = arith.constant 3 : index
      %c3_203 = arith.constant 3 : index
      %177 = memref.load %arg6[%c3_202, %c3_203] : memref<4x4xf32, #tpu.memory_space<smem>>
      %178 = vector.broadcast %177 : f32 to vector<8x1xf32>
      %c9_204 = arith.constant 9 : index
      %c0_205 = arith.constant 0 : index
      %c0_206 = arith.constant 0 : index
      %179 = vector.load %arg13[%c9_204, %c0_205, %c0_206] : memref<10x8x1xf32, #tpu.memory_space<vmem>>, vector<1x8x1xf32>
      %180 = vector.shape_cast %179 : vector<1x8x1xf32> to vector<8x1xf32>
      %181 = vector.shape_cast %178 : vector<8x1xf32> to vector<1x8x1xf32>
      tpu.vector_store %arg13[%c9_204, %c0_205, %c0_206], %181 {strides = array<i32>} : memref<10x8x1xf32, #tpu.memory_space<vmem>>, vector<1x8x1xf32>,
    } else {
    }
    %c0 = arith.constant 0 : index
    %c0_1 = arith.constant 0 : index
    %3 = memref.load %arg3[%c0, %c0_1] : memref<4x4xf32, #tpu.memory_space<smem>>
    %c0_2 = arith.constant 0 : index
    %c1 = arith.constant 1 : index
    %4 = memref.load %arg3[%c0_2, %c1] : memref<4x4xf32, #tpu.memory_space<smem>>
    %c0_3 = arith.constant 0 : index
    %c2 = arith.constant 2 : index
    %5 = memref.load %arg3[%c0_3, %c2] : memref<4x4xf32, #tpu.memory_space<smem>>
    %c0_4 = arith.constant 0 : index
    %c3 = arith.constant 3 : index
    %6 = memref.load %arg3[%c0_4, %c3] : memref<4x4xf32, #tpu.memory_space<smem>>
    %c1_5 = arith.constant 1 : index
    %c0_6 = arith.constant 0 : index
    %7 = memref.load %arg3[%c1_5, %c0_6] : memref<4x4xf32, #tpu.memory_space<smem>>
    %c1_7 = arith.constant 1 : index
    %c1_8 = arith.constant 1 : index
    %8 = memref.load %arg3[%c1_7, %c1_8] : memref<4x4xf32, #tpu.memory_space<smem>>
    %c1_9 = arith.constant 1 : index
    %c2_10 = arith.constant 2 : index
    %9 = memref.load %arg3[%c1_9, %c2_10] : memref<4x4xf32, #tpu.memory_space<smem>>
    %c1_11 = arith.constant 1 : index
    %c3_12 = arith.constant 3 : index
    %10 = memref.load %arg3[%c1_11, %c3_12] : memref<4x4xf32, #tpu.memory_space<smem>>
    %c2_13 = arith.constant 2 : index
    %c0_14 = arith.constant 0 : index
    %11 = memref.load %arg3[%c2_13, %c0_14] : memref<4x4xf32, #tpu.memory_space<smem>>
    %c2_15 = arith.constant 2 : index
    %c1_16 = arith.constant 1 : index
    %12 = memref.load %arg3[%c2_15, %c1_16] : memref<4x4xf32, #tpu.memory_space<smem>>
    %c2_17 = arith.constant 2 : index
    %c2_18 = arith.constant 2 : index
    %13 = memref.load %arg3[%c2_17, %c2_18] : memref<4x4xf32, #tpu.memory_space<smem>>
    %c2_19 = arith.constant 2 : index
    %c3_20 = arith.constant 3 : index
    %14 = memref.load %arg3[%c2_19, %c3_20] : memref<4x4xf32, #tpu.memory_space<smem>>
    %c3_21 = arith.constant 3 : index
    %c0_22 = arith.constant 0 : index
    %15 = memref.load %arg3[%c3_21, %c0_22] : memref<4x4xf32, #tpu.memory_space<smem>>
    %c3_23 = arith.constant 3 : index
    %c1_24 = arith.constant 1 : index
    %16 = memref.load %arg3[%c3_23, %c1_24] : memref<4x4xf32, #tpu.memory_space<smem>>
    %c3_25 = arith.constant 3 : index
    %c2_26 = arith.constant 2 : index
    %17 = memref.load %arg3[%c3_25, %c2_26] : memref<4x4xf32, #tpu.memory_space<smem>>
    %c3_27 = arith.constant 3 : index
    %c3_28 = arith.constant 3 : index
    %18 = memref.load %arg3[%c3_27, %c3_28] : memref<4x4xf32, #tpu.memory_space<smem>>
    %c0_29 = arith.constant 0 : index
    %c0_30 = arith.constant 0 : index
    %19 = memref.load %arg4[%c0_29, %c0_30] : memref<3x4xf32, #tpu.memory_space<smem>>
    %c0_31 = arith.constant 0 : index
    %c1_32 = arith.constant 1 : index
    %20 = memref.load %arg4[%c0_31, %c1_32] : memref<3x4xf32, #tpu.memory_space<smem>>
    %c0_33 = arith.constant 0 : index
    %c2_34 = arith.constant 2 : index
    %21 = memref.load %arg4[%c0_33, %c2_34] : memref<3x4xf32, #tpu.memory_space<smem>>
    %c0_35 = arith.constant 0 : index
    %c3_36 = arith.constant 3 : index
    %22 = memref.load %arg4[%c0_35, %c3_36] : memref<3x4xf32, #tpu.memory_space<smem>>
    %c1_37 = arith.constant 1 : index
    %c0_38 = arith.constant 0 : index
    %23 = memref.load %arg4[%c1_37, %c0_38] : memref<3x4xf32, #tpu.memory_space<smem>>
    %c1_39 = arith.constant 1 : index
    %c1_40 = arith.constant 1 : index
    %24 = memref.load %arg4[%c1_39, %c1_40] : memref<3x4xf32, #tpu.memory_space<smem>>
    %c1_41 = arith.constant 1 : index
    %c2_42 = arith.constant 2 : index
    %25 = memref.load %arg4[%c1_41, %c2_42] : memref<3x4xf32, #tpu.memory_space<smem>>
    %c1_43 = arith.constant 1 : index
    %c3_44 = arith.constant 3 : index
    %26 = memref.load %arg4[%c1_43, %c3_44] : memref<3x4xf32, #tpu.memory_space<smem>>
    %c2_45 = arith.constant 2 : index
    %c0_46 = arith.constant 0 : index
    %27 = memref.load %arg4[%c2_45, %c0_46] : memref<3x4xf32, #tpu.memory_space<smem>>
    %c2_47 = arith.constant 2 : index
    %c1_48 = arith.constant 1 : index
    %28 = memref.load %arg4[%c2_47, %c1_48] : memref<3x4xf32, #tpu.memory_space<smem>>
    %c2_49 = arith.constant 2 : index
    %c2_50 = arith.constant 2 : index
    %29 = memref.load %arg4[%c2_49, %c2_50] : memref<3x4xf32, #tpu.memory_space<smem>>
    %c2_51 = arith.constant 2 : index
    %c3_52 = arith.constant 3 : index
    %30 = memref.load %arg4[%c2_51, %c3_52] : memref<3x4xf32, #tpu.memory_space<smem>>
    %c0_53 = arith.constant 0 : index
    %31 = memref.load %arg7[%c0_53] : memref<4xf32, #tpu.memory_space<smem>>
    %c1_54 = arith.constant 1 : index
    %32 = memref.load %arg7[%c1_54] : memref<4xf32, #tpu.memory_space<smem>>
    %c2_55 = arith.constant 2 : index
    %33 = memref.load %arg7[%c2_55] : memref<4xf32, #tpu.memory_space<smem>>
    %c3_56 = arith.constant 3 : index
    %34 = memref.load %arg7[%c3_56] : memref<4xf32, #tpu.memory_space<smem>>
    %c0_57 = arith.constant 0 : index
    %35 = memref.load %arg8[%c0_57] : memref<3xf32, #tpu.memory_space<smem>>
    %c1_58 = arith.constant 1 : index
    %36 = memref.load %arg8[%c1_58] : memref<3xf32, #tpu.memory_space<smem>>
    %c2_59 = arith.constant 2 : index
    %37 = memref.load %arg8[%c2_59] : memref<3xf32, #tpu.memory_space<smem>>
    %cst = arith.constant 1.000000e+00 : f32
    %38 = vector.broadcast %cst : f32 to vector<8x1xf32>
    %cst_60 = arith.constant 0.000000e+00 : f32
    %39 = vector.broadcast %cst_60 : f32 to vector<8x1xf32>
    %c0_61 = arith.constant 0 : index
    %c0_62 = arith.constant 0 : index
    %c0_63 = arith.constant 0 : index
    %40 = vector.load %arg12[%c0_61, %c0_62, %c0_63] : memref<4x8x1xf32, #tpu.memory_space<vmem>>, vector<1x8x1xf32>
    %41 = vector.shape_cast %40 : vector<1x8x1xf32> to vector<8x1xf32>
    %c1_64 = arith.constant 1 : index
    %c0_65 = arith.constant 0 : index
    %c0_66 = arith.constant 0 : index
    %42 = vector.load %arg12[%c1_64, %c0_65, %c0_66] : memref<4x8x1xf32, #tpu.memory_space<vmem>>, vector<1x8x1xf32>
    %43 = vector.shape_cast %42 : vector<1x8x1xf32> to vector<8x1xf32>
    %c2_67 = arith.constant 2 : index
    %c0_68 = arith.constant 0 : index
    %c0_69 = arith.constant 0 : index
    %44 = vector.load %arg12[%c2_67, %c0_68, %c0_69] : memref<4x8x1xf32, #tpu.memory_space<vmem>>, vector<1x8x1xf32>
    %45 = vector.shape_cast %44 : vector<1x8x1xf32> to vector<8x1xf32>
    %c3_70 = arith.constant 3 : index
    %c0_71 = arith.constant 0 : index
    %c0_72 = arith.constant 0 : index
    %46 = vector.load %arg12[%c3_70, %c0_71, %c0_72] : memref<4x8x1xf32, #tpu.memory_space<vmem>>, vector<1x8x1xf32>
    %47 = vector.shape_cast %46 : vector<1x8x1xf32> to vector<8x1xf32>
    %c0_73 = arith.constant 0 : index
    %c0_74 = arith.constant 0 : index
    %c0_75 = arith.constant 0 : index
    %48 = vector.load %arg13[%c0_73, %c0_74, %c0_75] : memref<10x8x1xf32, #tpu.memory_space<vmem>>, vector<1x8x1xf32>
    %49 = vector.shape_cast %48 : vector<1x8x1xf32> to vector<8x1xf32>
    %c1_76 = arith.constant 1 : index
    %c0_77 = arith.constant 0 : index
    %c0_78 = arith.constant 0 : index
    %50 = vector.load %arg13[%c1_76, %c0_77, %c0_78] : memref<10x8x1xf32, #tpu.memory_space<vmem>>, vector<1x8x1xf32>
    %51 = vector.shape_cast %50 : vector<1x8x1xf32> to vector<8x1xf32>
    %c2_79 = arith.constant 2 : index
    %c0_80 = arith.constant 0 : index
    %c0_81 = arith.constant 0 : index
    %52 = vector.load %arg13[%c2_79, %c0_80, %c0_81] : memref<10x8x1xf32, #tpu.memory_space<vmem>>, vector<1x8x1xf32>
    %53 = vector.shape_cast %52 : vector<1x8x1xf32> to vector<8x1xf32>
    %c3_82 = arith.constant 3 : index
    %c0_83 = arith.constant 0 : index
    %c0_84 = arith.constant 0 : index
    %54 = vector.load %arg13[%c3_82, %c0_83, %c0_84] : memref<10x8x1xf32, #tpu.memory_space<vmem>>, vector<1x8x1xf32>
    %55 = vector.shape_cast %54 : vector<1x8x1xf32> to vector<8x1xf32>
    %c4 = arith.constant 4 : index
    %c0_85 = arith.constant 0 : index
    %c0_86 = arith.constant 0 : index
    %56 = vector.load %arg13[%c4, %c0_85, %c0_86] : memref<10x8x1xf32, #tpu.memory_space<vmem>>, vector<1x8x1xf32>
    %57 = vector.shape_cast %56 : vector<1x8x1xf32> to vector<8x1xf32>
    %c5 = arith.constant 5 : index
    %c0_87 = arith.constant 0 : index
    %c0_88 = arith.constant 0 : index
    %58 = vector.load %arg13[%c5, %c0_87, %c0_88] : memref<10x8x1xf32, #tpu.memory_space<vmem>>, vector<1x8x1xf32>
    %59 = vector.shape_cast %58 : vector<1x8x1xf32> to vector<8x1xf32>
    %c6 = arith.constant 6 : index
    %c0_89 = arith.constant 0 : index
    %c0_90 = arith.constant 0 : index
    %60 = vector.load %arg13[%c6, %c0_89, %c0_90] : memref<10x8x1xf32, #tpu.memory_space<vmem>>, vector<1x8x1xf32>
    %61 = vector.shape_cast %60 : vector<1x8x1xf32> to vector<8x1xf32>
    %c7 = arith.constant 7 : index
    %c0_91 = arith.constant 0 : index
    %c0_92 = arith.constant 0 : index
    %62 = vector.load %arg13[%c7, %c0_91, %c0_92] : memref<10x8x1xf32, #tpu.memory_space<vmem>>, vector<1x8x1xf32>
    %63 = vector.shape_cast %62 : vector<1x8x1xf32> to vector<8x1xf32>
    %c8 = arith.constant 8 : index
    %c0_93 = arith.constant 0 : index
    %c0_94 = arith.constant 0 : index
    %64 = vector.load %arg13[%c8, %c0_93, %c0_94] : memref<10x8x1xf32, #tpu.memory_space<vmem>>, vector<1x8x1xf32>
    %65 = vector.shape_cast %64 : vector<1x8x1xf32> to vector<8x1xf32>
    %c9 = arith.constant 9 : index
    %c0_95 = arith.constant 0 : index
    %c0_96 = arith.constant 0 : index
    %66 = vector.load %arg13[%c9, %c0_95, %c0_96] : memref<10x8x1xf32, #tpu.memory_space<vmem>>, vector<1x8x1xf32>
    %67 = vector.shape_cast %66 : vector<1x8x1xf32> to vector<8x1xf32>
    %c0_i32_97 = arith.constant 0 : i32
    %c4_i32 = arith.constant 4 : i32
    %68 = arith.addi %c0_i32_97, %c4_i32 : i32
    %c1_i32 = arith.constant 1 : i32
    %69:14 = scf.for %arg14 = %c0_i32_97 to %68 step %c1_i32 iter_args(%arg15 = %41, %arg16 = %43, %arg17 = %45, %arg18 = %47, %arg19 = %49, %arg20 = %51, %arg21 = %53, %arg22 = %55, %arg23 = %57, %arg24 = %59, %arg25 = %61, %arg26 = %63, %arg27 = %65, %arg28 = %67) -> (vector<8x1xf32>, vector<8x1xf32>, vector<8x1xf32>, vector<8x1xf32>, vector<8x1xf32>, vector<8x1xf32>, vector<8x1xf32>, vector<8x1xf32>, vector<8x1xf32>, vector<8x1xf32>, vector<8x1xf32>, vector<8x1xf32>, vector<8x1xf32>, vector<8x1xf32>)  : i32 {
      %c2_i32 = arith.constant 2 : i32
      %112 = arith.muli %arg14, %c2_i32 : i32
      %c1_i32_141 = arith.constant 1 : i32
      %113 = arith.addi %112, %c1_i32_141 : i32
      %c2_i32_142 = arith.constant 2 : i32
      %114 = arith.muli %arg14, %c2_i32_142 : i32
      %115 = arith.index_cast %114 : i32 to index
      %c0_143 = arith.constant 0 : index
      %c0_144 = arith.constant 0 : index
      %c0_145 = arith.constant 0 : index
      %116 = vector.load %arg2[%115, %c0_143, %c0_144, %c0_145] : memref<8x4x8x1xf32, #tpu.memory_space<vmem>>, vector<1x4x8x1xf32>
      %117 = vector.shape_cast %116 : vector<1x4x8x1xf32> to vector<4x8x1xf32>
      %118 = vector.extract_strided_slice %117 {offsets = [3, 0, 0], sizes = [1, 8, 1], strides = [1, 1, 1]} : vector<4x8x1xf32> to vector<1x8x1xf32>
      %119 = vector.shape_cast %118 : vector<1x8x1xf32> to vector<8x1xf32>
      %120 = vector.extract_strided_slice %117 {offsets = [0, 0, 0], sizes = [1, 8, 1], strides = [1, 1, 1]} : vector<4x8x1xf32> to vector<1x8x1xf32>
      %121 = vector.shape_cast %120 : vector<1x8x1xf32> to vector<8x1xf32>
      %122 = arith.mulf %121, %119 : vector<8x1xf32>
      %123 = vector.extract_strided_slice %117 {offsets = [1, 0, 0], sizes = [1, 8, 1], strides = [1, 1, 1]} : vector<4x8x1xf32> to vector<1x8x1xf32>
      %124 = vector.shape_cast %123 : vector<1x8x1xf32> to vector<8x1xf32>
      %125 = arith.mulf %124, %119 : vector<8x1xf32>
      %126 = vector.extract_strided_slice %117 {offsets = [2, 0, 0], sizes = [1, 8, 1], strides = [1, 1, 1]} : vector<4x8x1xf32> to vector<1x8x1xf32>
      %127 = vector.shape_cast %126 : vector<1x8x1xf32> to vector<8x1xf32>
      %128 = arith.mulf %127, %119 : vector<8x1xf32>
      %129 = vector.broadcast %19 : f32 to vector<8x1xf32>
      %130 = arith.mulf %129, %arg15 : vector<8x1xf32>
      %131 = vector.broadcast %20 : f32 to vector<8x1xf32>
      %132 = arith.mulf %131, %arg16 : vector<8x1xf32>
      %133 = arith.addf %130, %132 : vector<8x1xf32>
      %134 = vector.broadcast %21 : f32 to vector<8x1xf32>
      %135 = arith.mulf %134, %arg17 : vector<8x1xf32>
      %136 = arith.addf %133, %135 : vector<8x1xf32>
      %137 = vector.broadcast %22 : f32 to vector<8x1xf32>
      %138 = arith.mulf %137, %arg18 : vector<8x1xf32>
      %139 = arith.addf %136, %138 : vector<8x1xf32>
      %140 = arith.subf %122, %139 : vector<8x1xf32>
      %141 = vector.broadcast %23 : f32 to vector<8x1xf32>
      %142 = arith.mulf %141, %arg15 : vector<8x1xf32>
      %143 = vector.broadcast %24 : f32 to vector<8x1xf32>
      %144 = arith.mulf %143, %arg16 : vector<8x1xf32>
      %145 = arith.addf %142, %144 : vector<8x1xf32>
      %146 = vector.broadcast %25 : f32 to vector<8x1xf32>
      %147 = arith.mulf %146, %arg17 : vector<8x1xf32>
      %148 = arith.addf %145, %147 : vector<8x1xf32>
      %149 = vector.broadcast %26 : f32 to vector<8x1xf32>
      %150 = arith.mulf %149, %arg18 : vector<8x1xf32>
      %151 = arith.addf %148, %150 : vector<8x1xf32>
      %152 = arith.subf %125, %151 : vector<8x1xf32>
      %153 = vector.broadcast %27 : f32 to vector<8x1xf32>
      %154 = arith.mulf %153, %arg15 : vector<8x1xf32>
      %155 = vector.broadcast %28 : f32 to vector<8x1xf32>
      %156 = arith.mulf %155, %arg16 : vector<8x1xf32>
      %157 = arith.addf %154, %156 : vector<8x1xf32>
      %158 = vector.broadcast %29 : f32 to vector<8x1xf32>
      %159 = arith.mulf %158, %arg17 : vector<8x1xf32>
      %160 = arith.addf %157, %159 : vector<8x1xf32>
      %161 = vector.broadcast %30 : f32 to vector<8x1xf32>
      %162 = arith.mulf %161, %arg18 : vector<8x1xf32>
      %163 = arith.addf %160, %162 : vector<8x1xf32>
      %164 = arith.subf %128, %163 : vector<8x1xf32>
      %165 = vector.broadcast %19 : f32 to vector<8x1xf32>
      %166 = arith.mulf %165, %arg19 : vector<8x1xf32>
      %167 = vector.broadcast %20 : f32 to vector<8x1xf32>
      %168 = arith.mulf %167, %arg20 : vector<8x1xf32>
      %169 = arith.addf %166, %168 : vector<8x1xf32>
      %170 = vector.broadcast %21 : f32 to vector<8x1xf32>
      %171 = arith.mulf %170, %arg21 : vector<8x1xf32>
      %172 = arith.addf %169, %171 : vector<8x1xf32>
      %173 = vector.broadcast %22 : f32 to vector<8x1xf32>
      %174 = arith.mulf %173, %arg22 : vector<8x1xf32>
      %175 = arith.addf %172, %174 : vector<8x1xf32>
      %176 = vector.broadcast %23 : f32 to vector<8x1xf32>
      %177 = arith.mulf %176, %arg19 : vector<8x1xf32>
      %178 = vector.broadcast %24 : f32 to vector<8x1xf32>
      %179 = arith.mulf %178, %arg20 : vector<8x1xf32>
      %180 = arith.addf %177, %179 : vector<8x1xf32>
      %181 = vector.broadcast %25 : f32 to vector<8x1xf32>
      %182 = arith.mulf %181, %arg21 : vector<8x1xf32>
      %183 = arith.addf %180, %182 : vector<8x1xf32>
      %184 = vector.broadcast %26 : f32 to vector<8x1xf32>
      %185 = arith.mulf %184, %arg22 : vector<8x1xf32>
      %186 = arith.addf %183, %185 : vector<8x1xf32>
      %187 = vector.broadcast %27 : f32 to vector<8x1xf32>
      %188 = arith.mulf %187, %arg19 : vector<8x1xf32>
      %189 = vector.broadcast %28 : f32 to vector<8x1xf32>
      %190 = arith.mulf %189, %arg20 : vector<8x1xf32>
      %191 = arith.addf %188, %190 : vector<8x1xf32>
      %192 = vector.broadcast %29 : f32 to vector<8x1xf32>
      %193 = arith.mulf %192, %arg21 : vector<8x1xf32>
      %194 = arith.addf %191, %193 : vector<8x1xf32>
      %195 = vector.broadcast %30 : f32 to vector<8x1xf32>
      %196 = arith.mulf %195, %arg22 : vector<8x1xf32>
      %197 = arith.addf %194, %196 : vector<8x1xf32>
      %198 = vector.broadcast %19 : f32 to vector<8x1xf32>
      %199 = arith.mulf %198, %arg20 : vector<8x1xf32>
      %200 = vector.broadcast %20 : f32 to vector<8x1xf32>
      %201 = arith.mulf %200, %arg23 : vector<8x1xf32>
      %202 = arith.addf %199, %201 : vector<8x1xf32>
      %203 = vector.broadcast %21 : f32 to vector<8x1xf32>
      %204 = arith.mulf %203, %arg24 : vector<8x1xf32>
      %205 = arith.addf %202, %204 : vector<8x1xf32>
      %206 = vector.broadcast %22 : f32 to vector<8x1xf32>
      %207 = arith.mulf %206, %arg25 : vector<8x1xf32>
      %208 = arith.addf %205, %207 : vector<8x1xf32>
      %209 = vector.broadcast %23 : f32 to vector<8x1xf32>
      %210 = arith.mulf %209, %arg20 : vector<8x1xf32>
      %211 = vector.broadcast %24 : f32 to vector<8x1xf32>
      %212 = arith.mulf %211, %arg23 : vector<8x1xf32>
      %213 = arith.addf %210, %212 : vector<8x1xf32>
      %214 = vector.broadcast %25 : f32 to vector<8x1xf32>
      %215 = arith.mulf %214, %arg24 : vector<8x1xf32>
      %216 = arith.addf %213, %215 : vector<8x1xf32>
      %217 = vector.broadcast %26 : f32 to vector<8x1xf32>
      %218 = arith.mulf %217, %arg25 : vector<8x1xf32>
      %219 = arith.addf %216, %218 : vector<8x1xf32>
      %220 = vector.broadcast %27 : f32 to vector<8x1xf32>
      %221 = arith.mulf %220, %arg20 : vector<8x1xf32>
      %222 = vector.broadcast %28 : f32 to vector<8x1xf32>
      %223 = arith.mulf %222, %arg23 : vector<8x1xf32>
      %224 = arith.addf %221, %223 : vector<8x1xf32>
      %225 = vector.broadcast %29 : f32 to vector<8x1xf32>
      %226 = arith.mulf %225, %arg24 : vector<8x1xf32>
      %227 = arith.addf %224, %226 : vector<8x1xf32>
      %228 = vector.broadcast %30 : f32 to vector<8x1xf32>
      %229 = arith.mulf %228, %arg25 : vector<8x1xf32>
      %230 = arith.addf %227, %229 : vector<8x1xf32>
      %231 = vector.broadcast %19 : f32 to vector<8x1xf32>
      %232 = arith.mulf %231, %arg21 : vector<8x1xf32>
      %233 = vector.broadcast %20 : f32 to vector<8x1xf32>
      %234 = arith.mulf %233, %arg24 : vector<8x1xf32>
      %235 = arith.addf %232, %234 : vector<8x1xf32>
      %236 = vector.broadcast %21 : f32 to vector<8x1xf32>
      %237 = arith.mulf %236, %arg26 : vector<8x1xf32>
      %238 = arith.addf %235, %237 : vector<8x1xf32>
      %239 = vector.broadcast %22 : f32 to vector<8x1xf32>
      %240 = arith.mulf %239, %arg27 : vector<8x1xf32>
      %241 = arith.addf %238, %240 : vector<8x1xf32>
      %242 = vector.broadcast %23 : f32 to vector<8x1xf32>
      %243 = arith.mulf %242, %arg21 : vector<8x1xf32>
      %244 = vector.broadcast %24 : f32 to vector<8x1xf32>
      %245 = arith.mulf %244, %arg24 : vector<8x1xf32>
      %246 = arith.addf %243, %245 : vector<8x1xf32>
      %247 = vector.broadcast %25 : f32 to vector<8x1xf32>
      %248 = arith.mulf %247, %arg26 : vector<8x1xf32>
      %249 = arith.addf %246, %248 : vector<8x1xf32>
      %250 = vector.broadcast %26 : f32 to vector<8x1xf32>
      %251 = arith.mulf %250, %arg27 : vector<8x1xf32>
      %252 = arith.addf %249, %251 : vector<8x1xf32>
      %253 = vector.broadcast %27 : f32 to vector<8x1xf32>
      %254 = arith.mulf %253, %arg21 : vector<8x1xf32>
      %255 = vector.broadcast %28 : f32 to vector<8x1xf32>
      %256 = arith.mulf %255, %arg24 : vector<8x1xf32>
      %257 = arith.addf %254, %256 : vector<8x1xf32>
      %258 = vector.broadcast %29 : f32 to vector<8x1xf32>
      %259 = arith.mulf %258, %arg26 : vector<8x1xf32>
      %260 = arith.addf %257, %259 : vector<8x1xf32>
      %261 = vector.broadcast %30 : f32 to vector<8x1xf32>
      %262 = arith.mulf %261, %arg27 : vector<8x1xf32>
      %263 = arith.addf %260, %262 : vector<8x1xf32>
      %264 = vector.broadcast %19 : f32 to vector<8x1xf32>
      %265 = arith.mulf %264, %arg22 : vector<8x1xf32>
      %266 = vector.broadcast %20 : f32 to vector<8x1xf32>
      %267 = arith.mulf %266, %arg25 : vector<8x1xf32>
      %268 = arith.addf %265, %267 : vector<8x1xf32>
      %269 = vector.broadcast %21 : f32 to vector<8x1xf32>
      %270 = arith.mulf %269, %arg27 : vector<8x1xf32>
      %271 = arith.addf %268, %270 : vector<8x1xf32>
      %272 = vector.broadcast %22 : f32 to vector<8x1xf32>
      %273 = arith.mulf %272, %arg28 : vector<8x1xf32>
      %274 = arith.addf %271, %273 : vector<8x1xf32>
      %275 = vector.broadcast %23 : f32 to vector<8x1xf32>
      %276 = arith.mulf %275, %arg22 : vector<8x1xf32>
      %277 = vector.broadcast %24 : f32 to vector<8x1xf32>
      %278 = arith.mulf %277, %arg25 : vector<8x1xf32>
      %279 = arith.addf %276, %278 : vector<8x1xf32>
      %280 = vector.broadcast %25 : f32 to vector<8x1xf32>
      %281 = arith.mulf %280, %arg27 : vector<8x1xf32>
      %282 = arith.addf %279, %281 : vector<8x1xf32>
      %283 = vector.broadcast %26 : f32 to vector<8x1xf32>
      %284 = arith.mulf %283, %arg28 : vector<8x1xf32>
      %285 = arith.addf %282, %284 : vector<8x1xf32>
      %286 = vector.broadcast %27 : f32 to vector<8x1xf32>
      %287 = arith.mulf %286, %arg22 : vector<8x1xf32>
      %288 = vector.broadcast %28 : f32 to vector<8x1xf32>
      %289 = arith.mulf %288, %arg25 : vector<8x1xf32>
      %290 = arith.addf %287, %289 : vector<8x1xf32>
      %291 = vector.broadcast %29 : f32 to vector<8x1xf32>
      %292 = arith.mulf %291, %arg27 : vector<8x1xf32>
      %293 = arith.addf %290, %292 : vector<8x1xf32>
      %294 = vector.broadcast %30 : f32 to vector<8x1xf32>
      %295 = arith.mulf %294, %arg28 : vector<8x1xf32>
      %296 = arith.addf %293, %295 : vector<8x1xf32>
      %297 = vector.broadcast %19 : f32 to vector<8x1xf32>
      %298 = arith.mulf %297, %175 : vector<8x1xf32>
      %299 = vector.broadcast %20 : f32 to vector<8x1xf32>
      %300 = arith.mulf %299, %208 : vector<8x1xf32>
      %301 = arith.addf %298, %300 : vector<8x1xf32>
      %302 = vector.broadcast %21 : f32 to vector<8x1xf32>
      %303 = arith.mulf %302, %241 : vector<8x1xf32>
      %304 = arith.addf %301, %303 : vector<8x1xf32>
      %305 = vector.broadcast %22 : f32 to vector<8x1xf32>
      %306 = arith.mulf %305, %274 : vector<8x1xf32>
      %307 = arith.addf %304, %306 : vector<8x1xf32>
      %308 = vector.broadcast %35 : f32 to vector<8x1xf32>
      %309 = arith.addf %307, %308 : vector<8x1xf32>
      %310 = vector.broadcast %19 : f32 to vector<8x1xf32>
      %311 = arith.mulf %310, %186 : vector<8x1xf32>
      %312 = vector.broadcast %20 : f32 to vector<8x1xf32>
      %313 = arith.mulf %312, %219 : vector<8x1xf32>
      %314 = arith.addf %311, %313 : vector<8x1xf32>
      %315 = vector.broadcast %21 : f32 to vector<8x1xf32>
      %316 = arith.mulf %315, %252 : vector<8x1xf32>
      %317 = arith.addf %314, %316 : vector<8x1xf32>
      %318 = vector.broadcast %22 : f32 to vector<8x1xf32>
      %319 = arith.mulf %318, %285 : vector<8x1xf32>
      %320 = arith.addf %317, %319 : vector<8x1xf32>
      %321 = vector.broadcast %19 : f32 to vector<8x1xf32>
      %322 = arith.mulf %321, %197 : vector<8x1xf32>
      %323 = vector.broadcast %20 : f32 to vector<8x1xf32>
      %324 = arith.mulf %323, %230 : vector<8x1xf32>
      %325 = arith.addf %322, %324 : vector<8x1xf32>
      %326 = vector.broadcast %21 : f32 to vector<8x1xf32>
      %327 = arith.mulf %326, %263 : vector<8x1xf32>
      %328 = arith.addf %325, %327 : vector<8x1xf32>
      %329 = vector.broadcast %22 : f32 to vector<8x1xf32>
      %330 = arith.mulf %329, %296 : vector<8x1xf32>
      %331 = arith.addf %328, %330 : vector<8x1xf32>
      %332 = vector.broadcast %23 : f32 to vector<8x1xf32>
      %333 = arith.mulf %332, %186 : vector<8x1xf32>
      %334 = vector.broadcast %24 : f32 to vector<8x1xf32>
      %335 = arith.mulf %334, %219 : vector<8x1xf32>
      %336 = arith.addf %333, %335 : vector<8x1xf32>
      %337 = vector.broadcast %25 : f32 to vector<8x1xf32>
      %338 = arith.mulf %337, %252 : vector<8x1xf32>
      %339 = arith.addf %336, %338 : vector<8x1xf32>
      %340 = vector.broadcast %26 : f32 to vector<8x1xf32>
      %341 = arith.mulf %340, %285 : vector<8x1xf32>
      %342 = arith.addf %339, %341 : vector<8x1xf32>
      %343 = vector.broadcast %36 : f32 to vector<8x1xf32>
      %344 = arith.addf %342, %343 : vector<8x1xf32>
      %345 = vector.broadcast %23 : f32 to vector<8x1xf32>
      %346 = arith.mulf %345, %197 : vector<8x1xf32>
      %347 = vector.broadcast %24 : f32 to vector<8x1xf32>
      %348 = arith.mulf %347, %230 : vector<8x1xf32>
      %349 = arith.addf %346, %348 : vector<8x1xf32>
      %350 = vector.broadcast %25 : f32 to vector<8x1xf32>
      %351 = arith.mulf %350, %263 : vector<8x1xf32>
      %352 = arith.addf %349, %351 : vector<8x1xf32>
      %353 = vector.broadcast %26 : f32 to vector<8x1xf32>
      %354 = arith.mulf %353, %296 : vector<8x1xf32>
      %355 = arith.addf %352, %354 : vector<8x1xf32>
      %356 = vector.broadcast %27 : f32 to vector<8x1xf32>
      %357 = arith.mulf %356, %197 : vector<8x1xf32>
      %358 = vector.broadcast %28 : f32 to vector<8x1xf32>
      %359 = arith.mulf %358, %230 : vector<8x1xf32>
      %360 = arith.addf %357, %359 : vector<8x1xf32>
      %361 = vector.broadcast %29 : f32 to vector<8x1xf32>
      %362 = arith.mulf %361, %263 : vector<8x1xf32>
      %363 = arith.addf %360, %362 : vector<8x1xf32>
      %364 = vector.broadcast %30 : f32 to vector<8x1xf32>
      %365 = arith.mulf %364, %296 : vector<8x1xf32>
      %366 = arith.addf %363, %365 : vector<8x1xf32>
      %367 = vector.broadcast %37 : f32 to vector<8x1xf32>
      %368 = arith.addf %366, %367 : vector<8x1xf32>
      %369 = tpu.reciprocal %309 {approx = true} : vector<8x1xf32> -> vector<8x1xf32>
      %370 = arith.mulf %309, %369 : vector<8x1xf32>
      %cst_146 = arith.constant 2.000000e+00 : f32
      %371 = vector.broadcast %cst_146 : f32 to vector<8x1xf32>
      %372 = arith.subf %371, %370 : vector<8x1xf32>
      %373 = arith.mulf %369, %372 : vector<8x1xf32>
      %374 = arith.mulf %309, %373 : vector<8x1xf32>
      %cst_147 = arith.constant 2.000000e+00 : f32
      %375 = vector.broadcast %cst_147 : f32 to vector<8x1xf32>
      %376 = arith.subf %375, %374 : vector<8x1xf32>
      %377 = arith.mulf %373, %376 : vector<8x1xf32>
      %378 = arith.mulf %320, %377 : vector<8x1xf32>
      %379 = arith.mulf %331, %377 : vector<8x1xf32>
      %380 = arith.mulf %38, %377 : vector<8x1xf32>
      %381 = arith.mulf %39, %377 : vector<8x1xf32>
      %382 = arith.mulf %39, %377 : vector<8x1xf32>
      %383 = arith.mulf %320, %378 : vector<8x1xf32>
      %384 = arith.subf %344, %383 : vector<8x1xf32>
      %385 = arith.mulf %320, %379 : vector<8x1xf32>
      %386 = arith.subf %355, %385 : vector<8x1xf32>
      %387 = arith.mulf %320, %380 : vector<8x1xf32>
      %388 = arith.subf %39, %387 : vector<8x1xf32>
      %389 = arith.mulf %320, %381 : vector<8x1xf32>
      %390 = arith.subf %38, %389 : vector<8x1xf32>
      %391 = arith.mulf %320, %382 : vector<8x1xf32>
      %392 = arith.subf %39, %391 : vector<8x1xf32>
      %393 = arith.mulf %331, %378 : vector<8x1xf32>
      %394 = arith.subf %355, %393 : vector<8x1xf32>
      %395 = arith.mulf %331, %379 : vector<8x1xf32>
      %396 = arith.subf %368, %395 : vector<8x1xf32>
      %397 = arith.mulf %331, %380 : vector<8x1xf32>
      %398 = arith.subf %39, %397 : vector<8x1xf32>
      %399 = arith.mulf %331, %381 : vector<8x1xf32>
      %400 = arith.subf %39, %399 : vector<8x1xf32>
      %401 = arith.mulf %331, %382 : vector<8x1xf32>
      %402 = arith.subf %38, %401 : vector<8x1xf32>
      %403 = tpu.reciprocal %384 {approx = true} : vector<8x1xf32> -> vector<8x1xf32>
      %404 = arith.mulf %384, %403 : vector<8x1xf32>
      %cst_148 = arith.constant 2.000000e+00 : f32
      %405 = vector.broadcast %cst_148 : f32 to vector<8x1xf32>
      %406 = arith.subf %405, %404 : vector<8x1xf32>
      %407 = arith.mulf %403, %406 : vector<8x1xf32>
      %408 = arith.mulf %384, %407 : vector<8x1xf32>
      %cst_149 = arith.constant 2.000000e+00 : f32
      %409 = vector.broadcast %cst_149 : f32 to vector<8x1xf32>
      %410 = arith.subf %409, %408 : vector<8x1xf32>
      %411 = arith.mulf %407, %410 : vector<8x1xf32>
      %412 = arith.mulf %386, %411 : vector<8x1xf32>
      %413 = arith.mulf %388, %411 : vector<8x1xf32>
      %414 = arith.mulf %390, %411 : vector<8x1xf32>
      %415 = arith.mulf %392, %411 : vector<8x1xf32>
      %416 = arith.mulf %378, %412 : vector<8x1xf32>
      %417 = arith.subf %379, %416 : vector<8x1xf32>
      %418 = arith.mulf %378, %413 : vector<8x1xf32>
      %419 = arith.subf %380, %418 : vector<8x1xf32>
      %420 = arith.mulf %378, %414 : vector<8x1xf32>
      %421 = arith.subf %381, %420 : vector<8x1xf32>
      %422 = arith.mulf %378, %415 : vector<8x1xf32>
      %423 = arith.subf %382, %422 : vector<8x1xf32>
      %424 = arith.mulf %394, %412 : vector<8x1xf32>
      %425 = arith.subf %396, %424 : vector<8x1xf32>
      %426 = arith.mulf %394, %413 : vector<8x1xf32>
      %427 = arith.subf %398, %426 : vector<8x1xf32>
      %428 = arith.mulf %394, %414 : vector<8x1xf32>
      %429 = arith.subf %400, %428 : vector<8x1xf32>
      %430 = arith.mulf %394, %415 : vector<8x1xf32>
      %431 = arith.subf %402, %430 : vector<8x1xf32>
      %432 = tpu.reciprocal %425 {approx = true} : vector<8x1xf32> -> vector<8x1xf32>
      %433 = arith.mulf %425, %432 : vector<8x1xf32>
      %cst_150 = arith.constant 2.000000e+00 : f32
      %434 = vector.broadcast %cst_150 : f32 to vector<8x1xf32>
      %435 = arith.subf %434, %433 : vector<8x1xf32>
      %436 = arith.mulf %432, %435 : vector<8x1xf32>
      %437 = arith.mulf %425, %436 : vector<8x1xf32>
      %cst_151 = arith.constant 2.000000e+00 : f32
      %438 = vector.broadcast %cst_151 : f32 to vector<8x1xf32>
      %439 = arith.subf %438, %437 : vector<8x1xf32>
      %440 = arith.mulf %436, %439 : vector<8x1xf32>
      %441 = arith.mulf %427, %440 : vector<8x1xf32>
      %442 = arith.mulf %429, %440 : vector<8x1xf32>
      %443 = arith.mulf %431, %440 : vector<8x1xf32>
      %444 = arith.mulf %417, %441 : vector<8x1xf32>
      %445 = arith.subf %419, %444 : vector<8x1xf32>
      %446 = arith.mulf %417, %442 : vector<8x1xf32>
      %447 = arith.subf %421, %446 : vector<8x1xf32>
      %448 = arith.mulf %417, %443 : vector<8x1xf32>
      %449 = arith.subf %423, %448 : vector<8x1xf32>
      %450 = arith.mulf %412, %441 : vector<8x1xf32>
      %451 = arith.subf %413, %450 : vector<8x1xf32>
      %452 = arith.mulf %412, %442 : vector<8x1xf32>
      %453 = arith.subf %414, %452 : vector<8x1xf32>
      %454 = arith.mulf %412, %443 : vector<8x1xf32>
      %455 = arith.subf %415, %454 : vector<8x1xf32>
      %456 = arith.mulf %175, %445 : vector<8x1xf32>
      %457 = arith.mulf %186, %451 : vector<8x1xf32>
      %458 = arith.addf %456, %457 : vector<8x1xf32>
      %459 = arith.mulf %197, %441 : vector<8x1xf32>
      %460 = arith.addf %458, %459 : vector<8x1xf32>
      %461 = arith.mulf %460, %119 : vector<8x1xf32>
      %462 = arith.mulf %175, %447 : vector<8x1xf32>
      %463 = arith.mulf %186, %453 : vector<8x1xf32>
      %464 = arith.addf %462, %463 : vector<8x1xf32>
      %465 = arith.mulf %197, %442 : vector<8x1xf32>
      %466 = arith.addf %464, %465 : vector<8x1xf32>
      %467 = arith.mulf %466, %119 : vector<8x1xf32>
      %468 = arith.mulf %175, %449 : vector<8x1xf32>
      %469 = arith.mulf %186, %455 : vector<8x1xf32>
      %470 = arith.addf %468, %469 : vector<8x1xf32>
      %471 = arith.mulf %197, %443 : vector<8x1xf32>
      %472 = arith.addf %470, %471 : vector<8x1xf32>
      %473 = arith.mulf %472, %119 : vector<8x1xf32>
      %474 = arith.mulf %208, %445 : vector<8x1xf32>
      %475 = arith.mulf %219, %451 : vector<8x1xf32>
      %476 = arith.addf %474, %475 : vector<8x1xf32>
      %477 = arith.mulf %230, %441 : vector<8x1xf32>
      %478 = arith.addf %476, %477 : vector<8x1xf32>
      %479 = arith.mulf %478, %119 : vector<8x1xf32>
      %480 = arith.mulf %208, %447 : vector<8x1xf32>
      %481 = arith.mulf %219, %453 : vector<8x1xf32>
      %482 = arith.addf %480, %481 : vector<8x1xf32>
      %483 = arith.mulf %230, %442 : vector<8x1xf32>
      %484 = arith.addf %482, %483 : vector<8x1xf32>
      %485 = arith.mulf %484, %119 : vector<8x1xf32>
      %486 = arith.mulf %208, %449 : vector<8x1xf32>
      %487 = arith.mulf %219, %455 : vector<8x1xf32>
      %488 = arith.addf %486, %487 : vector<8x1xf32>
      %489 = arith.mulf %230, %443 : vector<8x1xf32>
      %490 = arith.addf %488, %489 : vector<8x1xf32>
      %491 = arith.mulf %490, %119 : vector<8x1xf32>
      %492 = arith.mulf %241, %445 : vector<8x1xf32>
      %493 = arith.mulf %252, %451 : vector<8x1xf32>
      %494 = arith.addf %492, %493 : vector<8x1xf32>
      %495 = arith.mulf %263, %441 : vector<8x1xf32>
      %496 = arith.addf %494, %495 : vector<8x1xf32>
      %497 = arith.mulf %496, %119 : vector<8x1xf32>
      %498 = arith.mulf %241, %447 : vector<8x1xf32>
      %499 = arith.mulf %252, %453 : vector<8x1xf32>
      %500 = arith.addf %498, %499 : vector<8x1xf32>
      %501 = arith.mulf %263, %442 : vector<8x1xf32>
      %502 = arith.addf %500, %501 : vector<8x1xf32>
      %503 = arith.mulf %502, %119 : vector<8x1xf32>
      %504 = arith.mulf %241, %449 : vector<8x1xf32>
      %505 = arith.mulf %252, %455 : vector<8x1xf32>
      %506 = arith.addf %504, %505 : vector<8x1xf32>
      %507 = arith.mulf %263, %443 : vector<8x1xf32>
      %508 = arith.addf %506, %507 : vector<8x1xf32>
      %509 = arith.mulf %508, %119 : vector<8x1xf32>
      %510 = arith.mulf %274, %445 : vector<8x1xf32>
      %511 = arith.mulf %285, %451 : vector<8x1xf32>
      %512 = arith.addf %510, %511 : vector<8x1xf32>
      %513 = arith.mulf %296, %441 : vector<8x1xf32>
      %514 = arith.addf %512, %513 : vector<8x1xf32>
      %515 = arith.mulf %514, %119 : vector<8x1xf32>
      %516 = arith.mulf %274, %447 : vector<8x1xf32>
      %517 = arith.mulf %285, %453 : vector<8x1xf32>
      %518 = arith.addf %516, %517 : vector<8x1xf32>
      %519 = arith.mulf %296, %442 : vector<8x1xf32>
      %520 = arith.addf %518, %519 : vector<8x1xf32>
      %521 = arith.mulf %520, %119 : vector<8x1xf32>
      %522 = arith.mulf %274, %449 : vector<8x1xf32>
      %523 = arith.mulf %285, %455 : vector<8x1xf32>
      %524 = arith.addf %522, %523 : vector<8x1xf32>
      %525 = arith.mulf %296, %443 : vector<8x1xf32>
      %526 = arith.addf %524, %525 : vector<8x1xf32>
      %527 = arith.mulf %526, %119 : vector<8x1xf32>
      %528 = arith.mulf %461, %140 : vector<8x1xf32>
      %529 = arith.mulf %467, %152 : vector<8x1xf32>
      %530 = arith.addf %528, %529 : vector<8x1xf32>
      %531 = arith.mulf %473, %164 : vector<8x1xf32>
      %532 = arith.addf %530, %531 : vector<8x1xf32>
      %533 = arith.addf %arg15, %532 : vector<8x1xf32>
      %534 = arith.mulf %479, %140 : vector<8x1xf32>
      %535 = arith.mulf %485, %152 : vector<8x1xf32>
      %536 = arith.addf %534, %535 : vector<8x1xf32>
      %537 = arith.mulf %491, %164 : vector<8x1xf32>
      %538 = arith.addf %536, %537 : vector<8x1xf32>
      %539 = arith.addf %arg16, %538 : vector<8x1xf32>
      %540 = arith.mulf %497, %140 : vector<8x1xf32>
      %541 = arith.mulf %503, %152 : vector<8x1xf32>
      %542 = arith.addf %540, %541 : vector<8x1xf32>
      %543 = arith.mulf %509, %164 : vector<8x1xf32>
      %544 = arith.addf %542, %543 : vector<8x1xf32>
      %545 = arith.addf %arg17, %544 : vector<8x1xf32>
      %546 = arith.mulf %515, %140 : vector<8x1xf32>
      %547 = arith.mulf %521, %152 : vector<8x1xf32>
      %548 = arith.addf %546, %547 : vector<8x1xf32>
      %549 = arith.mulf %527, %164 : vector<8x1xf32>
      %550 = arith.addf %548, %549 : vector<8x1xf32>
      %551 = arith.addf %arg18, %550 : vector<8x1xf32>
      %552 = arith.mulf %461, %175 : vector<8x1xf32>
      %553 = arith.mulf %467, %186 : vector<8x1xf32>
      %554 = arith.addf %552, %553 : vector<8x1xf32>
      %555 = arith.mulf %473, %197 : vector<8x1xf32>
      %556 = arith.addf %554, %555 : vector<8x1xf32>
      %557 = arith.subf %arg19, %556 : vector<8x1xf32>
      %558 = arith.mulf %461, %208 : vector<8x1xf32>
      %559 = arith.mulf %467, %219 : vector<8x1xf32>
      %560 = arith.addf %558, %559 : vector<8x1xf32>
      %561 = arith.mulf %473, %230 : vector<8x1xf32>
      %562 = arith.addf %560, %561 : vector<8x1xf32>
      %563 = arith.subf %arg20, %562 : vector<8x1xf32>
      %564 = arith.mulf %461, %241 : vector<8x1xf32>
      %565 = arith.mulf %467, %252 : vector<8x1xf32>
      %566 = arith.addf %564, %565 : vector<8x1xf32>
      %567 = arith.mulf %473, %263 : vector<8x1xf32>
      %568 = arith.addf %566, %567 : vector<8x1xf32>
      %569 = arith.subf %arg21, %568 : vector<8x1xf32>
      %570 = arith.mulf %461, %274 : vector<8x1xf32>
      %571 = arith.mulf %467, %285 : vector<8x1xf32>
      %572 = arith.addf %570, %571 : vector<8x1xf32>
      %573 = arith.mulf %473, %296 : vector<8x1xf32>
      %574 = arith.addf %572, %573 : vector<8x1xf32>
      %575 = arith.subf %arg22, %574 : vector<8x1xf32>
      %576 = arith.mulf %479, %208 : vector<8x1xf32>
      %577 = arith.mulf %485, %219 : vector<8x1xf32>
      %578 = arith.addf %576, %577 : vector<8x1xf32>
      %579 = arith.mulf %491, %230 : vector<8x1xf32>
      %580 = arith.addf %578, %579 : vector<8x1xf32>
      %581 = arith.subf %arg23, %580 : vector<8x1xf32>
      %582 = arith.mulf %479, %241 : vector<8x1xf32>
      %583 = arith.mulf %485, %252 : vector<8x1xf32>
      %584 = arith.addf %582, %583 : vector<8x1xf32>
      %585 = arith.mulf %491, %263 : vector<8x1xf32>
      %586 = arith.addf %584, %585 : vector<8x1xf32>
      %587 = arith.subf %arg24, %586 : vector<8x1xf32>
      %588 = arith.mulf %479, %274 : vector<8x1xf32>
      %589 = arith.mulf %485, %285 : vector<8x1xf32>
      %590 = arith.addf %588, %589 : vector<8x1xf32>
      %591 = arith.mulf %491, %296 : vector<8x1xf32>
      %592 = arith.addf %590, %591 : vector<8x1xf32>
      %593 = arith.subf %arg25, %592 : vector<8x1xf32>
      %594 = arith.mulf %497, %241 : vector<8x1xf32>
      %595 = arith.mulf %503, %252 : vector<8x1xf32>
      %596 = arith.addf %594, %595 : vector<8x1xf32>
      %597 = arith.mulf %509, %263 : vector<8x1xf32>
      %598 = arith.addf %596, %597 : vector<8x1xf32>
      %599 = arith.subf %arg26, %598 : vector<8x1xf32>
      %600 = arith.mulf %497, %274 : vector<8x1xf32>
      %601 = arith.mulf %503, %285 : vector<8x1xf32>
      %602 = arith.addf %600, %601 : vector<8x1xf32>
      %603 = arith.mulf %509, %296 : vector<8x1xf32>
      %604 = arith.addf %602, %603 : vector<8x1xf32>
      %605 = arith.subf %arg27, %604 : vector<8x1xf32>
      %606 = arith.mulf %515, %274 : vector<8x1xf32>
      %607 = arith.mulf %521, %285 : vector<8x1xf32>
      %608 = arith.addf %606, %607 : vector<8x1xf32>
      %609 = arith.mulf %527, %296 : vector<8x1xf32>
      %610 = arith.addf %608, %609 : vector<8x1xf32>
      %611 = arith.subf %arg28, %610 : vector<8x1xf32>
      %612 = vector.broadcast %3 : f32 to vector<8x1xf32>
      %613 = arith.mulf %612, %533 : vector<8x1xf32>
      %614 = vector.broadcast %4 : f32 to vector<8x1xf32>
      %615 = arith.mulf %614, %539 : vector<8x1xf32>
      %616 = arith.addf %613, %615 : vector<8x1xf32>
      %617 = vector.broadcast %5 : f32 to vector<8x1xf32>
      %618 = arith.mulf %617, %545 : vector<8x1xf32>
      %619 = arith.addf %616, %618 : vector<8x1xf32>
      %620 = vector.broadcast %6 : f32 to vector<8x1xf32>
      %621 = arith.mulf %620, %551 : vector<8x1xf32>
      %622 = arith.addf %619, %621 : vector<8x1xf32>
      %623 = vector.broadcast %7 : f32 to vector<8x1xf32>
      %624 = arith.mulf %623, %533 : vector<8x1xf32>
      %625 = vector.broadcast %8 : f32 to vector<8x1xf32>
      %626 = arith.mulf %625, %539 : vector<8x1xf32>
      %627 = arith.addf %624, %626 : vector<8x1xf32>
      %628 = vector.broadcast %9 : f32 to vector<8x1xf32>
      %629 = arith.mulf %628, %545 : vector<8x1xf32>
      %630 = arith.addf %627, %629 : vector<8x1xf32>
      %631 = vector.broadcast %10 : f32 to vector<8x1xf32>
      %632 = arith.mulf %631, %551 : vector<8x1xf32>
      %633 = arith.addf %630, %632 : vector<8x1xf32>
      %634 = vector.broadcast %11 : f32 to vector<8x1xf32>
      %635 = arith.mulf %634, %533 : vector<8x1xf32>
      %636 = vector.broadcast %12 : f32 to vector<8x1xf32>
      %637 = arith.mulf %636, %539 : vector<8x1xf32>
      %638 = arith.addf %635, %637 : vector<8x1xf32>
      %639 = vector.broadcast %13 : f32 to vector<8x1xf32>
      %640 = arith.mulf %639, %545 : vector<8x1xf32>
      %641 = arith.addf %638, %640 : vector<8x1xf32>
      %642 = vector.broadcast %14 : f32 to vector<8x1xf32>
      %643 = arith.mulf %642, %551 : vector<8x1xf32>
      %644 = arith.addf %641, %643 : vector<8x1xf32>
      %645 = vector.broadcast %15 : f32 to vector<8x1xf32>
      %646 = arith.mulf %645, %533 : vector<8x1xf32>
      %647 = vector.broadcast %16 : f32 to vector<8x1xf32>
      %648 = arith.mulf %647, %539 : vector<8x1xf32>
      %649 = arith.addf %646, %648 : vector<8x1xf32>
      %650 = vector.broadcast %17 : f32 to vector<8x1xf32>
      %651 = arith.mulf %650, %545 : vector<8x1xf32>
      %652 = arith.addf %649, %651 : vector<8x1xf32>
      %653 = vector.broadcast %18 : f32 to vector<8x1xf32>
      %654 = arith.mulf %653, %551 : vector<8x1xf32>
      %655 = arith.addf %652, %654 : vector<8x1xf32>
      %656 = vector.broadcast %3 : f32 to vector<8x1xf32>
      %657 = arith.mulf %656, %557 : vector<8x1xf32>
      %658 = vector.broadcast %4 : f32 to vector<8x1xf32>
      %659 = arith.mulf %658, %563 : vector<8x1xf32>
      %660 = arith.addf %657, %659 : vector<8x1xf32>
      %661 = vector.broadcast %5 : f32 to vector<8x1xf32>
      %662 = arith.mulf %661, %569 : vector<8x1xf32>
      %663 = arith.addf %660, %662 : vector<8x1xf32>
      %664 = vector.broadcast %6 : f32 to vector<8x1xf32>
      %665 = arith.mulf %664, %575 : vector<8x1xf32>
      %666 = arith.addf %663, %665 : vector<8x1xf32>
      %667 = vector.broadcast %3 : f32 to vector<8x1xf32>
      %668 = arith.mulf %667, %563 : vector<8x1xf32>
      %669 = vector.broadcast %4 : f32 to vector<8x1xf32>
      %670 = arith.mulf %669, %581 : vector<8x1xf32>
      %671 = arith.addf %668, %670 : vector<8x1xf32>
      %672 = vector.broadcast %5 : f32 to vector<8x1xf32>
      %673 = arith.mulf %672, %587 : vector<8x1xf32>
      %674 = arith.addf %671, %673 : vector<8x1xf32>
      %675 = vector.broadcast %6 : f32 to vector<8x1xf32>
      %676 = arith.mulf %675, %593 : vector<8x1xf32>
      %677 = arith.addf %674, %676 : vector<8x1xf32>
      %678 = vector.broadcast %3 : f32 to vector<8x1xf32>
      %679 = arith.mulf %678, %569 : vector<8x1xf32>
      %680 = vector.broadcast %4 : f32 to vector<8x1xf32>
      %681 = arith.mulf %680, %587 : vector<8x1xf32>
      %682 = arith.addf %679, %681 : vector<8x1xf32>
      %683 = vector.broadcast %5 : f32 to vector<8x1xf32>
      %684 = arith.mulf %683, %599 : vector<8x1xf32>
      %685 = arith.addf %682, %684 : vector<8x1xf32>
      %686 = vector.broadcast %6 : f32 to vector<8x1xf32>
      %687 = arith.mulf %686, %605 : vector<8x1xf32>
      %688 = arith.addf %685, %687 : vector<8x1xf32>
      %689 = vector.broadcast %3 : f32 to vector<8x1xf32>
      %690 = arith.mulf %689, %575 : vector<8x1xf32>
      %691 = vector.broadcast %4 : f32 to vector<8x1xf32>
      %692 = arith.mulf %691, %593 : vector<8x1xf32>
      %693 = arith.addf %690, %692 : vector<8x1xf32>
      %694 = vector.broadcast %5 : f32 to vector<8x1xf32>
      %695 = arith.mulf %694, %605 : vector<8x1xf32>
      %696 = arith.addf %693, %695 : vector<8x1xf32>
      %697 = vector.broadcast %6 : f32 to vector<8x1xf32>
      %698 = arith.mulf %697, %611 : vector<8x1xf32>
      %699 = arith.addf %696, %698 : vector<8x1xf32>
      %700 = vector.broadcast %7 : f32 to vector<8x1xf32>
      %701 = arith.mulf %700, %557 : vector<8x1xf32>
      %702 = vector.broadcast %8 : f32 to vector<8x1xf32>
      %703 = arith.mulf %702, %563 : vector<8x1xf32>
      %704 = arith.addf %701, %703 : vector<8x1xf32>
      %705 = vector.broadcast %9 : f32 to vector<8x1xf32>
      %706 = arith.mulf %705, %569 : vector<8x1xf32>
      %707 = arith.addf %704, %706 : vector<8x1xf32>
      %708 = vector.broadcast %10 : f32 to vector<8x1xf32>
      %709 = arith.mulf %708, %575 : vector<8x1xf32>
      %710 = arith.addf %707, %709 : vector<8x1xf32>
      %711 = vector.broadcast %7 : f32 to vector<8x1xf32>
      %712 = arith.mulf %711, %563 : vector<8x1xf32>
      %713 = vector.broadcast %8 : f32 to vector<8x1xf32>
      %714 = arith.mulf %713, %581 : vector<8x1xf32>
      %715 = arith.addf %712, %714 : vector<8x1xf32>
      %716 = vector.broadcast %9 : f32 to vector<8x1xf32>
      %717 = arith.mulf %716, %587 : vector<8x1xf32>
      %718 = arith.addf %715, %717 : vector<8x1xf32>
      %719 = vector.broadcast %10 : f32 to vector<8x1xf32>
      %720 = arith.mulf %719, %593 : vector<8x1xf32>
      %721 = arith.addf %718, %720 : vector<8x1xf32>
      %722 = vector.broadcast %7 : f32 to vector<8x1xf32>
      %723 = arith.mulf %722, %569 : vector<8x1xf32>
      %724 = vector.broadcast %8 : f32 to vector<8x1xf32>
      %725 = arith.mulf %724, %587 : vector<8x1xf32>
      %726 = arith.addf %723, %725 : vector<8x1xf32>
      %727 = vector.broadcast %9 : f32 to vector<8x1xf32>
      %728 = arith.mulf %727, %599 : vector<8x1xf32>
      %729 = arith.addf %726, %728 : vector<8x1xf32>
      %730 = vector.broadcast %10 : f32 to vector<8x1xf32>
      %731 = arith.mulf %730, %605 : vector<8x1xf32>
      %732 = arith.addf %729, %731 : vector<8x1xf32>
      %733 = vector.broadcast %7 : f32 to vector<8x1xf32>
      %734 = arith.mulf %733, %575 : vector<8x1xf32>
      %735 = vector.broadcast %8 : f32 to vector<8x1xf32>
      %736 = arith.mulf %735, %593 : vector<8x1xf32>
      %737 = arith.addf %734, %736 : vector<8x1xf32>
      %738 = vector.broadcast %9 : f32 to vector<8x1xf32>
      %739 = arith.mulf %738, %605 : vector<8x1xf32>
      %740 = arith.addf %737, %739 : vector<8x1xf32>
      %741 = vector.broadcast %10 : f32 to vector<8x1xf32>
      %742 = arith.mulf %741, %611 : vector<8x1xf32>
      %743 = arith.addf %740, %742 : vector<8x1xf32>
      %744 = vector.broadcast %11 : f32 to vector<8x1xf32>
      %745 = arith.mulf %744, %557 : vector<8x1xf32>
      %746 = vector.broadcast %12 : f32 to vector<8x1xf32>
      %747 = arith.mulf %746, %563 : vector<8x1xf32>
      %748 = arith.addf %745, %747 : vector<8x1xf32>
      %749 = vector.broadcast %13 : f32 to vector<8x1xf32>
      %750 = arith.mulf %749, %569 : vector<8x1xf32>
      %751 = arith.addf %748, %750 : vector<8x1xf32>
      %752 = vector.broadcast %14 : f32 to vector<8x1xf32>
      %753 = arith.mulf %752, %575 : vector<8x1xf32>
      %754 = arith.addf %751, %753 : vector<8x1xf32>
      %755 = vector.broadcast %11 : f32 to vector<8x1xf32>
      %756 = arith.mulf %755, %563 : vector<8x1xf32>
      %757 = vector.broadcast %12 : f32 to vector<8x1xf32>
      %758 = arith.mulf %757, %581 : vector<8x1xf32>
      %759 = arith.addf %756, %758 : vector<8x1xf32>
      %760 = vector.broadcast %13 : f32 to vector<8x1xf32>
      %761 = arith.mulf %760, %587 : vector<8x1xf32>
      %762 = arith.addf %759, %761 : vector<8x1xf32>
      %763 = vector.broadcast %14 : f32 to vector<8x1xf32>
      %764 = arith.mulf %763, %593 : vector<8x1xf32>
      %765 = arith.addf %762, %764 : vector<8x1xf32>
      %766 = vector.broadcast %11 : f32 to vector<8x1xf32>
      %767 = arith.mulf %766, %569 : vector<8x1xf32>
      %768 = vector.broadcast %12 : f32 to vector<8x1xf32>
      %769 = arith.mulf %768, %587 : vector<8x1xf32>
      %770 = arith.addf %767, %769 : vector<8x1xf32>
      %771 = vector.broadcast %13 : f32 to vector<8x1xf32>
      %772 = arith.mulf %771, %599 : vector<8x1xf32>
      %773 = arith.addf %770, %772 : vector<8x1xf32>
      %774 = vector.broadcast %14 : f32 to vector<8x1xf32>
      %775 = arith.mulf %774, %605 : vector<8x1xf32>
      %776 = arith.addf %773, %775 : vector<8x1xf32>
      %777 = vector.broadcast %11 : f32 to vector<8x1xf32>
      %778 = arith.mulf %777, %575 : vector<8x1xf32>
      %779 = vector.broadcast %12 : f32 to vector<8x1xf32>
      %780 = arith.mulf %779, %593 : vector<8x1xf32>
      %781 = arith.addf %778, %780 : vector<8x1xf32>
      %782 = vector.broadcast %13 : f32 to vector<8x1xf32>
      %783 = arith.mulf %782, %605 : vector<8x1xf32>
      %784 = arith.addf %781, %783 : vector<8x1xf32>
      %785 = vector.broadcast %14 : f32 to vector<8x1xf32>
      %786 = arith.mulf %785, %611 : vector<8x1xf32>
      %787 = arith.addf %784, %786 : vector<8x1xf32>
      %788 = vector.broadcast %15 : f32 to vector<8x1xf32>
      %789 = arith.mulf %788, %557 : vector<8x1xf32>
      %790 = vector.broadcast %16 : f32 to vector<8x1xf32>
      %791 = arith.mulf %790, %563 : vector<8x1xf32>
      %792 = arith.addf %789, %791 : vector<8x1xf32>
      %793 = vector.broadcast %17 : f32 to vector<8x1xf32>
      %794 = arith.mulf %793, %569 : vector<8x1xf32>
      %795 = arith.addf %792, %794 : vector<8x1xf32>
      %796 = vector.broadcast %18 : f32 to vector<8x1xf32>
      %797 = arith.mulf %796, %575 : vector<8x1xf32>
      %798 = arith.addf %795, %797 : vector<8x1xf32>
      %799 = vector.broadcast %15 : f32 to vector<8x1xf32>
      %800 = arith.mulf %799, %563 : vector<8x1xf32>
      %801 = vector.broadcast %16 : f32 to vector<8x1xf32>
      %802 = arith.mulf %801, %581 : vector<8x1xf32>
      %803 = arith.addf %800, %802 : vector<8x1xf32>
      %804 = vector.broadcast %17 : f32 to vector<8x1xf32>
      %805 = arith.mulf %804, %587 : vector<8x1xf32>
      %806 = arith.addf %803, %805 : vector<8x1xf32>
      %807 = vector.broadcast %18 : f32 to vector<8x1xf32>
      %808 = arith.mulf %807, %593 : vector<8x1xf32>
      %809 = arith.addf %806, %808 : vector<8x1xf32>
      %810 = vector.broadcast %15 : f32 to vector<8x1xf32>
      %811 = arith.mulf %810, %569 : vector<8x1xf32>
      %812 = vector.broadcast %16 : f32 to vector<8x1xf32>
      %813 = arith.mulf %812, %587 : vector<8x1xf32>
      %814 = arith.addf %811, %813 : vector<8x1xf32>
      %815 = vector.broadcast %17 : f32 to vector<8x1xf32>
      %816 = arith.mulf %815, %599 : vector<8x1xf32>
      %817 = arith.addf %814, %816 : vector<8x1xf32>
      %818 = vector.broadcast %18 : f32 to vector<8x1xf32>
      %819 = arith.mulf %818, %605 : vector<8x1xf32>
      %820 = arith.addf %817, %819 : vector<8x1xf32>
      %821 = vector.broadcast %15 : f32 to vector<8x1xf32>
      %822 = arith.mulf %821, %575 : vector<8x1xf32>
      %823 = vector.broadcast %16 : f32 to vector<8x1xf32>
      %824 = arith.mulf %823, %593 : vector<8x1xf32>
      %825 = arith.addf %822, %824 : vector<8x1xf32>
      %826 = vector.broadcast %17 : f32 to vector<8x1xf32>
      %827 = arith.mulf %826, %605 : vector<8x1xf32>
      %828 = arith.addf %825, %827 : vector<8x1xf32>
      %829 = vector.broadcast %18 : f32 to vector<8x1xf32>
      %830 = arith.mulf %829, %611 : vector<8x1xf32>
      %831 = arith.addf %828, %830 : vector<8x1xf32>
      %832 = vector.broadcast %3 : f32 to vector<8x1xf32>
      %833 = arith.mulf %666, %832 : vector<8x1xf32>
      %834 = vector.broadcast %4 : f32 to vector<8x1xf32>
      %835 = arith.mulf %677, %834 : vector<8x1xf32>
      %836 = arith.addf %833, %835 : vector<8x1xf32>
      %837 = vector.broadcast %5 : f32 to vector<8x1xf32>
      %838 = arith.mulf %688, %837 : vector<8x1xf32>
      %839 = arith.addf %836, %838 : vector<8x1xf32>
      %840 = vector.broadcast %6 : f32 to vector<8x1xf32>
      %841 = arith.mulf %699, %840 : vector<8x1xf32>
      %842 = arith.addf %839, %841 : vector<8x1xf32>
      %843 = vector.broadcast %31 : f32 to vector<8x1xf32>
      %844 = arith.addf %842, %843 : vector<8x1xf32>
      %845 = vector.broadcast %7 : f32 to vector<8x1xf32>
      %846 = arith.mulf %666, %845 : vector<8x1xf32>
      %847 = vector.broadcast %8 : f32 to vector<8x1xf32>
      %848 = arith.mulf %677, %847 : vector<8x1xf32>
      %849 = arith.addf %846, %848 : vector<8x1xf32>
      %850 = vector.broadcast %9 : f32 to vector<8x1xf32>
      %851 = arith.mulf %688, %850 : vector<8x1xf32>
      %852 = arith.addf %849, %851 : vector<8x1xf32>
      %853 = vector.broadcast %10 : f32 to vector<8x1xf32>
      %854 = arith.mulf %699, %853 : vector<8x1xf32>
      %855 = arith.addf %852, %854 : vector<8x1xf32>
      %856 = vector.broadcast %11 : f32 to vector<8x1xf32>
      %857 = arith.mulf %666, %856 : vector<8x1xf32>
      %858 = vector.broadcast %12 : f32 to vector<8x1xf32>
      %859 = arith.mulf %677, %858 : vector<8x1xf32>
      %860 = arith.addf %857, %859 : vector<8x1xf32>
      %861 = vector.broadcast %13 : f32 to vector<8x1xf32>
      %862 = arith.mulf %688, %861 : vector<8x1xf32>
      %863 = arith.addf %860, %862 : vector<8x1xf32>
      %864 = vector.broadcast %14 : f32 to vector<8x1xf32>
      %865 = arith.mulf %699, %864 : vector<8x1xf32>
      %866 = arith.addf %863, %865 : vector<8x1xf32>
      %867 = vector.broadcast %15 : f32 to vector<8x1xf32>
      %868 = arith.mulf %666, %867 : vector<8x1xf32>
      %869 = vector.broadcast %16 : f32 to vector<8x1xf32>
      %870 = arith.mulf %677, %869 : vector<8x1xf32>
      %871 = arith.addf %868, %870 : vector<8x1xf32>
      %872 = vector.broadcast %17 : f32 to vector<8x1xf32>
      %873 = arith.mulf %688, %872 : vector<8x1xf32>
      %874 = arith.addf %871, %873 : vector<8x1xf32>
      %875 = vector.broadcast %18 : f32 to vector<8x1xf32>
      %876 = arith.mulf %699, %875 : vector<8x1xf32>
      %877 = arith.addf %874, %876 : vector<8x1xf32>
      %878 = vector.broadcast %7 : f32 to vector<8x1xf32>
      %879 = arith.mulf %710, %878 : vector<8x1xf32>
      %880 = vector.broadcast %8 : f32 to vector<8x1xf32>
      %881 = arith.mulf %721, %880 : vector<8x1xf32>
      %882 = arith.addf %879, %881 : vector<8x1xf32>
      %883 = vector.broadcast %9 : f32 to vector<8x1xf32>
      %884 = arith.mulf %732, %883 : vector<8x1xf32>
      %885 = arith.addf %882, %884 : vector<8x1xf32>
      %886 = vector.broadcast %10 : f32 to vector<8x1xf32>
      %887 = arith.mulf %743, %886 : vector<8x1xf32>
      %888 = arith.addf %885, %887 : vector<8x1xf32>
      %889 = vector.broadcast %32 : f32 to vector<8x1xf32>
      %890 = arith.addf %888, %889 : vector<8x1xf32>
      %891 = vector.broadcast %11 : f32 to vector<8x1xf32>
      %892 = arith.mulf %710, %891 : vector<8x1xf32>
      %893 = vector.broadcast %12 : f32 to vector<8x1xf32>
      %894 = arith.mulf %721, %893 : vector<8x1xf32>
      %895 = arith.addf %892, %894 : vector<8x1xf32>
      %896 = vector.broadcast %13 : f32 to vector<8x1xf32>
      %897 = arith.mulf %732, %896 : vector<8x1xf32>
      %898 = arith.addf %895, %897 : vector<8x1xf32>
      %899 = vector.broadcast %14 : f32 to vector<8x1xf32>
      %900 = arith.mulf %743, %899 : vector<8x1xf32>
      %901 = arith.addf %898, %900 : vector<8x1xf32>
      %902 = vector.broadcast %15 : f32 to vector<8x1xf32>
      %903 = arith.mulf %710, %902 : vector<8x1xf32>
      %904 = vector.broadcast %16 : f32 to vector<8x1xf32>
      %905 = arith.mulf %721, %904 : vector<8x1xf32>
      %906 = arith.addf %903, %905 : vector<8x1xf32>
      %907 = vector.broadcast %17 : f32 to vector<8x1xf32>
      %908 = arith.mulf %732, %907 : vector<8x1xf32>
      %909 = arith.addf %906, %908 : vector<8x1xf32>
      %910 = vector.broadcast %18 : f32 to vector<8x1xf32>
      %911 = arith.mulf %743, %910 : vector<8x1xf32>
      %912 = arith.addf %909, %911 : vector<8x1xf32>
      %913 = vector.broadcast %11 : f32 to vector<8x1xf32>
      %914 = arith.mulf %754, %913 : vector<8x1xf32>
      %915 = vector.broadcast %12 : f32 to vector<8x1xf32>
      %916 = arith.mulf %765, %915 : vector<8x1xf32>
      %917 = arith.addf %914, %916 : vector<8x1xf32>
      %918 = vector.broadcast %13 : f32 to vector<8x1xf32>
      %919 = arith.mulf %776, %918 : vector<8x1xf32>
      %920 = arith.addf %917, %919 : vector<8x1xf32>
      %921 = vector.broadcast %14 : f32 to vector<8x1xf32>
      %922 = arith.mulf %787, %921 : vector<8x1xf32>
      %923 = arith.addf %920, %922 : vector<8x1xf32>
      %924 = vector.broadcast %33 : f32 to vector<8x1xf32>
      %925 = arith.addf %923, %924 : vector<8x1xf32>
      %926 = vector.broadcast %15 : f32 to vector<8x1xf32>
      %927 = arith.mulf %754, %926 : vector<8x1xf32>
      %928 = vector.broadcast %16 : f32 to vector<8x1xf32>
      %929 = arith.mulf %765, %928 : vector<8x1xf32>
      %930 = arith.addf %927, %929 : vector<8x1xf32>
      %931 = vector.broadcast %17 : f32 to vector<8x1xf32>
      %932 = arith.mulf %776, %931 : vector<8x1xf32>
      %933 = arith.addf %930, %932 : vector<8x1xf32>
      %934 = vector.broadcast %18 : f32 to vector<8x1xf32>
      %935 = arith.mulf %787, %934 : vector<8x1xf32>
      %936 = arith.addf %933, %935 : vector<8x1xf32>
      %937 = vector.broadcast %15 : f32 to vector<8x1xf32>
      %938 = arith.mulf %798, %937 : vector<8x1xf32>
      %939 = vector.broadcast %16 : f32 to vector<8x1xf32>
      %940 = arith.mulf %809, %939 : vector<8x1xf32>
      %941 = arith.addf %938, %940 : vector<8x1xf32>
      %942 = vector.broadcast %17 : f32 to vector<8x1xf32>
      %943 = arith.mulf %820, %942 : vector<8x1xf32>
      %944 = arith.addf %941, %943 : vector<8x1xf32>
      %945 = vector.broadcast %18 : f32 to vector<8x1xf32>
      %946 = arith.mulf %831, %945 : vector<8x1xf32>
      %947 = arith.addf %944, %946 : vector<8x1xf32>
      %948 = vector.broadcast %34 : f32 to vector<8x1xf32>
      %949 = arith.addf %947, %948 : vector<8x1xf32>
      %950 = arith.index_cast %114 : i32 to index
      %c0_152 = arith.constant 0 : index
      %c0_153 = arith.constant 0 : index
      %c0_154 = arith.constant 0 : index
      %951 = vector.load %arg9[%950, %c0_152, %c0_153, %c0_154] : memref<8x8x8x1xf32, #tpu.memory_space<vmem>>, vector<1x1x8x1xf32>
      %952 = vector.shape_cast %951 : vector<1x1x8x1xf32> to vector<8x1xf32>
      %953 = vector.shape_cast %533 : vector<8x1xf32> to vector<1x1x8x1xf32>
      tpu.vector_store %arg9[%950, %c0_152, %c0_153, %c0_154], %953 {strides = array<i32>} : memref<8x8x8x1xf32, #tpu.memory_space<vmem>>, vector<1x1x8x1xf32>,
      %954 = arith.index_cast %114 : i32 to index
      %c4_155 = arith.constant 4 : index
      %c0_156 = arith.constant 0 : index
      %c0_157 = arith.constant 0 : index
      %955 = vector.load %arg9[%954, %c4_155, %c0_156, %c0_157] : memref<8x8x8x1xf32, #tpu.memory_space<vmem>>, vector<1x1x8x1xf32>
      %956 = vector.shape_cast %955 : vector<1x1x8x1xf32> to vector<8x1xf32>
      %957 = vector.shape_cast %622 : vector<8x1xf32> to vector<1x1x8x1xf32>
      tpu.vector_store %arg9[%954, %c4_155, %c0_156, %c0_157], %957 {strides = array<i32>} : memref<8x8x8x1xf32, #tpu.memory_space<vmem>>, vector<1x1x8x1xf32>,
      %958 = arith.index_cast %114 : i32 to index
      %c1_158 = arith.constant 1 : index
      %c0_159 = arith.constant 0 : index
      %c0_160 = arith.constant 0 : index
      %959 = vector.load %arg9[%958, %c1_158, %c0_159, %c0_160] : memref<8x8x8x1xf32, #tpu.memory_space<vmem>>, vector<1x1x8x1xf32>
      %960 = vector.shape_cast %959 : vector<1x1x8x1xf32> to vector<8x1xf32>
      %961 = vector.shape_cast %539 : vector<8x1xf32> to vector<1x1x8x1xf32>
      tpu.vector_store %arg9[%958, %c1_158, %c0_159, %c0_160], %961 {strides = array<i32>} : memref<8x8x8x1xf32, #tpu.memory_space<vmem>>, vector<1x1x8x1xf32>,
      %962 = arith.index_cast %114 : i32 to index
      %c5_161 = arith.constant 5 : index
      %c0_162 = arith.constant 0 : index
      %c0_163 = arith.constant 0 : index
      %963 = vector.load %arg9[%962, %c5_161, %c0_162, %c0_163] : memref<8x8x8x1xf32, #tpu.memory_space<vmem>>, vector<1x1x8x1xf32>
      %964 = vector.shape_cast %963 : vector<1x1x8x1xf32> to vector<8x1xf32>
      %965 = vector.shape_cast %633 : vector<8x1xf32> to vector<1x1x8x1xf32>
      tpu.vector_store %arg9[%962, %c5_161, %c0_162, %c0_163], %965 {strides = array<i32>} : memref<8x8x8x1xf32, #tpu.memory_space<vmem>>, vector<1x1x8x1xf32>,
      %966 = arith.index_cast %114 : i32 to index
      %c2_164 = arith.constant 2 : index
      %c0_165 = arith.constant 0 : index
      %c0_166 = arith.constant 0 : index
      %967 = vector.load %arg9[%966, %c2_164, %c0_165, %c0_166] : memref<8x8x8x1xf32, #tpu.memory_space<vmem>>, vector<1x1x8x1xf32>
      %968 = vector.shape_cast %967 : vector<1x1x8x1xf32> to vector<8x1xf32>
      %969 = vector.shape_cast %545 : vector<8x1xf32> to vector<1x1x8x1xf32>
      tpu.vector_store %arg9[%966, %c2_164, %c0_165, %c0_166], %969 {strides = array<i32>} : memref<8x8x8x1xf32, #tpu.memory_space<vmem>>, vector<1x1x8x1xf32>,
      %970 = arith.index_cast %114 : i32 to index
      %c6_167 = arith.constant 6 : index
      %c0_168 = arith.constant 0 : index
      %c0_169 = arith.constant 0 : index
      %971 = vector.load %arg9[%970, %c6_167, %c0_168, %c0_169] : memref<8x8x8x1xf32, #tpu.memory_space<vmem>>, vector<1x1x8x1xf32>
      %972 = vector.shape_cast %971 : vector<1x1x8x1xf32> to vector<8x1xf32>
      %973 = vector.shape_cast %644 : vector<8x1xf32> to vector<1x1x8x1xf32>
      tpu.vector_store %arg9[%970, %c6_167, %c0_168, %c0_169], %973 {strides = array<i32>} : memref<8x8x8x1xf32, #tpu.memory_space<vmem>>, vector<1x1x8x1xf32>,
      %974 = arith.index_cast %114 : i32 to index
      %c3_170 = arith.constant 3 : index
      %c0_171 = arith.constant 0 : index
      %c0_172 = arith.constant 0 : index
      %975 = vector.load %arg9[%974, %c3_170, %c0_171, %c0_172] : memref<8x8x8x1xf32, #tpu.memory_space<vmem>>, vector<1x1x8x1xf32>
      %976 = vector.shape_cast %975 : vector<1x1x8x1xf32> to vector<8x1xf32>
      %977 = vector.shape_cast %551 : vector<8x1xf32> to vector<1x1x8x1xf32>
      tpu.vector_store %arg9[%974, %c3_170, %c0_171, %c0_172], %977 {strides = array<i32>} : memref<8x8x8x1xf32, #tpu.memory_space<vmem>>, vector<1x1x8x1xf32>,
      %978 = arith.index_cast %114 : i32 to index
      %c7_173 = arith.constant 7 : index
      %c0_174 = arith.constant 0 : index
      %c0_175 = arith.constant 0 : index
      %979 = vector.load %arg9[%978, %c7_173, %c0_174, %c0_175] : memref<8x8x8x1xf32, #tpu.memory_space<vmem>>, vector<1x1x8x1xf32>
      %980 = vector.shape_cast %979 : vector<1x1x8x1xf32> to vector<8x1xf32>
      %981 = vector.shape_cast %655 : vector<8x1xf32> to vector<1x1x8x1xf32>
      tpu.vector_store %arg9[%978, %c7_173, %c0_174, %c0_175], %981 {strides = array<i32>} : memref<8x8x8x1xf32, #tpu.memory_space<vmem>>, vector<1x1x8x1xf32>,
      %982 = arith.index_cast %114 : i32 to index
      %c0_176 = arith.constant 0 : index
      %c0_177 = arith.constant 0 : index
      %c0_178 = arith.constant 0 : index
      %983 = vector.load %arg11[%982, %c0_176, %c0_177, %c0_178] : memref<8x16x8x1xf32, #tpu.memory_space<vmem>>, vector<1x1x8x1xf32>
      %984 = vector.shape_cast %983 : vector<1x1x8x1xf32> to vector<8x1xf32>
      %985 = vector.shape_cast %557 : vector<8x1xf32> to vector<1x1x8x1xf32>
      tpu.vector_store %arg11[%982, %c0_176, %c0_177, %c0_178], %985 {strides = array<i32>} : memref<8x16x8x1xf32, #tpu.memory_space<vmem>>, vector<1x1x8x1xf32>,
      %986 = arith.index_cast %114 : i32 to index
      %c0_179 = arith.constant 0 : index
      %c0_180 = arith.constant 0 : index
      %c0_181 = arith.constant 0 : index
      %987 = vector.load %arg10[%986, %c0_179, %c0_180, %c0_181] : memref<8x16x8x1xf32, #tpu.memory_space<vmem>>, vector<1x1x8x1xf32>
      %988 = vector.shape_cast %987 : vector<1x1x8x1xf32> to vector<8x1xf32>
      %989 = vector.shape_cast %844 : vector<8x1xf32> to vector<1x1x8x1xf32>
      tpu.vector_store %arg10[%986, %c0_179, %c0_180, %c0_181], %989 {strides = array<i32>} : memref<8x16x8x1xf32, #tpu.memory_space<vmem>>, vector<1x1x8x1xf32>,
      %990 = arith.index_cast %114 : i32 to index
      %c1_182 = arith.constant 1 : index
      %c0_183 = arith.constant 0 : index
      %c0_184 = arith.constant 0 : index
      %991 = vector.load %arg11[%990, %c1_182, %c0_183, %c0_184] : memref<8x16x8x1xf32, #tpu.memory_space<vmem>>, vector<1x1x8x1xf32>
      %992 = vector.shape_cast %991 : vector<1x1x8x1xf32> to vector<8x1xf32>
      %993 = vector.shape_cast %563 : vector<8x1xf32> to vector<1x1x8x1xf32>
      tpu.vector_store %arg11[%990, %c1_182, %c0_183, %c0_184], %993 {strides = array<i32>} : memref<8x16x8x1xf32, #tpu.memory_space<vmem>>, vector<1x1x8x1xf32>,
      %994 = arith.index_cast %114 : i32 to index
      %c1_185 = arith.constant 1 : index
      %c0_186 = arith.constant 0 : index
      %c0_187 = arith.constant 0 : index
      %995 = vector.load %arg10[%994, %c1_185, %c0_186, %c0_187] : memref<8x16x8x1xf32, #tpu.memory_space<vmem>>, vector<1x1x8x1xf32>
      %996 = vector.shape_cast %995 : vector<1x1x8x1xf32> to vector<8x1xf32>
      %997 = vector.shape_cast %855 : vector<8x1xf32> to vector<1x1x8x1xf32>
      tpu.vector_store %arg10[%994, %c1_185, %c0_186, %c0_187], %997 {strides = array<i32>} : memref<8x16x8x1xf32, #tpu.memory_space<vmem>>, vector<1x1x8x1xf32>,
      %998 = arith.index_cast %114 : i32 to index
      %c2_188 = arith.constant 2 : index
      %c0_189 = arith.constant 0 : index
      %c0_190 = arith.constant 0 : index
      %999 = vector.load %arg11[%998, %c2_188, %c0_189, %c0_190] : memref<8x16x8x1xf32, #tpu.memory_space<vmem>>, vector<1x1x8x1xf32>
      %1000 = vector.shape_cast %999 : vector<1x1x8x1xf32> to vector<8x1xf32>
      %1001 = vector.shape_cast %569 : vector<8x1xf32> to vector<1x1x8x1xf32>
      tpu.vector_store %arg11[%998, %c2_188, %c0_189, %c0_190], %1001 {strides = array<i32>} : memref<8x16x8x1xf32, #tpu.memory_space<vmem>>, vector<1x1x8x1xf32>,
      %1002 = arith.index_cast %114 : i32 to index
      %c2_191 = arith.constant 2 : index
      %c0_192 = arith.constant 0 : index
      %c0_193 = arith.constant 0 : index
      %1003 = vector.load %arg10[%1002, %c2_191, %c0_192, %c0_193] : memref<8x16x8x1xf32, #tpu.memory_space<vmem>>, vector<1x1x8x1xf32>
      %1004 = vector.shape_cast %1003 : vector<1x1x8x1xf32> to vector<8x1xf32>
      %1005 = vector.shape_cast %866 : vector<8x1xf32> to vector<1x1x8x1xf32>
      tpu.vector_store %arg10[%1002, %c2_191, %c0_192, %c0_193], %1005 {strides = array<i32>} : memref<8x16x8x1xf32, #tpu.memory_space<vmem>>, vector<1x1x8x1xf32>,
      %1006 = arith.index_cast %114 : i32 to index
      %c3_194 = arith.constant 3 : index
      %c0_195 = arith.constant 0 : index
      %c0_196 = arith.constant 0 : index
      %1007 = vector.load %arg11[%1006, %c3_194, %c0_195, %c0_196] : memref<8x16x8x1xf32, #tpu.memory_space<vmem>>, vector<1x1x8x1xf32>
      %1008 = vector.shape_cast %1007 : vector<1x1x8x1xf32> to vector<8x1xf32>
      %1009 = vector.shape_cast %575 : vector<8x1xf32> to vector<1x1x8x1xf32>
      tpu.vector_store %arg11[%1006, %c3_194, %c0_195, %c0_196], %1009 {strides = array<i32>} : memref<8x16x8x1xf32, #tpu.memory_space<vmem>>, vector<1x1x8x1xf32>,
      %1010 = arith.index_cast %114 : i32 to index
      %c3_197 = arith.constant 3 : index
      %c0_198 = arith.constant 0 : index
      %c0_199 = arith.constant 0 : index
      %1011 = vector.load %arg10[%1010, %c3_197, %c0_198, %c0_199] : memref<8x16x8x1xf32, #tpu.memory_space<vmem>>, vector<1x1x8x1xf32>
      %1012 = vector.shape_cast %1011 : vector<1x1x8x1xf32> to vector<8x1xf32>
      %1013 = vector.shape_cast %877 : vector<8x1xf32> to vector<1x1x8x1xf32>
      tpu.vector_store %arg10[%1010, %c3_197, %c0_198, %c0_199], %1013 {strides = array<i32>} : memref<8x16x8x1xf32, #tpu.memory_space<vmem>>, vector<1x1x8x1xf32>,
      %1014 = arith.index_cast %114 : i32 to index
      %c4_200 = arith.constant 4 : index
      %c0_201 = arith.constant 0 : index
      %c0_202 = arith.constant 0 : index
      %1015 = vector.load %arg11[%1014, %c4_200, %c0_201, %c0_202] : memref<8x16x8x1xf32, #tpu.memory_space<vmem>>, vector<1x1x8x1xf32>
      %1016 = vector.shape_cast %1015 : vector<1x1x8x1xf32> to vector<8x1xf32>
      %1017 = vector.shape_cast %563 : vector<8x1xf32> to vector<1x1x8x1xf32>
      tpu.vector_store %arg11[%1014, %c4_200, %c0_201, %c0_202], %1017 {strides = array<i32>} : memref<8x16x8x1xf32, #tpu.memory_space<vmem>>, vector<1x1x8x1xf32>,
      %1018 = arith.index_cast %114 : i32 to index
      %c4_203 = arith.constant 4 : index
      %c0_204 = arith.constant 0 : index
      %c0_205 = arith.constant 0 : index
      %1019 = vector.load %arg10[%1018, %c4_203, %c0_204, %c0_205] : memref<8x16x8x1xf32, #tpu.memory_space<vmem>>, vector<1x1x8x1xf32>
      %1020 = vector.shape_cast %1019 : vector<1x1x8x1xf32> to vector<8x1xf32>
      %1021 = vector.shape_cast %855 : vector<8x1xf32> to vector<1x1x8x1xf32>
      tpu.vector_store %arg10[%1018, %c4_203, %c0_204, %c0_205], %1021 {strides = array<i32>} : memref<8x16x8x1xf32, #tpu.memory_space<vmem>>, vector<1x1x8x1xf32>,
      %1022 = arith.index_cast %114 : i32 to index
      %c5_206 = arith.constant 5 : index
      %c0_207 = arith.constant 0 : index
      %c0_208 = arith.constant 0 : index
      %1023 = vector.load %arg11[%1022, %c5_206, %c0_207, %c0_208] : memref<8x16x8x1xf32, #tpu.memory_space<vmem>>, vector<1x1x8x1xf32>
      %1024 = vector.shape_cast %1023 : vector<1x1x8x1xf32> to vector<8x1xf32>
      %1025 = vector.shape_cast %581 : vector<8x1xf32> to vector<1x1x8x1xf32>
      tpu.vector_store %arg11[%1022, %c5_206, %c0_207, %c0_208], %1025 {strides = array<i32>} : memref<8x16x8x1xf32, #tpu.memory_space<vmem>>, vector<1x1x8x1xf32>,
      %1026 = arith.index_cast %114 : i32 to index
      %c5_209 = arith.constant 5 : index
      %c0_210 = arith.constant 0 : index
      %c0_211 = arith.constant 0 : index
      %1027 = vector.load %arg10[%1026, %c5_209, %c0_210, %c0_211] : memref<8x16x8x1xf32, #tpu.memory_space<vmem>>, vector<1x1x8x1xf32>
      %1028 = vector.shape_cast %1027 : vector<1x1x8x1xf32> to vector<8x1xf32>
      %1029 = vector.shape_cast %890 : vector<8x1xf32> to vector<1x1x8x1xf32>
      tpu.vector_store %arg10[%1026, %c5_209, %c0_210, %c0_211], %1029 {strides = array<i32>} : memref<8x16x8x1xf32, #tpu.memory_space<vmem>>, vector<1x1x8x1xf32>,
      %1030 = arith.index_cast %114 : i32 to index
      %c6_212 = arith.constant 6 : index
      %c0_213 = arith.constant 0 : index
      %c0_214 = arith.constant 0 : index
      %1031 = vector.load %arg11[%1030, %c6_212, %c0_213, %c0_214] : memref<8x16x8x1xf32, #tpu.memory_space<vmem>>, vector<1x1x8x1xf32>
      %1032 = vector.shape_cast %1031 : vector<1x1x8x1xf32> to vector<8x1xf32>
      %1033 = vector.shape_cast %587 : vector<8x1xf32> to vector<1x1x8x1xf32>
      tpu.vector_store %arg11[%1030, %c6_212, %c0_213, %c0_214], %1033 {strides = array<i32>} : memref<8x16x8x1xf32, #tpu.memory_space<vmem>>, vector<1x1x8x1xf32>,
      %1034 = arith.index_cast %114 : i32 to index
      %c6_215 = arith.constant 6 : index
      %c0_216 = arith.constant 0 : index
      %c0_217 = arith.constant 0 : index
      %1035 = vector.load %arg10[%1034, %c6_215, %c0_216, %c0_217] : memref<8x16x8x1xf32, #tpu.memory_space<vmem>>, vector<1x1x8x1xf32>
      %1036 = vector.shape_cast %1035 : vector<1x1x8x1xf32> to vector<8x1xf32>
      %1037 = vector.shape_cast %901 : vector<8x1xf32> to vector<1x1x8x1xf32>
      tpu.vector_store %arg10[%1034, %c6_215, %c0_216, %c0_217], %1037 {strides = array<i32>} : memref<8x16x8x1xf32, #tpu.memory_space<vmem>>, vector<1x1x8x1xf32>,
      %1038 = arith.index_cast %114 : i32 to index
      %c7_218 = arith.constant 7 : index
      %c0_219 = arith.constant 0 : index
      %c0_220 = arith.constant 0 : index
      %1039 = vector.load %arg11[%1038, %c7_218, %c0_219, %c0_220] : memref<8x16x8x1xf32, #tpu.memory_space<vmem>>, vector<1x1x8x1xf32>
      %1040 = vector.shape_cast %1039 : vector<1x1x8x1xf32> to vector<8x1xf32>
      %1041 = vector.shape_cast %593 : vector<8x1xf32> to vector<1x1x8x1xf32>
      tpu.vector_store %arg11[%1038, %c7_218, %c0_219, %c0_220], %1041 {strides = array<i32>} : memref<8x16x8x1xf32, #tpu.memory_space<vmem>>, vector<1x1x8x1xf32>,
      %1042 = arith.index_cast %114 : i32 to index
      %c7_221 = arith.constant 7 : index
      %c0_222 = arith.constant 0 : index
      %c0_223 = arith.constant 0 : index
      %1043 = vector.load %arg10[%1042, %c7_221, %c0_222, %c0_223] : memref<8x16x8x1xf32, #tpu.memory_space<vmem>>, vector<1x1x8x1xf32>
      %1044 = vector.shape_cast %1043 : vector<1x1x8x1xf32> to vector<8x1xf32>
      %1045 = vector.shape_cast %912 : vector<8x1xf32> to vector<1x1x8x1xf32>
      tpu.vector_store %arg10[%1042, %c7_221, %c0_222, %c0_223], %1045 {strides = array<i32>} : memref<8x16x8x1xf32, #tpu.memory_space<vmem>>, vector<1x1x8x1xf32>,
      %1046 = arith.index_cast %114 : i32 to index
      %c8_224 = arith.constant 8 : index
      %c0_225 = arith.constant 0 : index
      %c0_226 = arith.constant 0 : index
      %1047 = vector.load %arg11[%1046, %c8_224, %c0_225, %c0_226] : memref<8x16x8x1xf32, #tpu.memory_space<vmem>>, vector<1x1x8x1xf32>
      %1048 = vector.shape_cast %1047 : vector<1x1x8x1xf32> to vector<8x1xf32>
      %1049 = vector.shape_cast %569 : vector<8x1xf32> to vector<1x1x8x1xf32>
      tpu.vector_store %arg11[%1046, %c8_224, %c0_225, %c0_226], %1049 {strides = array<i32>} : memref<8x16x8x1xf32, #tpu.memory_space<vmem>>, vector<1x1x8x1xf32>,
      %1050 = arith.index_cast %114 : i32 to index
      %c8_227 = arith.constant 8 : index
      %c0_228 = arith.constant 0 : index
      %c0_229 = arith.constant 0 : index
      %1051 = vector.load %arg10[%1050, %c8_227, %c0_228, %c0_229] : memref<8x16x8x1xf32, #tpu.memory_space<vmem>>, vector<1x1x8x1xf32>
      %1052 = vector.shape_cast %1051 : vector<1x1x8x1xf32> to vector<8x1xf32>
      %1053 = vector.shape_cast %866 : vector<8x1xf32> to vector<1x1x8x1xf32>
      tpu.vector_store %arg10[%1050, %c8_227, %c0_228, %c0_229], %1053 {strides = array<i32>} : memref<8x16x8x1xf32, #tpu.memory_space<vmem>>, vector<1x1x8x1xf32>,
      %1054 = arith.index_cast %114 : i32 to index
      %c9_230 = arith.constant 9 : index
      %c0_231 = arith.constant 0 : index
      %c0_232 = arith.constant 0 : index
      %1055 = vector.load %arg11[%1054, %c9_230, %c0_231, %c0_232] : memref<8x16x8x1xf32, #tpu.memory_space<vmem>>, vector<1x1x8x1xf32>
      %1056 = vector.shape_cast %1055 : vector<1x1x8x1xf32> to vector<8x1xf32>
      %1057 = vector.shape_cast %587 : vector<8x1xf32> to vector<1x1x8x1xf32>
      tpu.vector_store %arg11[%1054, %c9_230, %c0_231, %c0_232], %1057 {strides = array<i32>} : memref<8x16x8x1xf32, #tpu.memory_space<vmem>>, vector<1x1x8x1xf32>,
      %1058 = arith.index_cast %114 : i32 to index
      %c9_233 = arith.constant 9 : index
      %c0_234 = arith.constant 0 : index
      %c0_235 = arith.constant 0 : index
      %1059 = vector.load %arg10[%1058, %c9_233, %c0_234, %c0_235] : memref<8x16x8x1xf32, #tpu.memory_space<vmem>>, vector<1x1x8x1xf32>
      %1060 = vector.shape_cast %1059 : vector<1x1x8x1xf32> to vector<8x1xf32>
      %1061 = vector.shape_cast %901 : vector<8x1xf32> to vector<1x1x8x1xf32>
      tpu.vector_store %arg10[%1058, %c9_233, %c0_234, %c0_235], %1061 {strides = array<i32>} : memref<8x16x8x1xf32, #tpu.memory_space<vmem>>, vector<1x1x8x1xf32>,
      %1062 = arith.index_cast %114 : i32 to index
      %c10 = arith.constant 10 : index
      %c0_236 = arith.constant 0 : index
      %c0_237 = arith.constant 0 : index
      %1063 = vector.load %arg11[%1062, %c10, %c0_236, %c0_237] : memref<8x16x8x1xf32, #tpu.memory_space<vmem>>, vector<1x1x8x1xf32>
      %1064 = vector.shape_cast %1063 : vector<1x1x8x1xf32> to vector<8x1xf32>
      %1065 = vector.shape_cast %599 : vector<8x1xf32> to vector<1x1x8x1xf32>
      tpu.vector_store %arg11[%1062, %c10, %c0_236, %c0_237], %1065 {strides = array<i32>} : memref<8x16x8x1xf32, #tpu.memory_space<vmem>>, vector<1x1x8x1xf32>,
      %1066 = arith.index_cast %114 : i32 to index
      %c10_238 = arith.constant 10 : index
      %c0_239 = arith.constant 0 : index
      %c0_240 = arith.constant 0 : index
      %1067 = vector.load %arg10[%1066, %c10_238, %c0_239, %c0_240] : memref<8x16x8x1xf32, #tpu.memory_space<vmem>>, vector<1x1x8x1xf32>
      %1068 = vector.shape_cast %1067 : vector<1x1x8x1xf32> to vector<8x1xf32>
      %1069 = vector.shape_cast %925 : vector<8x1xf32> to vector<1x1x8x1xf32>
      tpu.vector_store %arg10[%1066, %c10_238, %c0_239, %c0_240], %1069 {strides = array<i32>} : memref<8x16x8x1xf32, #tpu.memory_space<vmem>>, vector<1x1x8x1xf32>,
      %1070 = arith.index_cast %114 : i32 to index
      %c11 = arith.constant 11 : index
      %c0_241 = arith.constant 0 : index
      %c0_242 = arith.constant 0 : index
      %1071 = vector.load %arg11[%1070, %c11, %c0_241, %c0_242] : memref<8x16x8x1xf32, #tpu.memory_space<vmem>>, vector<1x1x8x1xf32>
      %1072 = vector.shape_cast %1071 : vector<1x1x8x1xf32> to vector<8x1xf32>
      %1073 = vector.shape_cast %605 : vector<8x1xf32> to vector<1x1x8x1xf32>
      tpu.vector_store %arg11[%1070, %c11, %c0_241, %c0_242], %1073 {strides = array<i32>} : memref<8x16x8x1xf32, #tpu.memory_space<vmem>>, vector<1x1x8x1xf32>,
      %1074 = arith.index_cast %114 : i32 to index
      %c11_243 = arith.constant 11 : index
      %c0_244 = arith.constant 0 : index
      %c0_245 = arith.constant 0 : index
      %1075 = vector.load %arg10[%1074, %c11_243, %c0_244, %c0_245] : memref<8x16x8x1xf32, #tpu.memory_space<vmem>>, vector<1x1x8x1xf32>
      %1076 = vector.shape_cast %1075 : vector<1x1x8x1xf32> to vector<8x1xf32>
      %1077 = vector.shape_cast %936 : vector<8x1xf32> to vector<1x1x8x1xf32>
      tpu.vector_store %arg10[%1074, %c11_243, %c0_244, %c0_245], %1077 {strides = array<i32>} : memref<8x16x8x1xf32, #tpu.memory_space<vmem>>, vector<1x1x8x1xf32>,
      %1078 = arith.index_cast %114 : i32 to index
      %c12 = arith.constant 12 : index
      %c0_246 = arith.constant 0 : index
      %c0_247 = arith.constant 0 : index
      %1079 = vector.load %arg11[%1078, %c12, %c0_246, %c0_247] : memref<8x16x8x1xf32, #tpu.memory_space<vmem>>, vector<1x1x8x1xf32>
      %1080 = vector.shape_cast %1079 : vector<1x1x8x1xf32> to vector<8x1xf32>
      %1081 = vector.shape_cast %575 : vector<8x1xf32> to vector<1x1x8x1xf32>
      tpu.vector_store %arg11[%1078, %c12, %c0_246, %c0_247], %1081 {strides = array<i32>} : memref<8x16x8x1xf32, #tpu.memory_space<vmem>>, vector<1x1x8x1xf32>,
      %1082 = arith.index_cast %114 : i32 to index
      %c12_248 = arith.constant 12 : index
      %c0_249 = arith.constant 0 : index
      %c0_250 = arith.constant 0 : index
      %1083 = vector.load %arg10[%1082, %c12_248, %c0_249, %c0_250] : memref<8x16x8x1xf32, #tpu.memory_space<vmem>>, vector<1x1x8x1xf32>
      %1084 = vector.shape_cast %1083 : vector<1x1x8x1xf32> to vector<8x1xf32>
      %1085 = vector.shape_cast %877 : vector<8x1xf32> to vector<1x1x8x1xf32>
      tpu.vector_store %arg10[%1082, %c12_248, %c0_249, %c0_250], %1085 {strides = array<i32>} : memref<8x16x8x1xf32, #tpu.memory_space<vmem>>, vector<1x1x8x1xf32>,
      %1086 = arith.index_cast %114 : i32 to index
      %c13 = arith.constant 13 : index
      %c0_251 = arith.constant 0 : index
      %c0_252 = arith.constant 0 : index
      %1087 = vector.load %arg11[%1086, %c13, %c0_251, %c0_252] : memref<8x16x8x1xf32, #tpu.memory_space<vmem>>, vector<1x1x8x1xf32>
      %1088 = vector.shape_cast %1087 : vector<1x1x8x1xf32> to vector<8x1xf32>
      %1089 = vector.shape_cast %593 : vector<8x1xf32> to vector<1x1x8x1xf32>
      tpu.vector_store %arg11[%1086, %c13, %c0_251, %c0_252], %1089 {strides = array<i32>} : memref<8x16x8x1xf32, #tpu.memory_space<vmem>>, vector<1x1x8x1xf32>,
      %1090 = arith.index_cast %114 : i32 to index
      %c13_253 = arith.constant 13 : index
      %c0_254 = arith.constant 0 : index
      %c0_255 = arith.constant 0 : index
      %1091 = vector.load %arg10[%1090, %c13_253, %c0_254, %c0_255] : memref<8x16x8x1xf32, #tpu.memory_space<vmem>>, vector<1x1x8x1xf32>
      %1092 = vector.shape_cast %1091 : vector<1x1x8x1xf32> to vector<8x1xf32>
      %1093 = vector.shape_cast %912 : vector<8x1xf32> to vector<1x1x8x1xf32>
      tpu.vector_store %arg10[%1090, %c13_253, %c0_254, %c0_255], %1093 {strides = array<i32>} : memref<8x16x8x1xf32, #tpu.memory_space<vmem>>, vector<1x1x8x1xf32>,
      %1094 = arith.index_cast %114 : i32 to index
      %c14 = arith.constant 14 : index
      %c0_256 = arith.constant 0 : index
      %c0_257 = arith.constant 0 : index
      %1095 = vector.load %arg11[%1094, %c14, %c0_256, %c0_257] : memref<8x16x8x1xf32, #tpu.memory_space<vmem>>, vector<1x1x8x1xf32>
      %1096 = vector.shape_cast %1095 : vector<1x1x8x1xf32> to vector<8x1xf32>
      %1097 = vector.shape_cast %605 : vector<8x1xf32> to vector<1x1x8x1xf32>
      tpu.vector_store %arg11[%1094, %c14, %c0_256, %c0_257], %1097 {strides = array<i32>} : memref<8x16x8x1xf32, #tpu.memory_space<vmem>>, vector<1x1x8x1xf32>,
      %1098 = arith.index_cast %114 : i32 to index
      %c14_258 = arith.constant 14 : index
      %c0_259 = arith.constant 0 : index
      %c0_260 = arith.constant 0 : index
      %1099 = vector.load %arg10[%1098, %c14_258, %c0_259, %c0_260] : memref<8x16x8x1xf32, #tpu.memory_space<vmem>>, vector<1x1x8x1xf32>
      %1100 = vector.shape_cast %1099 : vector<1x1x8x1xf32> to vector<8x1xf32>
      %1101 = vector.shape_cast %936 : vector<8x1xf32> to vector<1x1x8x1xf32>
      tpu.vector_store %arg10[%1098, %c14_258, %c0_259, %c0_260], %1101 {strides = array<i32>} : memref<8x16x8x1xf32, #tpu.memory_space<vmem>>, vector<1x1x8x1xf32>,
      %1102 = arith.index_cast %114 : i32 to index
      %c15 = arith.constant 15 : index
      %c0_261 = arith.constant 0 : index
      %c0_262 = arith.constant 0 : index
      %1103 = vector.load %arg11[%1102, %c15, %c0_261, %c0_262] : memref<8x16x8x1xf32, #tpu.memory_space<vmem>>, vector<1x1x8x1xf32>
      %1104 = vector.shape_cast %1103 : vector<1x1x8x1xf32> to vector<8x1xf32>
      %1105 = vector.shape_cast %611 : vector<8x1xf32> to vector<1x1x8x1xf32>
      tpu.vector_store %arg11[%1102, %c15, %c0_261, %c0_262], %1105 {strides = array<i32>} : memref<8x16x8x1xf32, #tpu.memory_space<vmem>>, vector<1x1x8x1xf32>,
      %1106 = arith.index_cast %114 : i32 to index
      %c15_263 = arith.constant 15 : index
      %c0_264 = arith.constant 0 : index
      %c0_265 = arith.constant 0 : index
      %1107 = vector.load %arg10[%1106, %c15_263, %c0_264, %c0_265] : memref<8x16x8x1xf32, #tpu.memory_space<vmem>>, vector<1x1x8x1xf32>
      %1108 = vector.shape_cast %1107 : vector<1x1x8x1xf32> to vector<8x1xf32>
      %1109 = vector.shape_cast %949 : vector<8x1xf32> to vector<1x1x8x1xf32>
      tpu.vector_store %arg10[%1106, %c15_263, %c0_264, %c0_265], %1109 {strides = array<i32>} : memref<8x16x8x1xf32, #tpu.memory_space<vmem>>, vector<1x1x8x1xf32>,
      %1110 = arith.index_cast %113 : i32 to index
      %c0_266 = arith.constant 0 : index
      %c0_267 = arith.constant 0 : index
      %c0_268 = arith.constant 0 : index
      %1111 = vector.load %arg2[%1110, %c0_266, %c0_267, %c0_268] : memref<8x4x8x1xf32, #tpu.memory_space<vmem>>, vector<1x4x8x1xf32>
      %1112 = vector.shape_cast %1111 : vector<1x4x8x1xf32> to vector<4x8x1xf32>
      %1113 = vector.extract_strided_slice %1112 {offsets = [3, 0, 0], sizes = [1, 8, 1], strides = [1, 1, 1]} : vector<4x8x1xf32> to vector<1x8x1xf32>
      %1114 = vector.shape_cast %1113 : vector<1x8x1xf32> to vector<8x1xf32>
      %1115 = vector.extract_strided_slice %1112 {offsets = [0, 0, 0], sizes = [1, 8, 1], strides = [1, 1, 1]} : vector<4x8x1xf32> to vector<1x8x1xf32>
      %1116 = vector.shape_cast %1115 : vector<1x8x1xf32> to vector<8x1xf32>
      %1117 = arith.mulf %1116, %1114 : vector<8x1xf32>
      %1118 = vector.extract_strided_slice %1112 {offsets = [1, 0, 0], sizes = [1, 8, 1], strides = [1, 1, 1]} : vector<4x8x1xf32> to vector<1x8x1xf32>
      %1119 = vector.shape_cast %1118 : vector<1x8x1xf32> to vector<8x1xf32>
      %1120 = arith.mulf %1119, %1114 : vector<8x1xf32>
      %1121 = vector.extract_strided_slice %1112 {offsets = [2, 0, 0], sizes = [1, 8, 1], strides = [1, 1, 1]} : vector<4x8x1xf32> to vector<1x8x1xf32>
      %1122 = vector.shape_cast %1121 : vector<1x8x1xf32> to vector<8x1xf32>
      %1123 = arith.mulf %1122, %1114 : vector<8x1xf32>
      %1124 = vector.broadcast %19 : f32 to vector<8x1xf32>
      %1125 = arith.mulf %1124, %622 : vector<8x1xf32>
      %1126 = vector.broadcast %20 : f32 to vector<8x1xf32>
      %1127 = arith.mulf %1126, %633 : vector<8x1xf32>
      %1128 = arith.addf %1125, %1127 : vector<8x1xf32>
      %1129 = vector.broadcast %21 : f32 to vector<8x1xf32>
      %1130 = arith.mulf %1129, %644 : vector<8x1xf32>
      %1131 = arith.addf %1128, %1130 : vector<8x1xf32>
      %1132 = vector.broadcast %22 : f32 to vector<8x1xf32>
      %1133 = arith.mulf %1132, %655 : vector<8x1xf32>
      %1134 = arith.addf %1131, %1133 : vector<8x1xf32>
      %1135 = arith.subf %1117, %1134 : vector<8x1xf32>
      %1136 = vector.broadcast %23 : f32 to vector<8x1xf32>
      %1137 = arith.mulf %1136, %622 : vector<8x1xf32>
      %1138 = vector.broadcast %24 : f32 to vector<8x1xf32>
      %1139 = arith.mulf %1138, %633 : vector<8x1xf32>
      %1140 = arith.addf %1137, %1139 : vector<8x1xf32>
      %1141 = vector.broadcast %25 : f32 to vector<8x1xf32>
      %1142 = arith.mulf %1141, %644 : vector<8x1xf32>
      %1143 = arith.addf %1140, %1142 : vector<8x1xf32>
      %1144 = vector.broadcast %26 : f32 to vector<8x1xf32>
      %1145 = arith.mulf %1144, %655 : vector<8x1xf32>
      %1146 = arith.addf %1143, %1145 : vector<8x1xf32>
      %1147 = arith.subf %1120, %1146 : vector<8x1xf32>
      %1148 = vector.broadcast %27 : f32 to vector<8x1xf32>
      %1149 = arith.mulf %1148, %622 : vector<8x1xf32>
      %1150 = vector.broadcast %28 : f32 to vector<8x1xf32>
      %1151 = arith.mulf %1150, %633 : vector<8x1xf32>
      %1152 = arith.addf %1149, %1151 : vector<8x1xf32>
      %1153 = vector.broadcast %29 : f32 to vector<8x1xf32>
      %1154 = arith.mulf %1153, %644 : vector<8x1xf32>
      %1155 = arith.addf %1152, %1154 : vector<8x1xf32>
      %1156 = vector.broadcast %30 : f32 to vector<8x1xf32>
      %1157 = arith.mulf %1156, %655 : vector<8x1xf32>
      %1158 = arith.addf %1155, %1157 : vector<8x1xf32>
      %1159 = arith.subf %1123, %1158 : vector<8x1xf32>
      %1160 = vector.broadcast %19 : f32 to vector<8x1xf32>
      %1161 = arith.mulf %1160, %844 : vector<8x1xf32>
      %1162 = vector.broadcast %20 : f32 to vector<8x1xf32>
      %1163 = arith.mulf %1162, %855 : vector<8x1xf32>
      %1164 = arith.addf %1161, %1163 : vector<8x1xf32>
      %1165 = vector.broadcast %21 : f32 to vector<8x1xf32>
      %1166 = arith.mulf %1165, %866 : vector<8x1xf32>
      %1167 = arith.addf %1164, %1166 : vector<8x1xf32>
      %1168 = vector.broadcast %22 : f32 to vector<8x1xf32>
      %1169 = arith.mulf %1168, %877 : vector<8x1xf32>
      %1170 = arith.addf %1167, %1169 : vector<8x1xf32>
      %1171 = vector.broadcast %23 : f32 to vector<8x1xf32>
      %1172 = arith.mulf %1171, %844 : vector<8x1xf32>
      %1173 = vector.broadcast %24 : f32 to vector<8x1xf32>
      %1174 = arith.mulf %1173, %855 : vector<8x1xf32>
      %1175 = arith.addf %1172, %1174 : vector<8x1xf32>
      %1176 = vector.broadcast %25 : f32 to vector<8x1xf32>
      %1177 = arith.mulf %1176, %866 : vector<8x1xf32>
      %1178 = arith.addf %1175, %1177 : vector<8x1xf32>
      %1179 = vector.broadcast %26 : f32 to vector<8x1xf32>
      %1180 = arith.mulf %1179, %877 : vector<8x1xf32>
      %1181 = arith.addf %1178, %1180 : vector<8x1xf32>
      %1182 = vector.broadcast %27 : f32 to vector<8x1xf32>
      %1183 = arith.mulf %1182, %844 : vector<8x1xf32>
      %1184 = vector.broadcast %28 : f32 to vector<8x1xf32>
      %1185 = arith.mulf %1184, %855 : vector<8x1xf32>
      %1186 = arith.addf %1183, %1185 : vector<8x1xf32>
      %1187 = vector.broadcast %29 : f32 to vector<8x1xf32>
      %1188 = arith.mulf %1187, %866 : vector<8x1xf32>
      %1189 = arith.addf %1186, %1188 : vector<8x1xf32>
      %1190 = vector.broadcast %30 : f32 to vector<8x1xf32>
      %1191 = arith.mulf %1190, %877 : vector<8x1xf32>
      %1192 = arith.addf %1189, %1191 : vector<8x1xf32>
      %1193 = vector.broadcast %19 : f32 to vector<8x1xf32>
      %1194 = arith.mulf %1193, %855 : vector<8x1xf32>
      %1195 = vector.broadcast %20 : f32 to vector<8x1xf32>
      %1196 = arith.mulf %1195, %890 : vector<8x1xf32>
      %1197 = arith.addf %1194, %1196 : vector<8x1xf32>
      %1198 = vector.broadcast %21 : f32 to vector<8x1xf32>
      %1199 = arith.mulf %1198, %901 : vector<8x1xf32>
      %1200 = arith.addf %1197, %1199 : vector<8x1xf32>
      %1201 = vector.broadcast %22 : f32 to vector<8x1xf32>
      %1202 = arith.mulf %1201, %912 : vector<8x1xf32>
      %1203 = arith.addf %1200, %1202 : vector<8x1xf32>
      %1204 = vector.broadcast %23 : f32 to vector<8x1xf32>
      %1205 = arith.mulf %1204, %855 : vector<8x1xf32>
      %1206 = vector.broadcast %24 : f32 to vector<8x1xf32>
      %1207 = arith.mulf %1206, %890 : vector<8x1xf32>
      %1208 = arith.addf %1205, %1207 : vector<8x1xf32>
      %1209 = vector.broadcast %25 : f32 to vector<8x1xf32>
      %1210 = arith.mulf %1209, %901 : vector<8x1xf32>
      %1211 = arith.addf %1208, %1210 : vector<8x1xf32>
      %1212 = vector.broadcast %26 : f32 to vector<8x1xf32>
      %1213 = arith.mulf %1212, %912 : vector<8x1xf32>
      %1214 = arith.addf %1211, %1213 : vector<8x1xf32>
      %1215 = vector.broadcast %27 : f32 to vector<8x1xf32>
      %1216 = arith.mulf %1215, %855 : vector<8x1xf32>
      %1217 = vector.broadcast %28 : f32 to vector<8x1xf32>
      %1218 = arith.mulf %1217, %890 : vector<8x1xf32>
      %1219 = arith.addf %1216, %1218 : vector<8x1xf32>
      %1220 = vector.broadcast %29 : f32 to vector<8x1xf32>
      %1221 = arith.mulf %1220, %901 : vector<8x1xf32>
      %1222 = arith.addf %1219, %1221 : vector<8x1xf32>
      %1223 = vector.broadcast %30 : f32 to vector<8x1xf32>
      %1224 = arith.mulf %1223, %912 : vector<8x1xf32>
      %1225 = arith.addf %1222, %1224 : vector<8x1xf32>
      %1226 = vector.broadcast %19 : f32 to vector<8x1xf32>
      %1227 = arith.mulf %1226, %866 : vector<8x1xf32>
      %1228 = vector.broadcast %20 : f32 to vector<8x1xf32>
      %1229 = arith.mulf %1228, %901 : vector<8x1xf32>
      %1230 = arith.addf %1227, %1229 : vector<8x1xf32>
      %1231 = vector.broadcast %21 : f32 to vector<8x1xf32>
      %1232 = arith.mulf %1231, %925 : vector<8x1xf32>
      %1233 = arith.addf %1230, %1232 : vector<8x1xf32>
      %1234 = vector.broadcast %22 : f32 to vector<8x1xf32>
      %1235 = arith.mulf %1234, %936 : vector<8x1xf32>
      %1236 = arith.addf %1233, %1235 : vector<8x1xf32>
      %1237 = vector.broadcast %23 : f32 to vector<8x1xf32>
      %1238 = arith.mulf %1237, %866 : vector<8x1xf32>
      %1239 = vector.broadcast %24 : f32 to vector<8x1xf32>
      %1240 = arith.mulf %1239, %901 : vector<8x1xf32>
      %1241 = arith.addf %1238, %1240 : vector<8x1xf32>
      %1242 = vector.broadcast %25 : f32 to vector<8x1xf32>
      %1243 = arith.mulf %1242, %925 : vector<8x1xf32>
      %1244 = arith.addf %1241, %1243 : vector<8x1xf32>
      %1245 = vector.broadcast %26 : f32 to vector<8x1xf32>
      %1246 = arith.mulf %1245, %936 : vector<8x1xf32>
      %1247 = arith.addf %1244, %1246 : vector<8x1xf32>
      %1248 = vector.broadcast %27 : f32 to vector<8x1xf32>
      %1249 = arith.mulf %1248, %866 : vector<8x1xf32>
      %1250 = vector.broadcast %28 : f32 to vector<8x1xf32>
      %1251 = arith.mulf %1250, %901 : vector<8x1xf32>
      %1252 = arith.addf %1249, %1251 : vector<8x1xf32>
      %1253 = vector.broadcast %29 : f32 to vector<8x1xf32>
      %1254 = arith.mulf %1253, %925 : vector<8x1xf32>
      %1255 = arith.addf %1252, %1254 : vector<8x1xf32>
      %1256 = vector.broadcast %30 : f32 to vector<8x1xf32>
      %1257 = arith.mulf %1256, %936 : vector<8x1xf32>
      %1258 = arith.addf %1255, %1257 : vector<8x1xf32>
      %1259 = vector.broadcast %19 : f32 to vector<8x1xf32>
      %1260 = arith.mulf %1259, %877 : vector<8x1xf32>
      %1261 = vector.broadcast %20 : f32 to vector<8x1xf32>
      %1262 = arith.mulf %1261, %912 : vector<8x1xf32>
      %1263 = arith.addf %1260, %1262 : vector<8x1xf32>
      %1264 = vector.broadcast %21 : f32 to vector<8x1xf32>
      %1265 = arith.mulf %1264, %936 : vector<8x1xf32>
      %1266 = arith.addf %1263, %1265 : vector<8x1xf32>
      %1267 = vector.broadcast %22 : f32 to vector<8x1xf32>
      %1268 = arith.mulf %1267, %949 : vector<8x1xf32>
      %1269 = arith.addf %1266, %1268 : vector<8x1xf32>
      %1270 = vector.broadcast %23 : f32 to vector<8x1xf32>
      %1271 = arith.mulf %1270, %877 : vector<8x1xf32>
      %1272 = vector.broadcast %24 : f32 to vector<8x1xf32>
      %1273 = arith.mulf %1272, %912 : vector<8x1xf32>
      %1274 = arith.addf %1271, %1273 : vector<8x1xf32>
      %1275 = vector.broadcast %25 : f32 to vector<8x1xf32>
      %1276 = arith.mulf %1275, %936 : vector<8x1xf32>
      %1277 = arith.addf %1274, %1276 : vector<8x1xf32>
      %1278 = vector.broadcast %26 : f32 to vector<8x1xf32>
      %1279 = arith.mulf %1278, %949 : vector<8x1xf32>
      %1280 = arith.addf %1277, %1279 : vector<8x1xf32>
      %1281 = vector.broadcast %27 : f32 to vector<8x1xf32>
      %1282 = arith.mulf %1281, %877 : vector<8x1xf32>
      %1283 = vector.broadcast %28 : f32 to vector<8x1xf32>
      %1284 = arith.mulf %1283, %912 : vector<8x1xf32>
      %1285 = arith.addf %1282, %1284 : vector<8x1xf32>
      %1286 = vector.broadcast %29 : f32 to vector<8x1xf32>
      %1287 = arith.mulf %1286, %936 : vector<8x1xf32>
      %1288 = arith.addf %1285, %1287 : vector<8x1xf32>
      %1289 = vector.broadcast %30 : f32 to vector<8x1xf32>
      %1290 = arith.mulf %1289, %949 : vector<8x1xf32>
      %1291 = arith.addf %1288, %1290 : vector<8x1xf32>
      %1292 = vector.broadcast %19 : f32 to vector<8x1xf32>
      %1293 = arith.mulf %1292, %1170 : vector<8x1xf32>
      %1294 = vector.broadcast %20 : f32 to vector<8x1xf32>
      %1295 = arith.mulf %1294, %1203 : vector<8x1xf32>
      %1296 = arith.addf %1293, %1295 : vector<8x1xf32>
      %1297 = vector.broadcast %21 : f32 to vector<8x1xf32>
      %1298 = arith.mulf %1297, %1236 : vector<8x1xf32>
      %1299 = arith.addf %1296, %1298 : vector<8x1xf32>
      %1300 = vector.broadcast %22 : f32 to vector<8x1xf32>
      %1301 = arith.mulf %1300, %1269 : vector<8x1xf32>
      %1302 = arith.addf %1299, %1301 : vector<8x1xf32>
      %1303 = vector.broadcast %35 : f32 to vector<8x1xf32>
      %1304 = arith.addf %1302, %1303 : vector<8x1xf32>
      %1305 = vector.broadcast %19 : f32 to vector<8x1xf32>
      %1306 = arith.mulf %1305, %1181 : vector<8x1xf32>
      %1307 = vector.broadcast %20 : f32 to vector<8x1xf32>
      %1308 = arith.mulf %1307, %1214 : vector<8x1xf32>
      %1309 = arith.addf %1306, %1308 : vector<8x1xf32>
      %1310 = vector.broadcast %21 : f32 to vector<8x1xf32>
      %1311 = arith.mulf %1310, %1247 : vector<8x1xf32>
      %1312 = arith.addf %1309, %1311 : vector<8x1xf32>
      %1313 = vector.broadcast %22 : f32 to vector<8x1xf32>
      %1314 = arith.mulf %1313, %1280 : vector<8x1xf32>
      %1315 = arith.addf %1312, %1314 : vector<8x1xf32>
      %1316 = vector.broadcast %19 : f32 to vector<8x1xf32>
      %1317 = arith.mulf %1316, %1192 : vector<8x1xf32>
      %1318 = vector.broadcast %20 : f32 to vector<8x1xf32>
      %1319 = arith.mulf %1318, %1225 : vector<8x1xf32>
      %1320 = arith.addf %1317, %1319 : vector<8x1xf32>
      %1321 = vector.broadcast %21 : f32 to vector<8x1xf32>
      %1322 = arith.mulf %1321, %1258 : vector<8x1xf32>
      %1323 = arith.addf %1320, %1322 : vector<8x1xf32>
      %1324 = vector.broadcast %22 : f32 to vector<8x1xf32>
      %1325 = arith.mulf %1324, %1291 : vector<8x1xf32>
      %1326 = arith.addf %1323, %1325 : vector<8x1xf32>
      %1327 = vector.broadcast %23 : f32 to vector<8x1xf32>
      %1328 = arith.mulf %1327, %1181 : vector<8x1xf32>
      %1329 = vector.broadcast %24 : f32 to vector<8x1xf32>
      %1330 = arith.mulf %1329, %1214 : vector<8x1xf32>
      %1331 = arith.addf %1328, %1330 : vector<8x1xf32>
      %1332 = vector.broadcast %25 : f32 to vector<8x1xf32>
      %1333 = arith.mulf %1332, %1247 : vector<8x1xf32>
      %1334 = arith.addf %1331, %1333 : vector<8x1xf32>
      %1335 = vector.broadcast %26 : f32 to vector<8x1xf32>
      %1336 = arith.mulf %1335, %1280 : vector<8x1xf32>
      %1337 = arith.addf %1334, %1336 : vector<8x1xf32>
      %1338 = vector.broadcast %36 : f32 to vector<8x1xf32>
      %1339 = arith.addf %1337, %1338 : vector<8x1xf32>
      %1340 = vector.broadcast %23 : f32 to vector<8x1xf32>
      %1341 = arith.mulf %1340, %1192 : vector<8x1xf32>
      %1342 = vector.broadcast %24 : f32 to vector<8x1xf32>
      %1343 = arith.mulf %1342, %1225 : vector<8x1xf32>
      %1344 = arith.addf %1341, %1343 : vector<8x1xf32>
      %1345 = vector.broadcast %25 : f32 to vector<8x1xf32>
      %1346 = arith.mulf %1345, %1258 : vector<8x1xf32>
      %1347 = arith.addf %1344, %1346 : vector<8x1xf32>
      %1348 = vector.broadcast %26 : f32 to vector<8x1xf32>
      %1349 = arith.mulf %1348, %1291 : vector<8x1xf32>
      %1350 = arith.addf %1347, %1349 : vector<8x1xf32>
      %1351 = vector.broadcast %27 : f32 to vector<8x1xf32>
      %1352 = arith.mulf %1351, %1192 : vector<8x1xf32>
      %1353 = vector.broadcast %28 : f32 to vector<8x1xf32>
      %1354 = arith.mulf %1353, %1225 : vector<8x1xf32>
      %1355 = arith.addf %1352, %1354 : vector<8x1xf32>
      %1356 = vector.broadcast %29 : f32 to vector<8x1xf32>
      %1357 = arith.mulf %1356, %1258 : vector<8x1xf32>
      %1358 = arith.addf %1355, %1357 : vector<8x1xf32>
      %1359 = vector.broadcast %30 : f32 to vector<8x1xf32>
      %1360 = arith.mulf %1359, %1291 : vector<8x1xf32>
      %1361 = arith.addf %1358, %1360 : vector<8x1xf32>
      %1362 = vector.broadcast %37 : f32 to vector<8x1xf32>
      %1363 = arith.addf %1361, %1362 : vector<8x1xf32>
      %1364 = tpu.reciprocal %1304 {approx = true} : vector<8x1xf32> -> vector<8x1xf32>
      %1365 = arith.mulf %1304, %1364 : vector<8x1xf32>
      %cst_269 = arith.constant 2.000000e+00 : f32
      %1366 = vector.broadcast %cst_269 : f32 to vector<8x1xf32>
      %1367 = arith.subf %1366, %1365 : vector<8x1xf32>
      %1368 = arith.mulf %1364, %1367 : vector<8x1xf32>
      %1369 = arith.mulf %1304, %1368 : vector<8x1xf32>
      %cst_270 = arith.constant 2.000000e+00 : f32
      %1370 = vector.broadcast %cst_270 : f32 to vector<8x1xf32>
      %1371 = arith.subf %1370, %1369 : vector<8x1xf32>
      %1372 = arith.mulf %1368, %1371 : vector<8x1xf32>
      %1373 = arith.mulf %1315, %1372 : vector<8x1xf32>
      %1374 = arith.mulf %1326, %1372 : vector<8x1xf32>
      %1375 = arith.mulf %38, %1372 : vector<8x1xf32>
      %1376 = arith.mulf %39, %1372 : vector<8x1xf32>
      %1377 = arith.mulf %39, %1372 : vector<8x1xf32>
      %1378 = arith.mulf %1315, %1373 : vector<8x1xf32>
      %1379 = arith.subf %1339, %1378 : vector<8x1xf32>
      %1380 = arith.mulf %1315, %1374 : vector<8x1xf32>
      %1381 = arith.subf %1350, %1380 : vector<8x1xf32>
      %1382 = arith.mulf %1315, %1375 : vector<8x1xf32>
      %1383 = arith.subf %39, %1382 : vector<8x1xf32>
      %1384 = arith.mulf %1315, %1376 : vector<8x1xf32>
      %1385 = arith.subf %38, %1384 : vector<8x1xf32>
      %1386 = arith.mulf %1315, %1377 : vector<8x1xf32>
      %1387 = arith.subf %39, %1386 : vector<8x1xf32>
      %1388 = arith.mulf %1326, %1373 : vector<8x1xf32>
      %1389 = arith.subf %1350, %1388 : vector<8x1xf32>
      %1390 = arith.mulf %1326, %1374 : vector<8x1xf32>
      %1391 = arith.subf %1363, %1390 : vector<8x1xf32>
      %1392 = arith.mulf %1326, %1375 : vector<8x1xf32>
      %1393 = arith.subf %39, %1392 : vector<8x1xf32>
      %1394 = arith.mulf %1326, %1376 : vector<8x1xf32>
      %1395 = arith.subf %39, %1394 : vector<8x1xf32>
      %1396 = arith.mulf %1326, %1377 : vector<8x1xf32>
      %1397 = arith.subf %38, %1396 : vector<8x1xf32>
      %1398 = tpu.reciprocal %1379 {approx = true} : vector<8x1xf32> -> vector<8x1xf32>
      %1399 = arith.mulf %1379, %1398 : vector<8x1xf32>
      %cst_271 = arith.constant 2.000000e+00 : f32
      %1400 = vector.broadcast %cst_271 : f32 to vector<8x1xf32>
      %1401 = arith.subf %1400, %1399 : vector<8x1xf32>
      %1402 = arith.mulf %1398, %1401 : vector<8x1xf32>
      %1403 = arith.mulf %1379, %1402 : vector<8x1xf32>
      %cst_272 = arith.constant 2.000000e+00 : f32
      %1404 = vector.broadcast %cst_272 : f32 to vector<8x1xf32>
      %1405 = arith.subf %1404, %1403 : vector<8x1xf32>
      %1406 = arith.mulf %1402, %1405 : vector<8x1xf32>
      %1407 = arith.mulf %1381, %1406 : vector<8x1xf32>
      %1408 = arith.mulf %1383, %1406 : vector<8x1xf32>
      %1409 = arith.mulf %1385, %1406 : vector<8x1xf32>
      %1410 = arith.mulf %1387, %1406 : vector<8x1xf32>
      %1411 = arith.mulf %1373, %1407 : vector<8x1xf32>
      %1412 = arith.subf %1374, %1411 : vector<8x1xf32>
      %1413 = arith.mulf %1373, %1408 : vector<8x1xf32>
      %1414 = arith.subf %1375, %1413 : vector<8x1xf32>
      %1415 = arith.mulf %1373, %1409 : vector<8x1xf32>
      %1416 = arith.subf %1376, %1415 : vector<8x1xf32>
      %1417 = arith.mulf %1373, %1410 : vector<8x1xf32>
      %1418 = arith.subf %1377, %1417 : vector<8x1xf32>
      %1419 = arith.mulf %1389, %1407 : vector<8x1xf32>
      %1420 = arith.subf %1391, %1419 : vector<8x1xf32>
      %1421 = arith.mulf %1389, %1408 : vector<8x1xf32>
      %1422 = arith.subf %1393, %1421 : vector<8x1xf32>
      %1423 = arith.mulf %1389, %1409 : vector<8x1xf32>
      %1424 = arith.subf %1395, %1423 : vector<8x1xf32>
      %1425 = arith.mulf %1389, %1410 : vector<8x1xf32>
      %1426 = arith.subf %1397, %1425 : vector<8x1xf32>
      %1427 = tpu.reciprocal %1420 {approx = true} : vector<8x1xf32> -> vector<8x1xf32>
      %1428 = arith.mulf %1420, %1427 : vector<8x1xf32>
      %cst_273 = arith.constant 2.000000e+00 : f32
      %1429 = vector.broadcast %cst_273 : f32 to vector<8x1xf32>
      %1430 = arith.subf %1429, %1428 : vector<8x1xf32>
      %1431 = arith.mulf %1427, %1430 : vector<8x1xf32>
      %1432 = arith.mulf %1420, %1431 : vector<8x1xf32>
      %cst_274 = arith.constant 2.000000e+00 : f32
      %1433 = vector.broadcast %cst_274 : f32 to vector<8x1xf32>
      %1434 = arith.subf %1433, %1432 : vector<8x1xf32>
      %1435 = arith.mulf %1431, %1434 : vector<8x1xf32>
      %1436 = arith.mulf %1422, %1435 : vector<8x1xf32>
      %1437 = arith.mulf %1424, %1435 : vector<8x1xf32>
      %1438 = arith.mulf %1426, %1435 : vector<8x1xf32>
      %1439 = arith.mulf %1412, %1436 : vector<8x1xf32>
      %1440 = arith.subf %1414, %1439 : vector<8x1xf32>
      %1441 = arith.mulf %1412, %1437 : vector<8x1xf32>
      %1442 = arith.subf %1416, %1441 : vector<8x1xf32>
      %1443 = arith.mulf %1412, %1438 : vector<8x1xf32>
      %1444 = arith.subf %1418, %1443 : vector<8x1xf32>
      %1445 = arith.mulf %1407, %1436 : vector<8x1xf32>
      %1446 = arith.subf %1408, %1445 : vector<8x1xf32>
      %1447 = arith.mulf %1407, %1437 : vector<8x1xf32>
      %1448 = arith.subf %1409, %1447 : vector<8x1xf32>
      %1449 = arith.mulf %1407, %1438 : vector<8x1xf32>
      %1450 = arith.subf %1410, %1449 : vector<8x1xf32>
      %1451 = arith.mulf %1170, %1440 : vector<8x1xf32>
      %1452 = arith.mulf %1181, %1446 : vector<8x1xf32>
      %1453 = arith.addf %1451, %1452 : vector<8x1xf32>
      %1454 = arith.mulf %1192, %1436 : vector<8x1xf32>
      %1455 = arith.addf %1453, %1454 : vector<8x1xf32>
      %1456 = arith.mulf %1455, %1114 : vector<8x1xf32>
      %1457 = arith.mulf %1170, %1442 : vector<8x1xf32>
      %1458 = arith.mulf %1181, %1448 : vector<8x1xf32>
      %1459 = arith.addf %1457, %1458 : vector<8x1xf32>
      %1460 = arith.mulf %1192, %1437 : vector<8x1xf32>
      %1461 = arith.addf %1459, %1460 : vector<8x1xf32>
      %1462 = arith.mulf %1461, %1114 : vector<8x1xf32>
      %1463 = arith.mulf %1170, %1444 : vector<8x1xf32>
      %1464 = arith.mulf %1181, %1450 : vector<8x1xf32>
      %1465 = arith.addf %1463, %1464 : vector<8x1xf32>
      %1466 = arith.mulf %1192, %1438 : vector<8x1xf32>
      %1467 = arith.addf %1465, %1466 : vector<8x1xf32>
      %1468 = arith.mulf %1467, %1114 : vector<8x1xf32>
      %1469 = arith.mulf %1203, %1440 : vector<8x1xf32>
      %1470 = arith.mulf %1214, %1446 : vector<8x1xf32>
      %1471 = arith.addf %1469, %1470 : vector<8x1xf32>
      %1472 = arith.mulf %1225, %1436 : vector<8x1xf32>
      %1473 = arith.addf %1471, %1472 : vector<8x1xf32>
      %1474 = arith.mulf %1473, %1114 : vector<8x1xf32>
      %1475 = arith.mulf %1203, %1442 : vector<8x1xf32>
      %1476 = arith.mulf %1214, %1448 : vector<8x1xf32>
      %1477 = arith.addf %1475, %1476 : vector<8x1xf32>
      %1478 = arith.mulf %1225, %1437 : vector<8x1xf32>
      %1479 = arith.addf %1477, %1478 : vector<8x1xf32>
      %1480 = arith.mulf %1479, %1114 : vector<8x1xf32>
      %1481 = arith.mulf %1203, %1444 : vector<8x1xf32>
      %1482 = arith.mulf %1214, %1450 : vector<8x1xf32>
      %1483 = arith.addf %1481, %1482 : vector<8x1xf32>
      %1484 = arith.mulf %1225, %1438 : vector<8x1xf32>
      %1485 = arith.addf %1483, %1484 : vector<8x1xf32>
      %1486 = arith.mulf %1485, %1114 : vector<8x1xf32>
      %1487 = arith.mulf %1236, %1440 : vector<8x1xf32>
      %1488 = arith.mulf %1247, %1446 : vector<8x1xf32>
      %1489 = arith.addf %1487, %1488 : vector<8x1xf32>
      %1490 = arith.mulf %1258, %1436 : vector<8x1xf32>
      %1491 = arith.addf %1489, %1490 : vector<8x1xf32>
      %1492 = arith.mulf %1491, %1114 : vector<8x1xf32>
      %1493 = arith.mulf %1236, %1442 : vector<8x1xf32>
      %1494 = arith.mulf %1247, %1448 : vector<8x1xf32>
      %1495 = arith.addf %1493, %1494 : vector<8x1xf32>
      %1496 = arith.mulf %1258, %1437 : vector<8x1xf32>
      %1497 = arith.addf %1495, %1496 : vector<8x1xf32>
      %1498 = arith.mulf %1497, %1114 : vector<8x1xf32>
      %1499 = arith.mulf %1236, %1444 : vector<8x1xf32>
      %1500 = arith.mulf %1247, %1450 : vector<8x1xf32>
      %1501 = arith.addf %1499, %1500 : vector<8x1xf32>
      %1502 = arith.mulf %1258, %1438 : vector<8x1xf32>
      %1503 = arith.addf %1501, %1502 : vector<8x1xf32>
      %1504 = arith.mulf %1503, %1114 : vector<8x1xf32>
      %1505 = arith.mulf %1269, %1440 : vector<8x1xf32>
      %1506 = arith.mulf %1280, %1446 : vector<8x1xf32>
      %1507 = arith.addf %1505, %1506 : vector<8x1xf32>
      %1508 = arith.mulf %1291, %1436 : vector<8x1xf32>
      %1509 = arith.addf %1507, %1508 : vector<8x1xf32>
      %1510 = arith.mulf %1509, %1114 : vector<8x1xf32>
      %1511 = arith.mulf %1269, %1442 : vector<8x1xf32>
      %1512 = arith.mulf %1280, %1448 : vector<8x1xf32>
      %1513 = arith.addf %1511, %1512 : vector<8x1xf32>
      %1514 = arith.mulf %1291, %1437 : vector<8x1xf32>
      %1515 = arith.addf %1513, %1514 : vector<8x1xf32>
      %1516 = arith.mulf %1515, %1114 : vector<8x1xf32>
      %1517 = arith.mulf %1269, %1444 : vector<8x1xf32>
      %1518 = arith.mulf %1280, %1450 : vector<8x1xf32>
      %1519 = arith.addf %1517, %1518 : vector<8x1xf32>
      %1520 = arith.mulf %1291, %1438 : vector<8x1xf32>
      %1521 = arith.addf %1519, %1520 : vector<8x1xf32>
      %1522 = arith.mulf %1521, %1114 : vector<8x1xf32>
      %1523 = arith.mulf %1456, %1135 : vector<8x1xf32>
      %1524 = arith.mulf %1462, %1147 : vector<8x1xf32>
      %1525 = arith.addf %1523, %1524 : vector<8x1xf32>
      %1526 = arith.mulf %1468, %1159 : vector<8x1xf32>
      %1527 = arith.addf %1525, %1526 : vector<8x1xf32>
      %1528 = arith.addf %622, %1527 : vector<8x1xf32>
      %1529 = arith.mulf %1474, %1135 : vector<8x1xf32>
      %1530 = arith.mulf %1480, %1147 : vector<8x1xf32>
      %1531 = arith.addf %1529, %1530 : vector<8x1xf32>
      %1532 = arith.mulf %1486, %1159 : vector<8x1xf32>
      %1533 = arith.addf %1531, %1532 : vector<8x1xf32>
      %1534 = arith.addf %633, %1533 : vector<8x1xf32>
      %1535 = arith.mulf %1492, %1135 : vector<8x1xf32>
      %1536 = arith.mulf %1498, %1147 : vector<8x1xf32>
      %1537 = arith.addf %1535, %1536 : vector<8x1xf32>
      %1538 = arith.mulf %1504, %1159 : vector<8x1xf32>
      %1539 = arith.addf %1537, %1538 : vector<8x1xf32>
      %1540 = arith.addf %644, %1539 : vector<8x1xf32>
      %1541 = arith.mulf %1510, %1135 : vector<8x1xf32>
      %1542 = arith.mulf %1516, %1147 : vector<8x1xf32>
      %1543 = arith.addf %1541, %1542 : vector<8x1xf32>
      %1544 = arith.mulf %1522, %1159 : vector<8x1xf32>
      %1545 = arith.addf %1543, %1544 : vector<8x1xf32>
      %1546 = arith.addf %655, %1545 : vector<8x1xf32>
      %1547 = arith.mulf %1456, %1170 : vector<8x1xf32>
      %1548 = arith.mulf %1462, %1181 : vector<8x1xf32>
      %1549 = arith.addf %1547, %1548 : vector<8x1xf32>
      %1550 = arith.mulf %1468, %1192 : vector<8x1xf32>
      %1551 = arith.addf %1549, %1550 : vector<8x1xf32>
      %1552 = arith.subf %844, %1551 : vector<8x1xf32>
      %1553 = arith.mulf %1456, %1203 : vector<8x1xf32>
      %1554 = arith.mulf %1462, %1214 : vector<8x1xf32>
      %1555 = arith.addf %1553, %1554 : vector<8x1xf32>
      %1556 = arith.mulf %1468, %1225 : vector<8x1xf32>
      %1557 = arith.addf %1555, %1556 : vector<8x1xf32>
      %1558 = arith.subf %855, %1557 : vector<8x1xf32>
      %1559 = arith.mulf %1456, %1236 : vector<8x1xf32>
      %1560 = arith.mulf %1462, %1247 : vector<8x1xf32>
      %1561 = arith.addf %1559, %1560 : vector<8x1xf32>
      %1562 = arith.mulf %1468, %1258 : vector<8x1xf32>
      %1563 = arith.addf %1561, %1562 : vector<8x1xf32>
      %1564 = arith.subf %866, %1563 : vector<8x1xf32>
      %1565 = arith.mulf %1456, %1269 : vector<8x1xf32>
      %1566 = arith.mulf %1462, %1280 : vector<8x1xf32>
      %1567 = arith.addf %1565, %1566 : vector<8x1xf32>
      %1568 = arith.mulf %1468, %1291 : vector<8x1xf32>
      %1569 = arith.addf %1567, %1568 : vector<8x1xf32>
      %1570 = arith.subf %877, %1569 : vector<8x1xf32>
      %1571 = arith.mulf %1474, %1203 : vector<8x1xf32>
      %1572 = arith.mulf %1480, %1214 : vector<8x1xf32>
      %1573 = arith.addf %1571, %1572 : vector<8x1xf32>
      %1574 = arith.mulf %1486, %1225 : vector<8x1xf32>
      %1575 = arith.addf %1573, %1574 : vector<8x1xf32>
      %1576 = arith.subf %890, %1575 : vector<8x1xf32>
      %1577 = arith.mulf %1474, %1236 : vector<8x1xf32>
      %1578 = arith.mulf %1480, %1247 : vector<8x1xf32>
      %1579 = arith.addf %1577, %1578 : vector<8x1xf32>
      %1580 = arith.mulf %1486, %1258 : vector<8x1xf32>
      %1581 = arith.addf %1579, %1580 : vector<8x1xf32>
      %1582 = arith.subf %901, %1581 : vector<8x1xf32>
      %1583 = arith.mulf %1474, %1269 : vector<8x1xf32>
      %1584 = arith.mulf %1480, %1280 : vector<8x1xf32>
      %1585 = arith.addf %1583, %1584 : vector<8x1xf32>
      %1586 = arith.mulf %1486, %1291 : vector<8x1xf32>
      %1587 = arith.addf %1585, %1586 : vector<8x1xf32>
      %1588 = arith.subf %912, %1587 : vector<8x1xf32>
      %1589 = arith.mulf %1492, %1236 : vector<8x1xf32>
      %1590 = arith.mulf %1498, %1247 : vector<8x1xf32>
      %1591 = arith.addf %1589, %1590 : vector<8x1xf32>
      %1592 = arith.mulf %1504, %1258 : vector<8x1xf32>
      %1593 = arith.addf %1591, %1592 : vector<8x1xf32>
      %1594 = arith.subf %925, %1593 : vector<8x1xf32>
      %1595 = arith.mulf %1492, %1269 : vector<8x1xf32>
      %1596 = arith.mulf %1498, %1280 : vector<8x1xf32>
      %1597 = arith.addf %1595, %1596 : vector<8x1xf32>
      %1598 = arith.mulf %1504, %1291 : vector<8x1xf32>
      %1599 = arith.addf %1597, %1598 : vector<8x1xf32>
      %1600 = arith.subf %936, %1599 : vector<8x1xf32>
      %1601 = arith.mulf %1510, %1269 : vector<8x1xf32>
      %1602 = arith.mulf %1516, %1280 : vector<8x1xf32>
      %1603 = arith.addf %1601, %1602 : vector<8x1xf32>
      %1604 = arith.mulf %1522, %1291 : vector<8x1xf32>
      %1605 = arith.addf %1603, %1604 : vector<8x1xf32>
      %1606 = arith.subf %949, %1605 : vector<8x1xf32>
      %1607 = vector.broadcast %3 : f32 to vector<8x1xf32>
      %1608 = arith.mulf %1607, %1528 : vector<8x1xf32>
      %1609 = vector.broadcast %4 : f32 to vector<8x1xf32>
      %1610 = arith.mulf %1609, %1534 : vector<8x1xf32>
      %1611 = arith.addf %1608, %1610 : vector<8x1xf32>
      %1612 = vector.broadcast %5 : f32 to vector<8x1xf32>
      %1613 = arith.mulf %1612, %1540 : vector<8x1xf32>
      %1614 = arith.addf %1611, %1613 : vector<8x1xf32>
      %1615 = vector.broadcast %6 : f32 to vector<8x1xf32>
      %1616 = arith.mulf %1615, %1546 : vector<8x1xf32>
      %1617 = arith.addf %1614, %1616 : vector<8x1xf32>
      %1618 = vector.broadcast %7 : f32 to vector<8x1xf32>
      %1619 = arith.mulf %1618, %1528 : vector<8x1xf32>
      %1620 = vector.broadcast %8 : f32 to vector<8x1xf32>
      %1621 = arith.mulf %1620, %1534 : vector<8x1xf32>
      %1622 = arith.addf %1619, %1621 : vector<8x1xf32>
      %1623 = vector.broadcast %9 : f32 to vector<8x1xf32>
      %1624 = arith.mulf %1623, %1540 : vector<8x1xf32>
      %1625 = arith.addf %1622, %1624 : vector<8x1xf32>
      %1626 = vector.broadcast %10 : f32 to vector<8x1xf32>
      %1627 = arith.mulf %1626, %1546 : vector<8x1xf32>
      %1628 = arith.addf %1625, %1627 : vector<8x1xf32>
      %1629 = vector.broadcast %11 : f32 to vector<8x1xf32>
      %1630 = arith.mulf %1629, %1528 : vector<8x1xf32>
      %1631 = vector.broadcast %12 : f32 to vector<8x1xf32>
      %1632 = arith.mulf %1631, %1534 : vector<8x1xf32>
      %1633 = arith.addf %1630, %1632 : vector<8x1xf32>
      %1634 = vector.broadcast %13 : f32 to vector<8x1xf32>
      %1635 = arith.mulf %1634, %1540 : vector<8x1xf32>
      %1636 = arith.addf %1633, %1635 : vector<8x1xf32>
      %1637 = vector.broadcast %14 : f32 to vector<8x1xf32>
      %1638 = arith.mulf %1637, %1546 : vector<8x1xf32>
      %1639 = arith.addf %1636, %1638 : vector<8x1xf32>
      %1640 = vector.broadcast %15 : f32 to vector<8x1xf32>
      %1641 = arith.mulf %1640, %1528 : vector<8x1xf32>
      %1642 = vector.broadcast %16 : f32 to vector<8x1xf32>
      %1643 = arith.mulf %1642, %1534 : vector<8x1xf32>
      %1644 = arith.addf %1641, %1643 : vector<8x1xf32>
      %1645 = vector.broadcast %17 : f32 to vector<8x1xf32>
      %1646 = arith.mulf %1645, %1540 : vector<8x1xf32>
      %1647 = arith.addf %1644, %1646 : vector<8x1xf32>
      %1648 = vector.broadcast %18 : f32 to vector<8x1xf32>
      %1649 = arith.mulf %1648, %1546 : vector<8x1xf32>
      %1650 = arith.addf %1647, %1649 : vector<8x1xf32>
      %1651 = vector.broadcast %3 : f32 to vector<8x1xf32>
      %1652 = arith.mulf %1651, %1552 : vector<8x1xf32>
      %1653 = vector.broadcast %4 : f32 to vector<8x1xf32>
      %1654 = arith.mulf %1653, %1558 : vector<8x1xf32>
      %1655 = arith.addf %1652, %1654 : vector<8x1xf32>
      %1656 = vector.broadcast %5 : f32 to vector<8x1xf32>
      %1657 = arith.mulf %1656, %1564 : vector<8x1xf32>
      %1658 = arith.addf %1655, %1657 : vector<8x1xf32>
      %1659 = vector.broadcast %6 : f32 to vector<8x1xf32>
      %1660 = arith.mulf %1659, %1570 : vector<8x1xf32>
      %1661 = arith.addf %1658, %1660 : vector<8x1xf32>
      %1662 = vector.broadcast %3 : f32 to vector<8x1xf32>
      %1663 = arith.mulf %1662, %1558 : vector<8x1xf32>
      %1664 = vector.broadcast %4 : f32 to vector<8x1xf32>
      %1665 = arith.mulf %1664, %1576 : vector<8x1xf32>
      %1666 = arith.addf %1663, %1665 : vector<8x1xf32>
      %1667 = vector.broadcast %5 : f32 to vector<8x1xf32>
      %1668 = arith.mulf %1667, %1582 : vector<8x1xf32>
      %1669 = arith.addf %1666, %1668 : vector<8x1xf32>
      %1670 = vector.broadcast %6 : f32 to vector<8x1xf32>
      %1671 = arith.mulf %1670, %1588 : vector<8x1xf32>
      %1672 = arith.addf %1669, %1671 : vector<8x1xf32>
      %1673 = vector.broadcast %3 : f32 to vector<8x1xf32>
      %1674 = arith.mulf %1673, %1564 : vector<8x1xf32>
      %1675 = vector.broadcast %4 : f32 to vector<8x1xf32>
      %1676 = arith.mulf %1675, %1582 : vector<8x1xf32>
      %1677 = arith.addf %1674, %1676 : vector<8x1xf32>
      %1678 = vector.broadcast %5 : f32 to vector<8x1xf32>
      %1679 = arith.mulf %1678, %1594 : vector<8x1xf32>
      %1680 = arith.addf %1677, %1679 : vector<8x1xf32>
      %1681 = vector.broadcast %6 : f32 to vector<8x1xf32>
      %1682 = arith.mulf %1681, %1600 : vector<8x1xf32>
      %1683 = arith.addf %1680, %1682 : vector<8x1xf32>
      %1684 = vector.broadcast %3 : f32 to vector<8x1xf32>
      %1685 = arith.mulf %1684, %1570 : vector<8x1xf32>
      %1686 = vector.broadcast %4 : f32 to vector<8x1xf32>
      %1687 = arith.mulf %1686, %1588 : vector<8x1xf32>
      %1688 = arith.addf %1685, %1687 : vector<8x1xf32>
      %1689 = vector.broadcast %5 : f32 to vector<8x1xf32>
      %1690 = arith.mulf %1689, %1600 : vector<8x1xf32>
      %1691 = arith.addf %1688, %1690 : vector<8x1xf32>
      %1692 = vector.broadcast %6 : f32 to vector<8x1xf32>
      %1693 = arith.mulf %1692, %1606 : vector<8x1xf32>
      %1694 = arith.addf %1691, %1693 : vector<8x1xf32>
      %1695 = vector.broadcast %7 : f32 to vector<8x1xf32>
      %1696 = arith.mulf %1695, %1552 : vector<8x1xf32>
      %1697 = vector.broadcast %8 : f32 to vector<8x1xf32>
      %1698 = arith.mulf %1697, %1558 : vector<8x1xf32>
      %1699 = arith.addf %1696, %1698 : vector<8x1xf32>
      %1700 = vector.broadcast %9 : f32 to vector<8x1xf32>
      %1701 = arith.mulf %1700, %1564 : vector<8x1xf32>
      %1702 = arith.addf %1699, %1701 : vector<8x1xf32>
      %1703 = vector.broadcast %10 : f32 to vector<8x1xf32>
      %1704 = arith.mulf %1703, %1570 : vector<8x1xf32>
      %1705 = arith.addf %1702, %1704 : vector<8x1xf32>
      %1706 = vector.broadcast %7 : f32 to vector<8x1xf32>
      %1707 = arith.mulf %1706, %1558 : vector<8x1xf32>
      %1708 = vector.broadcast %8 : f32 to vector<8x1xf32>
      %1709 = arith.mulf %1708, %1576 : vector<8x1xf32>
      %1710 = arith.addf %1707, %1709 : vector<8x1xf32>
      %1711 = vector.broadcast %9 : f32 to vector<8x1xf32>
      %1712 = arith.mulf %1711, %1582 : vector<8x1xf32>
      %1713 = arith.addf %1710, %1712 : vector<8x1xf32>
      %1714 = vector.broadcast %10 : f32 to vector<8x1xf32>
      %1715 = arith.mulf %1714, %1588 : vector<8x1xf32>
      %1716 = arith.addf %1713, %1715 : vector<8x1xf32>
      %1717 = vector.broadcast %7 : f32 to vector<8x1xf32>
      %1718 = arith.mulf %1717, %1564 : vector<8x1xf32>
      %1719 = vector.broadcast %8 : f32 to vector<8x1xf32>
      %1720 = arith.mulf %1719, %1582 : vector<8x1xf32>
      %1721 = arith.addf %1718, %1720 : vector<8x1xf32>
      %1722 = vector.broadcast %9 : f32 to vector<8x1xf32>
      %1723 = arith.mulf %1722, %1594 : vector<8x1xf32>
      %1724 = arith.addf %1721, %1723 : vector<8x1xf32>
      %1725 = vector.broadcast %10 : f32 to vector<8x1xf32>
      %1726 = arith.mulf %1725, %1600 : vector<8x1xf32>
      %1727 = arith.addf %1724, %1726 : vector<8x1xf32>
      %1728 = vector.broadcast %7 : f32 to vector<8x1xf32>
      %1729 = arith.mulf %1728, %1570 : vector<8x1xf32>
      %1730 = vector.broadcast %8 : f32 to vector<8x1xf32>
      %1731 = arith.mulf %1730, %1588 : vector<8x1xf32>
      %1732 = arith.addf %1729, %1731 : vector<8x1xf32>
      %1733 = vector.broadcast %9 : f32 to vector<8x1xf32>
      %1734 = arith.mulf %1733, %1600 : vector<8x1xf32>
      %1735 = arith.addf %1732, %1734 : vector<8x1xf32>
      %1736 = vector.broadcast %10 : f32 to vector<8x1xf32>
      %1737 = arith.mulf %1736, %1606 : vector<8x1xf32>
      %1738 = arith.addf %1735, %1737 : vector<8x1xf32>
      %1739 = vector.broadcast %11 : f32 to vector<8x1xf32>
      %1740 = arith.mulf %1739, %1552 : vector<8x1xf32>
      %1741 = vector.broadcast %12 : f32 to vector<8x1xf32>
      %1742 = arith.mulf %1741, %1558 : vector<8x1xf32>
      %1743 = arith.addf %1740, %1742 : vector<8x1xf32>
      %1744 = vector.broadcast %13 : f32 to vector<8x1xf32>
      %1745 = arith.mulf %1744, %1564 : vector<8x1xf32>
      %1746 = arith.addf %1743, %1745 : vector<8x1xf32>
      %1747 = vector.broadcast %14 : f32 to vector<8x1xf32>
      %1748 = arith.mulf %1747, %1570 : vector<8x1xf32>
      %1749 = arith.addf %1746, %1748 : vector<8x1xf32>
      %1750 = vector.broadcast %11 : f32 to vector<8x1xf32>
      %1751 = arith.mulf %1750, %1558 : vector<8x1xf32>
      %1752 = vector.broadcast %12 : f32 to vector<8x1xf32>
      %1753 = arith.mulf %1752, %1576 : vector<8x1xf32>
      %1754 = arith.addf %1751, %1753 : vector<8x1xf32>
      %1755 = vector.broadcast %13 : f32 to vector<8x1xf32>
      %1756 = arith.mulf %1755, %1582 : vector<8x1xf32>
      %1757 = arith.addf %1754, %1756 : vector<8x1xf32>
      %1758 = vector.broadcast %14 : f32 to vector<8x1xf32>
      %1759 = arith.mulf %1758, %1588 : vector<8x1xf32>
      %1760 = arith.addf %1757, %1759 : vector<8x1xf32>
      %1761 = vector.broadcast %11 : f32 to vector<8x1xf32>
      %1762 = arith.mulf %1761, %1564 : vector<8x1xf32>
      %1763 = vector.broadcast %12 : f32 to vector<8x1xf32>
      %1764 = arith.mulf %1763, %1582 : vector<8x1xf32>
      %1765 = arith.addf %1762, %1764 : vector<8x1xf32>
      %1766 = vector.broadcast %13 : f32 to vector<8x1xf32>
      %1767 = arith.mulf %1766, %1594 : vector<8x1xf32>
      %1768 = arith.addf %1765, %1767 : vector<8x1xf32>
      %1769 = vector.broadcast %14 : f32 to vector<8x1xf32>
      %1770 = arith.mulf %1769, %1600 : vector<8x1xf32>
      %1771 = arith.addf %1768, %1770 : vector<8x1xf32>
      %1772 = vector.broadcast %11 : f32 to vector<8x1xf32>
      %1773 = arith.mulf %1772, %1570 : vector<8x1xf32>
      %1774 = vector.broadcast %12 : f32 to vector<8x1xf32>
      %1775 = arith.mulf %1774, %1588 : vector<8x1xf32>
      %1776 = arith.addf %1773, %1775 : vector<8x1xf32>
      %1777 = vector.broadcast %13 : f32 to vector<8x1xf32>
      %1778 = arith.mulf %1777, %1600 : vector<8x1xf32>
      %1779 = arith.addf %1776, %1778 : vector<8x1xf32>
      %1780 = vector.broadcast %14 : f32 to vector<8x1xf32>
      %1781 = arith.mulf %1780, %1606 : vector<8x1xf32>
      %1782 = arith.addf %1779, %1781 : vector<8x1xf32>
      %1783 = vector.broadcast %15 : f32 to vector<8x1xf32>
      %1784 = arith.mulf %1783, %1552 : vector<8x1xf32>
      %1785 = vector.broadcast %16 : f32 to vector<8x1xf32>
      %1786 = arith.mulf %1785, %1558 : vector<8x1xf32>
      %1787 = arith.addf %1784, %1786 : vector<8x1xf32>
      %1788 = vector.broadcast %17 : f32 to vector<8x1xf32>
      %1789 = arith.mulf %1788, %1564 : vector<8x1xf32>
      %1790 = arith.addf %1787, %1789 : vector<8x1xf32>
      %1791 = vector.broadcast %18 : f32 to vector<8x1xf32>
      %1792 = arith.mulf %1791, %1570 : vector<8x1xf32>
      %1793 = arith.addf %1790, %1792 : vector<8x1xf32>
      %1794 = vector.broadcast %15 : f32 to vector<8x1xf32>
      %1795 = arith.mulf %1794, %1558 : vector<8x1xf32>
      %1796 = vector.broadcast %16 : f32 to vector<8x1xf32>
      %1797 = arith.mulf %1796, %1576 : vector<8x1xf32>
      %1798 = arith.addf %1795, %1797 : vector<8x1xf32>
      %1799 = vector.broadcast %17 : f32 to vector<8x1xf32>
      %1800 = arith.mulf %1799, %1582 : vector<8x1xf32>
      %1801 = arith.addf %1798, %1800 : vector<8x1xf32>
      %1802 = vector.broadcast %18 : f32 to vector<8x1xf32>
      %1803 = arith.mulf %1802, %1588 : vector<8x1xf32>
      %1804 = arith.addf %1801, %1803 : vector<8x1xf32>
      %1805 = vector.broadcast %15 : f32 to vector<8x1xf32>
      %1806 = arith.mulf %1805, %1564 : vector<8x1xf32>
      %1807 = vector.broadcast %16 : f32 to vector<8x1xf32>
      %1808 = arith.mulf %1807, %1582 : vector<8x1xf32>
      %1809 = arith.addf %1806, %1808 : vector<8x1xf32>
      %1810 = vector.broadcast %17 : f32 to vector<8x1xf32>
      %1811 = arith.mulf %1810, %1594 : vector<8x1xf32>
      %1812 = arith.addf %1809, %1811 : vector<8x1xf32>
      %1813 = vector.broadcast %18 : f32 to vector<8x1xf32>
      %1814 = arith.mulf %1813, %1600 : vector<8x1xf32>
      %1815 = arith.addf %1812, %1814 : vector<8x1xf32>
      %1816 = vector.broadcast %15 : f32 to vector<8x1xf32>
      %1817 = arith.mulf %1816, %1570 : vector<8x1xf32>
      %1818 = vector.broadcast %16 : f32 to vector<8x1xf32>
      %1819 = arith.mulf %1818, %1588 : vector<8x1xf32>
      %1820 = arith.addf %1817, %1819 : vector<8x1xf32>
      %1821 = vector.broadcast %17 : f32 to vector<8x1xf32>
      %1822 = arith.mulf %1821, %1600 : vector<8x1xf32>
      %1823 = arith.addf %1820, %1822 : vector<8x1xf32>
      %1824 = vector.broadcast %18 : f32 to vector<8x1xf32>
      %1825 = arith.mulf %1824, %1606 : vector<8x1xf32>
      %1826 = arith.addf %1823, %1825 : vector<8x1xf32>
      %1827 = vector.broadcast %3 : f32 to vector<8x1xf32>
      %1828 = arith.mulf %1661, %1827 : vector<8x1xf32>
      %1829 = vector.broadcast %4 : f32 to vector<8x1xf32>
      %1830 = arith.mulf %1672, %1829 : vector<8x1xf32>
      %1831 = arith.addf %1828, %1830 : vector<8x1xf32>
      %1832 = vector.broadcast %5 : f32 to vector<8x1xf32>
      %1833 = arith.mulf %1683, %1832 : vector<8x1xf32>
      %1834 = arith.addf %1831, %1833 : vector<8x1xf32>
      %1835 = vector.broadcast %6 : f32 to vector<8x1xf32>
      %1836 = arith.mulf %1694, %1835 : vector<8x1xf32>
      %1837 = arith.addf %1834, %1836 : vector<8x1xf32>
      %1838 = vector.broadcast %31 : f32 to vector<8x1xf32>
      %1839 = arith.addf %1837, %1838 : vector<8x1xf32>
      %1840 = vector.broadcast %7 : f32 to vector<8x1xf32>
      %1841 = arith.mulf %1661, %1840 : vector<8x1xf32>
      %1842 = vector.broadcast %8 : f32 to vector<8x1xf32>
      %1843 = arith.mulf %1672, %1842 : vector<8x1xf32>
      %1844 = arith.addf %1841, %1843 : vector<8x1xf32>
      %1845 = vector.broadcast %9 : f32 to vector<8x1xf32>
      %1846 = arith.mulf %1683, %1845 : vector<8x1xf32>
      %1847 = arith.addf %1844, %1846 : vector<8x1xf32>
      %1848 = vector.broadcast %10 : f32 to vector<8x1xf32>
      %1849 = arith.mulf %1694, %1848 : vector<8x1xf32>
      %1850 = arith.addf %1847, %1849 : vector<8x1xf32>
      %1851 = vector.broadcast %11 : f32 to vector<8x1xf32>
      %1852 = arith.mulf %1661, %1851 : vector<8x1xf32>
      %1853 = vector.broadcast %12 : f32 to vector<8x1xf32>
      %1854 = arith.mulf %1672, %1853 : vector<8x1xf32>
      %1855 = arith.addf %1852, %1854 : vector<8x1xf32>
      %1856 = vector.broadcast %13 : f32 to vector<8x1xf32>
      %1857 = arith.mulf %1683, %1856 : vector<8x1xf32>
      %1858 = arith.addf %1855, %1857 : vector<8x1xf32>
      %1859 = vector.broadcast %14 : f32 to vector<8x1xf32>
      %1860 = arith.mulf %1694, %1859 : vector<8x1xf32>
      %1861 = arith.addf %1858, %1860 : vector<8x1xf32>
      %1862 = vector.broadcast %15 : f32 to vector<8x1xf32>
      %1863 = arith.mulf %1661, %1862 : vector<8x1xf32>
      %1864 = vector.broadcast %16 : f32 to vector<8x1xf32>
      %1865 = arith.mulf %1672, %1864 : vector<8x1xf32>
      %1866 = arith.addf %1863, %1865 : vector<8x1xf32>
      %1867 = vector.broadcast %17 : f32 to vector<8x1xf32>
      %1868 = arith.mulf %1683, %1867 : vector<8x1xf32>
      %1869 = arith.addf %1866, %1868 : vector<8x1xf32>
      %1870 = vector.broadcast %18 : f32 to vector<8x1xf32>
      %1871 = arith.mulf %1694, %1870 : vector<8x1xf32>
      %1872 = arith.addf %1869, %1871 : vector<8x1xf32>
      %1873 = vector.broadcast %7 : f32 to vector<8x1xf32>
      %1874 = arith.mulf %1705, %1873 : vector<8x1xf32>
      %1875 = vector.broadcast %8 : f32 to vector<8x1xf32>
      %1876 = arith.mulf %1716, %1875 : vector<8x1xf32>
      %1877 = arith.addf %1874, %1876 : vector<8x1xf32>
      %1878 = vector.broadcast %9 : f32 to vector<8x1xf32>
      %1879 = arith.mulf %1727, %1878 : vector<8x1xf32>
      %1880 = arith.addf %1877, %1879 : vector<8x1xf32>
      %1881 = vector.broadcast %10 : f32 to vector<8x1xf32>
      %1882 = arith.mulf %1738, %1881 : vector<8x1xf32>
      %1883 = arith.addf %1880, %1882 : vector<8x1xf32>
      %1884 = vector.broadcast %32 : f32 to vector<8x1xf32>
      %1885 = arith.addf %1883, %1884 : vector<8x1xf32>
      %1886 = vector.broadcast %11 : f32 to vector<8x1xf32>
      %1887 = arith.mulf %1705, %1886 : vector<8x1xf32>
      %1888 = vector.broadcast %12 : f32 to vector<8x1xf32>
      %1889 = arith.mulf %1716, %1888 : vector<8x1xf32>
      %1890 = arith.addf %1887, %1889 : vector<8x1xf32>
      %1891 = vector.broadcast %13 : f32 to vector<8x1xf32>
      %1892 = arith.mulf %1727, %1891 : vector<8x1xf32>
      %1893 = arith.addf %1890, %1892 : vector<8x1xf32>
      %1894 = vector.broadcast %14 : f32 to vector<8x1xf32>
      %1895 = arith.mulf %1738, %1894 : vector<8x1xf32>
      %1896 = arith.addf %1893, %1895 : vector<8x1xf32>
      %1897 = vector.broadcast %15 : f32 to vector<8x1xf32>
      %1898 = arith.mulf %1705, %1897 : vector<8x1xf32>
      %1899 = vector.broadcast %16 : f32 to vector<8x1xf32>
      %1900 = arith.mulf %1716, %1899 : vector<8x1xf32>
      %1901 = arith.addf %1898, %1900 : vector<8x1xf32>
      %1902 = vector.broadcast %17 : f32 to vector<8x1xf32>
      %1903 = arith.mulf %1727, %1902 : vector<8x1xf32>
      %1904 = arith.addf %1901, %1903 : vector<8x1xf32>
      %1905 = vector.broadcast %18 : f32 to vector<8x1xf32>
      %1906 = arith.mulf %1738, %1905 : vector<8x1xf32>
      %1907 = arith.addf %1904, %1906 : vector<8x1xf32>
      %1908 = vector.broadcast %11 : f32 to vector<8x1xf32>
      %1909 = arith.mulf %1749, %1908 : vector<8x1xf32>
      %1910 = vector.broadcast %12 : f32 to vector<8x1xf32>
      %1911 = arith.mulf %1760, %1910 : vector<8x1xf32>
      %1912 = arith.addf %1909, %1911 : vector<8x1xf32>
      %1913 = vector.broadcast %13 : f32 to vector<8x1xf32>
      %1914 = arith.mulf %1771, %1913 : vector<8x1xf32>
      %1915 = arith.addf %1912, %1914 : vector<8x1xf32>
      %1916 = vector.broadcast %14 : f32 to vector<8x1xf32>
      %1917 = arith.mulf %1782, %1916 : vector<8x1xf32>
      %1918 = arith.addf %1915, %1917 : vector<8x1xf32>
      %1919 = vector.broadcast %33 : f32 to vector<8x1xf32>
      %1920 = arith.addf %1918, %1919 : vector<8x1xf32>
      %1921 = vector.broadcast %15 : f32 to vector<8x1xf32>
      %1922 = arith.mulf %1749, %1921 : vector<8x1xf32>
      %1923 = vector.broadcast %16 : f32 to vector<8x1xf32>
      %1924 = arith.mulf %1760, %1923 : vector<8x1xf32>
      %1925 = arith.addf %1922, %1924 : vector<8x1xf32>
      %1926 = vector.broadcast %17 : f32 to vector<8x1xf32>
      %1927 = arith.mulf %1771, %1926 : vector<8x1xf32>
      %1928 = arith.addf %1925, %1927 : vector<8x1xf32>
      %1929 = vector.broadcast %18 : f32 to vector<8x1xf32>
      %1930 = arith.mulf %1782, %1929 : vector<8x1xf32>
      %1931 = arith.addf %1928, %1930 : vector<8x1xf32>
      %1932 = vector.broadcast %15 : f32 to vector<8x1xf32>
      %1933 = arith.mulf %1793, %1932 : vector<8x1xf32>
      %1934 = vector.broadcast %16 : f32 to vector<8x1xf32>
      %1935 = arith.mulf %1804, %1934 : vector<8x1xf32>
      %1936 = arith.addf %1933, %1935 : vector<8x1xf32>
      %1937 = vector.broadcast %17 : f32 to vector<8x1xf32>
      %1938 = arith.mulf %1815, %1937 : vector<8x1xf32>
      %1939 = arith.addf %1936, %1938 : vector<8x1xf32>
      %1940 = vector.broadcast %18 : f32 to vector<8x1xf32>
      %1941 = arith.mulf %1826, %1940 : vector<8x1xf32>
      %1942 = arith.addf %1939, %1941 : vector<8x1xf32>
      %1943 = vector.broadcast %34 : f32 to vector<8x1xf32>
      %1944 = arith.addf %1942, %1943 : vector<8x1xf32>
      %1945 = arith.index_cast %113 : i32 to index
      %c0_275 = arith.constant 0 : index
      %c0_276 = arith.constant 0 : index
      %c0_277 = arith.constant 0 : index
      %1946 = vector.load %arg9[%1945, %c0_275, %c0_276, %c0_277] : memref<8x8x8x1xf32, #tpu.memory_space<vmem>>, vector<1x1x8x1xf32>
      %1947 = vector.shape_cast %1946 : vector<1x1x8x1xf32> to vector<8x1xf32>
      %1948 = vector.shape_cast %1528 : vector<8x1xf32> to vector<1x1x8x1xf32>
      tpu.vector_store %arg9[%1945, %c0_275, %c0_276, %c0_277], %1948 {strides = array<i32>} : memref<8x8x8x1xf32, #tpu.memory_space<vmem>>, vector<1x1x8x1xf32>,
      %1949 = arith.index_cast %113 : i32 to index
      %c4_278 = arith.constant 4 : index
      %c0_279 = arith.constant 0 : index
      %c0_280 = arith.constant 0 : index
      %1950 = vector.load %arg9[%1949, %c4_278, %c0_279, %c0_280] : memref<8x8x8x1xf32, #tpu.memory_space<vmem>>, vector<1x1x8x1xf32>
      %1951 = vector.shape_cast %1950 : vector<1x1x8x1xf32> to vector<8x1xf32>
      %1952 = vector.shape_cast %1617 : vector<8x1xf32> to vector<1x1x8x1xf32>
      tpu.vector_store %arg9[%1949, %c4_278, %c0_279, %c0_280], %1952 {strides = array<i32>} : memref<8x8x8x1xf32, #tpu.memory_space<vmem>>, vector<1x1x8x1xf32>,
      %1953 = arith.index_cast %113 : i32 to index
      %c1_281 = arith.constant 1 : index
      %c0_282 = arith.constant 0 : index
      %c0_283 = arith.constant 0 : index
      %1954 = vector.load %arg9[%1953, %c1_281, %c0_282, %c0_283] : memref<8x8x8x1xf32, #tpu.memory_space<vmem>>, vector<1x1x8x1xf32>
      %1955 = vector.shape_cast %1954 : vector<1x1x8x1xf32> to vector<8x1xf32>
      %1956 = vector.shape_cast %1534 : vector<8x1xf32> to vector<1x1x8x1xf32>
      tpu.vector_store %arg9[%1953, %c1_281, %c0_282, %c0_283], %1956 {strides = array<i32>} : memref<8x8x8x1xf32, #tpu.memory_space<vmem>>, vector<1x1x8x1xf32>,
      %1957 = arith.index_cast %113 : i32 to index
      %c5_284 = arith.constant 5 : index
      %c0_285 = arith.constant 0 : index
      %c0_286 = arith.constant 0 : index
      %1958 = vector.load %arg9[%1957, %c5_284, %c0_285, %c0_286] : memref<8x8x8x1xf32, #tpu.memory_space<vmem>>, vector<1x1x8x1xf32>
      %1959 = vector.shape_cast %1958 : vector<1x1x8x1xf32> to vector<8x1xf32>
      %1960 = vector.shape_cast %1628 : vector<8x1xf32> to vector<1x1x8x1xf32>
      tpu.vector_store %arg9[%1957, %c5_284, %c0_285, %c0_286], %1960 {strides = array<i32>} : memref<8x8x8x1xf32, #tpu.memory_space<vmem>>, vector<1x1x8x1xf32>,
      %1961 = arith.index_cast %113 : i32 to index
      %c2_287 = arith.constant 2 : index
      %c0_288 = arith.constant 0 : index
      %c0_289 = arith.constant 0 : index
      %1962 = vector.load %arg9[%1961, %c2_287, %c0_288, %c0_289] : memref<8x8x8x1xf32, #tpu.memory_space<vmem>>, vector<1x1x8x1xf32>
      %1963 = vector.shape_cast %1962 : vector<1x1x8x1xf32> to vector<8x1xf32>
      %1964 = vector.shape_cast %1540 : vector<8x1xf32> to vector<1x1x8x1xf32>
      tpu.vector_store %arg9[%1961, %c2_287, %c0_288, %c0_289], %1964 {strides = array<i32>} : memref<8x8x8x1xf32, #tpu.memory_space<vmem>>, vector<1x1x8x1xf32>,
      %1965 = arith.index_cast %113 : i32 to index
      %c6_290 = arith.constant 6 : index
      %c0_291 = arith.constant 0 : index
      %c0_292 = arith.constant 0 : index
      %1966 = vector.load %arg9[%1965, %c6_290, %c0_291, %c0_292] : memref<8x8x8x1xf32, #tpu.memory_space<vmem>>, vector<1x1x8x1xf32>
      %1967 = vector.shape_cast %1966 : vector<1x1x8x1xf32> to vector<8x1xf32>
      %1968 = vector.shape_cast %1639 : vector<8x1xf32> to vector<1x1x8x1xf32>
      tpu.vector_store %arg9[%1965, %c6_290, %c0_291, %c0_292], %1968 {strides = array<i32>} : memref<8x8x8x1xf32, #tpu.memory_space<vmem>>, vector<1x1x8x1xf32>,
      %1969 = arith.index_cast %113 : i32 to index
      %c3_293 = arith.constant 3 : index
      %c0_294 = arith.constant 0 : index
      %c0_295 = arith.constant 0 : index
      %1970 = vector.load %arg9[%1969, %c3_293, %c0_294, %c0_295] : memref<8x8x8x1xf32, #tpu.memory_space<vmem>>, vector<1x1x8x1xf32>
      %1971 = vector.shape_cast %1970 : vector<1x1x8x1xf32> to vector<8x1xf32>
      %1972 = vector.shape_cast %1546 : vector<8x1xf32> to vector<1x1x8x1xf32>
      tpu.vector_store %arg9[%1969, %c3_293, %c0_294, %c0_295], %1972 {strides = array<i32>} : memref<8x8x8x1xf32, #tpu.memory_space<vmem>>, vector<1x1x8x1xf32>,
      %1973 = arith.index_cast %113 : i32 to index
      %c7_296 = arith.constant 7 : index
      %c0_297 = arith.constant 0 : index
      %c0_298 = arith.constant 0 : index
      %1974 = vector.load %arg9[%1973, %c7_296, %c0_297, %c0_298] : memref<8x8x8x1xf32, #tpu.memory_space<vmem>>, vector<1x1x8x1xf32>
      %1975 = vector.shape_cast %1974 : vector<1x1x8x1xf32> to vector<8x1xf32>
      %1976 = vector.shape_cast %1650 : vector<8x1xf32> to vector<1x1x8x1xf32>
      tpu.vector_store %arg9[%1973, %c7_296, %c0_297, %c0_298], %1976 {strides = array<i32>} : memref<8x8x8x1xf32, #tpu.memory_space<vmem>>, vector<1x1x8x1xf32>,
      %1977 = arith.index_cast %113 : i32 to index
      %c0_299 = arith.constant 0 : index
      %c0_300 = arith.constant 0 : index
      %c0_301 = arith.constant 0 : index
      %1978 = vector.load %arg11[%1977, %c0_299, %c0_300, %c0_301] : memref<8x16x8x1xf32, #tpu.memory_space<vmem>>, vector<1x1x8x1xf32>
      %1979 = vector.shape_cast %1978 : vector<1x1x8x1xf32> to vector<8x1xf32>
      %1980 = vector.shape_cast %1552 : vector<8x1xf32> to vector<1x1x8x1xf32>
      tpu.vector_store %arg11[%1977, %c0_299, %c0_300, %c0_301], %1980 {strides = array<i32>} : memref<8x16x8x1xf32, #tpu.memory_space<vmem>>, vector<1x1x8x1xf32>,
      %1981 = arith.index_cast %113 : i32 to index
      %c0_302 = arith.constant 0 : index
      %c0_303 = arith.constant 0 : index
      %c0_304 = arith.constant 0 : index
      %1982 = vector.load %arg10[%1981, %c0_302, %c0_303, %c0_304] : memref<8x16x8x1xf32, #tpu.memory_space<vmem>>, vector<1x1x8x1xf32>
      %1983 = vector.shape_cast %1982 : vector<1x1x8x1xf32> to vector<8x1xf32>
      %1984 = vector.shape_cast %1839 : vector<8x1xf32> to vector<1x1x8x1xf32>
      tpu.vector_store %arg10[%1981, %c0_302, %c0_303, %c0_304], %1984 {strides = array<i32>} : memref<8x16x8x1xf32, #tpu.memory_space<vmem>>, vector<1x1x8x1xf32>,
      %1985 = arith.index_cast %113 : i32 to index
      %c1_305 = arith.constant 1 : index
      %c0_306 = arith.constant 0 : index
      %c0_307 = arith.constant 0 : index
      %1986 = vector.load %arg11[%1985, %c1_305, %c0_306, %c0_307] : memref<8x16x8x1xf32, #tpu.memory_space<vmem>>, vector<1x1x8x1xf32>
      %1987 = vector.shape_cast %1986 : vector<1x1x8x1xf32> to vector<8x1xf32>
      %1988 = vector.shape_cast %1558 : vector<8x1xf32> to vector<1x1x8x1xf32>
      tpu.vector_store %arg11[%1985, %c1_305, %c0_306, %c0_307], %1988 {strides = array<i32>} : memref<8x16x8x1xf32, #tpu.memory_space<vmem>>, vector<1x1x8x1xf32>,
      %1989 = arith.index_cast %113 : i32 to index
      %c1_308 = arith.constant 1 : index
      %c0_309 = arith.constant 0 : index
      %c0_310 = arith.constant 0 : index
      %1990 = vector.load %arg10[%1989, %c1_308, %c0_309, %c0_310] : memref<8x16x8x1xf32, #tpu.memory_space<vmem>>, vector<1x1x8x1xf32>
      %1991 = vector.shape_cast %1990 : vector<1x1x8x1xf32> to vector<8x1xf32>
      %1992 = vector.shape_cast %1850 : vector<8x1xf32> to vector<1x1x8x1xf32>
      tpu.vector_store %arg10[%1989, %c1_308, %c0_309, %c0_310], %1992 {strides = array<i32>} : memref<8x16x8x1xf32, #tpu.memory_space<vmem>>, vector<1x1x8x1xf32>,
      %1993 = arith.index_cast %113 : i32 to index
      %c2_311 = arith.constant 2 : index
      %c0_312 = arith.constant 0 : index
      %c0_313 = arith.constant 0 : index
      %1994 = vector.load %arg11[%1993, %c2_311, %c0_312, %c0_313] : memref<8x16x8x1xf32, #tpu.memory_space<vmem>>, vector<1x1x8x1xf32>
      %1995 = vector.shape_cast %1994 : vector<1x1x8x1xf32> to vector<8x1xf32>
      %1996 = vector.shape_cast %1564 : vector<8x1xf32> to vector<1x1x8x1xf32>
      tpu.vector_store %arg11[%1993, %c2_311, %c0_312, %c0_313], %1996 {strides = array<i32>} : memref<8x16x8x1xf32, #tpu.memory_space<vmem>>, vector<1x1x8x1xf32>,
      %1997 = arith.index_cast %113 : i32 to index
      %c2_314 = arith.constant 2 : index
      %c0_315 = arith.constant 0 : index
      %c0_316 = arith.constant 0 : index
      %1998 = vector.load %arg10[%1997, %c2_314, %c0_315, %c0_316] : memref<8x16x8x1xf32, #tpu.memory_space<vmem>>, vector<1x1x8x1xf32>
      %1999 = vector.shape_cast %1998 : vector<1x1x8x1xf32> to vector<8x1xf32>
      %2000 = vector.shape_cast %1861 : vector<8x1xf32> to vector<1x1x8x1xf32>
      tpu.vector_store %arg10[%1997, %c2_314, %c0_315, %c0_316], %2000 {strides = array<i32>} : memref<8x16x8x1xf32, #tpu.memory_space<vmem>>, vector<1x1x8x1xf32>,
      %2001 = arith.index_cast %113 : i32 to index
      %c3_317 = arith.constant 3 : index
      %c0_318 = arith.constant 0 : index
      %c0_319 = arith.constant 0 : index
      %2002 = vector.load %arg11[%2001, %c3_317, %c0_318, %c0_319] : memref<8x16x8x1xf32, #tpu.memory_space<vmem>>, vector<1x1x8x1xf32>
      %2003 = vector.shape_cast %2002 : vector<1x1x8x1xf32> to vector<8x1xf32>
      %2004 = vector.shape_cast %1570 : vector<8x1xf32> to vector<1x1x8x1xf32>
      tpu.vector_store %arg11[%2001, %c3_317, %c0_318, %c0_319], %2004 {strides = array<i32>} : memref<8x16x8x1xf32, #tpu.memory_space<vmem>>, vector<1x1x8x1xf32>,
      %2005 = arith.index_cast %113 : i32 to index
      %c3_320 = arith.constant 3 : index
      %c0_321 = arith.constant 0 : index
      %c0_322 = arith.constant 0 : index
      %2006 = vector.load %arg10[%2005, %c3_320, %c0_321, %c0_322] : memref<8x16x8x1xf32, #tpu.memory_space<vmem>>, vector<1x1x8x1xf32>
      %2007 = vector.shape_cast %2006 : vector<1x1x8x1xf32> to vector<8x1xf32>
      %2008 = vector.shape_cast %1872 : vector<8x1xf32> to vector<1x1x8x1xf32>
      tpu.vector_store %arg10[%2005, %c3_320, %c0_321, %c0_322], %2008 {strides = array<i32>} : memref<8x16x8x1xf32, #tpu.memory_space<vmem>>, vector<1x1x8x1xf32>,
      %2009 = arith.index_cast %113 : i32 to index
      %c4_323 = arith.constant 4 : index
      %c0_324 = arith.constant 0 : index
      %c0_325 = arith.constant 0 : index
      %2010 = vector.load %arg11[%2009, %c4_323, %c0_324, %c0_325] : memref<8x16x8x1xf32, #tpu.memory_space<vmem>>, vector<1x1x8x1xf32>
      %2011 = vector.shape_cast %2010 : vector<1x1x8x1xf32> to vector<8x1xf32>
      %2012 = vector.shape_cast %1558 : vector<8x1xf32> to vector<1x1x8x1xf32>
      tpu.vector_store %arg11[%2009, %c4_323, %c0_324, %c0_325], %2012 {strides = array<i32>} : memref<8x16x8x1xf32, #tpu.memory_space<vmem>>, vector<1x1x8x1xf32>,
      %2013 = arith.index_cast %113 : i32 to index
      %c4_326 = arith.constant 4 : index
      %c0_327 = arith.constant 0 : index
      %c0_328 = arith.constant 0 : index
      %2014 = vector.load %arg10[%2013, %c4_326, %c0_327, %c0_328] : memref<8x16x8x1xf32, #tpu.memory_space<vmem>>, vector<1x1x8x1xf32>
      %2015 = vector.shape_cast %2014 : vector<1x1x8x1xf32> to vector<8x1xf32>
      %2016 = vector.shape_cast %1850 : vector<8x1xf32> to vector<1x1x8x1xf32>
      tpu.vector_store %arg10[%2013, %c4_326, %c0_327, %c0_328], %2016 {strides = array<i32>} : memref<8x16x8x1xf32, #tpu.memory_space<vmem>>, vector<1x1x8x1xf32>,
      %2017 = arith.index_cast %113 : i32 to index
      %c5_329 = arith.constant 5 : index
      %c0_330 = arith.constant 0 : index
      %c0_331 = arith.constant 0 : index
      %2018 = vector.load %arg11[%2017, %c5_329, %c0_330, %c0_331] : memref<8x16x8x1xf32, #tpu.memory_space<vmem>>, vector<1x1x8x1xf32>
      %2019 = vector.shape_cast %2018 : vector<1x1x8x1xf32> to vector<8x1xf32>
      %2020 = vector.shape_cast %1576 : vector<8x1xf32> to vector<1x1x8x1xf32>
      tpu.vector_store %arg11[%2017, %c5_329, %c0_330, %c0_331], %2020 {strides = array<i32>} : memref<8x16x8x1xf32, #tpu.memory_space<vmem>>, vector<1x1x8x1xf32>,
      %2021 = arith.index_cast %113 : i32 to index
      %c5_332 = arith.constant 5 : index
      %c0_333 = arith.constant 0 : index
      %c0_334 = arith.constant 0 : index
      %2022 = vector.load %arg10[%2021, %c5_332, %c0_333, %c0_334] : memref<8x16x8x1xf32, #tpu.memory_space<vmem>>, vector<1x1x8x1xf32>
      %2023 = vector.shape_cast %2022 : vector<1x1x8x1xf32> to vector<8x1xf32>
      %2024 = vector.shape_cast %1885 : vector<8x1xf32> to vector<1x1x8x1xf32>
      tpu.vector_store %arg10[%2021, %c5_332, %c0_333, %c0_334], %2024 {strides = array<i32>} : memref<8x16x8x1xf32, #tpu.memory_space<vmem>>, vector<1x1x8x1xf32>,
      %2025 = arith.index_cast %113 : i32 to index
      %c6_335 = arith.constant 6 : index
      %c0_336 = arith.constant 0 : index
      %c0_337 = arith.constant 0 : index
      %2026 = vector.load %arg11[%2025, %c6_335, %c0_336, %c0_337] : memref<8x16x8x1xf32, #tpu.memory_space<vmem>>, vector<1x1x8x1xf32>
      %2027 = vector.shape_cast %2026 : vector<1x1x8x1xf32> to vector<8x1xf32>
      %2028 = vector.shape_cast %1582 : vector<8x1xf32> to vector<1x1x8x1xf32>
      tpu.vector_store %arg11[%2025, %c6_335, %c0_336, %c0_337], %2028 {strides = array<i32>} : memref<8x16x8x1xf32, #tpu.memory_space<vmem>>, vector<1x1x8x1xf32>,
      %2029 = arith.index_cast %113 : i32 to index
      %c6_338 = arith.constant 6 : index
      %c0_339 = arith.constant 0 : index
      %c0_340 = arith.constant 0 : index
      %2030 = vector.load %arg10[%2029, %c6_338, %c0_339, %c0_340] : memref<8x16x8x1xf32, #tpu.memory_space<vmem>>, vector<1x1x8x1xf32>
      %2031 = vector.shape_cast %2030 : vector<1x1x8x1xf32> to vector<8x1xf32>
      %2032 = vector.shape_cast %1896 : vector<8x1xf32> to vector<1x1x8x1xf32>
      tpu.vector_store %arg10[%2029, %c6_338, %c0_339, %c0_340], %2032 {strides = array<i32>} : memref<8x16x8x1xf32, #tpu.memory_space<vmem>>, vector<1x1x8x1xf32>,
      %2033 = arith.index_cast %113 : i32 to index
      %c7_341 = arith.constant 7 : index
      %c0_342 = arith.constant 0 : index
      %c0_343 = arith.constant 0 : index
      %2034 = vector.load %arg11[%2033, %c7_341, %c0_342, %c0_343] : memref<8x16x8x1xf32, #tpu.memory_space<vmem>>, vector<1x1x8x1xf32>
      %2035 = vector.shape_cast %2034 : vector<1x1x8x1xf32> to vector<8x1xf32>
      %2036 = vector.shape_cast %1588 : vector<8x1xf32> to vector<1x1x8x1xf32>
      tpu.vector_store %arg11[%2033, %c7_341, %c0_342, %c0_343], %2036 {strides = array<i32>} : memref<8x16x8x1xf32, #tpu.memory_space<vmem>>, vector<1x1x8x1xf32>,
      %2037 = arith.index_cast %113 : i32 to index
      %c7_344 = arith.constant 7 : index
      %c0_345 = arith.constant 0 : index
      %c0_346 = arith.constant 0 : index
      %2038 = vector.load %arg10[%2037, %c7_344, %c0_345, %c0_346] : memref<8x16x8x1xf32, #tpu.memory_space<vmem>>, vector<1x1x8x1xf32>
      %2039 = vector.shape_cast %2038 : vector<1x1x8x1xf32> to vector<8x1xf32>
      %2040 = vector.shape_cast %1907 : vector<8x1xf32> to vector<1x1x8x1xf32>
      tpu.vector_store %arg10[%2037, %c7_344, %c0_345, %c0_346], %2040 {strides = array<i32>} : memref<8x16x8x1xf32, #tpu.memory_space<vmem>>, vector<1x1x8x1xf32>,
      %2041 = arith.index_cast %113 : i32 to index
      %c8_347 = arith.constant 8 : index
      %c0_348 = arith.constant 0 : index
      %c0_349 = arith.constant 0 : index
      %2042 = vector.load %arg11[%2041, %c8_347, %c0_348, %c0_349] : memref<8x16x8x1xf32, #tpu.memory_space<vmem>>, vector<1x1x8x1xf32>
      %2043 = vector.shape_cast %2042 : vector<1x1x8x1xf32> to vector<8x1xf32>
      %2044 = vector.shape_cast %1564 : vector<8x1xf32> to vector<1x1x8x1xf32>
      tpu.vector_store %arg11[%2041, %c8_347, %c0_348, %c0_349], %2044 {strides = array<i32>} : memref<8x16x8x1xf32, #tpu.memory_space<vmem>>, vector<1x1x8x1xf32>,
      %2045 = arith.index_cast %113 : i32 to index
      %c8_350 = arith.constant 8 : index
      %c0_351 = arith.constant 0 : index
      %c0_352 = arith.constant 0 : index
      %2046 = vector.load %arg10[%2045, %c8_350, %c0_351, %c0_352] : memref<8x16x8x1xf32, #tpu.memory_space<vmem>>, vector<1x1x8x1xf32>
      %2047 = vector.shape_cast %2046 : vector<1x1x8x1xf32> to vector<8x1xf32>
      %2048 = vector.shape_cast %1861 : vector<8x1xf32> to vector<1x1x8x1xf32>
      tpu.vector_store %arg10[%2045, %c8_350, %c0_351, %c0_352], %2048 {strides = array<i32>} : memref<8x16x8x1xf32, #tpu.memory_space<vmem>>, vector<1x1x8x1xf32>,
      %2049 = arith.index_cast %113 : i32 to index
      %c9_353 = arith.constant 9 : index
      %c0_354 = arith.constant 0 : index
      %c0_355 = arith.constant 0 : index
      %2050 = vector.load %arg11[%2049, %c9_353, %c0_354, %c0_355] : memref<8x16x8x1xf32, #tpu.memory_space<vmem>>, vector<1x1x8x1xf32>
      %2051 = vector.shape_cast %2050 : vector<1x1x8x1xf32> to vector<8x1xf32>
      %2052 = vector.shape_cast %1582 : vector<8x1xf32> to vector<1x1x8x1xf32>
      tpu.vector_store %arg11[%2049, %c9_353, %c0_354, %c0_355], %2052 {strides = array<i32>} : memref<8x16x8x1xf32, #tpu.memory_space<vmem>>, vector<1x1x8x1xf32>,
      %2053 = arith.index_cast %113 : i32 to index
      %c9_356 = arith.constant 9 : index
      %c0_357 = arith.constant 0 : index
      %c0_358 = arith.constant 0 : index
      %2054 = vector.load %arg10[%2053, %c9_356, %c0_357, %c0_358] : memref<8x16x8x1xf32, #tpu.memory_space<vmem>>, vector<1x1x8x1xf32>
      %2055 = vector.shape_cast %2054 : vector<1x1x8x1xf32> to vector<8x1xf32>
      %2056 = vector.shape_cast %1896 : vector<8x1xf32> to vector<1x1x8x1xf32>
      tpu.vector_store %arg10[%2053, %c9_356, %c0_357, %c0_358], %2056 {strides = array<i32>} : memref<8x16x8x1xf32, #tpu.memory_space<vmem>>, vector<1x1x8x1xf32>,
      %2057 = arith.index_cast %113 : i32 to index
      %c10_359 = arith.constant 10 : index
      %c0_360 = arith.constant 0 : index
      %c0_361 = arith.constant 0 : index
      %2058 = vector.load %arg11[%2057, %c10_359, %c0_360, %c0_361] : memref<8x16x8x1xf32, #tpu.memory_space<vmem>>, vector<1x1x8x1xf32>
      %2059 = vector.shape_cast %2058 : vector<1x1x8x1xf32> to vector<8x1xf32>
      %2060 = vector.shape_cast %1594 : vector<8x1xf32> to vector<1x1x8x1xf32>
      tpu.vector_store %arg11[%2057, %c10_359, %c0_360, %c0_361], %2060 {strides = array<i32>} : memref<8x16x8x1xf32, #tpu.memory_space<vmem>>, vector<1x1x8x1xf32>,
      %2061 = arith.index_cast %113 : i32 to index
      %c10_362 = arith.constant 10 : index
      %c0_363 = arith.constant 0 : index
      %c0_364 = arith.constant 0 : index
      %2062 = vector.load %arg10[%2061, %c10_362, %c0_363, %c0_364] : memref<8x16x8x1xf32, #tpu.memory_space<vmem>>, vector<1x1x8x1xf32>
      %2063 = vector.shape_cast %2062 : vector<1x1x8x1xf32> to vector<8x1xf32>
      %2064 = vector.shape_cast %1920 : vector<8x1xf32> to vector<1x1x8x1xf32>
      tpu.vector_store %arg10[%2061, %c10_362, %c0_363, %c0_364], %2064 {strides = array<i32>} : memref<8x16x8x1xf32, #tpu.memory_space<vmem>>, vector<1x1x8x1xf32>,
      %2065 = arith.index_cast %113 : i32 to index
      %c11_365 = arith.constant 11 : index
      %c0_366 = arith.constant 0 : index
      %c0_367 = arith.constant 0 : index
      %2066 = vector.load %arg11[%2065, %c11_365, %c0_366, %c0_367] : memref<8x16x8x1xf32, #tpu.memory_space<vmem>>, vector<1x1x8x1xf32>
      %2067 = vector.shape_cast %2066 : vector<1x1x8x1xf32> to vector<8x1xf32>
      %2068 = vector.shape_cast %1600 : vector<8x1xf32> to vector<1x1x8x1xf32>
      tpu.vector_store %arg11[%2065, %c11_365, %c0_366, %c0_367], %2068 {strides = array<i32>} : memref<8x16x8x1xf32, #tpu.memory_space<vmem>>, vector<1x1x8x1xf32>,
      %2069 = arith.index_cast %113 : i32 to index
      %c11_368 = arith.constant 11 : index
      %c0_369 = arith.constant 0 : index
      %c0_370 = arith.constant 0 : index
      %2070 = vector.load %arg10[%2069, %c11_368, %c0_369, %c0_370] : memref<8x16x8x1xf32, #tpu.memory_space<vmem>>, vector<1x1x8x1xf32>
      %2071 = vector.shape_cast %2070 : vector<1x1x8x1xf32> to vector<8x1xf32>
      %2072 = vector.shape_cast %1931 : vector<8x1xf32> to vector<1x1x8x1xf32>
      tpu.vector_store %arg10[%2069, %c11_368, %c0_369, %c0_370], %2072 {strides = array<i32>} : memref<8x16x8x1xf32, #tpu.memory_space<vmem>>, vector<1x1x8x1xf32>,
      %2073 = arith.index_cast %113 : i32 to index
      %c12_371 = arith.constant 12 : index
      %c0_372 = arith.constant 0 : index
      %c0_373 = arith.constant 0 : index
      %2074 = vector.load %arg11[%2073, %c12_371, %c0_372, %c0_373] : memref<8x16x8x1xf32, #tpu.memory_space<vmem>>, vector<1x1x8x1xf32>
      %2075 = vector.shape_cast %2074 : vector<1x1x8x1xf32> to vector<8x1xf32>
      %2076 = vector.shape_cast %1570 : vector<8x1xf32> to vector<1x1x8x1xf32>
      tpu.vector_store %arg11[%2073, %c12_371, %c0_372, %c0_373], %2076 {strides = array<i32>} : memref<8x16x8x1xf32, #tpu.memory_space<vmem>>, vector<1x1x8x1xf32>,
      %2077 = arith.index_cast %113 : i32 to index
      %c12_374 = arith.constant 12 : index
      %c0_375 = arith.constant 0 : index
      %c0_376 = arith.constant 0 : index
      %2078 = vector.load %arg10[%2077, %c12_374, %c0_375, %c0_376] : memref<8x16x8x1xf32, #tpu.memory_space<vmem>>, vector<1x1x8x1xf32>
      %2079 = vector.shape_cast %2078 : vector<1x1x8x1xf32> to vector<8x1xf32>
      %2080 = vector.shape_cast %1872 : vector<8x1xf32> to vector<1x1x8x1xf32>
      tpu.vector_store %arg10[%2077, %c12_374, %c0_375, %c0_376], %2080 {strides = array<i32>} : memref<8x16x8x1xf32, #tpu.memory_space<vmem>>, vector<1x1x8x1xf32>,
      %2081 = arith.index_cast %113 : i32 to index
      %c13_377 = arith.constant 13 : index
      %c0_378 = arith.constant 0 : index
      %c0_379 = arith.constant 0 : index
      %2082 = vector.load %arg11[%2081, %c13_377, %c0_378, %c0_379] : memref<8x16x8x1xf32, #tpu.memory_space<vmem>>, vector<1x1x8x1xf32>
      %2083 = vector.shape_cast %2082 : vector<1x1x8x1xf32> to vector<8x1xf32>
      %2084 = vector.shape_cast %1588 : vector<8x1xf32> to vector<1x1x8x1xf32>
      tpu.vector_store %arg11[%2081, %c13_377, %c0_378, %c0_379], %2084 {strides = array<i32>} : memref<8x16x8x1xf32, #tpu.memory_space<vmem>>, vector<1x1x8x1xf32>,
      %2085 = arith.index_cast %113 : i32 to index
      %c13_380 = arith.constant 13 : index
      %c0_381 = arith.constant 0 : index
      %c0_382 = arith.constant 0 : index
      %2086 = vector.load %arg10[%2085, %c13_380, %c0_381, %c0_382] : memref<8x16x8x1xf32, #tpu.memory_space<vmem>>, vector<1x1x8x1xf32>
      %2087 = vector.shape_cast %2086 : vector<1x1x8x1xf32> to vector<8x1xf32>
      %2088 = vector.shape_cast %1907 : vector<8x1xf32> to vector<1x1x8x1xf32>
      tpu.vector_store %arg10[%2085, %c13_380, %c0_381, %c0_382], %2088 {strides = array<i32>} : memref<8x16x8x1xf32, #tpu.memory_space<vmem>>, vector<1x1x8x1xf32>,
      %2089 = arith.index_cast %113 : i32 to index
      %c14_383 = arith.constant 14 : index
      %c0_384 = arith.constant 0 : index
      %c0_385 = arith.constant 0 : index
      %2090 = vector.load %arg11[%2089, %c14_383, %c0_384, %c0_385] : memref<8x16x8x1xf32, #tpu.memory_space<vmem>>, vector<1x1x8x1xf32>
      %2091 = vector.shape_cast %2090 : vector<1x1x8x1xf32> to vector<8x1xf32>
      %2092 = vector.shape_cast %1600 : vector<8x1xf32> to vector<1x1x8x1xf32>
      tpu.vector_store %arg11[%2089, %c14_383, %c0_384, %c0_385], %2092 {strides = array<i32>} : memref<8x16x8x1xf32, #tpu.memory_space<vmem>>, vector<1x1x8x1xf32>,
      %2093 = arith.index_cast %113 : i32 to index
      %c14_386 = arith.constant 14 : index
      %c0_387 = arith.constant 0 : index
      %c0_388 = arith.constant 0 : index
      %2094 = vector.load %arg10[%2093, %c14_386, %c0_387, %c0_388] : memref<8x16x8x1xf32, #tpu.memory_space<vmem>>, vector<1x1x8x1xf32>
      %2095 = vector.shape_cast %2094 : vector<1x1x8x1xf32> to vector<8x1xf32>
      %2096 = vector.shape_cast %1931 : vector<8x1xf32> to vector<1x1x8x1xf32>
      tpu.vector_store %arg10[%2093, %c14_386, %c0_387, %c0_388], %2096 {strides = array<i32>} : memref<8x16x8x1xf32, #tpu.memory_space<vmem>>, vector<1x1x8x1xf32>,
      %2097 = arith.index_cast %113 : i32 to index
      %c15_389 = arith.constant 15 : index
      %c0_390 = arith.constant 0 : index
      %c0_391 = arith.constant 0 : index
      %2098 = vector.load %arg11[%2097, %c15_389, %c0_390, %c0_391] : memref<8x16x8x1xf32, #tpu.memory_space<vmem>>, vector<1x1x8x1xf32>
      %2099 = vector.shape_cast %2098 : vector<1x1x8x1xf32> to vector<8x1xf32>
      %2100 = vector.shape_cast %1606 : vector<8x1xf32> to vector<1x1x8x1xf32>
      tpu.vector_store %arg11[%2097, %c15_389, %c0_390, %c0_391], %2100 {strides = array<i32>} : memref<8x16x8x1xf32, #tpu.memory_space<vmem>>, vector<1x1x8x1xf32>,
      %2101 = arith.index_cast %113 : i32 to index
      %c15_392 = arith.constant 15 : index
      %c0_393 = arith.constant 0 : index
      %c0_394 = arith.constant 0 : index
      %2102 = vector.load %arg10[%2101, %c15_392, %c0_393, %c0_394] : memref<8x16x8x1xf32, #tpu.memory_space<vmem>>, vector<1x1x8x1xf32>
      %2103 = vector.shape_cast %2102 : vector<1x1x8x1xf32> to vector<8x1xf32>
      %2104 = vector.shape_cast %1944 : vector<8x1xf32> to vector<1x1x8x1xf32>
      tpu.vector_store %arg10[%2101, %c15_392, %c0_393, %c0_394], %2104 {strides = array<i32>} : memref<8x16x8x1xf32, #tpu.memory_space<vmem>>, vector<1x1x8x1xf32>,
      scf.yield %1617, %1628, %1639, %1650, %1839, %1850, %1861, %1872, %1885, %1896, %1907, %1920, %1931, %1944 : vector<8x1xf32>, vector<8x1xf32>, vector<8x1xf32>, vector<8x1xf32>, vector<8x1xf32>, vector<8x1xf32>, vector<8x1xf32>, vector<8x1xf32>, vector<8x1xf32>, vector<8x1xf32>, vector<8x1xf32>, vector<8x1xf32>, vector<8x1xf32>, vector<8x1xf32>
    }
    %c4_i32_98 = arith.constant 4 : i32
    %c0_99 = arith.constant 0 : index
    %c0_100 = arith.constant 0 : index
    %c0_101 = arith.constant 0 : index
    %70 = vector.load %arg12[%c0_99, %c0_100, %c0_101] : memref<4x8x1xf32, #tpu.memory_space<vmem>>, vector<1x8x1xf32>
    %71 = vector.shape_cast %70 : vector<1x8x1xf32> to vector<8x1xf32>
    %72 = vector.shape_cast %69#0 : vector<8x1xf32> to vector<1x8x1xf32>
    tpu.vector_store %arg12[%c0_99, %c0_100, %c0_101], %72 {strides = array<i32>} : memref<4x8x1xf32, #tpu.memory_space<vmem>>, vector<1x8x1xf32>,
    %c1_102 = arith.constant 1 : index
    %c0_103 = arith.constant 0 : index
    %c0_104 = arith.constant 0 : index
    %73 = vector.load %arg12[%c1_102, %c0_103, %c0_104] : memref<4x8x1xf32, #tpu.memory_space<vmem>>, vector<1x8x1xf32>
    %74 = vector.shape_cast %73 : vector<1x8x1xf32> to vector<8x1xf32>
    %75 = vector.shape_cast %69#1 : vector<8x1xf32> to vector<1x8x1xf32>
    tpu.vector_store %arg12[%c1_102, %c0_103, %c0_104], %75 {strides = array<i32>} : memref<4x8x1xf32, #tpu.memory_space<vmem>>, vector<1x8x1xf32>,
    %c2_105 = arith.constant 2 : index
    %c0_106 = arith.constant 0 : index
    %c0_107 = arith.constant 0 : index
    %76 = vector.load %arg12[%c2_105, %c0_106, %c0_107] : memref<4x8x1xf32, #tpu.memory_space<vmem>>, vector<1x8x1xf32>
    %77 = vector.shape_cast %76 : vector<1x8x1xf32> to vector<8x1xf32>
    %78 = vector.shape_cast %69#2 : vector<8x1xf32> to vector<1x8x1xf32>
    tpu.vector_store %arg12[%c2_105, %c0_106, %c0_107], %78 {strides = array<i32>} : memref<4x8x1xf32, #tpu.memory_space<vmem>>, vector<1x8x1xf32>,
    %c3_108 = arith.constant 3 : index
    %c0_109 = arith.constant 0 : index
    %c0_110 = arith.constant 0 : index
    %79 = vector.load %arg12[%c3_108, %c0_109, %c0_110] : memref<4x8x1xf32, #tpu.memory_space<vmem>>, vector<1x8x1xf32>
    %80 = vector.shape_cast %79 : vector<1x8x1xf32> to vector<8x1xf32>
    %81 = vector.shape_cast %69#3 : vector<8x1xf32> to vector<1x8x1xf32>
    tpu.vector_store %arg12[%c3_108, %c0_109, %c0_110], %81 {strides = array<i32>} : memref<4x8x1xf32, #tpu.memory_space<vmem>>, vector<1x8x1xf32>,
    %c0_111 = arith.constant 0 : index
    %c0_112 = arith.constant 0 : index
    %c0_113 = arith.constant 0 : index
    %82 = vector.load %arg13[%c0_111, %c0_112, %c0_113] : memref<10x8x1xf32, #tpu.memory_space<vmem>>, vector<1x8x1xf32>
    %83 = vector.shape_cast %82 : vector<1x8x1xf32> to vector<8x1xf32>
    %84 = vector.shape_cast %69#4 : vector<8x1xf32> to vector<1x8x1xf32>
    tpu.vector_store %arg13[%c0_111, %c0_112, %c0_113], %84 {strides = array<i32>} : memref<10x8x1xf32, #tpu.memory_space<vmem>>, vector<1x8x1xf32>,
    %c1_114 = arith.constant 1 : index
    %c0_115 = arith.constant 0 : index
    %c0_116 = arith.constant 0 : index
    %85 = vector.load %arg13[%c1_114, %c0_115, %c0_116] : memref<10x8x1xf32, #tpu.memory_space<vmem>>, vector<1x8x1xf32>
    %86 = vector.shape_cast %85 : vector<1x8x1xf32> to vector<8x1xf32>
    %87 = vector.shape_cast %69#5 : vector<8x1xf32> to vector<1x8x1xf32>
    tpu.vector_store %arg13[%c1_114, %c0_115, %c0_116], %87 {strides = array<i32>} : memref<10x8x1xf32, #tpu.memory_space<vmem>>, vector<1x8x1xf32>,
    %c2_117 = arith.constant 2 : index
    %c0_118 = arith.constant 0 : index
    %c0_119 = arith.constant 0 : index
    %88 = vector.load %arg13[%c2_117, %c0_118, %c0_119] : memref<10x8x1xf32, #tpu.memory_space<vmem>>, vector<1x8x1xf32>
    %89 = vector.shape_cast %88 : vector<1x8x1xf32> to vector<8x1xf32>
    %90 = vector.shape_cast %69#6 : vector<8x1xf32> to vector<1x8x1xf32>
    tpu.vector_store %arg13[%c2_117, %c0_118, %c0_119], %90 {strides = array<i32>} : memref<10x8x1xf32, #tpu.memory_space<vmem>>, vector<1x8x1xf32>,
    %c3_120 = arith.constant 3 : index
    %c0_121 = arith.constant 0 : index
    %c0_122 = arith.constant 0 : index
    %91 = vector.load %arg13[%c3_120, %c0_121, %c0_122] : memref<10x8x1xf32, #tpu.memory_space<vmem>>, vector<1x8x1xf32>
    %92 = vector.shape_cast %91 : vector<1x8x1xf32> to vector<8x1xf32>
    %93 = vector.shape_cast %69#7 : vector<8x1xf32> to vector<1x8x1xf32>
    tpu.vector_store %arg13[%c3_120, %c0_121, %c0_122], %93 {strides = array<i32>} : memref<10x8x1xf32, #tpu.memory_space<vmem>>, vector<1x8x1xf32>,
    %c4_123 = arith.constant 4 : index
    %c0_124 = arith.constant 0 : index
    %c0_125 = arith.constant 0 : index
    %94 = vector.load %arg13[%c4_123, %c0_124, %c0_125] : memref<10x8x1xf32, #tpu.memory_space<vmem>>, vector<1x8x1xf32>
    %95 = vector.shape_cast %94 : vector<1x8x1xf32> to vector<8x1xf32>
    %96 = vector.shape_cast %69#8 : vector<8x1xf32> to vector<1x8x1xf32>
    tpu.vector_store %arg13[%c4_123, %c0_124, %c0_125], %96 {strides = array<i32>} : memref<10x8x1xf32, #tpu.memory_space<vmem>>, vector<1x8x1xf32>,
    %c5_126 = arith.constant 5 : index
    %c0_127 = arith.constant 0 : index
    %c0_128 = arith.constant 0 : index
    %97 = vector.load %arg13[%c5_126, %c0_127, %c0_128] : memref<10x8x1xf32, #tpu.memory_space<vmem>>, vector<1x8x1xf32>
    %98 = vector.shape_cast %97 : vector<1x8x1xf32> to vector<8x1xf32>
    %99 = vector.shape_cast %69#9 : vector<8x1xf32> to vector<1x8x1xf32>
    tpu.vector_store %arg13[%c5_126, %c0_127, %c0_128], %99 {strides = array<i32>} : memref<10x8x1xf32, #tpu.memory_space<vmem>>, vector<1x8x1xf32>,
    %c6_129 = arith.constant 6 : index
    %c0_130 = arith.constant 0 : index
    %c0_131 = arith.constant 0 : index
    %100 = vector.load %arg13[%c6_129, %c0_130, %c0_131] : memref<10x8x1xf32, #tpu.memory_space<vmem>>, vector<1x8x1xf32>
    %101 = vector.shape_cast %100 : vector<1x8x1xf32> to vector<8x1xf32>
    %102 = vector.shape_cast %69#10 : vector<8x1xf32> to vector<1x8x1xf32>
    tpu.vector_store %arg13[%c6_129, %c0_130, %c0_131], %102 {strides = array<i32>} : memref<10x8x1xf32, #tpu.memory_space<vmem>>, vector<1x8x1xf32>,
    %c7_132 = arith.constant 7 : index
    %c0_133 = arith.constant 0 : index
    %c0_134 = arith.constant 0 : index
    %103 = vector.load %arg13[%c7_132, %c0_133, %c0_134] : memref<10x8x1xf32, #tpu.memory_space<vmem>>, vector<1x8x1xf32>
    %104 = vector.shape_cast %103 : vector<1x8x1xf32> to vector<8x1xf32>
    %105 = vector.shape_cast %69#11 : vector<8x1xf32> to vector<1x8x1xf32>
    tpu.vector_store %arg13[%c7_132, %c0_133, %c0_134], %105 {strides = array<i32>} : memref<10x8x1xf32, #tpu.memory_space<vmem>>, vector<1x8x1xf32>,
    %c8_135 = arith.constant 8 : index
    %c0_136 = arith.constant 0 : index
    %c0_137 = arith.constant 0 : index
    %106 = vector.load %arg13[%c8_135, %c0_136, %c0_137] : memref<10x8x1xf32, #tpu.memory_space<vmem>>, vector<1x8x1xf32>
    %107 = vector.shape_cast %106 : vector<1x8x1xf32> to vector<8x1xf32>
    %108 = vector.shape_cast %69#12 : vector<8x1xf32> to vector<1x8x1xf32>
    tpu.vector_store %arg13[%c8_135, %c0_136, %c0_137], %108 {strides = array<i32>} : memref<10x8x1xf32, #tpu.memory_space<vmem>>, vector<1x8x1xf32>,
    %c9_138 = arith.constant 9 : index
    %c0_139 = arith.constant 0 : index
    %c0_140 = arith.constant 0 : index
    %109 = vector.load %arg13[%c9_138, %c0_139, %c0_140] : memref<10x8x1xf32, #tpu.memory_space<vmem>>, vector<1x8x1xf32>
    %110 = vector.shape_cast %109 : vector<1x8x1xf32> to vector<8x1xf32>
    %111 = vector.shape_cast %69#13 : vector<8x1xf32> to vector<1x8x1xf32>
    tpu.vector_store %arg13[%c9_138, %c0_139, %c0_140], %111 {strides = array<i32>} : memref<10x8x1xf32, #tpu.memory_space<vmem>>, vector<1x8x1xf32>,
    return
  }
  func.func @transform_0(%arg0: i32, %arg1: i32) -> (i32, i32, i32, i32) {
    %c0_i32 = arith.constant 0 : i32
    %c0_i32_0 = arith.constant 0 : i32
    %c0_i32_1 = arith.constant 0 : i32
    return %arg1, %c0_i32, %arg0, %c0_i32_0 : i32, i32, i32, i32
  }
  func.func @transform_1(%arg0: i32, %arg1: i32) -> (i32, i32) {
    %c0_i32 = arith.constant 0 : i32
    %c0_i32_0 = arith.constant 0 : i32
    %c0_i32_1 = arith.constant 0 : i32
    return %c0_i32, %c0_i32_0 : i32, i32
  }
  func.func @transform_2(%arg0: i32, %arg1: i32) -> (i32, i32) {
    %c0_i32 = arith.constant 0 : i32
    %c0_i32_0 = arith.constant 0 : i32
    %c0_i32_1 = arith.constant 0 : i32
    return %c0_i32, %c0_i32_0 : i32, i32
  }
  func.func @transform_3(%arg0: i32, %arg1: i32) -> i32 {
    %c0_i32 = arith.constant 0 : i32
    %c0_i32_0 = arith.constant 0 : i32
    return %c0_i32 : i32
  }
  func.func @transform_4(%arg0: i32, %arg1: i32) -> (i32, i32) {
    %c0_i32 = arith.constant 0 : i32
    %c0_i32_0 = arith.constant 0 : i32
    %c0_i32_1 = arith.constant 0 : i32
    return %c0_i32, %c0_i32_0 : i32, i32
  }
  func.func @transform_5(%arg0: i32, %arg1: i32) -> i32 {
    %c0_i32 = arith.constant 0 : i32
    %c0_i32_0 = arith.constant 0 : i32
    return %c0_i32 : i32
  }
  func.func @transform_6(%arg0: i32, %arg1: i32) -> i32 {
    %c0_i32 = arith.constant 0 : i32
    %c0_i32_0 = arith.constant 0 : i32
    return %c0_i32 : i32
  }
  func.func @transform_7(%arg0: i32, %arg1: i32) -> (i32, i32, i32, i32) {
    %c0_i32 = arith.constant 0 : i32
    %c0_i32_0 = arith.constant 0 : i32
    %c0_i32_1 = arith.constant 0 : i32
    return %arg1, %c0_i32, %arg0, %c0_i32_0 : i32, i32, i32, i32
  }
  func.func @transform_8(%arg0: i32, %arg1: i32) -> (i32, i32, i32, i32) {
    %c0_i32 = arith.constant 0 : i32
    %c0_i32_0 = arith.constant 0 : i32
    %c0_i32_1 = arith.constant 0 : i32
    return %arg1, %c0_i32, %arg0, %c0_i32_0 : i32, i32, i32, i32
  }
  func.func @transform_9(%arg0: i32, %arg1: i32) -> (i32, i32, i32, i32) {
    %c0_i32 = arith.constant 0 : i32
    %c0_i32_0 = arith.constant 0 : i32
    %c0_i32_1 = arith.constant 0 : i32
    return %arg1, %c0_i32, %arg0, %c0_i32_0 : i32, i32, i32, i32
  }
}

</mosaic_0001>

<bundles_post_ra>
// kernel: tpu_custom_call.1
= control target key start
LH: loop header
LB: loop body
LE: loop exit
PB: predicated region body
PF: predicated region fallthrough
CT: control target
= control target key end

     0   :  { %s5684_s0 = inlined_call_operand.vmem [shape: f32[24,4,8,1], index: 0, kind: input, shape index: {}]   ;;  %s5685_s1 = inlined_call_operand.hbm [shape: f32[4,4], index: 1, kind: input, shape index: {}]   ;;  %s5686_s2 = inlined_call_operand.hbm [shape: f32[3,4], index: 2, kind: input, shape index: {}]   ;;  %s5687_s3 = inlined_call_operand.hbm [shape: f32[4], index: 3, kind: input, shape index: {}]   ;;  %s5688_s4 = inlined_call_operand.hbm [shape: f32[4,4], index: 4, kind: input, shape index: {}]   ;;  %s5689_s5 = inlined_call_operand.hbm [shape: f32[4], index: 5, kind: input, shape index: {}]   ;;  %s5690_s6 = inlined_call_operand.hbm [shape: f32[3], index: 6, kind: input, shape index: {}]   ;;  %s5691_s7 = inlined_call_operand.vmem [shape: f32[24,8,8,1], index: 7, kind: output, shape index: {0}]   ;;  %s5692_s8 = inlined_call_operand.vmem [shape: f32[24,16,8,1], index: 8, kind: output, shape index: {1}]   ;;  %s5693_s9 = inlined_call_operand.vmem [shape: f32[24,16,8,1], index: 9, kind: output, shape index: {2}]  }
   0x1   :  { %5772 = sst [smem:[#allocation70_spill]] %s5684_s0 }
   0x2   :  { %5773 = sst [smem:[#allocation71_spill]] %s5685_s1 }
   0x3   :  { %5774 = sst [smem:[#allocation72_spill]] %s5686_s2 }
   0x4   :  { %5775 = sst [smem:[#allocation73_spill]] %s5687_s3 }
   0x5   :  { %5776 = sst [smem:[#allocation74_spill]] %s5688_s4 }
   0x6   :  { %5777 = sst [smem:[#allocation75_spill]] %s5689_s5 }
   0x7   :  { %5778 = sst [smem:[#allocation76_spill]] %s5690_s6 }
   0x8   :  { %5779 = sst [smem:[#allocation77_spill]] %s5691_s7 }
   0x9   :  { %5780 = sst [smem:[#allocation78_spill]] %s5692_s8 }
   0xa   :  { %5781 = sst [smem:[#allocation79_spill]] %s5693_s9 }
   0xb   :  { %15 = vsyncpa [#allocation5], 0 }
   0xc   :  { %16 = vsyncpa [#allocation7], 0 }
   0xd   :  { %17 = vsyncpa [#allocation10], 0 }
   0xe   :  { %18 = vsyncpa [#allocation13], 0  ;;  %s3514_s30 = smov 0   ;;  %s3516_s10 = smov 0  }
   0xf   :  { %s3518_s11 = smov 0  }
  0x10 LB: > { %5782 = sst [smem:[#allocation18_spill]] %s3392_s10  ;;  %s2676_s12 = sadd.s32 4294967295, %s3396_s11   ;;  %s3396_s11 = sphi %s3518_s11, %s24_s11   ;;  %s3392_s10 = sphi %s3516_s10, %s5950_s10   ;;  %s3388_s30 = sphi %s3514_s30, %s5949_s30  }
  0x11   : > { %5783 = sst [smem:[#allocation19_spill]] %s3396_s11  ;;  %p2678_p0 = scmp.ge.s32.totalorder %s3396_s11, 1 }
  0x12   : > { %p279_p1 = scmp.lt.s32.totalorder %s3396_s11, 4  ;;  %p3532_p2 = scmp.eq.s32.totalorder %s2676_s12, 0 }
  0x13   : > { %s33_s15 = sadd.s32 1, %s3392_s10  ;;  %s5788_s2 = sld [smem:[#allocation72_spill]] }
  0x14   : > { %p3536_p3 = pnand %p2678_p0, %p279_p1  ;;  %p34_p5 = scmp.ge.s32.totalorder %s33_s15, 3 }
  0x16   : > { %p3027_p4 = pneg %p3536_p3  ;;  %s5952_s15 = smov (%p34_p5, %s33_s15), 0 }
  0x17   : > { %5787 = sst [smem:[#allocation20_spill]] %s5952_s15 }
  0x18   : > { %p3545_p6 = pnand %p3532_p2, %p3027_p4 }
  0x19   : > { %s3220_s19 = scalar_lea.hbm %s5788_s2, 64 }
  0x1a   : > { %p3221_p7 = scmp.ne.s32.totalorder %s5788_s2, %s3220_s19  ;;  %p3559_p8 = pneg %p3545_p6 }
  0x1b   : > { %p3227_p11 = scmp.lt.u32.totalorder %s3220_s19, %s5788_s2 }
  0x1c   : > { %p3223_p9 = pnand %p3559_p8, %p3221_p7 }
  0x1e   : > { %p3224_p10 = pneg %p3223_p9 }
  0x20   : > { %p3229_p12 = pnand %p3227_p11, %p3224_p10 }
  0x22   : > { %3232 = shalt.err (!%p3229_p12)
}
  0x23   : > { %s3458_s25 = smov [#allocation6]   ;;  %s5790_s4 = sld [smem:[#allocation74_spill]] }
  0x24   : > { %3033 = dma.hbm_to_smem (!%p3545_p6), %s5788_s2, 64, %s3458_s25, [#allocation7]  }
  0x29   : > { %s3233_s12 = scalar_lea.hbm %s5790_s4, 64 }
  0x2a   : > { %p3234_p13 = scmp.ne.s32.totalorder %s5790_s4, %s3233_s12  ;;  %p3240_p4 = scmp.lt.u32.totalorder %s3233_s12, %s5790_s4 }
  0x2c   : > { %p3236_p0 = pnand %p3234_p13, %p3559_p8 }
  0x2e   : > { %p3237_p1 = pneg %p3236_p0 }
  0x30   : > { %p3242_p5 = pnand %p3240_p4, %p3237_p1 }
  0x32   : > { %3245 = shalt.err (!%p3242_p5)
}
  0x33   : > { %s3459_s21 = smov [#allocation9]   ;;  %s5791_s1 = sld [smem:[#allocation71_spill]] }
  0x34   : > { %3039 = dma.hbm_to_smem (!%p3545_p6), %s5790_s4, 64, %s3459_s21, [#allocation10]  }
  0x39   : > { %s3246_s27 = scalar_lea.hbm %s5791_s1, 64 }
  0x3a   : > { %p3247_p7 = scmp.ne.s32.totalorder %s5791_s1, %s3246_s27  ;;  %p3253_p11 = scmp.lt.u32.totalorder %s3246_s27, %s5791_s1 }
  0x3c   : > { %p3249_p9 = pnand %p3247_p7, %p3559_p8 }
  0x3e   : > { %p3250_p10 = pneg %p3249_p9 }
  0x40   : > { %p3255_p12 = pnand %p3253_p11, %p3250_p10 }
  0x42   : > { %3258 = shalt.err (!%p3255_p12)
}
  0x43   : > { %s3460_s18 = smov [#allocation4]   ;;  %s5792_s3 = sld [smem:[#allocation73_spill]] }
  0x44   : > { %3030 = dma.hbm_to_smem (!%p3545_p6), %s5791_s1, 64, %s3460_s18, [#allocation5]  }
  0x49   : > { %s3259_s24 = scalar_lea.hbm %s5792_s3, 16 }
  0x4a   : > { %p3260_p13 = scmp.ne.s32.totalorder %s5792_s3, %s3259_s24  ;;  %p3266_p4 = scmp.lt.u32.totalorder %s3259_s24, %s5792_s3 }
  0x4c   : > { %p3262_p0 = pnand %p3260_p13, %p3559_p8 }
  0x4e   : > { %p3263_p1 = pneg %p3262_p0 }
  0x50   : > { %p3268_p5 = pnand %p3266_p4, %p3263_p1 }
  0x52   : > { %3271 = shalt.err (!%p3268_p5)
}
  0x53   : > { %s3461_s29 = smov [#allocation8]   ;;  %s5793_s5 = sld [smem:[#allocation75_spill]] }
  0x54   : > { %3036 = dma.hbm_to_smem (!%p3545_p6), %s5792_s3, 16, %s3461_s29, [#allocation7]  }
  0x59   : > { %s3272_s20 = scalar_lea.hbm %s5793_s5, 16 }
  0x5a   : > { %p3273_p7 = scmp.ne.s32.totalorder %s5793_s5, %s3272_s20  ;;  %p3279_p11 = scmp.lt.u32.totalorder %s3272_s20, %s5793_s5 }
  0x5c   : > { %p3275_p9 = pnand %p3273_p7, %p3559_p8 }
  0x5e   : > { %p3276_p10 = pneg %p3275_p9 }
  0x60   : > { %p3281_p12 = pnand %p3279_p11, %p3276_p10 }
  0x62   : > { %3284 = shalt.err (!%p3281_p12)
}
  0x63   : > { %s3462_s26 = smov [#allocation11]   ;;  %s5794_s6 = sld [smem:[#allocation76_spill]] }
  0x64   : > { %3042 = dma.hbm_to_smem (!%p3545_p6), %s5793_s5, 16, %s3462_s26, [#allocation10]  }
  0x69   : > { %s3285_s17 = scalar_lea.hbm %s5794_s6, 16 }
  0x6a   : > { %p3286_p13 = scmp.ne.s32.totalorder %s5794_s6, %s3285_s17  ;;  %p3292_p4 = scmp.lt.u32.totalorder %s3285_s17, %s5794_s6 }
  0x6c   : > { %p3288_p0 = pnand %p3286_p13, %p3559_p8 }
  0x6e   : > { %p3289_p1 = pneg %p3288_p0 }
  0x70   : > { %p3294_p5 = pnand %p3292_p4, %p3289_p1 }
  0x72   : > { %3297 = shalt.err (!%p3294_p5)
}
  0x73   : > { %s3463_s23 = smov [#allocation12]   ;;  %361 = sbr.rel (%p3536_p3) target bundleno = 609 (0x261), region = 48 }
  0x74   : > { %3045 = dma.hbm_to_smem (!%p3545_p6), %s5794_s6, 16, %s3463_s23, [#allocation13]  }
  0x7a   : > { %3371 = dma.done.wait (%p3532_p2), [#allocation5], 64  }
  0x7b   : > { %3373 = vsyncadd (%p3532_p2), [#allocation5], 4294967232 }
  0x7c   : > { %3375 = dma.done.wait (%p3532_p2), [#allocation7], 80  }
  0x7d   : > { %3377 = vsyncadd (%p3532_p2), [#allocation7], 4294967216 }
  0x7e   : > { %3379 = dma.done.wait (%p3532_p2), [#allocation10], 80  }
  0x7f   : > { %3381 = vsyncadd (%p3532_p2), [#allocation10], 4294967216 }
  0x80   : > { %3383 = dma.done.wait (%p3532_p2), [#allocation13], 16  }
  0x81   : > { %3385 = vsyncadd (%p3532_p2), [#allocation13], 4294967280 }
  0x82   : > { %387 = sfence }
  0x83   : > { %s2693_s14 = sshll.u32 %s3388_s30, 3  ;;  %s5795_s0 = sld [smem:[#allocation70_spill]] }
  0x84   : > { %p445_p3 = scmp.lt.s32.totalorder %s2693_s14, 23  ;;  %s5796_s7 = sld [smem:[#allocation77_spill]] }
  0x85   : > { %s5798_s8 = sld [smem:[#allocation78_spill]]  ;;  %s5800_s9 = sld [smem:[#allocation79_spill]] }
  0x86   : > { %s5954_s14 = smov (!%p445_p3, %s2693_s14), 23  ;;  %p2705_p2 = scmp.ne.s32.totalorder %s3388_s30, 0 }
  0x87   : > { %s2955_s16 = sshll.u32 %s5954_s14, 5  ;;  %s2956_s22 = sshll.u32 %s5954_s14, 6  ;;  %vm490_vm0 = vcmask (!%p2705_p2), 7168  }
  0x88   : > { %s2957_s18 = sshll.u32 %s5954_s14, 7  ;;  %487 = sbr.rel (%p2705_p2) target bundleno = 155 (0x9b), region = 76 }
  0x89   : > { %s3675_s28 = scalar_lea.vmem %s5795_s0, %s2955_s16  ;;  %s488_s25 = sld [smem:[#allocation8]] (!%p2705_p2) }
  0x8a   : > { %s3680_s17 = scalar_lea.vmem %s5796_s7, %s2956_s22  ;;  %s2706_s16 = sld [smem:[#allocation8 + $0x1]] (!%p2705_p2) }
  0x8b   : > { %5797 = sst [smem:[#allocation21_spill]] %s3680_s17  ;;  %s3685_s20 = scalar_lea.vmem %s5798_s8, %s2957_s18 }
  0x8c   : > { %5799 = sst [smem:[#allocation22_spill]] %s3685_s20  ;;  %s3690_s24 = scalar_lea.vmem %s5800_s9, %s2957_s18 }
  0x8d   : > { %5801 = sst [smem:[#allocation23_spill]] %s3690_s24  ;;  %s2707_s26 = sld [smem:[#allocation8 + $0x2]] (!%p2705_p2) }
  0x8e   : > { %s2708_s27 = sld [smem:[#allocation8 + $0x3]] (!%p2705_p2)  ;;  %s504_s22 = sld [smem:[#allocation9]] (!%p2705_p2) }
  0x8f   : > { %s2709_s29 = sld [smem:[#allocation9 + $0x1]]  ;;  %s2710_s14 = sld [smem:[#allocation9 + $0x2]]  ;;  %v489_v0 = vstv %s488_s25 }
  0x90   : > { %s2711_s12 = sld [smem:[#allocation9 + $0x3]]  ;;  %s2712_s13 = sld [smem:[#allocation9 + $0x81]]  ;;  %v493_v1 = vstv %s2706_s16  ;;  %491 = vst.msk [vmem:[#allocation2] sm:$0xff] %vm490_vm0, %v489_v0 }
  0x91   : > { %s2713_s19 = sld [smem:[#allocation9 + $0x82]]  ;;  %s2714_s0 = sld [smem:[#allocation9 + $0x83]]  ;;  %495 = vst.msk [vmem:[#allocation2 + $0x8] sm:$0xff] %vm490_vm0, %v493_v1 }
  0x92   : > { %s2715_s1 = sld [smem:[#allocation9 + $0x102]]  ;;  %s2716_s18 = sld [smem:[#allocation9 + $0x103]] }
  0x93   : > { %s2717_s21 = sld [smem:[#allocation9 + $0x183]]  ;;  %v497_v2 = vstv %s2707_s26 }
  0x94   : > { %v501_v3 = vstv %s2708_s27  ;;  %499 = vst.msk [vmem:[#allocation2 + $0x10] sm:$0xff] %vm490_vm0, %v497_v2  ;;  %v505_v4 = vstv %s504_s22 }
  0x95   : > { %503 = vst.msk [vmem:[#allocation2 + $0x18] sm:$0xff] %vm490_vm0, %v501_v3  ;;  %v508_v5 = vstv %s2709_s29  ;;  %506 = vst.msk [vmem:[#allocation3] sm:$0xff] %vm490_vm0, %v505_v4  ;;  %v512_v6 = vstv %s2710_s14 }
  0x96   : > { %510 = vst.msk [vmem:[#allocation3 + $0x8] sm:$0xff] %vm490_vm0, %v508_v5  ;;  %v516_v7 = vstv %s2711_s12  ;;  %514 = vst.msk [vmem:[#allocation3 + $0x10] sm:$0xff] %vm490_vm0, %v512_v6  ;;  %v520_v8 = vstv %s2712_s13 }
  0x97   : > { %518 = vst.msk [vmem:[#allocation3 + $0x18] sm:$0xff] %vm490_vm0, %v516_v7  ;;  %v524_v9 = vstv %s2713_s19  ;;  %522 = vst.msk [vmem:[#allocation3 + $0x20] sm:$0xff] %vm490_vm0, %v520_v8  ;;  %v528_v10 = vstv %s2714_s0 }
  0x98   : > { %526 = vst.msk [vmem:[#allocation3 + $0x28] sm:$0xff] %vm490_vm0, %v524_v9  ;;  %v532_v11 = vstv %s2715_s1  ;;  %530 = vst.msk [vmem:[#allocation3 + $0x30] sm:$0xff] %vm490_vm0, %v528_v10  ;;  %v536_v12 = vstv %s2716_s18 }
  0x99   : > { %534 = vst.msk [vmem:[#allocation3 + $0x38] sm:$0xff] %vm490_vm0, %v532_v11  ;;  %v540_v13 = vstv %s2717_s21  ;;  %538 = vst.msk [vmem:[#allocation3 + $0x40] sm:$0xff] %vm490_vm0, %v536_v12 }
  0x9a   : > { %542 = vst.msk [vmem:[#allocation3 + $0x48] sm:$0xff] %vm490_vm0, %v540_v13 }
  0x9b PF: > { %s3707_s30 = sld [smem:[#allocation4]]  ;;  %s3709_s23 = sld [smem:[#allocation4 + $0x1]]  ;;  %v578_v14 = vld [vmem:[#allocation2] sm:$0xff]   ;;  %v580_v15 = vld [vmem:[#allocation2 + $0x8] sm:$0xff]   ;;  %v582_v16 = vld [vmem:[#allocation2 + $0x10] sm:$0xff]  }
  0x9c   : > { %s3711_s25 = sld [smem:[#allocation4 + $0x2]]  ;;  %s3713_s0 = sld [smem:[#allocation4 + $0x3]]  ;;  %v584_v17 = vld [vmem:[#allocation2 + $0x18] sm:$0xff]   ;;  %v585_v18 = vld [vmem:[#allocation3] sm:$0xff]  }
  0x9d   : > { %s3715_s1 = sld [smem:[#allocation4 + $0x80]]  ;;  %s3717_s16 = sld [smem:[#allocation4 + $0x81]]  ;;  %v587_v19 = vld [vmem:[#allocation3 + $0x8] sm:$0xff]   ;;  %v589_v20 = vld [vmem:[#allocation3 + $0x10] sm:$0xff]  }
  0x9e   : > { %s3719_s26 = sld [smem:[#allocation4 + $0x82]]  ;;  %s3721_s27 = sld [smem:[#allocation4 + $0x83]]  ;;  %v591_v21 = vld [vmem:[#allocation3 + $0x18] sm:$0xff]   ;;  %v593_v22 = vld [vmem:[#allocation3 + $0x20] sm:$0xff]  }
  0x9f   : > { %s3723_s22 = sld [smem:[#allocation4 + $0x100]]  ;;  %s3725_s29 = sld [smem:[#allocation4 + $0x101]]  ;;  %v595_v23 = vld [vmem:[#allocation3 + $0x28] sm:$0xff]   ;;  %v597_v24 = vld [vmem:[#allocation3 + $0x30] sm:$0xff]  }
  0xa0   : > { %s3727_s14 = sld [smem:[#allocation4 + $0x102]]  ;;  %s3729_s12 = sld [smem:[#allocation4 + $0x103]]  ;;  %v599_v25 = vld [vmem:[#allocation3 + $0x38] sm:$0xff]   ;;  %v601_v26 = vld [vmem:[#allocation3 + $0x40] sm:$0xff]  }
  0xa1   : > { %s3731_s13 = sld [smem:[#allocation4 + $0x180]]  ;;  %s3733_s19 = sld [smem:[#allocation4 + $0x181]]  ;;  %v603_v27 = vld [vmem:[#allocation3 + $0x48] sm:$0xff]  }
  0xa2   : > { %5802 = sst [smem:[#allocation24_spill]] %s3713_s0  ;;  %s3735_s18 = sld [smem:[#allocation4 + $0x182]] }
  0xa3   : > { %5803 = sst [smem:[#allocation25_spill]] %s3715_s1  ;;  %s3737_s21 = sld [smem:[#allocation4 + $0x183]] }
  0xa4   : > { %s3739_s2 = sld [smem:[#allocation6]]  ;;  %s3741_s3 = sld [smem:[#allocation6 + $0x1]] }
  0xa5   : > { %s3743_s4 = sld [smem:[#allocation6 + $0x2]]  ;;  %s3745_s5 = sld [smem:[#allocation6 + $0x3]] }
  0xa6   : > { %5804 = sst [smem:[#allocation26_spill]] %s3729_s12  ;;  %s3749_s7 = sld [smem:[#allocation6 + $0x81]] }
  0xa7   : > { %5805 = sst [smem:[#allocation27_spill]] %s3731_s13  ;;  %s3747_s6 = sld [smem:[#allocation6 + $0x80]] }
  0xa8   : > { %5806 = sst [smem:[#allocation28_spill]] %s3733_s19  ;;  %s3753_s9 = sld [smem:[#allocation6 + $0x83]] }
  0xa9   : > { %5807 = sst [smem:[#allocation29_spill]] %s3735_s18  ;;  %s3751_s8 = sld [smem:[#allocation6 + $0x82]] }
  0xaa   : > { %5808 = sst [smem:[#allocation30_spill]] %s3737_s21  ;;  %s3755_s15 = sld [smem:[#allocation6 + $0x100]] }
  0xab   : > { %5809 = sst [smem:[#allocation31_spill]] %s3739_s2  ;;  %s3757_s10 = sld [smem:[#allocation6 + $0x101]] }
  0xac   : > { %5810 = sst [smem:[#allocation32_spill]] %s3741_s3  ;;  %s3759_s11 = sld [smem:[#allocation6 + $0x102]] }
  0xad   : > { %5811 = sst [smem:[#allocation33_spill]] %s3743_s4  ;;  %s3761_s20 = sld [smem:[#allocation6 + $0x103]] }
  0xae   : > { %5812 = sst [smem:[#allocation34_spill]] %s3745_s5  ;;  %s3765_s12 = sld [smem:[#allocation11 + $0x1]] }
  0xaf   : > { %s3763_s21 = sld [smem:[#allocation11]]  ;;  %s3767_s24 = sld [smem:[#allocation11 + $0x2]] }
  0xb0   : > { %s3769_s17 = sld [smem:[#allocation11 + $0x3]]  ;;  %s3771_s18 = sld [smem:[#allocation12]] }
  0xb1   : > { %s3773_s19 = sld [smem:[#allocation12 + $0x1]]  ;;  %s3775_s13 = sld [smem:[#allocation12 + $0x2]] }
  0xb6   : > { %5813 = sst [smem:[#allocation35_spill]] %s3769_s17  ;;  %s3805_s17 = smov 0  }
  0xb7 LB: >> { %s5814_s2 = sld [smem:[#allocation31_spill]]  ;;  %5815 = vst [vmem:[#allocation36_spill] sm:$0xff] %v3400_v27  ;;  %s5816_s3 = sld [smem:[#allocation32_spill]]  ;;  %5817 = vst [vmem:[#allocation37_spill] sm:$0xff] %v3408_v25  ;;  %v3903_v58 = vstv %s3747_s6  ;;  %v3906_v60 = vstv %s3749_s7  ;;  %v3927_v7 = vstv %s3751_s8  ;;  %v5698_v9 = vstv %s3771_s18  ;;  %s3456_s17 = sphi %s3805_s17, %s609_s17   ;;  %v3452_v14 = vphi %v578_v14, %v5947_v14   ;;  %v3448_v15 = vphi %v580_v15, %v5946_v15   ;;  %v3444_v16 = vphi %v582_v16, %v5945_v16   ;;  %v3440_v17 = vphi %v584_v17, %v5944_v17   ;;  %v3436_v18 = vphi %v585_v18, %v5943_v18   ;;  %v3432_v19 = vphi %v587_v19, %v5942_v19   ;;  %v3428_v20 = vphi %v589_v20, %v5941_v20   ;;  %v3424_v21 = vphi %v591_v21, %v5940_v21   ;;  %v3420_v22 = vphi %v593_v22, %v5939_v22   ;;  %v3416_v23 = vphi %v595_v23, %v5938_v23   ;;  %v3412_v24 = vphi %v597_v24, %v5937_v24   ;;  %v3408_v25 = vphi %v599_v25, %v5936_v25   ;;  %v3404_v26 = vphi %v601_v26, %v5935_v26   ;;  %v3400_v27 = vphi %v603_v27, %v5934_v27  }
  0xb8   : >> { %s5818_s4 = sld [smem:[#allocation33_spill]]  ;;  %5819 = vst [vmem:[#allocation38_spill] sm:$0xff] %v3420_v22  ;;  %s5820_s5 = sld [smem:[#allocation34_spill]]  ;;  %5821 = vst [vmem:[#allocation39_spill] sm:$0xff] %v3436_v18  ;;  %v678_v1 = vmul.f32 %v3436_v18, %v3903_v58  ;;  %v679_v3 = vmul.f32 %v3432_v19, %v3906_v60  ;;  %v699_v4 = vmul.f32 %v3432_v19, %v3903_v58  ;;  %vm1270_vm1 = vcmask 7168  }
  0xb9   : >> { %5822 = vst [vmem:[#allocation40_spill] sm:$0xff] %v3440_v17  ;;  %5823 = vst [vmem:[#allocation41_spill] sm:$0xff] %v3444_v16  ;;  %v700_v5 = vmul.f32 %v3420_v22, %v3906_v60  ;;  %v720_v10 = vmul.f32 %v3428_v20, %v3903_v58  ;;  %v721_v11 = vmul.f32 %v3416_v23, %v3906_v60  ;;  %s5838_s0 = sld [smem:[#allocation24_spill]]  ;;  %s5839_s1 = sld [smem:[#allocation25_spill]] }
  0xba   : >> { %5828 = vst [vmem:[#allocation46_spill] sm:$0xff] %v3903_v58  ;;  %5829 = vst [vmem:[#allocation47_spill] sm:$0xff] %v3906_v60  ;;  %v680_v13 = vadd.f32 %v679_v3, %v678_v1 }
  0xbb   : >> { %5830 = vst [vmem:[#allocation48_spill] sm:$0xff] %v3927_v7 }
  0xbd   : >> { %v3853_v28 = vstv %s5814_s2  ;;  %v3856_v29 = vstv %s5816_s3  ;;  %s2959_s2 = sshll.u32 %s3456_s17, 6 }
  0xbe   : >> { %5824 = vst [vmem:[#allocation42_spill] sm:$0xff] %v3853_v28  ;;  %5825 = vst [vmem:[#allocation43_spill] sm:$0xff] %v3856_v29  ;;  %v671_v30 = vmul.f32 %v3436_v18, %v3853_v28  ;;  %v672_v31 = vmul.f32 %v3432_v19, %v3856_v29  ;;  %v692_v32 = vmul.f32 %v3432_v19, %v3853_v28  ;;  %v3865_v33 = vstv %s5818_s4  ;;  %s4111_s3 = scalar_lea.vmem %s3675_s28, %s2959_s2  ;;  %s5843_s2 = sld [smem:[#allocation27_spill]] }
  0xbf   : >> { %5826 = vst [vmem:[#allocation44_spill] sm:$0xff] %v3865_v33  ;;  %v693_v34 = vmul.f32 %v3420_v22, %v3856_v29  ;;  %v3870_v35 = vstv %s5820_s5  ;;  %v674_v37 = vmul.f32 %v3428_v20, %v3865_v33  ;;  %v695_v39 = vmul.f32 %v3416_v23, %v3865_v33  ;;  %s5845_s4 = sld [smem:[#allocation28_spill]]  ;;  %s2961_s5 = sshll.u32 %s3456_s17, 8 }
  0xc0   : >> { %5827 = vst [vmem:[#allocation45_spill] sm:$0xff] %v3870_v35  ;;  %v673_v36 = vadd.f32 %v672_v31, %v671_v30  ;;  %v713_v40 = vmul.f32 %v3428_v20, %v3853_v28  ;;  %v714_v41 = vmul.f32 %v3416_v23, %v3856_v29  ;;  %v716_v42 = vmul.f32 %v3408_v25, %v3865_v33 }
  0xc1   : >> { %v694_v38 = vadd.f32 %v693_v34, %v692_v32  ;;  %v676_v43 = vmul.f32 %v3424_v21, %v3870_v35  ;;  %v697_v46 = vmul.f32 %v3412_v24, %v3870_v35  ;;  %v718_v48 = vmul.f32 %v3404_v26, %v3870_v35 }
  0xc2   : >> { %v675_v44 = vadd.f32 %v674_v37, %v673_v36  ;;  %v715_v47 = vadd.f32 %v714_v41, %v713_v40  ;;  %v734_v50 = vmul.f32 %v3424_v21, %v3853_v28  ;;  %v735_v51 = vmul.f32 %v3412_v24, %v3856_v29 }
  0xc3   : >> { %v696_v45 = vadd.f32 %v695_v39, %v694_v38  ;;  %v737_v54 = vmul.f32 %v3404_v26, %v3865_v33  ;;  %v739_v57 = vmul.f32 %v3400_v27, %v3870_v35  ;;  %v681_v30 = vmul.f32 %v3428_v20, %v3927_v7 }
  0xc4   : >> { %v717_v49 = vadd.f32 %v716_v42, %v715_v47  ;;  %v3892_v52 = vadd.f32 %v676_v43, %v675_v44  ;;  %v736_v56 = vadd.f32 %v735_v51, %v734_v50  ;;  %v701_v31 = vadd.f32 %v700_v5, %v699_v4 }
  0xc5   : >> { %v3894_v53 = vadd.f32 %v697_v46, %v696_v45  ;;  %v702_v32 = vmul.f32 %v3416_v23, %v3927_v7  ;;  %v3939_v34 = vstv %s3753_s9  ;;  %v722_v37 = vadd.f32 %v721_v11, %v720_v10 }
  0xc6   : >> { %v3898_v55 = vadd.f32 %v718_v48, %v717_v49  ;;  %v738_v59 = vadd.f32 %v737_v54, %v736_v56  ;;  %v755_v61 = vmul.f32 %v3892_v52, %v3853_v28  ;;  %5831 = vst [vmem:[#allocation49_spill] sm:$0xff] %v3939_v34  ;;  %v723_v38 = vmul.f32 %v3408_v25, %v3927_v7 }
  0xc7   : >> { %v756_v62 = vmul.f32 %v3894_v53, %v3856_v29  ;;  %v741_v39 = vmul.f32 %v3424_v21, %v3903_v58  ;;  %v742_v40 = vmul.f32 %v3412_v24, %v3906_v60  ;;  %v682_v41 = vadd.f32 %v681_v30, %v680_v13 }
  0xc8   : >> { %v3912_v63 = vadd.f32 %v739_v57, %v738_v59  ;;  %v758_v0 = vmul.f32 %v3898_v55, %v3865_v33  ;;  %v683_v42 = vmul.f32 %v3424_v21, %v3939_v34  ;;  %v703_v43 = vadd.f32 %v702_v32, %v701_v31 }
  0xc9   : >> { %v757_v2 = vadd.f32 %v756_v62, %v755_v61  ;;  %v704_v44 = vmul.f32 %v3412_v24, %v3939_v34  ;;  %v3954_v45 = vstv %s3755_s15  ;;  %v3957_v46 = vstv %s3757_s10 }
  0xca   : >> { %v760_v6 = vmul.f32 %v3912_v63, %v3870_v35  ;;  %5832 = vst [vmem:[#allocation50_spill] sm:$0xff] %v3954_v45  ;;  %5833 = vst [vmem:[#allocation51_spill] sm:$0xff] %v3957_v46  ;;  %v724_v47 = vadd.f32 %v723_v38, %v722_v37  ;;  %v725_v48 = vmul.f32 %v3404_v26, %v3939_v34  ;;  %v3972_v59 = vstv %s3759_s11 }
  0xcb   : >> { %v759_v8 = vadd.f32 %v758_v0, %v757_v2  ;;  %v743_v49 = vadd.f32 %v742_v40, %v741_v39  ;;  %v744_v50 = vmul.f32 %v3404_v26, %v3927_v7  ;;  %v3963_v51 = vadd.f32 %v683_v42, %v682_v41  ;;  %5835 = vst [vmem:[#allocation53_spill] sm:$0xff] %v3972_v59 }
  0xcc   : >> { %v3965_v54 = vadd.f32 %v704_v44, %v703_v43  ;;  %v685_v56 = vmul.f32 %v3436_v18, %v3954_v45  ;;  %v686_v57 = vmul.f32 %v3432_v19, %v3957_v46  ;;  %v3974_v61 = vadd.f32 %v725_v48, %v724_v47 }
  0xcd   : >> { %v761_v12 = vadd.f32 %v760_v6, %v759_v8  ;;  %5834 = vst [vmem:[#allocation52_spill] sm:$0xff] %v3963_v51  ;;  %v745_v62 = vadd.f32 %v744_v50, %v743_v49  ;;  %v746_v0 = vmul.f32 %v3400_v27, %v3939_v34  ;;  %v764_v1 = vmul.f32 %v3963_v51, %v3853_v28 }
  0xce   : >> { %v765_v2 = vmul.f32 %v3965_v54, %v3856_v29  ;;  %v778_v3 = vmul.f32 %v3963_v51, %v3903_v58  ;;  %v779_v4 = vmul.f32 %v3965_v54, %v3906_v60  ;;  %v706_v5 = vmul.f32 %v3432_v19, %v3954_v45 }
  0xcf   : >> { %v763_v36 = vadd.f32 %v5698_v9, %v761_v12  ;;  %v707_v6 = vmul.f32 %v3420_v22, %v3957_v46  ;;  %v3991_v8 = vstv %s3761_s20  ;;  %v687_v10 = vadd.f32 %v686_v57, %v685_v56 }
  0xd0   : >> { %5836 = vst [vmem:[#allocation54_spill] sm:$0xff] %v3991_v8  ;;  %v688_v11 = vmul.f32 %v3428_v20, %v3972_v59  ;;  %v727_v13 = vmul.f32 %v3428_v20, %v3954_v45  ;;  %v728_v30 = vmul.f32 %v3416_v23, %v3957_v46  ;;  %v3999_v31 = vadd.f32 %v746_v0, %v745_v62 }
  0xd1   : >> { %3208 = vrcp.f32 %v763_v36  ;;  %v767_v32 = vmul.f32 %v3974_v61, %v3865_v33  ;;  %v766_v37 = vadd.f32 %v765_v2, %v764_v1  ;;  %v780_v38 = vadd.f32 %v779_v4, %v778_v3 }
  0xd2   : >> { %v781_v39 = vmul.f32 %v3974_v61, %v3927_v7  ;;  %v708_v41 = vadd.f32 %v707_v6, %v706_v5  ;;  %v709_v42 = vmul.f32 %v3416_v23, %v3972_v59  ;;  %v690_v43 = vmul.f32 %v3424_v21, %v3991_v8 }
  0xd3   : >> { %v689_v47 = vadd.f32 %v688_v11, %v687_v10  ;;  %v729_v48 = vadd.f32 %v728_v30, %v727_v13  ;;  %v730_v49 = vmul.f32 %v3408_v25, %v3972_v59  ;;  %v769_v50 = vmul.f32 %v3999_v31, %v3870_v35 }
  0xd4   : >> { %v768_v56 = vadd.f32 %v767_v32, %v766_v37  ;;  %v782_v57 = vadd.f32 %v781_v39, %v780_v38  ;;  %v783_v62 = vmul.f32 %v3999_v31, %v3939_v34  ;;  %v710_v1 = vadd.f32 %v709_v42, %v708_v41 }
  0xd5   : >> { %v711_v2 = vmul.f32 %v3412_v24, %v3991_v8  ;;  %v748_v3 = vmul.f32 %v3424_v21, %v3954_v45  ;;  %v749_v4 = vmul.f32 %v3412_v24, %v3957_v46  ;;  %v4021_v6 = vadd.f32 %v690_v43, %v689_v47 }
  0xd6   : >> { %v732_v10 = vmul.f32 %v3404_v26, %v3991_v8  ;;  %v731_v11 = vadd.f32 %v730_v49, %v729_v48  ;;  %v4025_v13 = vadd.f32 %v769_v50, %v768_v56  ;;  %v751_v38 = vmul.f32 %v3404_v26, %v3972_v59 }
  0xd7   : >> { %5837 = vst [vmem:[#allocation55_spill] sm:$0xff] %v4021_v6  ;;  %v4027_v32 = vadd.f32 %v711_v2, %v710_v1  ;;  %v750_v37 = vadd.f32 %v749_v4, %v748_v3  ;;  %v5697_v39 = vstv %s3773_s19  ;;  %v771_v47 = vmul.f32 %v4021_v6, %v3853_v28 }
  0xd8   : >> { %v787_v2 = vmul.f32 %v4021_v6, %v3903_v58  ;;  %v794_v4 = vmul.f32 %v4021_v6, %v3954_v45 }
  0xd9   : >> { %v752_v43 = vadd.f32 %v751_v38, %v750_v37  ;;  %v772_v48 = vmul.f32 %v4027_v32, %v3856_v29  ;;  %v788_v3 = vmul.f32 %v4027_v32, %v3906_v60 }
  0xdb   : >> { %v3209_v12 = vpop.eup %3208 }
  0xdc   : >> { %v804_v40 = vmul.f32 %v3209_v12, %v763_v36 }
  0xde   : >> { %v805_v44 = vsub.f32 2.0, %v804_v40 }
  0xe0   : >> { %v806_v0 = vmul.f32 %v3209_v12, %v805_v44  ;;  %v784_v12 = vadd.f32 %v783_v62, %v782_v57  ;;  %v753_v44 = vmul.f32 %v3400_v27, %v3991_v8  ;;  %v773_v57 = vadd.f32 %v772_v48, %v771_v47 }
  0xe2   : >> { %v807_v5 = vmul.f32 %v806_v0, %v763_v36  ;;  %v4034_v36 = vadd.f32 %v732_v10, %v731_v11  ;;  %v786_v41 = vadd.f32 %v5697_v39, %v784_v12  ;;  %v4050_v56 = vadd.f32 %v753_v44, %v752_v43 }
  0xe3   : >> { %v789_v11 = vadd.f32 %v788_v3, %v787_v2  ;;  %v5699_v3 = vstv %s3775_s13 }
  0xe4   : >> { %v808_v30 = vsub.f32 2.0, %v807_v5  ;;  %v774_v62 = vmul.f32 %v4034_v36, %v3865_v33  ;;  %v776_v1 = vmul.f32 %v4050_v56, %v3870_v35  ;;  %v795_v5 = vmul.f32 %v4027_v32, %v3957_v46 }
  0xe5   : >> { %v790_v12 = vmul.f32 %v4034_v36, %v3927_v7  ;;  %v797_v37 = vmul.f32 %v4034_v36, %v3972_v59  ;;  %v792_v43 = vmul.f32 %v4050_v56, %v3939_v34 }
  0xe6   : >> { %v4032_v40 = vmul.f32 %v808_v30, %v806_v0  ;;  %v775_v0 = vadd.f32 %v774_v62, %v773_v57  ;;  %v796_v30 = vadd.f32 %v795_v5, %v794_v4 }
  0xe8   : >> { %v4040_v42 = vmul.f32 %v4032_v40, %v4025_v13  ;;  %v777_v10 = vadd.f32 %v776_v1, %v775_v0  ;;  %v798_v48 = vadd.f32 %v797_v37, %v796_v30 }
  0xea   : >> { %v813_v49 = vmul.f32 %v4040_v42, %v4025_v13  ;;  %v4071_v44 = vmul.f32 %v4032_v40, %v777_v10  ;;  %v821_v5 = vmul.f32 %v4040_v42, %v777_v10 }
  0xec   : >> { %v814_v50 = vsub.f32 %v786_v41, %v813_v49  ;;  %v791_v41 = vadd.f32 %v790_v12, %v789_v11  ;;  %v799_v49 = vmul.f32 %v4050_v56, %v3991_v8  ;;  %v815_v0 = vmul.f32 %v4071_v44, %v4025_v13 }
  0xed   : >> { %v823_v30 = vmul.f32 %v4071_v44, %v777_v10 }
  0xee   : >> { %3210 = vrcp.f32 %v814_v50  ;;  %v793_v62 = vadd.f32 %v792_v43, %v791_v41  ;;  %v800_v2 = vadd.f32 %v799_v49, %v798_v48  ;;  %v4086_v48 = vmul.f32 0.0, %v4032_v40 }
  0xef   : >> { %v638_v49 = vmul.f32 %v3448_v15, %v3856_v29 }
  0xf0   : >> { %v816_v11 = vsub.f32 %v793_v62, %v815_v0  ;;  %v802_v39 = vadd.f32 %v5699_v3, %v800_v2  ;;  %v822_v9 = vsub.f32 %v793_v62, %v821_v5  ;;  %v660_v62 = vmul.f32 %v3452_v14, %v3954_v45 }
  0xf1   : >> { %v662_v0 = vmul.f32 %v3448_v15, %v3957_v46  ;;  %v630_v46 = vld [vmem:[%s4111_s3 + $0x10] sm:$0xff]  ;;  %v826_v45 = vmul.f32 %v4086_v48, %v777_v10 }
  0xf2   : >> { %v824_v41 = vsub.f32 %v802_v39, %v823_v30  ;;  %v650_v39 = vmul.f32 %v3448_v15, %v3906_v60  ;;  %v665_v30 = vmul.f32 %v3444_v16, %v3972_v59 }
  0xf3   : >> { %v827_v10 = vsub.f32 0.0, %v826_v45  ;;  %v828_v29 = vsub.f32 1.0, %v826_v45 }
  0xf8   : >> { %v3211_v38 = vpop.eup %3210 }
  0xf9   : >> { %v830_v47 = vmul.f32 %v3211_v38, %v814_v50 }
  0xfb   : >> { %v831_v57 = vsub.f32 2.0, %v830_v47 }
  0xfd   : >> { %v832_v1 = vmul.f32 %v3211_v38, %v831_v57  ;;  %v648_v57 = vmul.f32 %v3452_v14, %v3903_v58 }
  0xff   : >> { %v833_v4 = vmul.f32 %v832_v1, %v814_v50  ;;  %v636_v50 = vmul.f32 %v3452_v14, %v3853_v28  ;;  %v651_v5 = vadd.f32 %v650_v39, %v648_v57  ;;  %v629_v57 = vld [vmem:[%s4111_s3 + $0x8] sm:$0xff] }
 0x101   : >> { %v834_v12 = vsub.f32 2.0, %v833_v4  ;;  %v639_v2 = vadd.f32 %v638_v49, %v636_v50  ;;  %v641_v4 = vmul.f32 %v3444_v16, %v3865_v33  ;;  %v644_v50 = vmul.f32 %v3440_v17, %v3870_v35  ;;  %v628_v49 = vld [vmem:[%s4111_s3] sm:$0xff] }
 0x102   : >> { %v825_v33 = vsub.f32 0.0, %v4071_v44 }
 0x103   : >> { %v835_v37 = vmul.f32 %v834_v12, %v832_v1  ;;  %v818_v1 = vmul.f32 %v4086_v48, %v4025_v13  ;;  %v663_v12 = vadd.f32 %v662_v0, %v660_v62  ;;  %v642_v13 = vadd.f32 %v641_v4, %v639_v2 }
 0x104   : >> { %v656_v62 = vmul.f32 %v3440_v17, %v3939_v34 }
 0x105   : >> { %v4082_v47 = vmul.f32 %v835_v37, %v816_v11  ;;  %v653_v11 = vmul.f32 %v3444_v16, %v3927_v7  ;;  %v820_v3 = vsub.f32 0.0, %v818_v1  ;;  %v666_v0 = vadd.f32 %v665_v30, %v663_v12  ;;  %v4124_v7 = vld [vmem:[%s4111_s3 + $0x18] sm:$0xff] }
 0x106   : >> { %v632_v35 = vmul.f32 %v4124_v7, %v628_v49  ;;  %v634_v12 = vmul.f32 %v4124_v7, %v630_v46 }
 0x107   : >> { %v848_v43 = vmul.f32 %v4082_v47, %v822_v9  ;;  %v654_v39 = vadd.f32 %v653_v11, %v651_v5  ;;  %v839_v60 = vmul.f32 %v835_v37, %v820_v3  ;;  %v633_v5 = vmul.f32 %v4124_v7, %v629_v57 }
 0x108   : >> { %v645_v11 = vadd.f32 %v644_v50, %v642_v13 }
 0x109   : >> { %v849_v38 = vsub.f32 %v824_v41, %v848_v43  ;;  %v817_v41 = vsub.f32 0.0, %v4040_v42  ;;  %v819_v43 = vsub.f32 1.0, %v818_v1  ;;  %v668_v1 = vmul.f32 %v3440_v17, %v3991_v8 }
 0x10a   : >> { %v657_v30 = vadd.f32 %v656_v62, %v654_v39  ;;  %v854_v3 = vmul.f32 %v839_v60, %v822_v9  ;;  %v4145_v39 = vstv %s3709_s23  ;;  %v4148_v62 = vstv %s3711_s25 }
 0x10b   : >> { %3212 = vrcp.f32 %v849_v38  ;;  %v837_v2 = vmul.f32 %v835_v37, %v817_v41  ;;  %v838_v4 = vmul.f32 %v835_v37, %v819_v43  ;;  %v669_v34 = vadd.f32 %v668_v1, %v666_v0  ;;  %5840 = vst [vmem:[#allocation56_spill] sm:$0xff] %v4145_v39  ;;  %5841 = vst [vmem:[#allocation57_spill] sm:$0xff] %v4148_v62 }
 0x10c   : >> { %v4130_v43 = vsub.f32 %v632_v35, %v645_v11  ;;  %v4132_v13 = vsub.f32 %v633_v5, %v657_v30  ;;  %v4142_v35 = vstv %s3707_s30  ;;  %v4154_v0 = vstv %s5839_s1 }
 0x10d   : >> { %v850_v28 = vmul.f32 %v837_v2, %v822_v9  ;;  %v852_v41 = vmul.f32 %v838_v4, %v822_v9  ;;  %v4134_v46 = vsub.f32 %v634_v12, %v669_v34  ;;  %v842_v45 = vmul.f32 %v837_v2, %v4040_v42  ;;  %5844 = vst [vmem:[#allocation59_spill] sm:$0xff] %v4154_v0 }
 0x10e   : >> { %v844_v9 = vmul.f32 %v838_v4, %v4040_v42  ;;  %v855_v34 = vsub.f32 %v828_v29, %v854_v3  ;;  %v4158_v5 = vstv %s3717_s16  ;;  %v4166_v11 = vstv %s3721_s27 }
 0x10f   : >> { %v853_v49 = vsub.f32 %v827_v10, %v852_v41  ;;  %5846 = vst [vmem:[#allocation60_spill] sm:$0xff] %v4158_v5  ;;  %v843_v29 = vsub.f32 %v4032_v40, %v842_v45  ;;  %5848 = vst [vmem:[#allocation62_spill] sm:$0xff] %v4166_v11  ;;  %v4169_v12 = vstv %s3723_s22  ;;  %v4179_v3 = vstv %s3725_s29 }
 0x110   : >> { %5849 = vst [vmem:[#allocation63_spill] sm:$0xff] %v4169_v12  ;;  %5850 = vst [vmem:[#allocation64_spill] sm:$0xff] %v4179_v3  ;;  %v4188_v40 = vstv %s5845_s4  ;;  %s5854_s4 = sld [smem:[#allocation29_spill]] }
 0x111   : >> { %5853 = vst [vmem:[#allocation67_spill] sm:$0xff] %v4188_v40 }
 0x115   : >> { %v3213_v59 = vpop.eup %3212 }
 0x116   : >> { %v857_v58 = vmul.f32 %v3213_v59, %v849_v38 }
 0x118   : >> { %v858_v8 = vsub.f32 2.0, %v857_v58  ;;  %v840_v58 = vmul.f32 %v4082_v47, %v4040_v42 }
 0x11a   : >> { %v859_v37 = vmul.f32 %v3213_v59, %v858_v8  ;;  %v846_v59 = vmul.f32 %v839_v60, %v4040_v42  ;;  %v851_v8 = vsub.f32 %v825_v33, %v850_v28  ;;  %v841_v42 = vsub.f32 %v4071_v44, %v840_v58 }
 0x11b   : >> { %v4161_v28 = vstv %s3719_s26  ;;  %v845_v33 = vsub.f32 %v4086_v48, %v844_v9  ;;  %v4185_v58 = vstv %s5843_s2  ;;  %s5857_s2 = sld [smem:[#allocation21_spill]] }
 0x11c   : >> { %v860_v50 = vmul.f32 %v859_v37, %v849_v38  ;;  %v4151_v38 = vstv %s5838_s0  ;;  %5847 = vst [vmem:[#allocation61_spill] sm:$0xff] %v4161_v28  ;;  %v847_v30 = vsub.f32 %v4086_v48, %v846_v59  ;;  %5852 = vst [vmem:[#allocation66_spill] sm:$0xff] %v4185_v58  ;;  %s5858_s0 = sld [smem:[#allocation23_spill]] }
 0x11d   : >> { %5842 = vst [vmem:[#allocation58_spill] sm:$0xff] %v4151_v38 }
 0x11e   : >> { %v861_v57 = vsub.f32 2.0, %v860_v50 }
 0x120   : >> { %v862_v1 = vmul.f32 %v861_v57, %v859_v37  ;;  %v4182_v37 = vstv %s3727_s14 }
 0x121   : >> { %5851 = vst [vmem:[#allocation65_spill] sm:$0xff] %v4182_v37 }
 0x122   : >> { %v4172_v10 = vmul.f32 %v862_v1, %v851_v8  ;;  %v4174_v41 = vmul.f32 %v862_v1, %v853_v49  ;;  %v4176_v44 = vmul.f32 %v862_v1, %v855_v34 }
 0x124   : >> { %v866_v50 = vmul.f32 %v4172_v10, %v841_v42  ;;  %v868_v45 = vmul.f32 %v4174_v41, %v841_v42  ;;  %v870_v48 = vmul.f32 %v4176_v44, %v841_v42  ;;  %v872_v9 = vmul.f32 %v4172_v10, %v4082_v47 }
 0x125   : >> { %v874_v59 = vmul.f32 %v4174_v41, %v4082_v47  ;;  %v876_v8 = vmul.f32 %v4176_v44, %v4082_v47  ;;  %v881_v49 = vmul.f32 %v4172_v10, %v4021_v6  ;;  %v887_v34 = vmul.f32 %v4174_v41, %v4021_v6 }
 0x126   : >> { %v4203_v57 = vsub.f32 %v843_v29, %v866_v50  ;;  %v4205_v1 = vsub.f32 %v845_v33, %v868_v45  ;;  %v4207_v42 = vsub.f32 %v847_v30, %v870_v48  ;;  %v4209_v22 = vsub.f32 %v837_v2, %v872_v9 }
 0x127   : >> { %v4211_v18 = vsub.f32 %v838_v4, %v874_v59  ;;  %v4213_v27 = vsub.f32 %v839_v60, %v876_v8  ;;  %v893_v47 = vmul.f32 %v4176_v44, %v4021_v6  ;;  %v899_v25 = vmul.f32 %v4172_v10, %v4027_v32 }
 0x128   : >> { %v878_v29 = vmul.f32 %v4203_v57, %v3892_v52  ;;  %v879_v33 = vmul.f32 %v4209_v22, %v3963_v51  ;;  %v884_v2 = vmul.f32 %v4205_v1, %v3892_v52  ;;  %v890_v4 = vmul.f32 %v4207_v42, %v3892_v52 }
 0x129   : >> { %v885_v60 = vmul.f32 %v4211_v18, %v3963_v51  ;;  %v891_v30 = vmul.f32 %v4213_v27, %v3963_v51  ;;  %v896_v50 = vmul.f32 %v4203_v57, %v3894_v53  ;;  %v897_v45 = vmul.f32 %v4209_v22, %v3965_v54 }
 0x12a   : >> { %v880_v48 = vadd.f32 %v879_v33, %v878_v29  ;;  %v902_v9 = vmul.f32 %v4205_v1, %v3894_v53  ;;  %v903_v59 = vmul.f32 %v4211_v18, %v3965_v54  ;;  %v905_v8 = vmul.f32 %v4174_v41, %v4027_v32 }
 0x12b   : >> { %v886_v11 = vadd.f32 %v885_v60, %v884_v2  ;;  %v892_v38 = vadd.f32 %v891_v30, %v890_v4  ;;  %v898_v6 = vadd.f32 %v897_v45, %v896_v50  ;;  %v908_v17 = vmul.f32 %v4207_v42, %v3894_v53 }
 0x12c   : >> { %v882_v40 = vadd.f32 %v881_v49, %v880_v48  ;;  %v904_v37 = vadd.f32 %v903_v59, %v902_v9  ;;  %v909_v29 = vmul.f32 %v4213_v27, %v3965_v54  ;;  %v911_v33 = vmul.f32 %v4176_v44, %v4027_v32 }
 0x12d   : >> { %v888_v3 = vadd.f32 %v887_v34, %v886_v11  ;;  %v894_v28 = vadd.f32 %v893_v47, %v892_v38  ;;  %v900_v5 = vadd.f32 %v899_v25, %v898_v6  ;;  %v914_v62 = vmul.f32 %v4203_v57, %v3898_v55 }
 0x12e   : >> { %v906_v2 = vadd.f32 %v905_v8, %v904_v37  ;;  %v910_v4 = vadd.f32 %v909_v29, %v908_v17  ;;  %v915_v60 = vmul.f32 %v4209_v22, %v3974_v61  ;;  %v4252_v30 = vstv %s5854_s4  ;;  %s2960_s4 = sshll.u32 %s3456_s17, 7  ;;  %s609_s17 = sadd.s32 1, %s3456_s17  }
 0x12f   : >> { %5855 = vst [vmem:[#allocation68_spill] sm:$0xff] %v4252_v30  ;;  %v4255_v49 = vmul.f32 %v882_v40, %v4124_v7  ;;  %v4258_v50 = vmul.f32 %v888_v3, %v4124_v7  ;;  %v4261_v11 = vmul.f32 %v894_v28, %v4124_v7  ;;  %v917_v25 = vmul.f32 %v4172_v10, %v4034_v36  ;;  %s4316_s1 = scalar_lea.vmem %s5857_s2, %s2960_s4  ;;  %s4342_s2 = scalar_lea.vmem %s5858_s0, %s2961_s5 }
 0x130   : >> { %v901_v6 = vmul.f32 %v900_v5, %v4124_v7  ;;  %v912_v17 = vadd.f32 %v911_v33, %v910_v4  ;;  %v916_v38 = vadd.f32 %v915_v60, %v914_v62  ;;  %v920_v37 = vmul.f32 %v4205_v1, %v3898_v55  ;;  %s5867_s0 = sld [smem:[#allocation26_spill]]  ;;  %s5869_s4 = sld [smem:[#allocation30_spill]] }
 0x131   : >> { %5856 = vst [vmem:[#allocation69_spill] sm:$0xff] %v4258_v50  ;;  %v921_v40 = vmul.f32 %v4211_v18, %v3974_v61  ;;  %v923_v3 = vmul.f32 %v4174_v41, %v4034_v36  ;;  %v926_v28 = vmul.f32 %v4207_v42, %v3898_v55  ;;  %v927_v34 = vmul.f32 %v4213_v27, %v3974_v61  ;;  %p5603_p6 = scmp.ge.s32.totalorder %s609_s17, 4  }
 0x132   : >> { %v907_v5 = vmul.f32 %v906_v2, %v4124_v7  ;;  %v918_v62 = vadd.f32 %v917_v25, %v916_v38  ;;  %v929_v47 = vmul.f32 %v4176_v44, %v4034_v36  ;;  %v950_v45 = vmul.f32 %v4255_v49, %v4130_v43 }
 0x133   : >> { %v922_v48 = vadd.f32 %v921_v40, %v920_v37  ;;  %v928_v9 = vadd.f32 %v927_v34, %v926_v28  ;;  %v951_v59 = vmul.f32 %v4258_v50, %v4132_v13  ;;  %v953_v8 = vmul.f32 %v4261_v11, %v4134_v46 }
 0x134   : >> { %v913_v29 = vmul.f32 %v912_v17, %v4124_v7  ;;  %v919_v33 = vmul.f32 %v918_v62, %v4124_v7  ;;  %v4288_v2 = vmul.f32 %v901_v6, %v4130_v43  ;;  %v4291_v4 = vmul.f32 %v907_v5, %v4132_v13 }
 0x135   : >> { %v924_v60 = vadd.f32 %v923_v3, %v922_v48  ;;  %v930_v25 = vadd.f32 %v929_v47, %v928_v9  ;;  %v952_v38 = vadd.f32 %v951_v59, %v950_v45  ;;  %v980_v37 = vmul.f32 %v4255_v49, %v3894_v53 }
 0x136   : >> { %v4297_v40 = vmul.f32 %v913_v29, %v4134_v46  ;;  %v981_v17 = vmul.f32 %v4258_v50, %v3965_v54  ;;  %v983_v28 = vmul.f32 %v4261_v11, %v4027_v32  ;;  %v986_v3 = vmul.f32 %v4255_v49, %v3898_v55 }
 0x137   : >> { %v925_v34 = vmul.f32 %v924_v60, %v4124_v7  ;;  %v931_v62 = vmul.f32 %v930_v25, %v4124_v7  ;;  %v954_v47 = vadd.f32 %v953_v8, %v952_v38  ;;  %v987_v45 = vmul.f32 %v4258_v50, %v3974_v61 }
 0x138   : >> { %v982_v48 = vadd.f32 %v981_v17, %v980_v37  ;;  %v989_v9 = vmul.f32 %v4261_v11, %v4034_v36  ;;  %v992_v59 = vmul.f32 %v4255_v49, %v3912_v63  ;;  %v993_v30 = vmul.f32 %v4258_v50, %v3999_v31 }
 0x139   : >> { %v4320_v8 = vadd.f32 %v3452_v14, %v954_v47  ;;  %v962_v60 = vmul.f32 %v919_v33, %v4130_v43  ;;  %v963_v25 = vmul.f32 %v925_v34, %v4132_v13  ;;  %v988_v38 = vadd.f32 %v987_v45, %v986_v3 }
 0x13a   : >> { %v4325_v37 = vmul.f32 %v931_v62, %v4134_v46  ;;  %v984_v17 = vadd.f32 %v983_v28, %v982_v48  ;;  %v994_v39 = vadd.f32 %v993_v30, %v992_v59  ;;  %v995_v50 = vmul.f32 %v4261_v11, %v4050_v56 }
 0x13b   : >> { %v990_v51 = vadd.f32 %v989_v9, %v988_v38  ;;  %v4330_v16 = vmul.f32 %v901_v6, %v3894_v53  ;;  %v4333_v14 = vmul.f32 %v907_v5, %v3965_v54  ;;  %v1004_v47 = vmul.f32 %v901_v6, %v3898_v55  ;;  %1271 = vst.msk [vmem:[%s4316_s1] sm:$0xff] %vm1270_vm1, %v4320_v8 }
 0x13c   : >> { %v4345_v30 = vsub.f32 %v3432_v19, %v984_v17  ;;  %v996_v28 = vadd.f32 %v995_v50, %v994_v39  ;;  %v1005_v53 = vmul.f32 %v907_v5, %v3974_v61  ;;  %v1007_v54 = vmul.f32 %v913_v29, %v4034_v36 }
 0x13d   : >> { %v4350_v3 = vsub.f32 %v3428_v20, %v990_v51  ;;  %v1010_v45 = vmul.f32 %v901_v6, %v3912_v63  ;;  %v1011_v48 = vmul.f32 %v907_v5, %v3999_v31  ;;  %v1013_v9 = vmul.f32 %v913_v29, %v4050_v56 }
 0x13e   : >> { %v4356_v19 = vsub.f32 %v3424_v21, %v996_v28  ;;  %v1006_v39 = vadd.f32 %v1005_v53, %v1004_v47  ;;  %v1016_v50 = vmul.f32 %v919_v33, %v3898_v55  ;;  %v1017_v59 = vmul.f32 %v925_v34, %v3974_v61  ;;  %2768 = vst.msk [vmem:[%s4342_s2 + $0x8] sm:$0xff] %vm1270_vm1, %v4345_v30 }
 0x13f   : >> { %2780 = vst.msk [vmem:[%s4342_s2 + $0x20] sm:$0xff] %vm1270_vm1, %v4345_v30  ;;  %v4367_v20 = vmul.f32 %v913_v29, %v4027_v32  ;;  %v1012_v51 = vadd.f32 %v1011_v48, %v1010_v45  ;;  %v1022_v6 = vmul.f32 %v919_v33, %v3912_v63  ;;  %v1023_v21 = vmul.f32 %v925_v34, %v3999_v31 }
 0x140   : >> { %2772 = vst.msk [vmem:[%s4342_s2 + $0x10] sm:$0xff] %vm1270_vm1, %v4350_v3  ;;  %2796 = vst.msk [vmem:[%s4342_s2 + $0x40] sm:$0xff] %vm1270_vm1, %v4350_v3  ;;  %v1008_v55 = vadd.f32 %v1007_v54, %v1006_v39  ;;  %v4378_v61 = vmul.f32 %v931_v62, %v4034_v36  ;;  %v1025_v5 = vmul.f32 %v931_v62, %v4050_v56 }
 0x141   : >> { %2776 = vst.msk [vmem:[%s4342_s2 + $0x18] sm:$0xff] %vm1270_vm1, %v4356_v19  ;;  %2812 = vst.msk [vmem:[%s4342_s2 + $0x60] sm:$0xff] %vm1270_vm1, %v4356_v19  ;;  %v932_v32 = vmul.f32 %v4203_v57, %v3912_v63  ;;  %v1014_v29 = vadd.f32 %v1013_v9, %v1012_v51  ;;  %v1024_v33 = vadd.f32 %v1023_v21, %v1022_v6  ;;  %v5859_v51 = vld [vmem:[#allocation41_spill] sm:$0xff] }
 0x142   : >> { %v933_v34 = vmul.f32 %v4209_v22, %v3999_v31  ;;  %v935_v36 = vmul.f32 %v4172_v10, %v4050_v56  ;;  %v4394_v62 = vsub.f32 %v3416_v23, %v1008_v55  ;;  %v1018_v38 = vadd.f32 %v1017_v59, %v1016_v50 }
 0x143   : >> { %v938_v17 = vmul.f32 %v4205_v1, %v3912_v63  ;;  %v939_v57 = vmul.f32 %v4211_v18, %v3999_v31  ;;  %v4401_v47 = vsub.f32 %v3412_v24, %v1014_v29  ;;  %v1026_v28 = vadd.f32 %v1025_v5, %v1024_v33  ;;  %v5861_v29 = vld [vmem:[#allocation69_spill] sm:$0xff]  ;;  %v5862_v33 = vld [vmem:[#allocation56_spill] sm:$0xff] }
 0x144   : >> { %v934_v22 = vadd.f32 %v933_v34, %v932_v32  ;;  %v941_v10 = vmul.f32 %v4174_v41, %v4050_v56  ;;  %2788 = vst.msk [vmem:[%s4342_s2 + $0x30] sm:$0xff] %vm1270_vm1, %v4394_v62  ;;  %2800 = vst.msk [vmem:[%s4342_s2 + $0x48] sm:$0xff] %vm1270_vm1, %v4394_v62  ;;  %v944_v18 = vmul.f32 %v4207_v42, %v3912_v63  ;;  %v5860_v32 = vld [vmem:[#allocation52_spill] sm:$0xff] }
 0x145   : >> { %v940_v23 = vadd.f32 %v939_v57, %v938_v17  ;;  %v945_v24 = vmul.f32 %v4213_v27, %v3999_v31  ;;  %v947_v1 = vmul.f32 %v4176_v44, %v4050_v56  ;;  %v4418_v41 = vsub.f32 %v3404_v26, %v1026_v28  ;;  %2792 = vst.msk [vmem:[%s4342_s2 + $0x38] sm:$0xff] %vm1270_vm1, %v4401_v47 }
 0x146   : >> { %2816 = vst.msk [vmem:[%s4342_s2 + $0x68] sm:$0xff] %vm1270_vm1, %v4401_v47  ;;  %v936_v53 = vadd.f32 %v935_v36, %v934_v22  ;;  %v958_v54 = vadd.f32 %v4291_v4, %v4288_v2  ;;  %v964_v42 = vadd.f32 %v963_v25, %v962_v60  ;;  %v1035_v27 = vmul.f32 %v4142_v35, %v4320_v8  ;;  %v5866_v22 = vld [vmem:[#allocation64_spill] sm:$0xff] }
 0x147   : >> { %v942_v45 = vadd.f32 %v941_v10, %v940_v23  ;;  %v946_v48 = vadd.f32 %v945_v24, %v944_v18  ;;  %v1046_v26 = vmul.f32 %v4154_v0, %v4320_v8  ;;  %2808 = vst.msk [vmem:[%s4342_s2 + $0x58] sm:$0xff] %vm1270_vm1, %v4418_v41  ;;  %2820 = vst.msk [vmem:[%s4342_s2 + $0x70] sm:$0xff] %vm1270_vm1, %v4418_v41  ;;  %v5868_v23 = vld [vmem:[#allocation65_spill] sm:$0xff] }
 0x148   : >> { %v937_v44 = vmul.f32 %v936_v53, %v4124_v7  ;;  %v960_v9 = vadd.f32 %v4297_v40, %v958_v54  ;;  %v966_v2 = vadd.f32 %v4325_v37, %v964_v42  ;;  %v1057_v4 = vmul.f32 %v4169_v12, %v4320_v8  ;;  %v5870_v53 = vld [vmem:[#allocation67_spill] sm:$0xff]  ;;  %v5871_v42 = vld [vmem:[#allocation68_spill] sm:$0xff] }
 0x149   : >> { %v943_v60 = vmul.f32 %v942_v45, %v4124_v7  ;;  %v948_v25 = vadd.f32 %v947_v1, %v946_v48  ;;  %v1068_v39 = vmul.f32 %v4185_v58, %v4320_v8  ;;  %v974_v50 = vmul.f32 %v4255_v49, %v3892_v52  ;;  %v5863_v52 = vld [vmem:[#allocation57_spill] sm:$0xff] }
 0x14a   : >> { %v961_v59 = vadd.f32 %v3448_v15, %v960_v9  ;;  %v967_v40 = vadd.f32 %v5859_v51, %v966_v2  ;;  %v968_v37 = vmul.f32 %v937_v44, %v4130_v43  ;;  %v1028_v6 = vmul.f32 %v937_v44, %v3912_v63  ;;  %v5864_v15 = vld [vmem:[#allocation60_spill] sm:$0xff]  ;;  %v5865_v63 = vld [vmem:[#allocation61_spill] sm:$0xff] }
 0x14b   : >> { %v949_v21 = vmul.f32 %v948_v25, %v4124_v7  ;;  %v969_v55 = vmul.f32 %v943_v60, %v4132_v13  ;;  %v1029_v5 = vmul.f32 %v943_v60, %v3999_v31  ;;  %v975_v8 = vmul.f32 %v5861_v29, %v5860_v32  ;;  %v5873_v60 = vld [vmem:[#allocation55_spill] sm:$0xff] }
 0x14c   : >> { %v1037_v34 = vmul.f32 %v5862_v33, %v961_v59  ;;  %v1040_v49 = vmul.f32 %v5863_v52, %v967_v40  ;;  %2755 = vst.msk [vmem:[%s4316_s1 + $0x8] sm:$0xff] %vm1270_vm1, %v961_v59  ;;  %2759 = vst.msk [vmem:[%s4316_s1 + $0x10] sm:$0xff] %vm1270_vm1, %v967_v40  ;;  %v1048_v43 = vmul.f32 %v5864_v15, %v961_v59 }
 0x14d   : >> { %v1051_v36 = vmul.f32 %v5865_v63, %v967_v40  ;;  %v970_v7 = vadd.f32 %v969_v55, %v968_v37  ;;  %v971_v13 = vmul.f32 %v949_v21, %v4134_v46  ;;  %v1030_v17 = vadd.f32 %v1029_v5, %v1028_v6 }
 0x14e   : >> { %v1031_v31 = vmul.f32 %v949_v21, %v4050_v56  ;;  %v1038_v57 = vadd.f32 %v1037_v34, %v1035_v27  ;;  %v1049_v28 = vadd.f32 %v1048_v43, %v1046_v26  ;;  %v1059_v10 = vmul.f32 %v5866_v22, %v961_v59  ;;  %v5872_v27 = vld [vmem:[#allocation40_spill] sm:$0xff]  ;;  %v5880_v43 = vld [vmem:[#allocation39_spill] sm:$0xff] }
 0x14f   : >> { %v1062_v18 = vmul.f32 %v5868_v23, %v967_v40  ;;  %v1020_v24 = vadd.f32 %v4378_v61, %v1018_v38  ;;  %v972_v1 = vadd.f32 %v971_v13, %v970_v7  ;;  %v1070_v54 = vmul.f32 %v5870_v53, %v961_v59  ;;  %v5876_v59 = vld [vmem:[#allocation58_spill] sm:$0xff] }
 0x150   : >> { %v1073_v45 = vmul.f32 %v5871_v42, %v967_v40  ;;  %v1032_v46 = vadd.f32 %v1031_v31, %v1030_v17  ;;  %v1041_v48 = vadd.f32 %v1040_v49, %v1038_v57  ;;  %v1060_v44 = vadd.f32 %v1059_v10, %v1057_v4  ;;  %v5877_v4 = vld [vmem:[#allocation62_spill] sm:$0xff] }
 0x151   : >> { %v976_v56 = vadd.f32 %v975_v8, %v974_v50  ;;  %v973_v26 = vadd.f32 %v5872_v27, %v972_v1  ;;  %v1052_v9 = vadd.f32 %v1051_v36, %v1049_v28  ;;  %v1071_v2 = vadd.f32 %v1070_v54, %v1068_v39  ;;  %v5879_v8 = vld [vmem:[#allocation36_spill] sm:$0xff] }
 0x152   : >> { %v977_v25 = vmul.f32 %v4261_v11, %v5873_v60  ;;  %v1063_v51 = vadd.f32 %v1062_v18, %v1060_v44  ;;  %v4476_v37 = vstv %s5867_s0  ;;  %v4479_v61 = vstv %s5869_s4  ;;  %s5882_s0 = sld [smem:[#allocation22_spill]] }
 0x153   : >> { %5874 = vst [vmem:[#allocation41_spill] sm:$0xff] %v4476_v37  ;;  %5875 = vst [vmem:[#allocation52_spill] sm:$0xff] %v4479_v61  ;;  %v1000_v38 = vadd.f32 %v4333_v14, %v4330_v16  ;;  %v1043_v40 = vmul.f32 %v5876_v59, %v973_v26  ;;  %v1054_v50 = vmul.f32 %v5877_v4, %v973_v26  ;;  %v5878_v14 = vld [vmem:[#allocation37_spill] sm:$0xff]  ;;  %v5745_v44 = vstv %s3763_s21 }
 0x154   : >> { %2763 = vst.msk [vmem:[%s4316_s1 + $0x18] sm:$0xff] %vm1270_vm1, %v973_v26  ;;  %v1065_v39 = vmul.f32 %v4476_v37, %v973_v26  ;;  %v1074_v11 = vadd.f32 %v1073_v45, %v1071_v2  ;;  %v1076_v6 = vmul.f32 %v4479_v61, %v973_v26  ;;  %v978_v21 = vadd.f32 %v977_v25, %v976_v56 }
 0x155   : >> { %v1002_v16 = vadd.f32 %v4367_v20, %v1000_v38  ;;  %v4491_v55 = vsub.f32 %v5878_v14, %v1020_v24  ;;  %v4493_v5 = vadd.f32 %v1043_v40, %v1041_v48  ;;  %v4495_v32 = vadd.f32 %v1054_v50, %v1052_v9  ;;  %v5881_v20 = vld [vmem:[#allocation38_spill] sm:$0xff] }
 0x156   : >> { %v4497_v29 = vadd.f32 %v1065_v39, %v1063_v51  ;;  %v4500_v34 = vsub.f32 %v5879_v8, %v1032_v46  ;;  %v4502_v49 = vadd.f32 %v1076_v6, %v1074_v11  ;;  %v4505_v36 = vsub.f32 %v5880_v43, %v978_v21 }
 0x157   : >> { %v4508_v7 = vsub.f32 %v5881_v20, %v1002_v16  ;;  %2804 = vst.msk [vmem:[%s4342_s2 + $0x50] sm:$0xff] %vm1270_vm1, %v4491_v55  ;;  %2753 = vst.msk [vmem:[%s4316_s1 + $0x20] sm:$0xff] %vm1270_vm1, %v4493_v5  ;;  %v1079_v13 = vmul.f32 %v5862_v33, %v4345_v30  ;;  %v1081_v31 = vmul.f32 %v5863_v52, %v4350_v3 }
 0x158   : >> { %2757 = vst.msk [vmem:[%s4316_s1 + $0x28] sm:$0xff] %vm1270_vm1, %v4495_v32  ;;  %2761 = vst.msk [vmem:[%s4316_s1 + $0x30] sm:$0xff] %vm1270_vm1, %v4497_v29  ;;  %v1078_v17 = vmul.f32 %v4142_v35, %v4505_v36  ;;  %v1107_v57 = vmul.f32 %v5864_v15, %v4345_v30  ;;  %v1106_v28 = vmul.f32 %v4154_v0, %v4505_v36  ;;  %s4596_s4 = scalar_lea.vmem %s5882_s0, %s2961_s5  ;;  %s5891_s5 = sld [smem:[#allocation35_spill]] }
 0x159   : >> { %2824 = vst.msk [vmem:[%s4342_s2 + $0x78] sm:$0xff] %vm1270_vm1, %v4500_v34  ;;  %2765 = vst.msk [vmem:[%s4316_s1 + $0x38] sm:$0xff] %vm1270_vm1, %v4502_v49  ;;  %v1083_v18 = vmul.f32 %v5876_v59, %v4356_v19  ;;  %v1085_v24 = vmul.f32 %v4142_v35, %v4345_v30  ;;  %v1086_v1 = vmul.f32 %v5862_v33, %v4508_v7 }
 0x15a   : >> { %1295 = vst.msk [vmem:[%s4342_s2] sm:$0xff] %vm1270_vm1, %v4505_v36  ;;  %2784 = vst.msk [vmem:[%s4342_s2 + $0x28] sm:$0xff] %vm1270_vm1, %v4508_v7  ;;  %v1080_v10 = vadd.f32 %v1079_v13, %v1078_v17  ;;  %v1088_v54 = vmul.f32 %v5863_v52, %v4394_v62  ;;  %v1108_v46 = vadd.f32 %v1107_v57, %v1106_v28 }
 0x15b   : >> { %v1092_v48 = vmul.f32 %v4142_v35, %v4350_v3  ;;  %v1087_v56 = vadd.f32 %v1086_v1, %v1085_v24  ;;  %v1090_v27 = vmul.f32 %v5876_v59, %v4401_v47  ;;  %v1093_v26 = vmul.f32 %v5862_v33, %v4394_v62 }
 0x15c   : >> { %v1082_v45 = vadd.f32 %v1081_v31, %v1080_v10  ;;  %v1095_v9 = vmul.f32 %v5863_v52, %v4491_v55  ;;  %v1099_v60 = vmul.f32 %v4142_v35, %v4356_v19  ;;  %v1100_v25 = vmul.f32 %v5862_v33, %v4401_v47 }
 0x15d   : >> { %v1102_v51 = vmul.f32 %v5863_v52, %v4418_v41  ;;  %v1089_v38 = vadd.f32 %v1088_v54, %v1087_v56  ;;  %v1094_v40 = vadd.f32 %v1093_v26, %v1092_v48  ;;  %v1097_v50 = vmul.f32 %v5876_v59, %v4418_v41 }
 0x15e   : >> { %v1084_v2 = vadd.f32 %v1083_v18, %v1082_v45  ;;  %v1109_v39 = vmul.f32 %v5865_v63, %v4350_v3  ;;  %v1101_v11 = vadd.f32 %v1100_v25, %v1099_v60  ;;  %v1104_v6 = vmul.f32 %v5876_v59, %v4500_v34 }
 0x15f   : >> { %v1091_v14 = vadd.f32 %v1090_v27, %v1089_v38  ;;  %v1096_v8 = vadd.f32 %v1095_v9, %v1094_v40  ;;  %v1113_v31 = vmul.f32 %v4154_v0, %v4345_v30  ;;  %v1114_v57 = vmul.f32 %v5864_v15, %v4508_v7 }
 0x160   : >> { %v1190_v21 = vmul.f32 %v1084_v2, %v4142_v35  ;;  %v1199_v16 = vmul.f32 %v1084_v2, %v4154_v0  ;;  %v1206_v43 = vmul.f32 %v1084_v2, %v4169_v12  ;;  %v1213_v20 = vmul.f32 %v1084_v2, %v4185_v58 }
 0x161   : >> { %v1103_v13 = vadd.f32 %v1102_v51, %v1101_v11  ;;  %v1110_v17 = vadd.f32 %v1109_v39, %v1108_v46  ;;  %v1098_v28 = vadd.f32 %v1097_v50, %v1096_v8  ;;  %v1191_v10 = vmul.f32 %v1091_v14, %v5862_v33 }
 0x162   : >> { %v1200_v18 = vmul.f32 %v1091_v14, %v5864_v15  ;;  %v1207_v24 = vmul.f32 %v1091_v14, %v5866_v22  ;;  %v1214_v54 = vmul.f32 %v1091_v14, %v5870_v53  ;;  %v1111_v45 = vmul.f32 %v5877_v4, %v4356_v19 }
 0x163   : >> { %v1105_v1 = vadd.f32 %v1104_v6, %v1103_v13  ;;  %v1115_v46 = vadd.f32 %v1114_v57, %v1113_v31  ;;  %v1192_v48 = vadd.f32 %v1191_v10, %v1190_v21  ;;  %v1193_v56 = vmul.f32 %v1098_v28, %v5863_v52 }
 0x164   : >> { %v1201_v27 = vadd.f32 %v1200_v18, %v1199_v16  ;;  %v1202_v26 = vmul.f32 %v1098_v28, %v5865_v63  ;;  %v1208_v60 = vadd.f32 %v1207_v24, %v1206_v43  ;;  %v1209_v25 = vmul.f32 %v1098_v28, %v5868_v23 }
 0x165   : >> { %v1195_v9 = vmul.f32 %v1105_v1, %v5876_v59  ;;  %v1204_v2 = vmul.f32 %v1105_v1, %v5877_v4  ;;  %v1194_v51 = vadd.f32 %v1193_v56, %v1192_v48  ;;  %v1211_v40 = vmul.f32 %v1105_v1, %v4476_v37 }
 0x166   : >> { %v1203_v38 = vadd.f32 %v1202_v26, %v1201_v27  ;;  %v1215_v50 = vadd.f32 %v1214_v54, %v1213_v20  ;;  %v1210_v39 = vadd.f32 %v1209_v25, %v1208_v60  ;;  %v1216_v11 = vmul.f32 %v1098_v28, %v5871_v42 }
 0x167   : >> { %v1218_v6 = vmul.f32 %v1105_v1, %v4479_v61  ;;  %v1116_v21 = vmul.f32 %v5865_v63, %v4394_v62  ;;  %v1196_v16 = vadd.f32 %v1195_v9, %v1194_v51  ;;  %v1118_v8 = vmul.f32 %v5877_v4, %v4401_v47 }
 0x168   : >> { %v4602_v14 = vadd.f32 %v1204_v2, %v1203_v38  ;;  %v1120_v43 = vmul.f32 %v4154_v0, %v4350_v3  ;;  %v4608_v20 = vadd.f32 %v1211_v40, %v1210_v39  ;;  %v1217_v13 = vadd.f32 %v1216_v11, %v1215_v50 }
 0x169   : >> { %v1117_v31 = vadd.f32 %v1116_v21, %v1115_v46  ;;  %v1121_v57 = vmul.f32 %v5864_v15, %v4394_v62  ;;  %v4614_v28 = vadd.f32 %v5745_v44, %v1196_v16  ;;  %v1112_v18 = vadd.f32 %v1111_v45, %v1110_v17 }
 0x16a   : >> { %2770 = vst.msk [vmem:[%s4596_s4 + $0x8] sm:$0xff] %vm1270_vm1, %v4602_v14  ;;  %2782 = vst.msk [vmem:[%s4596_s4 + $0x20] sm:$0xff] %vm1270_vm1, %v4602_v14  ;;  %v4622_v10 = vadd.f32 %v1218_v6, %v1217_v13  ;;  %v1123_v54 = vmul.f32 %v5865_v63, %v4491_v55  ;;  %v1125_v46 = vmul.f32 %v5877_v4, %v4418_v41  ;;  %v5744_v11 = vstv %s3765_s12 }
 0x16b   : >> { %5883 = vst [vmem:[#allocation69_spill] sm:$0xff] %v4614_v28  ;;  %2774 = vst.msk [vmem:[%s4596_s4 + $0x10] sm:$0xff] %vm1270_vm1, %v4608_v20  ;;  %v1119_v24 = vadd.f32 %v1118_v8, %v1117_v31  ;;  %v1122_v1 = vadd.f32 %v1121_v57, %v1120_v43  ;;  %v1127_v48 = vmul.f32 %v4154_v0, %v4356_v19 }
 0x16c   : >> { %2798 = vst.msk [vmem:[%s4596_s4 + $0x40] sm:$0xff] %vm1270_vm1, %v4608_v20  ;;  %1297 = vst.msk [vmem:[%s4596_s4] sm:$0xff] %vm1270_vm1, %v4614_v28  ;;  %v1128_v56 = vmul.f32 %v5864_v15, %v4401_v47  ;;  %v1130_v27 = vmul.f32 %v5865_v63, %v4418_v41  ;;  %v1132_v45 = vmul.f32 %v5877_v4, %v4500_v34 }
 0x16d   : >> { %2778 = vst.msk [vmem:[%s4596_s4 + $0x18] sm:$0xff] %vm1270_vm1, %v4622_v10  ;;  %2814 = vst.msk [vmem:[%s4596_s4 + $0x60] sm:$0xff] %vm1270_vm1, %v4622_v10  ;;  %v1124_v26 = vadd.f32 %v1123_v54, %v1122_v1  ;;  %v1220_v9 = vmul.f32 %v1112_v18, %v4154_v0  ;;  %v1221_v2 = vmul.f32 %v1119_v24, %v5864_v15 }
 0x16e   : >> { %v1129_v17 = vadd.f32 %v1128_v56, %v1127_v48  ;;  %v1229_v38 = vmul.f32 %v1112_v18, %v4169_v12  ;;  %v1230_v40 = vmul.f32 %v1119_v24, %v5866_v22  ;;  %v1236_v16 = vmul.f32 %v1112_v18, %v4185_v58 }
 0x16f   : >> { %v1126_v60 = vadd.f32 %v1125_v46, %v1124_v26  ;;  %v1222_v51 = vadd.f32 %v1221_v2, %v1220_v9  ;;  %v1237_v8 = vmul.f32 %v1119_v24, %v5870_v53  ;;  %v1134_v1 = vmul.f32 %v4169_v12, %v4505_v36 }
 0x170   : >> { %v1131_v25 = vadd.f32 %v1130_v27, %v1129_v17  ;;  %v1231_v6 = vadd.f32 %v1230_v40, %v1229_v38  ;;  %v1135_v48 = vmul.f32 %v5866_v22, %v4345_v30  ;;  %v1141_v17 = vmul.f32 %v4169_v12, %v4345_v30 }
 0x171   : >> { %v1223_v39 = vmul.f32 %v1126_v60, %v5865_v63  ;;  %v1232_v21 = vmul.f32 %v1126_v60, %v5868_v23  ;;  %v1239_v57 = vmul.f32 %v1126_v60, %v5871_v42  ;;  %v1238_v46 = vadd.f32 %v1237_v8, %v1236_v16 }
 0x172   : >> { %v1133_v50 = vadd.f32 %v1132_v45, %v1131_v25  ;;  %v1142_v45 = vmul.f32 %v5866_v22, %v4508_v7  ;;  %v1136_v2 = vadd.f32 %v1135_v48, %v1134_v1  ;;  %v1137_v60 = vmul.f32 %v5868_v23, %v4350_v3 }
 0x173   : >> { %v1224_v43 = vadd.f32 %v1223_v39, %v1222_v51  ;;  %v1233_v54 = vadd.f32 %v1232_v21, %v1231_v6  ;;  %v1240_v27 = vadd.f32 %v1239_v57, %v1238_v46  ;;  %v1139_v51 = vmul.f32 %v4476_v37, %v4356_v19 }
 0x174   : >> { %v1225_v13 = vmul.f32 %v1133_v50, %v5877_v4  ;;  %v1234_v31 = vmul.f32 %v1133_v50, %v4476_v37  ;;  %v1241_v18 = vmul.f32 %v1133_v50, %v4479_v61  ;;  %v1143_v25 = vadd.f32 %v1142_v45, %v1141_v17  ;;  %v5886_v45 = vld [vmem:[#allocation43_spill] sm:$0xff] }
 0x175   : >> { %v1138_v38 = vadd.f32 %v1137_v60, %v1136_v2  ;;  %v1144_v40 = vmul.f32 %v5868_v23, %v4394_v62  ;;  %v1148_v50 = vmul.f32 %v4169_v12, %v4350_v3  ;;  %v1149_v39 = vmul.f32 %v5866_v22, %v4394_v62 }
 0x176   : >> { %v1226_v24 = vadd.f32 %v1225_v13, %v1224_v43  ;;  %v4668_v56 = vadd.f32 %v1234_v31, %v1233_v54  ;;  %v4678_v9 = vadd.f32 %v1241_v18, %v1240_v27  ;;  %v1146_v6 = vmul.f32 %v4476_v37, %v4401_v47  ;;  %v5885_v27 = vld [vmem:[#allocation42_spill] sm:$0xff] }
 0x177   : >> { %v1151_v21 = vmul.f32 %v5868_v23, %v4491_v55  ;;  %v1145_v16 = vadd.f32 %v1144_v40, %v1143_v25  ;;  %v1150_v8 = vadd.f32 %v1149_v39, %v1148_v50  ;;  %v1153_v43 = vmul.f32 %v4476_v37, %v4418_v41 }
 0x178   : >> { %v4672_v26 = vadd.f32 %v5744_v11, %v1226_v24  ;;  %2790 = vst.msk [vmem:[%s4596_s4 + $0x30] sm:$0xff] %vm1270_vm1, %v4668_v56  ;;  %2802 = vst.msk [vmem:[%s4596_s4 + $0x48] sm:$0xff] %vm1270_vm1, %v4668_v56  ;;  %v1155_v13 = vmul.f32 %v4169_v12, %v4356_v19  ;;  %v1156_v31 = vmul.f32 %v5866_v22, %v4401_v47  ;;  %v5903_v63 = vstv %s3775_s13 }
 0x179   : >> { %2794 = vst.msk [vmem:[%s4596_s4 + $0x38] sm:$0xff] %vm1270_vm1, %v4678_v9  ;;  %2818 = vst.msk [vmem:[%s4596_s4 + $0x68] sm:$0xff] %vm1270_vm1, %v4678_v9  ;;  %v1140_v57 = vadd.f32 %v1139_v51, %v1138_v38  ;;  %v1152_v1 = vadd.f32 %v1151_v21, %v1150_v8  ;;  %v1158_v54 = vmul.f32 %v5868_v23, %v4418_v41 }
 0x17a   : >> { %5884 = vst [vmem:[#allocation56_spill] sm:$0xff] %v4672_v26  ;;  %2786 = vst.msk [vmem:[%s4596_s4 + $0x28] sm:$0xff] %vm1270_vm1, %v4672_v26  ;;  %v1147_v46 = vadd.f32 %v1146_v6, %v1145_v16  ;;  %v1157_v24 = vadd.f32 %v1156_v31, %v1155_v13  ;;  %v1160_v48 = vmul.f32 %v4476_v37, %v4500_v34 }
 0x17b   : >> { %v1154_v18 = vadd.f32 %v1153_v43, %v1152_v1  ;;  %v1406_v17 = vmul.f32 %v4614_v28, %v5885_v27  ;;  %v1407_v2 = vmul.f32 %v4602_v14, %v5886_v45  ;;  %v1243_v25 = vmul.f32 %v1140_v57, %v4169_v12 }
 0x17c   : >> { %v1159_v60 = vadd.f32 %v1158_v54, %v1157_v24  ;;  %v1244_v51 = vmul.f32 %v1147_v46, %v5866_v22  ;;  %v1252_v40 = vmul.f32 %v1140_v57, %v4185_v58  ;;  %v1253_v50 = vmul.f32 %v1147_v46, %v5870_v53  ;;  %v5887_v46 = vld [vmem:[#allocation44_spill] sm:$0xff] }
 0x17d   : >> { %v1246_v38 = vmul.f32 %v1154_v18, %v5868_v23  ;;  %v1255_v6 = vmul.f32 %v1154_v18, %v5871_v42  ;;  %v1427_v21 = vmul.f32 %v4602_v14, %v5885_v27  ;;  %v1428_v16 = vmul.f32 %v4672_v26, %v5886_v45 }
 0x17e   : >> { %v1161_v39 = vadd.f32 %v1160_v48, %v1159_v60  ;;  %v1245_v8 = vadd.f32 %v1244_v51, %v1243_v25  ;;  %v1254_v43 = vadd.f32 %v1253_v50, %v1252_v40  ;;  %v1162_v13 = vmul.f32 %v4185_v58, %v4505_v36 }
 0x17f   : >> { %v5743_v1 = vstv %s3767_s24  ;;  %v1408_v54 = vadd.f32 %v1407_v2, %v1406_v17  ;;  %v1409_v18 = vmul.f32 %v4608_v20, %v5887_v46  ;;  %v1430_v60 = vmul.f32 %v4668_v56, %v5887_v46 }
 0x180   : >> { %v1248_v31 = vmul.f32 %v1161_v39, %v4476_v37  ;;  %v1257_v57 = vmul.f32 %v1161_v39, %v4479_v61  ;;  %v1247_v24 = vadd.f32 %v1246_v38, %v1245_v8  ;;  %v1256_v48 = vadd.f32 %v1255_v6, %v1254_v43 }
 0x181   : >> { %v1163_v36 = vmul.f32 %v5870_v53, %v4345_v30  ;;  %v1165_v25 = vmul.f32 %v5871_v42, %v4350_v3  ;;  %v1169_v17 = vmul.f32 %v4185_v58, %v4345_v30  ;;  %v1429_v2 = vadd.f32 %v1428_v16, %v1427_v21 }
 0x182   : >> { %v1249_v51 = vadd.f32 %v1248_v31, %v1247_v24  ;;  %v4748_v40 = vadd.f32 %v1257_v57, %v1256_v48  ;;  %v1170_v38 = vmul.f32 %v5870_v53, %v4508_v7  ;;  %v1167_v39 = vmul.f32 %v4479_v61, %v4356_v19  ;;  %v5890_v24 = vld [vmem:[#allocation45_spill] sm:$0xff] }
 0x183   : >> { %v1164_v50 = vadd.f32 %v1163_v36, %v1162_v13  ;;  %v1172_v6 = vmul.f32 %v5871_v42, %v4394_v62  ;;  %v1176_v8 = vmul.f32 %v4185_v58, %v4350_v3  ;;  %v1448_v21 = vmul.f32 %v4608_v20, %v5885_v27 }
 0x184   : >> { %5888 = vst [vmem:[#allocation40_spill] sm:$0xff] %v4748_v40  ;;  %v4760_v30 = vadd.f32 %v5743_v1, %v1249_v51  ;;  %v1449_v7 = vmul.f32 %v4668_v56, %v5886_v45  ;;  %2810 = vst.msk [vmem:[%s4596_s4 + $0x58] sm:$0xff] %vm1270_vm1, %v4748_v40  ;;  %v1174_v16 = vmul.f32 %v4479_v61, %v4401_v47 }
 0x185   : >> { %2822 = vst.msk [vmem:[%s4596_s4 + $0x70] sm:$0xff] %vm1270_vm1, %v4748_v40  ;;  %v1166_v43 = vadd.f32 %v1165_v25, %v1164_v50  ;;  %v1171_v3 = vadd.f32 %v1170_v38, %v1169_v17  ;;  %v1177_v13 = vmul.f32 %v5870_v53, %v4394_v62  ;;  %v1179_v31 = vmul.f32 %v5871_v42, %v4491_v55 }
 0x186   : >> { %5889 = vst [vmem:[#allocation55_spill] sm:$0xff] %v4760_v30  ;;  %v1410_v57 = vadd.f32 %v1409_v18, %v1408_v54  ;;  %v1411_v48 = vmul.f32 %v4622_v10, %v5890_v24  ;;  %v1432_v36 = vmul.f32 %v4678_v9, %v5890_v24  ;;  %2806 = vst.msk [vmem:[%s4596_s4 + $0x50] sm:$0xff] %vm1270_vm1, %v4760_v30 }
 0x187   : >> { %v1181_v25 = vmul.f32 %v4479_v61, %v4418_v41  ;;  %v1168_v17 = vadd.f32 %v1167_v39, %v1166_v43  ;;  %v1173_v51 = vadd.f32 %v1172_v6, %v1171_v3  ;;  %v1178_v38 = vadd.f32 %v1177_v13, %v1176_v8 }
 0x188   : >> { %v1183_v62 = vmul.f32 %v4185_v58, %v4356_v19  ;;  %v1431_v55 = vadd.f32 %v1430_v60, %v1429_v2  ;;  %v1450_v54 = vadd.f32 %v1449_v7, %v1448_v21  ;;  %v1451_v18 = vmul.f32 %v4760_v30, %v5887_v46 }
 0x189   : >> { %v1184_v50 = vmul.f32 %v5870_v53, %v4401_v47  ;;  %v1175_v1 = vadd.f32 %v1174_v16, %v1173_v51  ;;  %v1180_v11 = vadd.f32 %v1179_v31, %v1178_v38  ;;  %v1186_v44 = vmul.f32 %v5871_v42, %v4418_v41 }
 0x18a   : >> { %v1188_v6 = vmul.f32 %v4479_v61, %v4500_v34  ;;  %v1259_v19 = vmul.f32 %v1168_v17, %v4185_v58  ;;  %v4799_v2 = vadd.f32 %v1411_v48, %v1410_v57  ;;  %v4801_v8 = vadd.f32 %v1432_v36, %v1431_v55 }
 0x18b   : >> { %v1185_v37 = vadd.f32 %v1184_v50, %v1183_v62  ;;  %v1182_v39 = vadd.f32 %v1181_v25, %v1180_v11  ;;  %v1260_v60 = vmul.f32 %v1175_v1, %v5870_v53  ;;  %v1452_v47 = vadd.f32 %v1451_v18, %v1450_v54  ;;  %v5892_v62 = vld [vmem:[#allocation46_spill] sm:$0xff]  ;;  %v5893_v54 = vld [vmem:[#allocation47_spill] sm:$0xff] }
 0x18c   : >> { %v1453_v21 = vmul.f32 %v4748_v40, %v5890_v24  ;;  %v1469_v34 = vmul.f32 %v4622_v10, %v5885_v27  ;;  %v1470_v1 = vmul.f32 %v4678_v9, %v5886_v45  ;;  %v1490_v3 = vmul.f32 %v4799_v2, %v5885_v27 }
 0x18d   : >> { %v1187_v7 = vadd.f32 %v1186_v44, %v1185_v37  ;;  %v1261_v41 = vadd.f32 %v1260_v60, %v1259_v19  ;;  %v1262_v11 = vmul.f32 %v1182_v39, %v5871_v42  ;;  %v1491_v13 = vmul.f32 %v4801_v8, %v5886_v45 }
 0x18e   : >> { %v4814_v37 = vadd.f32 %v1453_v21, %v1452_v47  ;;  %v1471_v31 = vadd.f32 %v1470_v1, %v1469_v34  ;;  %v1472_v57 = vmul.f32 %v4748_v40, %v5887_v46  ;;  %v5748_v48 = vstv %s5891_s5  ;;  %v5894_v21 = vld [vmem:[#allocation48_spill] sm:$0xff] }
 0x18f   : >> { %v1189_v16 = vadd.f32 %v1188_v6, %v1187_v7  ;;  %v1263_v43 = vadd.f32 %v1262_v11, %v1261_v41  ;;  %v1492_v25 = vadd.f32 %v1491_v13, %v1490_v3  ;;  %v1413_v55 = vmul.f32 %v4614_v28, %v5892_v62  ;;  %v5895_v13 = vld [vmem:[#allocation49_spill] sm:$0xff] }
 0x190   : >> { %v1493_v17 = vmul.f32 %v4814_v37, %v5887_v46  ;;  %v1473_v38 = vadd.f32 %v1472_v57, %v1471_v31  ;;  %v1414_v18 = vmul.f32 %v4602_v14, %v5893_v54  ;;  %v1434_v50 = vmul.f32 %v4602_v14, %v5892_v62 }
 0x191   : >> { %v1264_v44 = vmul.f32 %v1189_v16, %v4479_v61  ;;  %v1435_v39 = vmul.f32 %v4672_v26, %v5893_v54  ;;  %v1416_v7 = vmul.f32 %v4608_v20, %v5894_v21  ;;  %v1437_v41 = vmul.f32 %v4668_v56, %v5894_v21 }
 0x192   : >> { %v1494_v19 = vadd.f32 %v1493_v17, %v1492_v25  ;;  %v1415_v47 = vadd.f32 %v1414_v18, %v1413_v55  ;;  %v1455_v34 = vmul.f32 %v4608_v20, %v5892_v62  ;;  %v1456_v1 = vmul.f32 %v4668_v56, %v5893_v54 }
 0x193   : >> { %v1265_v36 = vadd.f32 %v1264_v44, %v1263_v43  ;;  %v1436_v11 = vadd.f32 %v1435_v39, %v1434_v50  ;;  %v1418_v44 = vmul.f32 %v4622_v10, %v5895_v13  ;;  %v1439_v31 = vmul.f32 %v4678_v9, %v5895_v13 }
 0x194   : >> { %v1417_v3 = vadd.f32 %v1416_v7, %v1415_v47  ;;  %v1458_v25 = vmul.f32 %v4760_v30, %v5894_v21  ;;  %v5896_v17 = vstv %s3771_s18  ;;  %v1476_v55 = vmul.f32 %v4622_v10, %v5892_v62 }
 0x195   : >> { %v4824_v51 = vadd.f32 %v5748_v48, %v1265_v36  ;;  %v1438_v57 = vadd.f32 %v1437_v41, %v1436_v11  ;;  %v1457_v36 = vadd.f32 %v1456_v1, %v1455_v34  ;;  %v1477_v18 = vmul.f32 %v4678_v9, %v5893_v54  ;;  %v5897_v41 = vld [vmem:[#allocation50_spill] sm:$0xff]  ;;  %v5898_v34 = vld [vmem:[#allocation51_spill] sm:$0xff] }
 0x196   : >> { %v4863_v50 = vadd.f32 %v1418_v44, %v1417_v3  ;;  %v1479_v7 = vmul.f32 %v4748_v40, %v5894_v21  ;;  %v1420_v11 = vmul.f32 %v4614_v28, %v5897_v41  ;;  %v1421_v1 = vmul.f32 %v4602_v14, %v5898_v34 }
 0x197   : >> { %2826 = vst.msk [vmem:[%s4596_s4 + $0x78] sm:$0xff] %vm1270_vm1, %v4824_v51  ;;  %v1474_v6 = vmul.f32 %v4824_v51, %v5890_v24  ;;  %v4865_v39 = vadd.f32 %v1439_v31, %v1438_v57  ;;  %v1478_v47 = vadd.f32 %v1477_v18, %v1476_v55  ;;  %v1442_v3 = vmul.f32 %v4672_v26, %v5898_v34  ;;  %v5899_v18 = vld [vmem:[#allocation53_spill] sm:$0xff] }
 0x198   : >> { %v1512_v57 = vmul.f32 %v4863_v50, %v5892_v62  ;;  %v1422_v55 = vadd.f32 %v1421_v1, %v1420_v11  ;;  %v1423_v48 = vmul.f32 %v4608_v20, %v5899_v18  ;;  %v1462_v11 = vmul.f32 %v4608_v20, %v5897_v41 }
 0x199   : >> { %v4839_v60 = vadd.f32 %v1474_v6, %v1473_v38  ;;  %v1459_v6 = vadd.f32 %v1458_v25, %v1457_v36  ;;  %v1499_v44 = vmul.f32 %v4865_v39, %v5886_v45  ;;  %v1513_v36 = vmul.f32 %v4865_v39, %v5893_v54 }
 0x19a   : >> { %v1480_v25 = vadd.f32 %v1479_v7, %v1478_v47  ;;  %v1463_v1 = vmul.f32 %v4668_v56, %v5898_v34  ;;  %v1465_v4 = vmul.f32 %v4760_v30, %v5899_v18 }
 0x19b   : >> { %v1495_v16 = vmul.f32 %v4839_v60, %v5890_v24  ;;  %v1514_v42 = vadd.f32 %v1513_v36, %v1512_v57 }
 0x19c   : >> { %v1464_v12 = vadd.f32 %v1463_v1, %v1462_v11  ;;  %v1486_v1 = vmul.f32 %v4748_v40, %v5899_v18 }
 0x19d   : >> { %v1496_v43 = vadd.f32 %v1495_v16, %v1494_v19  ;;  %v1460_v19 = vmul.f32 %v4748_v40, %v5895_v13  ;;  %v1498_v16 = vmul.f32 %v4863_v50, %v5885_v27 }
 0x19f   : >> { %v1497_v38 = vadd.f32 %v1496_v43, %v5896_v17  ;;  %v1441_v43 = vmul.f32 %v4602_v14, %v5897_v41  ;;  %v4883_v31 = vadd.f32 %v1460_v19, %v1459_v6  ;;  %v1481_v17 = vmul.f32 %v4824_v51, %v5895_v13 }
 0x1a0   : >> { %v1444_v6 = vmul.f32 %v4668_v56, %v5899_v18  ;;  %v1500_v19 = vadd.f32 %v1499_v44, %v1498_v16  ;;  %v1424_v44 = vadd.f32 %v1423_v48, %v1422_v55 }
 0x1a1   : >> { %3214 = vrcp.f32 %v1497_v38  ;;  %v1443_v28 = vadd.f32 %v1442_v3, %v1441_v43  ;;  %v1501_v61 = vmul.f32 %v4883_v31, %v5887_v46  ;;  %v1515_v47 = vmul.f32 %v4883_v31, %v5894_v21  ;;  %v5900_v43 = vld [vmem:[#allocation54_spill] sm:$0xff] }
 0x1a2   : >> { %v4899_v7 = vadd.f32 %v1481_v17, %v1480_v25  ;;  %v1425_v3 = vmul.f32 %v4622_v10, %v5900_v43  ;;  %v1446_v57 = vmul.f32 %v4678_v9, %v5900_v43 }
 0x1a3   : >> { %v1445_v58 = vadd.f32 %v1444_v6, %v1443_v28  ;;  %v1502_v36 = vadd.f32 %v1501_v61, %v1500_v19  ;;  %v1516_v23 = vadd.f32 %v1515_v47, %v1514_v42  ;;  %v1484_v28 = vmul.f32 %v4678_v9, %v5898_v34 }
 0x1a4   : >> { %v1503_v25 = vmul.f32 %v4899_v7, %v5890_v24  ;;  %v1517_v17 = vmul.f32 %v4899_v7, %v5895_v13  ;;  %v4919_v42 = vadd.f32 %v1425_v3, %v1424_v44  ;;  %v1467_v47 = vmul.f32 %v4748_v40, %v5900_v43 }
 0x1a5   : >> { %v4921_v48 = vadd.f32 %v1446_v57, %v1445_v58  ;;  %v5902_v3 = vstv %s3773_s19  ;;  %v1488_v57 = vmul.f32 %v4824_v51, %v5900_v43 }
 0x1a6   : >> { %5901 = vst [vmem:[#allocation37_spill] sm:$0xff] %v4919_v42  ;;  %v1504_v55 = vadd.f32 %v1503_v25, %v1502_v36  ;;  %v1518_v6 = vadd.f32 %v1517_v17, %v1516_v23 }
 0x1a8   : >> { %v1519_v44 = vadd.f32 %v1518_v6, %v5902_v3 }
 0x1ab   : >> { %v3215_v26 = vpop.eup %3214 }
 0x1ac   : >> { %v1536_v53 = vmul.f32 %v3215_v26, %v1497_v38 }
 0x1ae   : >> { %v1537_v16 = vsub.f32 2.0, %v1536_v53  ;;  %v1483_v53 = vmul.f32 %v4622_v10, %v5897_v41 }
 0x1b0   : >> { %v1538_v22 = vmul.f32 %v3215_v26, %v1537_v16  ;;  %v1466_v26 = vadd.f32 %v1465_v4, %v1464_v12  ;;  %v1485_v11 = vadd.f32 %v1484_v28, %v1483_v53  ;;  %v1506_v12 = vmul.f32 %v4921_v48, %v5886_v45 }
 0x1b1   : >> { %v1520_v28 = vmul.f32 %v4919_v42, %v5892_v62 }
 0x1b2   : >> { %v1539_v61 = vmul.f32 %v1538_v22, %v1497_v38  ;;  %v1505_v38 = vmul.f32 %v4919_v42, %v5885_v27  ;;  %v4938_v23 = vadd.f32 %v1467_v47, %v1466_v26  ;;  %v1487_v4 = vadd.f32 %v1486_v1, %v1485_v11 }
 0x1b3   : >> { %v1527_v26 = vmul.f32 %v4919_v42, %v5897_v41  ;;  %v1528_v47 = vmul.f32 %v4921_v48, %v5898_v34 }
 0x1b4   : >> { %v1540_v19 = vsub.f32 2.0, %v1539_v61  ;;  %v1507_v25 = vadd.f32 %v1506_v12, %v1505_v38  ;;  %v1508_v17 = vmul.f32 %v4938_v23, %v5887_v46  ;;  %v4945_v53 = vadd.f32 %v1488_v57, %v1487_v4 }
 0x1b5   : >> { %v1521_v61 = vmul.f32 %v4921_v48, %v5893_v54  ;;  %v1523_v38 = vmul.f32 %v4938_v23, %v5894_v21  ;;  %v1529_v3 = vadd.f32 %v1528_v47, %v1527_v26 }
 0x1b6   : >> { %v4927_v16 = vmul.f32 %v1540_v19, %v1538_v22  ;;  %v1509_v6 = vadd.f32 %v1508_v17, %v1507_v25  ;;  %v1510_v19 = vmul.f32 %v4945_v53, %v5890_v24  ;;  %v1525_v57 = vmul.f32 %v4945_v53, %v5895_v13 }
 0x1b7   : >> { %v1522_v11 = vadd.f32 %v1521_v61, %v1520_v28  ;;  %v1532_v28 = vmul.f32 %v4945_v53, %v5900_v43 }
 0x1b8   : >> { %v4934_v58 = vmul.f32 %v4927_v16, %v1504_v55  ;;  %v1511_v1 = vadd.f32 %v1510_v19, %v1509_v6 }
 0x1b9   : >> { %v1524_v4 = vadd.f32 %v1523_v38, %v1522_v11 }
 0x1ba   : >> { %v1545_v22 = vmul.f32 %v4934_v58, %v1504_v55  ;;  %v1553_v11 = vmul.f32 %v4934_v58, %v1511_v1 }
 0x1bb   : >> { %v1526_v6 = vadd.f32 %v1525_v57, %v1524_v4 }
 0x1bc   : >> { %v1546_v36 = vsub.f32 %v1519_v44, %v1545_v22  ;;  %v1530_v44 = vmul.f32 %v4938_v23, %v5899_v18  ;;  %v4964_v22 = vmul.f32 %v4927_v16, %v1511_v1 }
 0x1be   : >> { %3216 = vrcp.f32 %v1546_v36  ;;  %v1531_v17 = vadd.f32 %v1530_v44, %v1529_v3  ;;  %v1547_v19 = vmul.f32 %v4964_v22, %v1504_v55  ;;  %v1555_v15 = vmul.f32 %v4964_v22, %v1511_v1 }
 0x1bf   : >> { %v1554_v3 = vsub.f32 %v1526_v6, %v1553_v11 }
 0x1c0   : >> { %v1533_v47 = vadd.f32 %v1532_v28, %v1531_v17  ;;  %v1548_v38 = vsub.f32 %v1526_v6, %v1547_v19  ;;  %v1398_v17 = vmul.f32 %v4493_v5, %v5897_v41  ;;  %v1401_v41 = vmul.f32 %v4497_v29, %v5899_v18 }
 0x1c2   : >> { %v1534_v52 = vadd.f32 %v1533_v47, %v5903_v63  ;;  %v1383_v63 = vmul.f32 %v4495_v32, %v5886_v45  ;;  %v1385_v45 = vmul.f32 %v4497_v29, %v5887_v46  ;;  %v1395_v46 = vmul.f32 %v4502_v49, %v5895_v13 }
 0x1c4   : >> { %v1556_v59 = vsub.f32 %v1534_v52, %v1555_v15  ;;  %v1391_v52 = vmul.f32 %v4495_v32, %v5893_v54  ;;  %v1549_v15 = vsub.f32 0.0, %v4934_v58 }
 0x1c8   : >> { %v3217_v12 = vpop.eup %3216 }
 0x1c9   : >> { %v1562_v25 = vmul.f32 %v3217_v12, %v1546_v36 }
 0x1cb   : >> { %v1563_v61 = vsub.f32 2.0, %v1562_v25 }
 0x1cd   : >> { %v1564_v26 = vmul.f32 %v3217_v12, %v1563_v61  ;;  %v4977_v12 = vmul.f32 0.0, %v4927_v16 }
 0x1cf   : >> { %v1565_v30 = vmul.f32 %v1564_v26, %v1546_v36  ;;  %v1550_v36 = vmul.f32 %v4977_v12, %v1504_v55  ;;  %v1399_v55 = vmul.f32 %v4495_v32, %v5898_v34  ;;  %v1558_v54 = vmul.f32 %v4977_v12, %v1511_v1 }
 0x1d1   : >> { %v1566_v40 = vsub.f32 2.0, %v1565_v30  ;;  %v1382_v30 = vmul.f32 %v4493_v5, %v5885_v27  ;;  %v1552_v25 = vsub.f32 0.0, %v1550_v36  ;;  %v1400_v11 = vadd.f32 %v1399_v55, %v1398_v17  ;;  %v2830_v17 = vld [vmem:[%s4111_s3 + $0x28] sm:$0xff]  ;;  %v2831_v55 = vld [vmem:[%s4111_s3 + $0x30] sm:$0xff] }
 0x1d3   : >> { %v1567_v0 = vmul.f32 %v1566_v40, %v1564_v26  ;;  %v1390_v40 = vmul.f32 %v4493_v5, %v5892_v62  ;;  %v1384_v27 = vadd.f32 %v1383_v63, %v1382_v30  ;;  %v1393_v62 = vmul.f32 %v4497_v29, %v5894_v21 }
 0x1d5   : >> { %v4973_v44 = vmul.f32 %v1567_v0, %v1548_v38  ;;  %v1392_v61 = vadd.f32 %v1391_v52, %v1390_v40  ;;  %v1569_v6 = vmul.f32 %v1567_v0, %v1549_v15  ;;  %v1571_v26 = vmul.f32 %v1567_v0, %v1552_v25  ;;  %v2829_v25 = vld [vmem:[%s4111_s3 + $0x20] sm:$0xff] }
 0x1d6   : >> { %v1386_v34 = vadd.f32 %v1385_v45, %v1384_v27  ;;  %v1387_v38 = vmul.f32 %v4502_v49, %v5890_v24  ;;  %v1402_v52 = vadd.f32 %v1401_v41, %v1400_v11  ;;  %v1403_v24 = vmul.f32 %v4502_v49, %v5900_v43 }
 0x1d7   : >> { %v1580_v4 = vmul.f32 %v4973_v44, %v1554_v3  ;;  %v1394_v1 = vadd.f32 %v1393_v62, %v1392_v61  ;;  %v1582_v30 = vmul.f32 %v1569_v6, %v1554_v3  ;;  %v1586_v18 = vmul.f32 %v1571_v26, %v1554_v3 }
 0x1d8   : >> { %v1388_v15 = vadd.f32 %v1387_v38, %v1386_v34  ;;  %v1572_v13 = vmul.f32 %v4973_v44, %v4934_v58  ;;  %v1574_v45 = vmul.f32 %v1569_v6, %v4934_v58  ;;  %v1404_v34 = vadd.f32 %v1403_v24, %v1402_v52 }
 0x1d9   : >> { %v1581_v57 = vsub.f32 %v1556_v59, %v1580_v4  ;;  %v1551_v59 = vsub.f32 1.0, %v1550_v36  ;;  %v1557_v4 = vsub.f32 0.0, %v4964_v22  ;;  %v1560_v36 = vsub.f32 1.0, %v1558_v54 }
 0x1da   : >> { %v1396_v27 = vadd.f32 %v1395_v46, %v1394_v1  ;;  %v1573_v38 = vsub.f32 %v4964_v22, %v1572_v13 }
 0x1db   : >> { %3218 = vrcp.f32 %v1581_v57  ;;  %v1570_v19 = vmul.f32 %v1567_v0, %v1551_v59  ;;  %v1559_v0 = vsub.f32 0.0, %v1558_v54  ;;  %v1583_v62 = vsub.f32 %v1557_v4, %v1582_v30 }
 0x1dc   : >> { %v1587_v43 = vsub.f32 %v1560_v36, %v1586_v18 }
 0x1dd   : >> { %v1584_v63 = vmul.f32 %v1570_v19, %v1554_v3  ;;  %v1576_v61 = vmul.f32 %v1570_v19, %v4934_v58  ;;  %v1578_v3 = vmul.f32 %v1571_v26, %v4934_v58 }
 0x1df   : >> { %v1585_v54 = vsub.f32 %v1559_v0, %v1584_v63  ;;  %v1577_v58 = vsub.f32 %v4977_v12, %v1576_v61  ;;  %v1579_v1 = vsub.f32 %v4977_v12, %v1578_v3 }
 0x1e5   : >> { %v3219_v28 = vpop.eup %3218 }
 0x1e6   : >> { %v1589_v47 = vmul.f32 %v3219_v28, %v1581_v57 }
 0x1e8   : >> { %v1590_v21 = vsub.f32 2.0, %v1589_v47 }
 0x1ea   : >> { %v1591_v40 = vmul.f32 %v3219_v28, %v1590_v21  ;;  %v5016_v28 = vld [vmem:[%s4111_s3 + $0x38] sm:$0xff]  ;;  %v1575_v21 = vsub.f32 %v4927_v16, %v1574_v45 }
 0x1eb   : >> { %v1379_v11 = vmul.f32 %v5016_v28, %v2829_v25  ;;  %v1381_v41 = vmul.f32 %v5016_v28, %v2831_v55 }
 0x1ec   : >> { %v1592_v59 = vmul.f32 %v1591_v40, %v1581_v57  ;;  %v1380_v57 = vmul.f32 %v5016_v28, %v2830_v17 }
 0x1ed   : >> { %v5031_v30 = vsub.f32 %v1379_v11, %v1388_v15  ;;  %v5035_v18 = vsub.f32 %v1381_v41, %v1404_v34 }
 0x1ee   : >> { %v1593_v47 = vsub.f32 2.0, %v1592_v59  ;;  %v5033_v63 = vsub.f32 %v1380_v57, %v1396_v27 }
 0x1f0   : >> { %v1594_v46 = vmul.f32 %v1593_v47, %v1591_v40 }
 0x1f2   : >> { %v5025_v4 = vmul.f32 %v1594_v46, %v1583_v62  ;;  %v5027_v0 = vmul.f32 %v1594_v46, %v1585_v54  ;;  %v5029_v36 = vmul.f32 %v1594_v46, %v1587_v43 }
 0x1f4   : >> { %v1598_v22 = vmul.f32 %v5025_v4, %v1573_v38  ;;  %v1600_v16 = vmul.f32 %v5027_v0, %v1573_v38  ;;  %v1602_v40 = vmul.f32 %v5029_v36, %v1573_v38  ;;  %v1604_v12 = vmul.f32 %v5025_v4, %v4973_v44 }
 0x1f5   : >> { %v1606_v52 = vmul.f32 %v5027_v0, %v4973_v44  ;;  %v1608_v24 = vmul.f32 %v5029_v36, %v4973_v44  ;;  %v1667_v15 = vmul.f32 %v5025_v4, %v4945_v53  ;;  %v1673_v13 = vmul.f32 %v5027_v0, %v4945_v53 }
 0x1f6   : >> { %v5050_v59 = vsub.f32 %v1575_v21, %v1598_v22  ;;  %v5052_v25 = vsub.f32 %v1577_v58, %v1600_v16  ;;  %v5054_v17 = vsub.f32 %v1579_v1, %v1602_v40  ;;  %v5056_v55 = vsub.f32 %v1569_v6, %v1604_v12 }
 0x1f7   : >> { %v5058_v27 = vsub.f32 %v1570_v19, %v1606_v52  ;;  %v5060_v45 = vsub.f32 %v1571_v26, %v1608_v24  ;;  %v1679_v44 = vmul.f32 %v5029_v36, %v4945_v53  ;;  %v1613_v61 = vmul.f32 %v5025_v4, %v4919_v42 }
 0x1f8   : >> { %v1664_v3 = vmul.f32 %v5050_v59, %v4839_v60  ;;  %v1665_v62 = vmul.f32 %v5056_v55, %v4899_v7  ;;  %v1670_v6 = vmul.f32 %v5052_v25, %v4839_v60  ;;  %v1676_v19 = vmul.f32 %v5054_v17, %v4839_v60 }
 0x1f9   : >> { %v1671_v26 = vmul.f32 %v5058_v27, %v4899_v7  ;;  %v1677_v54 = vmul.f32 %v5060_v45, %v4899_v7  ;;  %v1610_v43 = vmul.f32 %v5050_v59, %v4799_v2  ;;  %v1611_v47 = vmul.f32 %v5056_v55, %v4863_v50 }
 0x1fa   : >> { %v1666_v11 = vadd.f32 %v1665_v62, %v1664_v3  ;;  %v1616_v57 = vmul.f32 %v5052_v25, %v4799_v2  ;;  %v1617_v41 = vmul.f32 %v5058_v27, %v4863_v50  ;;  %v1619_v34 = vmul.f32 %v5027_v0, %v4919_v42 }
 0x1fb   : >> { %v1672_v38 = vadd.f32 %v1671_v26, %v1670_v6  ;;  %v1678_v46 = vadd.f32 %v1677_v54, %v1676_v19  ;;  %v1612_v21 = vadd.f32 %v1611_v47, %v1610_v43  ;;  %v1622_v58 = vmul.f32 %v5054_v17, %v4799_v2 }
 0x1fc   : >> { %v1668_v1 = vadd.f32 %v1667_v15, %v1666_v11  ;;  %v1618_v22 = vadd.f32 %v1617_v41, %v1616_v57  ;;  %v1623_v16 = vmul.f32 %v5060_v45, %v4863_v50  ;;  %v1625_v40 = vmul.f32 %v5029_v36, %v4919_v42 }
 0x1fd   : >> { %v1674_v12 = vadd.f32 %v1673_v13, %v1672_v38  ;;  %v1680_v52 = vadd.f32 %v1679_v44, %v1678_v46  ;;  %v1614_v24 = vadd.f32 %v1613_v61, %v1612_v21  ;;  %v1628_v3 = vmul.f32 %v5050_v59, %v4801_v8 }
 0x1fe   : >> { %v5097_v62 = vmul.f32 %v5016_v28, %v1668_v1  ;;  %v1620_v6 = vadd.f32 %v1619_v34, %v1618_v22  ;;  %v1624_v19 = vadd.f32 %v1623_v16, %v1622_v58  ;;  %v1629_v15 = vmul.f32 %v5056_v55, %v4865_v39 }
 0x1ff   : >> { %v5102_v26 = vmul.f32 %v5016_v28, %v1674_v12  ;;  %v5105_v54 = vmul.f32 %v5016_v28, %v1680_v52  ;;  %v5108_v13 = vmul.f32 %v5016_v28, %v1614_v24  ;;  %v1631_v44 = vmul.f32 %v5025_v4, %v4921_v48 }
 0x200   : >> { %v1760_v61 = vmul.f32 %v5097_v62, %v4839_v60  ;;  %v5115_v43 = vmul.f32 %v5016_v28, %v1620_v6  ;;  %v1626_v47 = vadd.f32 %v1625_v40, %v1624_v19  ;;  %v1630_v11 = vadd.f32 %v1629_v15, %v1628_v3 }
 0x201   : >> { %v1761_v57 = vmul.f32 %v5102_v26, %v4899_v7  ;;  %v1763_v41 = vmul.f32 %v5105_v54, %v4945_v53  ;;  %v1682_v34 = vmul.f32 %v5108_v13, %v5031_v30  ;;  %v1712_v38 = vmul.f32 %v5108_v13, %v4801_v8 }
 0x202   : >> { %5904 = vst [vmem:[#allocation36_spill] sm:$0xff] %v5115_v43  ;;  %v5126_v46 = vmul.f32 %v5016_v28, %v1626_v47  ;;  %v1683_v21 = vmul.f32 %v5115_v43, %v5033_v63  ;;  %v1713_v58 = vmul.f32 %v5115_v43, %v4865_v39  ;;  %v1718_v1 = vmul.f32 %v5108_v13, %v4814_v37 }
 0x203   : >> { %v1762_v22 = vadd.f32 %v1761_v57, %v1760_v61  ;;  %v1719_v16 = vmul.f32 %v5115_v43, %v4883_v31  ;;  %v1724_v40 = vmul.f32 %v5108_v13, %v4839_v60  ;;  %v1725_v12 = vmul.f32 %v5115_v43, %v4899_v7 }
 0x204   : >> { %v1684_v52 = vadd.f32 %v1683_v21, %v1682_v34  ;;  %v1685_v24 = vmul.f32 %v5126_v46, %v5035_v18  ;;  %v1714_v3 = vadd.f32 %v1713_v58, %v1712_v38  ;;  %v1715_v6 = vmul.f32 %v5126_v46, %v4921_v48 }
 0x205   : >> { %v1764_v19 = vadd.f32 %v1763_v41, %v1762_v22  ;;  %v1720_v15 = vadd.f32 %v1719_v16, %v1718_v1  ;;  %v1721_v61 = vmul.f32 %v5126_v46, %v4938_v23  ;;  %v1726_v47 = vadd.f32 %v1725_v12, %v1724_v40 }
 0x206   : >> { %v1686_v57 = vadd.f32 %v1685_v24, %v1684_v52  ;;  %v1716_v42 = vadd.f32 %v1715_v6, %v1714_v3  ;;  %v1727_v43 = vmul.f32 %v5126_v46, %v4945_v53  ;;  %v1632_v34 = vadd.f32 %v1631_v44, %v1630_v11 }
 0x207   : >> { %v5149_v38 = vsub.f32 %v4824_v51, %v1764_v19  ;;  %v1722_v21 = vadd.f32 %v1721_v61, %v1720_v15  ;;  %v1634_v41 = vmul.f32 %v5052_v25, %v4801_v8  ;;  %v1635_v58 = vmul.f32 %v5058_v27, %v4865_v39 }
 0x208   : >> { %v5156_v1 = vadd.f32 %v1686_v57, %v4493_v5  ;;  %v5159_v22 = vsub.f32 %v4602_v14, %v1716_v42  ;;  %v1728_v44 = vadd.f32 %v1727_v43, %v1726_v47  ;;  %v5162_v51 = vmul.f32 %v5016_v28, %v1632_v34 }
 0x209   : >> { %2949 = vst.msk [vmem:[%s4342_s2 + $0xf8] sm:$0xff] %vm1270_vm1, %v5149_v38  ;;  %v5168_v11 = vsub.f32 %v4608_v20, %v1722_v21  ;;  %v1636_v16 = vadd.f32 %v1635_v58, %v1634_v41  ;;  %v1637_v5 = vmul.f32 %v5027_v0, %v4921_v48  ;;  %v1640_v14 = vmul.f32 %v5054_v17, %v4801_v8 }
 0x20a   : >> { %v5175_v42 = vsub.f32 %v4622_v10, %v1728_v44  ;;  %2835 = vst.msk [vmem:[%s4316_s1 + $0x40] sm:$0xff] %vm1270_vm1, %v5156_v1  ;;  %2865 = vst.msk [vmem:[%s4342_s2 + $0x88] sm:$0xff] %vm1270_vm1, %v5159_v22  ;;  %v1641_v20 = vmul.f32 %v5060_v45, %v4865_v39  ;;  %v1643_v43 = vmul.f32 %v5029_v36, %v4921_v48 }
 0x20b   : >> { %2883 = vst.msk [vmem:[%s4342_s2 + $0xa0] sm:$0xff] %vm1270_vm1, %v5159_v22  ;;  %v1646_v40 = vmul.f32 %v5050_v59, %v4814_v37  ;;  %2871 = vst.msk [vmem:[%s4342_s2 + $0x90] sm:$0xff] %vm1270_vm1, %v5168_v11  ;;  %v1638_v10 = vadd.f32 %v1637_v5, %v1636_v16  ;;  %v1647_v12 = vmul.f32 %v5056_v55, %v4883_v31 }
 0x20c   : >> { %2907 = vst.msk [vmem:[%s4342_s2 + $0xc0] sm:$0xff] %vm1270_vm1, %v5168_v11  ;;  %v1649_v52 = vmul.f32 %v5025_v4, %v4938_v23  ;;  %v1652_v24 = vmul.f32 %v5052_v25, %v4814_v37  ;;  %2877 = vst.msk [vmem:[%s4342_s2 + $0x98] sm:$0xff] %vm1270_vm1, %v5175_v42  ;;  %v1642_v59 = vadd.f32 %v1641_v20, %v1640_v14 }
 0x20d   : >> { %2931 = vst.msk [vmem:[%s4342_s2 + $0xe0] sm:$0xff] %vm1270_vm1, %v5175_v42  ;;  %v1653_v3 = vmul.f32 %v5058_v27, %v4883_v31  ;;  %v1655_v6 = vmul.f32 %v5027_v0, %v4938_v23  ;;  %v1658_v55 = vmul.f32 %v5054_v17, %v4814_v37  ;;  %v5217_v4 = vmul.f32 %v5016_v28, %v1638_v10 }
 0x20e   : >> { %v1648_v25 = vadd.f32 %v1647_v12, %v1646_v40  ;;  %v1659_v19 = vmul.f32 %v5060_v45, %v4883_v31  ;;  %v1661_v15 = vmul.f32 %v5029_v36, %v4938_v23  ;;  %v1644_v61 = vadd.f32 %v1643_v43, %v1642_v59 }
 0x20f   : >> { %v1654_v47 = vadd.f32 %v1653_v3, %v1652_v24  ;;  %v1688_v27 = vmul.f32 %v5162_v51, %v5031_v30  ;;  %v1700_v0 = vmul.f32 %v5097_v62, %v5031_v30  ;;  %v1689_v34 = vmul.f32 %v5217_v4, %v5033_v63 }
 0x210   : >> { %v1650_v57 = vadd.f32 %v1649_v52, %v1648_v25  ;;  %v1660_v17 = vadd.f32 %v1659_v19, %v1658_v55  ;;  %v1701_v21 = vmul.f32 %v5102_v26, %v5033_v63  ;;  %v5232_v45 = vmul.f32 %v5016_v28, %v1644_v61 }
 0x211   : >> { %v1656_v36 = vadd.f32 %v1655_v6, %v1654_v47  ;;  %v1703_v41 = vmul.f32 %v5105_v54, %v5035_v18  ;;  %v1736_v58 = vmul.f32 %v5162_v51, %v4814_v37  ;;  %v1690_v16 = vadd.f32 %v1689_v34, %v1688_v27 }
 0x212   : >> { %v1651_v62 = vmul.f32 %v5016_v28, %v1650_v57  ;;  %v1662_v44 = vadd.f32 %v1661_v15, %v1660_v17  ;;  %v1702_v5 = vadd.f32 %v1701_v21, %v1700_v0  ;;  %v1691_v26 = vmul.f32 %v5232_v45, %v5035_v18  ;;  %v5905_v17 = vld [vmem:[#allocation58_spill] sm:$0xff] }
 0x213   : >> { %v1657_v14 = vmul.f32 %v5016_v28, %v1656_v36  ;;  %v1737_v20 = vmul.f32 %v5217_v4, %v4883_v31  ;;  %v1739_v43 = vmul.f32 %v5232_v45, %v4938_v23  ;;  %v1742_v12 = vmul.f32 %v5162_v51, %v4839_v60 }
 0x214   : >> { %v1663_v54 = vmul.f32 %v5016_v28, %v1662_v44  ;;  %v1694_v40 = vmul.f32 %v1651_v62, %v5031_v30  ;;  %v1704_v10 = vadd.f32 %v1703_v41, %v1702_v5  ;;  %v1692_v52 = vadd.f32 %v1691_v26, %v1690_v16  ;;  %v5909_v16 = vld [vmem:[#allocation61_spill] sm:$0xff] }
 0x215   : >> { %v1695_v24 = vmul.f32 %v1657_v14, %v5033_v63  ;;  %v1738_v59 = vadd.f32 %v1737_v20, %v1736_v58  ;;  %v1743_v3 = vmul.f32 %v5217_v4, %v4899_v7  ;;  %v1745_v28 = vmul.f32 %v5232_v45, %v4945_v53  ;;  %v5911_v20 = vld [vmem:[#allocation63_spill] sm:$0xff] }
 0x216   : >> { %v1697_v6 = vmul.f32 %v1663_v54, %v5035_v18  ;;  %v1705_v55 = vadd.f32 %v1704_v10, %v4502_v49  ;;  %v1748_v30 = vmul.f32 %v1651_v62, %v4814_v37  ;;  %v1693_v25 = vadd.f32 %v1692_v52, %v4495_v32 }
 0x217   : >> { %v1696_v19 = vadd.f32 %v1695_v24, %v1694_v40  ;;  %v1740_v15 = vadd.f32 %v1739_v43, %v1738_v59  ;;  %v1744_v61 = vadd.f32 %v1743_v3, %v1742_v12  ;;  %v1749_v63 = vmul.f32 %v1657_v14, %v4883_v31  ;;  %v5913_v12 = vld [vmem:[#allocation64_spill] sm:$0xff]  ;;  %v5914_v24 = vld [vmem:[#allocation65_spill] sm:$0xff] }
 0x218   : >> { %v1751_v47 = vmul.f32 %v1663_v54, %v4938_v23  ;;  %v1754_v18 = vmul.f32 %v1651_v62, %v4839_v60  ;;  %v1755_v49 = vmul.f32 %v1657_v14, %v4899_v7  ;;  %2853 = vst.msk [vmem:[%s4316_s1 + $0x58] sm:$0xff] %vm1270_vm1, %v1705_v55  ;;  %v1757_v0 = vmul.f32 %v1663_v54, %v4945_v53  ;;  %v5906_v53 = vld [vmem:[#allocation59_spill] sm:$0xff]  ;;  %v5907_v62 = vld [vmem:[#allocation60_spill] sm:$0xff]  ;;  %v5910_v14 = vld [vmem:[#allocation62_spill] sm:$0xff] }
 0x219   : >> { %v1698_v27 = vadd.f32 %v1697_v6, %v1696_v19  ;;  %v5266_v37 = vsub.f32 %v4668_v56, %v1740_v15  ;;  %v1746_v32 = vadd.f32 %v1745_v28, %v1744_v61  ;;  %2841 = vst.msk [vmem:[%s4316_s1 + $0x48] sm:$0xff] %vm1270_vm1, %v1693_v25  ;;  %v1750_v31 = vadd.f32 %v1749_v63, %v1748_v30  ;;  %v5912_v54 = vld [vmem:[#allocation40_spill] sm:$0xff]  ;;  %v5915_v6 = vld [vmem:[#allocation41_spill] sm:$0xff]  ;;  %v5916_v30 = vld [vmem:[#allocation66_spill] sm:$0xff] }
 0x21a   : >> { %v1756_v23 = vadd.f32 %v1755_v49, %v1754_v18  ;;  %v1766_v60 = vmul.f32 %v5156_v1, %v4142_v35  ;;  %v1767_v7 = vmul.f32 %v1693_v25, %v5862_v33  ;;  %v1771_v34 = vmul.f32 %v1705_v55, %v5905_v17  ;;  %v5917_v15 = vld [vmem:[#allocation67_spill] sm:$0xff]  ;;  %v5918_v18 = vld [vmem:[#allocation68_spill] sm:$0xff] }
 0x21b   : >> { %v1699_v57 = vadd.f32 %v1698_v27, %v4497_v29  ;;  %v5276_v56 = vsub.f32 %v4678_v9, %v1746_v32  ;;  %2895 = vst.msk [vmem:[%s4342_s2 + $0xb0] sm:$0xff] %vm1270_vm1, %v5266_v37  ;;  %2913 = vst.msk [vmem:[%s4342_s2 + $0xc8] sm:$0xff] %vm1270_vm1, %v5266_v37  ;;  %v1773_v21 = vmul.f32 %v5156_v1, %v5906_v53  ;;  %v5908_v29 = vld [vmem:[#allocation57_spill] sm:$0xff]  ;;  %v5919_v27 = vld [vmem:[#allocation52_spill] sm:$0xff] }
 0x21c   : >> { %v1752_v36 = vadd.f32 %v1751_v47, %v1750_v31  ;;  %v1758_v41 = vadd.f32 %v1757_v0, %v1756_v23  ;;  %v1768_v58 = vadd.f32 %v1767_v7, %v1766_v60  ;;  %v1774_v44 = vmul.f32 %v1693_v25, %v5907_v62 }
 0x21d   : >> { %v1769_v9 = vmul.f32 %v1699_v57, %v5908_v29  ;;  %2847 = vst.msk [vmem:[%s4316_s1 + $0x50] sm:$0xff] %vm1270_vm1, %v1699_v57  ;;  %2901 = vst.msk [vmem:[%s4342_s2 + $0xb8] sm:$0xff] %vm1270_vm1, %v5276_v56  ;;  %v1776_v5 = vmul.f32 %v1699_v57, %v5909_v16  ;;  %v1778_v26 = vmul.f32 %v1705_v55, %v5910_v14 }
 0x21e   : >> { %2937 = vst.msk [vmem:[%s4342_s2 + $0xe8] sm:$0xff] %vm1270_vm1, %v5276_v56  ;;  %v1780_v43 = vmul.f32 %v5156_v1, %v5911_v20  ;;  %v5302_v40 = vsub.f32 %v5912_v54, %v1758_v41  ;;  %v1775_v10 = vadd.f32 %v1774_v44, %v1773_v21  ;;  %v1781_v52 = vmul.f32 %v1693_v25, %v5913_v12  ;;  %v5921_v21 = vld [vmem:[#allocation37_spill] sm:$0xff] }
 0x21f   : >> { %v1783_v59 = vmul.f32 %v1699_v57, %v5914_v24  ;;  %v1770_v3 = vadd.f32 %v1769_v9, %v1768_v58  ;;  %v1785_v28 = vmul.f32 %v1705_v55, %v5915_v6  ;;  %v1787_v19 = vmul.f32 %v5156_v1, %v5916_v30 }
 0x220   : >> { %v1788_v61 = vmul.f32 %v1693_v25, %v5917_v15  ;;  %2925 = vst.msk [vmem:[%s4342_s2 + $0xd8] sm:$0xff] %vm1270_vm1, %v5302_v40  ;;  %2943 = vst.msk [vmem:[%s4342_s2 + $0xf0] sm:$0xff] %vm1270_vm1, %v5302_v40  ;;  %v1777_v63 = vadd.f32 %v1776_v5, %v1775_v10  ;;  %v1782_v47 = vadd.f32 %v1781_v52, %v1780_v43  ;;  %v5920_v25 = vld [vmem:[#allocation36_spill] sm:$0xff] }
 0x221   : >> { %v1790_v49 = vmul.f32 %v1699_v57, %v5918_v18  ;;  %v1792_v32 = vmul.f32 %v1705_v55, %v5919_v27  ;;  %v5318_v0 = vadd.f32 %v1771_v34, %v1770_v3   ;;  %v1706_v1 = vmul.f32 %v5108_v13, %v4799_v2 }
 0x222   : >> { %v1789_v31 = vadd.f32 %v1788_v61, %v1787_v19  ;;  %v1707_v23 = vmul.f32 %v5920_v25, %v4863_v50  ;;  %v5324_v60 = vadd.f32 %v1778_v26, %v1777_v63   ;;  %v1784_v7 = vadd.f32 %v1783_v59, %v1782_v47  ;;  %v5923_v26 = vld [vmem:[#allocation69_spill] sm:$0xff]  ;;  %v5924_v63 = vld [vmem:[#allocation56_spill] sm:$0xff] }
 0x223   : >> { %v1709_v41 = vmul.f32 %v5126_v46, %v5921_v21  ;;  %v1730_v57 = vmul.f32 %v5162_v51, %v4801_v8  ;;  %2838 = vst.msk [vmem:[%s4316_s1 + $0x60] sm:$0xff] %vm1270_vm1, %v5318_v0  ;;  %v1731_v2 = vmul.f32 %v5217_v4, %v4865_v39  ;;  %v1733_v50 = vmul.f32 %v5232_v45, %v4921_v48  ;;  %v5922_v46 = vld [vmem:[#allocation55_spill] sm:$0xff] }
 0x224   : >> { %v1791_v55 = vadd.f32 %v1790_v49, %v1789_v31  ;;  %v1708_v34 = vadd.f32 %v1707_v23, %v1706_v1  ;;  %2844 = vst.msk [vmem:[%s4316_s1 + $0x68] sm:$0xff] %vm1270_vm1, %v5324_v60  ;;  %v5340_v13 = vadd.f32 %v1785_v28, %v1784_v7   ;;  %v5343_v8 = vsub.f32 %v5922_v46, %v1752_v36 }
 0x225   : >> { %v1795_v51 = vmul.f32 %v5159_v22, %v5862_v33  ;;  %v1797_v58 = vmul.f32 %v5168_v11, %v5908_v29  ;;  %v1732_v44 = vadd.f32 %v1731_v2, %v1730_v57  ;;  %v1799_v48 = vmul.f32 %v5175_v42, %v5905_v17  ;;  %2085 = vst.msk [vmem:[#allocation2] sm:$0xff] (%p5603_p6), %vm1270_vm1, %v5318_v0 }
 0x226   : >> { %v5349_v39 = vadd.f32 %v1792_v32, %v1791_v55   ;;  %v1710_v4 = vadd.f32 %v1709_v41, %v1708_v34  ;;  %2850 = vst.msk [vmem:[%s4316_s1 + $0x70] sm:$0xff] %vm1270_vm1, %v5340_v13  ;;  %v1801_v45 = vmul.f32 %v5159_v22, %v4142_v35  ;;  %v1804_v36 = vmul.f32 %v5266_v37, %v5908_v29 }
 0x227   : >> { %v1806_v9 = vmul.f32 %v5276_v56, %v5905_v17  ;;  %v1808_v5 = vmul.f32 %v5168_v11, %v4142_v35  ;;  %2919 = vst.msk [vmem:[%s4342_s2 + $0xd0] sm:$0xff] %vm1270_vm1, %v5343_v8  ;;  %v1734_v54 = vadd.f32 %v1733_v50, %v1732_v44  ;;  %v1809_v10 = vmul.f32 %v5266_v37, %v5862_v33 }
 0x228   : >> { %2856 = vst.msk [vmem:[%s4316_s1 + $0x78] sm:$0xff] %vm1270_vm1, %v5349_v39  ;;  %v5371_v43 = vsub.f32 %v5923_v26, %v1710_v4  ;;  %v1811_v52 = vmul.f32 %v5343_v8, %v5908_v29  ;;  %v1813_v59 = vmul.f32 %v5302_v40, %v5905_v17  ;;  %v1815_v3 = vmul.f32 %v5175_v42, %v4142_v35 }
 0x229   : >> { %v1816_v28 = vmul.f32 %v5276_v56, %v5862_v33  ;;  %v1818_v19 = vmul.f32 %v5302_v40, %v5908_v29  ;;  %v5391_v47 = vsub.f32 %v5924_v63, %v1734_v54  ;;  %v1810_v49 = vadd.f32 %v1809_v10, %v1808_v5  ;;  %2086 = vst.msk [vmem:[#allocation2 + $0x8] sm:$0xff] (%p5603_p6), %vm1270_vm1, %v5324_v60 }
 0x22a   : >> { %v1794_v61 = vmul.f32 %v5371_v43, %v4142_v35  ;;  %2859 = vst.msk [vmem:[%s4342_s2 + $0x80] sm:$0xff] %vm1270_vm1, %v5371_v43  ;;  %v1820_v32 = vmul.f32 %v5149_v38, %v5905_v17  ;;  %v1822_v1 = vmul.f32 %v5371_v43, %v5906_v53  ;;  %v1823_v25 = vmul.f32 %v5159_v22, %v5907_v62 }
 0x22b   : >> { %v1817_v31 = vadd.f32 %v1816_v28, %v1815_v3  ;;  %v1825_v23 = vmul.f32 %v5168_v11, %v5909_v16  ;;  %v1802_v21 = vmul.f32 %v5391_v47, %v5862_v33  ;;  %v1812_v41 = vadd.f32 %v1811_v52, %v1810_v49  ;;  %2889 = vst.msk [vmem:[%s4342_s2 + $0xa8] sm:$0xff] %vm1270_vm1, %v5391_v47 }
 0x22c   : >> { %v1796_v7 = vadd.f32 %v1795_v51, %v1794_v61  ;;  %v1827_v57 = vmul.f32 %v5175_v42, %v5910_v14  ;;  %v1824_v34 = vadd.f32 %v1823_v25, %v1822_v1  ;;  %v1829_v2 = vmul.f32 %v5159_v22, %v5906_v53  ;;  %2087 = vst.msk [vmem:[#allocation2 + $0x10] sm:$0xff] (%p5603_p6), %vm1270_vm1, %v5340_v13 }
 0x22d   : >> { %v1819_v55 = vadd.f32 %v1818_v19, %v1817_v31  ;;  %v1830_v50 = vmul.f32 %v5391_v47, %v5907_v62  ;;  %v1803_v51 = vadd.f32 %v1802_v21, %v1801_v45  ;;  %v1814_v4 = vadd.f32 %v1813_v59, %v1812_v41  ;;  %2088 = vst.msk [vmem:[#allocation2 + $0x18] sm:$0xff] (%p5603_p6), %vm1270_vm1, %v5349_v39 }
 0x22e   : >> { %v1798_v46 = vadd.f32 %v1797_v58, %v1796_v7  ;;  %v1832_v44 = vmul.f32 %v5266_v37, %v5909_v16  ;;  %v1826_v26 = vadd.f32 %v1825_v23, %v1824_v34  ;;  %v1834_v10 = vmul.f32 %v5276_v56, %v5910_v14 }
 0x22f   : >> { %v1821_v5 = vadd.f32 %v1820_v32, %v1819_v55  ;;  %v1831_v54 = vadd.f32 %v1830_v50, %v1829_v2  ;;  %v1805_v3 = vadd.f32 %v1804_v36, %v1803_v51  ;;  %v1909_v28 = vmul.f32 %v1814_v4, %v5908_v29 }
 0x230   : >> { %v1800_v52 = vadd.f32 %v1799_v48, %v1798_v46  ;;  %v1917_v19 = vmul.f32 %v1814_v4, %v5909_v16  ;;  %v1924_v45 = vmul.f32 %v1814_v4, %v5914_v24  ;;  %v1931_v29 = vmul.f32 %v1814_v4, %v5918_v18 }
 0x231   : >> { %v1911_v61 = vmul.f32 %v1821_v5, %v5905_v17  ;;  %v1919_v58 = vmul.f32 %v1821_v5, %v5910_v14  ;;  %v1926_v59 = vmul.f32 %v1821_v5, %v5915_v6  ;;  %v1807_v63 = vadd.f32 %v1806_v9, %v1805_v3 }
 0x232   : >> { %v1906_v49 = vmul.f32 %v1800_v52, %v4142_v35  ;;  %v1914_v32 = vmul.f32 %v1800_v52, %v5906_v53  ;;  %v1921_v48 = vmul.f32 %v1800_v52, %v5911_v20  ;;  %v1928_v36 = vmul.f32 %v1800_v52, %v5916_v30 }
 0x233   : >> { %v1933_v31 = vmul.f32 %v1821_v5, %v5919_v27  ;;  %v1828_v17 = vadd.f32 %v1827_v57, %v1826_v26  ;;  %v1907_v1 = vmul.f32 %v1807_v63, %v5862_v33  ;;  %v1915_v25 = vmul.f32 %v1807_v63, %v5907_v62 }
 0x234   : >> { %v1922_v23 = vmul.f32 %v1807_v63, %v5913_v12  ;;  %v1929_v9 = vmul.f32 %v1807_v63, %v5917_v15  ;;  %v1833_v35 = vadd.f32 %v1832_v44, %v1831_v54  ;;  %v1836_v7 = vmul.f32 %v5168_v11, %v5906_v53 }
 0x235   : >> { %v1837_v21 = vmul.f32 %v5266_v37, %v5907_v62  ;;  %v1839_v41 = vmul.f32 %v5343_v8, %v5909_v16  ;;  %v1908_v55 = vadd.f32 %v1907_v1, %v1906_v49  ;;  %v1916_v57 = vadd.f32 %v1915_v25, %v1914_v32 }
 0x236   : >> { %v1923_v34 = vadd.f32 %v1922_v23, %v1921_v48  ;;  %v1930_v33 = vadd.f32 %v1929_v9, %v1928_v36  ;;  %v1835_v2 = vadd.f32 %v1834_v10, %v1833_v35  ;;  %v1841_v46 = vmul.f32 %v5302_v40, %v5910_v14 }
 0x237   : >> { %v1838_v50 = vadd.f32 %v1837_v21, %v1836_v7  ;;  %v1843_v51 = vmul.f32 %v5175_v42, %v5906_v53  ;;  %v1910_v4 = vadd.f32 %v1909_v28, %v1908_v55  ;;  %v1918_v44 = vadd.f32 %v1917_v19, %v1916_v57 }
 0x238   : >> { %v1925_v5 = vadd.f32 %v1924_v45, %v1923_v34  ;;  %v1932_v26 = vadd.f32 %v1931_v29, %v1930_v33  ;;  %v1844_v10 = vmul.f32 %v5276_v56, %v5907_v62  ;;  %v1846_v52 = vmul.f32 %v5302_v40, %v5909_v16 }
 0x239   : >> { %v1840_v54 = vadd.f32 %v1839_v41, %v1838_v50  ;;  %v1848_v3 = vmul.f32 %v5149_v38, %v5910_v14  ;;  %v1912_v28 = vadd.f32 %v1911_v61, %v1910_v4  ;;  %v5448_v19 = vadd.f32 %v1919_v58, %v1918_v44  }
 0x23a   : >> { %v5450_v45 = vadd.f32 %v1926_v59, %v1925_v5   ;;  %v5452_v21 = vadd.f32 %v1933_v31, %v1932_v26   ;;  %v1845_v48 = vadd.f32 %v1844_v10, %v1843_v51  ;;  %v1935_v36 = vmul.f32 %v1828_v17, %v5906_v53 }
 0x23b   : >> { %v5925_v63 = vmov %v5448_v19  ;;  %v1842_v32 = vadd.f32 %v1841_v46, %v1840_v54  ;;  %v1936_v29 = vmul.f32 %v1835_v2, %v5907_v62  ;;  %v5927_v1 = vstv %s3763_s21 }
 0x23c   : >> { %v5926_v49 = vmov %v5452_v21  ;;  %v5458_v25 = vadd.f32 %v1912_v28, %v5927_v1   ;;  %2868 = vst.msk [vmem:[%s4596_s4 + $0x88] sm:$0xff] %vm1270_vm1, %v5925_v63  ;;  %2886 = vst.msk [vmem:[%s4596_s4 + $0xa0] sm:$0xff] %vm1270_vm1, %v5925_v63  ;;  %v1943_v53 = vmul.f32 %v1828_v17, %v5911_v20  ;;  %v1944_v62 = vmul.f32 %v1835_v2, %v5913_v12 }
 0x23d   : >> { %2874 = vst.msk [vmem:[%s4596_s4 + $0x90] sm:$0xff] %vm1270_vm1, %v5450_v45  ;;  %2910 = vst.msk [vmem:[%s4596_s4 + $0xc0] sm:$0xff] %vm1270_vm1, %v5450_v45  ;;  %v1950_v19 = vmul.f32 %v1828_v17, %v5916_v30  ;;  %v1847_v61 = vadd.f32 %v1846_v52, %v1845_v48  ;;  %v1937_v58 = vadd.f32 %v1936_v29, %v1935_v36  ;;  %v5930_v29 = vstv %s3765_s12 }
 0x23e   : >> { %v5928_v9 = vmov %v5458_v25  ;;  %2880 = vst.msk [vmem:[%s4596_s4 + $0x98] sm:$0xff] %vm1270_vm1, %v5926_v49  ;;  %2934 = vst.msk [vmem:[%s4596_s4 + $0xe0] sm:$0xff] %vm1270_vm1, %v5926_v49  ;;  %v1938_v59 = vmul.f32 %v1842_v32, %v5909_v16  ;;  %v1946_v31 = vmul.f32 %v1842_v32, %v5914_v24  ;;  %v1945_v23 = vadd.f32 %v1944_v62, %v1943_v53 }
 0x23f   : >> { %2862 = vst.msk [vmem:[%s4596_s4 + $0x80] sm:$0xff] %vm1270_vm1, %v5928_v9  ;;  %v1951_v35 = vmul.f32 %v1835_v2, %v5917_v15  ;;  %v1953_v7 = vmul.f32 %v1842_v32, %v5918_v18  ;;  %v1850_v21 = vmul.f32 %v5371_v43, %v5911_v20  ;;  %v1849_v41 = vadd.f32 %v1848_v3, %v1847_v61 }
 0x240   : >> { %v1939_v55 = vadd.f32 %v1938_v59, %v1937_v58  ;;  %v1851_v17 = vmul.f32 %v5159_v22, %v5913_v12  ;;  %v1853_v16 = vmul.f32 %v5168_v11, %v5914_v24  ;;  %v1947_v57 = vadd.f32 %v1946_v31, %v1945_v23  ;;  %2089 = vst.msk [vmem:[#allocation3] sm:$0xff] (%p5603_p6), %vm1270_vm1, %v5928_v9 }
 0x241   : >> { %v1952_v34 = vadd.f32 %v1951_v35, %v1950_v19  ;;  %v1855_v33 = vmul.f32 %v5175_v42, %v5915_v6  ;;  %v1857_v2 = vmul.f32 %v5159_v22, %v5911_v20  ;;  %v1940_v50 = vmul.f32 %v1849_v41, %v5910_v14  ;;  %2090 = vst.msk [vmem:[#allocation3 + $0x8] sm:$0xff] (%p5603_p6), %vm1270_vm1, %v5925_v63 }
 0x242   : >> { %v1948_v46 = vmul.f32 %v1849_v41, %v5915_v6  ;;  %v1955_v51 = vmul.f32 %v1849_v41, %v5919_v27  ;;  %v1852_v4 = vadd.f32 %v1851_v17, %v1850_v21  ;;  %v1858_v5 = vmul.f32 %v5391_v47, %v5913_v12  ;;  %2091 = vst.msk [vmem:[#allocation3 + $0x10] sm:$0xff] (%p5603_p6), %vm1270_vm1, %v5450_v45 }
 0x243   : >> { %v1954_v44 = vadd.f32 %v1953_v7, %v1952_v34  ;;  %v1860_v26 = vmul.f32 %v5266_v37, %v5914_v24  ;;  %v1862_v54 = vmul.f32 %v5276_v56, %v5915_v6  ;;  %v1941_v14 = vadd.f32 %v1940_v50, %v1939_v55  ;;  %2092 = vst.msk [vmem:[#allocation3 + $0x18] sm:$0xff] (%p5603_p6), %vm1270_vm1, %v5926_v49 }
 0x244   : >> { %v5507_v23 = vadd.f32 %v1948_v46, %v1947_v57   ;;  %v1854_v52 = vadd.f32 %v1853_v16, %v1852_v4  ;;  %v1864_v3 = vmul.f32 %v5168_v11, %v5911_v20  ;;  %v1859_v32 = vadd.f32 %v1858_v5, %v1857_v2 }
 0x245   : >> { %v5511_v28 = vadd.f32 %v1955_v51, %v1954_v44   ;;  %v1865_v48 = vmul.f32 %v5266_v37, %v5913_v12  ;;  %v1867_v36 = vmul.f32 %v5343_v8, %v5914_v24  ;;  %v5519_v1 = vadd.f32 %v1941_v14, %v5930_v29  }
 0x246   : >> { %v5929_v10 = vmov %v5507_v23  ;;  %v1856_v25 = vadd.f32 %v1855_v33, %v1854_v52  ;;  %v1869_v53 = vmul.f32 %v5302_v40, %v5915_v6  ;;  %v1871_v62 = vmul.f32 %v5175_v42, %v5911_v20 }
 0x247   : >> { %2898 = vst.msk [vmem:[%s4596_s4 + $0xb0] sm:$0xff] %vm1270_vm1, %v5929_v10  ;;  %2916 = vst.msk [vmem:[%s4596_s4 + $0xc8] sm:$0xff] %vm1270_vm1, %v5929_v10  ;;  %v1861_v19 = vadd.f32 %v1860_v26, %v1859_v32  ;;  %v1866_v61 = vadd.f32 %v1865_v48, %v1864_v3  ;;  %v1872_v58 = vmul.f32 %v5276_v56, %v5913_v12 }
 0x248   : >> { %2904 = vst.msk [vmem:[%s4596_s4 + $0xb8] sm:$0xff] %vm1270_vm1, %v5511_v28  ;;  %2940 = vst.msk [vmem:[%s4596_s4 + $0xe8] sm:$0xff] %vm1270_vm1, %v5511_v28  ;;  %v1874_v59 = vmul.f32 %v5302_v40, %v5914_v24  ;;  %v1876_v31 = vmul.f32 %v5149_v38, %v5915_v6  ;;  %v1957_v23 = vmul.f32 %v1856_v25, %v5911_v20 }
 0x249   : >> { %2892 = vst.msk [vmem:[%s4596_s4 + $0xa8] sm:$0xff] %vm1270_vm1, %v5519_v1  ;;  %v1965_v35 = vmul.f32 %v1856_v25, %v5916_v30  ;;  %v1878_v7 = vmul.f32 %v5371_v43, %v5916_v30  ;;  %v1863_v21 = vadd.f32 %v1862_v54, %v1861_v19  ;;  %v1868_v41 = vadd.f32 %v1867_v36, %v1866_v61 }
 0x24a   : >> { %v1873_v55 = vadd.f32 %v1872_v58, %v1871_v62  ;;  %v1879_v17 = vmul.f32 %v5159_v22, %v5917_v15  ;;  %v1881_v16 = vmul.f32 %v5168_v11, %v5918_v18  ;;  %v1883_v57 = vmul.f32 %v5175_v42, %v5919_v27  ;;  %2093 = vst.msk [vmem:[#allocation3 + $0x20] sm:$0xff] (%p5603_p6), %vm1270_vm1, %v5519_v1 }
 0x24b   : >> { %v1885_v20 = vmul.f32 %v5159_v22, %v5916_v30  ;;  %v1886_v34 = vmul.f32 %v5391_v47, %v5917_v15  ;;  %v1870_v33 = vadd.f32 %v1869_v53, %v1868_v41  ;;  %v1958_v2 = vmul.f32 %v1863_v21, %v5913_v12  ;;  %2094 = vst.msk [vmem:[#allocation3 + $0x28] sm:$0xff] (%p5603_p6), %vm1270_vm1, %v5929_v10 }
 0x24c   : >> { %v1875_v43 = vadd.f32 %v1874_v59, %v1873_v55  ;;  %v1966_v50 = vmul.f32 %v1863_v21, %v5917_v15  ;;  %v1880_v46 = vadd.f32 %v1879_v17, %v1878_v7  ;;  %v1888_v4 = vmul.f32 %v5266_v37, %v5918_v18  ;;  %2095 = vst.msk [vmem:[#allocation3 + $0x30] sm:$0xff] (%p5603_p6), %vm1270_vm1, %v5511_v28 }
 0x24d   : >> { %v1887_v51 = vadd.f32 %v1886_v34, %v1885_v20  ;;  %v1890_v44 = vmul.f32 %v5276_v56, %v5919_v27  ;;  %v1959_v26 = vadd.f32 %v1958_v2, %v1957_v23  ;;  %v1960_v22 = vmul.f32 %v1870_v33, %v5914_v24 }
 0x24e   : >> { %v1877_v5 = vadd.f32 %v1876_v31, %v1875_v43  ;;  %v1967_v54 = vadd.f32 %v1966_v50, %v1965_v35  ;;  %v1968_v47 = vmul.f32 %v1870_v33, %v5918_v18  ;;  %v1882_v14 = vadd.f32 %v1881_v16, %v1880_v46 }
 0x24f   : >> { %v1889_v52 = vadd.f32 %v1888_v4, %v1887_v51  ;;  %v1892_v12 = vmul.f32 %v5168_v11, %v5916_v30  ;;  %v1961_v3 = vadd.f32 %v1960_v22, %v1959_v26  ;;  %v1893_v36 = vmul.f32 %v5266_v37, %v5917_v15 }
 0x250   : >> { %v1962_v32 = vmul.f32 %v1877_v5, %v5915_v6  ;;  %v1970_v48 = vmul.f32 %v1877_v5, %v5919_v27  ;;  %v1969_v29 = vadd.f32 %v1968_v47, %v1967_v54  ;;  %v1884_v24 = vadd.f32 %v1883_v57, %v1882_v14 }
 0x251   : >> { %v1891_v25 = vadd.f32 %v1890_v44, %v1889_v52  ;;  %v1895_v53 = vmul.f32 %v5343_v8, %v5918_v18  ;;  %v1894_v11 = vadd.f32 %v1893_v36, %v1892_v12  ;;  %v1897_v19 = vmul.f32 %v5302_v40, %v5919_v27 }
 0x252   : >> { %v1963_v62 = vadd.f32 %v1962_v32, %v1961_v3  ;;  %v1899_v6 = vmul.f32 %v5175_v42, %v5916_v30  ;;  %v1971_v61 = vadd.f32 %v1970_v48, %v1969_v29   ;;  %v1900_v37 = vmul.f32 %v5276_v56, %v5917_v15 }
 0x253   : >> { %v1902_v58 = vmul.f32 %v5302_v40, %v5918_v18  ;;  %v5931_v59 = vstv %s3767_s24  ;;  %v1896_v23 = vadd.f32 %v1895_v53, %v1894_v11  ;;  %v1972_v8 = vmul.f32 %v1884_v24, %v5916_v30 }
 0x254   : >> { %v1964_v31 = vadd.f32 %v1963_v62, %v5931_v59   ;;  %v1973_v35 = vmul.f32 %v1891_v25, %v5917_v15  ;;  %2928 = vst.msk [vmem:[%s4596_s4 + $0xd8] sm:$0xff] %vm1270_vm1, %v1971_v61  ;;  %2946 = vst.msk [vmem:[%s4596_s4 + $0xf0] sm:$0xff] %vm1270_vm1, %v1971_v61  ;;  %v1901_v42 = vadd.f32 %v1900_v37, %v1899_v6  ;;  %v5932_v16 = vstv %s5891_s5 }
 0x255   : >> { %v1904_v56 = vmul.f32 %v5149_v38, %v5919_v27  ;;  %v1898_v40 = vadd.f32 %v1897_v19, %v1896_v23  ;;  %v5935_v26 = vmov %v1971_v61  ;;  %v5937_v24 = vmov %v5511_v28  ;;  %2097 = vst.msk [vmem:[#allocation3 + $0x40] sm:$0xff] (%p5603_p6), %vm1270_vm1, %v1971_v61 }
 0x256   : >> { %2922 = vst.msk [vmem:[%s4596_s4 + $0xd0] sm:$0xff] %vm1270_vm1, %v1964_v31  ;;  %v1974_v7 = vadd.f32 %v1973_v35, %v1972_v8  ;;  %v1903_v21 = vadd.f32 %v1902_v58, %v1901_v42  ;;  %v5936_v25 = vmov %v1964_v31  ;;  %v5938_v23 = vmov %v5929_v10  ;;  %2096 = vst.msk [vmem:[#allocation3 + $0x38] sm:$0xff] (%p5603_p6), %vm1270_vm1, %v1964_v31 }
 0x257   : >> { %v1975_v41 = vmul.f32 %v1898_v40, %v5918_v18  ;;  %v5939_v22 = vmov %v5519_v1  ;;  %v5941_v20 = vmov %v5450_v45  ;;  %v5942_v19 = vmov %v5925_v63 }
 0x258   : >> { %v1905_v55 = vadd.f32 %v1904_v56, %v1903_v21  ;;  %v5940_v21 = vmov %v5926_v49  ;;  %v5943_v18 = vmov %v5928_v9  ;;  %v5947_v14 = vmov %v5318_v0 }
 0x259   : >> { %v1976_v30 = vadd.f32 %v1975_v41, %v1974_v7 }
 0x25a   : >> { %v1977_v17 = vmul.f32 %v1905_v55, %v5919_v27  ;;  %608 = sbr.rel (!%p5603_p6) target bundleno = 183 (0xb7), region = 244 }
 0x25c   : >> { %v1978_v15 = vadd.f32 %v1977_v17, %v1976_v30  ;;  %v5944_v17 = vmov %v5349_v39 }
 0x25e   : >> { %v1979_v57 = vadd.f32 %v1978_v15, %v5932_v16   ;;  %v5945_v16 = vmov %v5340_v13  ;;  %v5946_v15 = vmov %v5324_v60 }
 0x260   : >> { %2952 = vst.msk [vmem:[%s4596_s4 + $0xf8] sm:$0xff] %vm1270_vm1, %v1979_v57  ;;  %v5934_v27 = vmov %v1979_v57  ;;  %2098 = vst.msk [vmem:[#allocation3 + $0x48] sm:$0xff] (%p5603_p6), %vm1270_vm1, %v1979_v57 }
 0x261 PF: > { %s5948_s6 = sld [smem:[#allocation19_spill]]  ;;  %s5949_s30 = sld [smem:[#allocation18_spill]] }
 0x262   : > { %s5950_s10 = sld [smem:[#allocation20_spill]] }
 0x267   : > { %s24_s11 = sadd.s32 1, %s5948_s6  }
 0x268   : > { %p21_p8 = scmp.ge.s32.totalorder %s24_s11, 5  }
 0x26a   :  { %23 = sbr.rel (!%p21_p8) target bundleno = 16 (0x10), region = 255 }
 0x271   :  { %2179 = vsyncpa [#allocation5], 1 }
 0x272   :  { %2181 = vsyncpa [#allocation5 + $0x1], 1 }
 0x273   :  { %2182 = vsyncpa [#allocation7], 1 }
 0x274   :  { %2183 = vsyncpa [#allocation10], 1 }
 0x275   :  { %2184 = vsyncpa [#allocation13], 1 }

</bundles_post_ra>
